<compile_context>
chip_gen: v7x
topology: tpu7x:2x2x1
jax: 0.10.0
libtpu: 0.0.40
codegen_flags: <defaults>
</compile_context>

<pallas_src>
import numpy as np

import jax
import jax.numpy as jnp
from jax.experimental import pallas as pl
from jax.experimental.pallas import tpu as pltpu


# Static shape constants for SimpleCNN (input 48x48x3).
H0, W0, C0 = 48, 48, 3            # conv1 input
C1 = 32                           # conv1 output channels
H1, W1 = 24, 24                   # pooled conv1 output
C2 = 64                           # conv2 output channels
H2, W2 = 12, 12                   # pooled conv2 output
Q1 = 16                           # conv1 quads per row (13 used, padded to 16)
NQ1 = W0 // 4 + 1                 # = 13 quads actually used
P2 = 16                           # conv2 width pairs per row (13 used, padded to 16)
K1 = 64                           # conv1 im2col depth (54 used, padded to 64)
K2 = 6 * 2 * C1                   # conv2 tap-concat depth = 384
M1 = H0 * Q1                      # conv1 accumulator rows = 768
M2 = H1 * P2                      # conv2 accumulator rows = 384
FH2 = (H1 + 3) * P2               # conv2 padded input slab rows = 432
NF = H2 * P2 * C2                 # fc input features incl. padded pairs = 12288

_DPERM = (0, 2, 1, 3)             # lane-block -> output-column-offset order in a conv1 quad


# ----------------------------------------------------------------------------
# Fused conv1(+bias+ReLU)+pool -> conv2(+bias+ReLU)+pool, one image per grid step.
# ----------------------------------------------------------------------------
def _conv_stack_kernel(x1_ref, w1_ref, b1_ref, w2_ref, b2_ref, o_ref,
                       xp2_ref, xc2_ref):
    f32 = jnp.float32

    # Zero conv2's padded pair-packed input slab (top/bottom pad rows + pad pairs).
    xp2_ref[...] = jnp.zeros_like(xp2_ref)

    # Pooled conv1 pair q holds [pooled col 2q-1 | pooled col 2q]; conv2's zero padding
    # lives at pooled col -1 (q==0, low half), pooled col 24 (q==12, high half) and the
    # alignment-pad pairs q >= 13.
    rid1 = jax.lax.broadcasted_iota(jnp.int32, (Q1, 2 * C1), 0)
    lid1 = jax.lax.broadcasted_iota(jnp.int32, (Q1, 2 * C1), 1)
    keep1 = jnp.logical_not(((rid1 == 0) & (lid1 < C1))
                            | ((rid1 == 12) & (lid1 >= C1))
                            | (rid1 >= 13)).astype(f32)

    # ---- conv1 + 2x2 pool: one pooled output row (32 accumulator rows) per chunk -----
    for oh in range(H1):
        a = jnp.dot(x1_ref[0, 32 * oh:32 * oh + 32, :], w1_ref[...],
                    preferred_element_type=f32)               # (32, 128) f32
        a = jnp.maximum(a + b1_ref[...], 0.0)                 # bias + ReLU
        mh = jnp.maximum(a[:Q1], a[Q1:])                      # pool over H -> (16, 128)
        mw = jnp.maximum(mh[:, :2 * C1], mh[:, 2 * C1:])      # pool over W -> (16, 64)
        # Padded row oh+1 of conv2's pair-packed input slab, all 16 pairs (aligned store).
        xp2_ref[(oh + 1) * P2:(oh + 2) * P2, :] = mw * keep1

    # ---- stage conv2's tap-concat LHS: 6 contiguous row-shifted slab copies ----------
    for dh in range(3):
        for s in range(2):
            t = dh * 2 + s
            off = dh * P2 + s
            xc2_ref[:, t * 2 * C1:(t + 1) * 2 * C1] = (
                xp2_ref[off:off + M2, :].astype(xc2_ref.dtype))

    rid2 = jax.lax.broadcasted_iota(jnp.int32, (P2, C2), 0)
    keep2 = (rid2 < W2).astype(f32)                           # zero the 4 pad pairs

    # ---- conv2 + 2x2 pool: one pooled output row per chunk ---------------------------
    for oh in range(H2):
        a = jnp.dot(xc2_ref[32 * oh:32 * oh + 32, :], w2_ref[...],
                    preferred_element_type=f32)               # (32, 128) f32
        a = jnp.maximum(a + b2_ref[...], 0.0)
        mh = jnp.maximum(a[:P2], a[P2:])                      # pool over H -> (16, 128)
        mw = jnp.maximum(mh[:, :C2], mh[:, C2:])              # pool over W -> (16, 64)
        o_ref[0, oh * P2:(oh + 1) * P2, :] = (mw * keep2).astype(o_ref.dtype)


def conv_stack(xcat1, w1, b1, w2, b2):
    B = xcat1.shape[0]
    return pl.pallas_call(
        _conv_stack_kernel,
        out_shape=jax.ShapeDtypeStruct((B, H2 * P2, C2), jnp.bfloat16),
        grid_spec=pltpu.PrefetchScalarGridSpec(
            num_scalar_prefetch=0,
            # TODO(synk): for large batches, block several images per grid step (v7x) to
            # amortize the per-step overhead; B=2 here keeps both cores busy already.
            grid=(B,),
            in_specs=[
                pl.BlockSpec((1, M1, K1), lambda b: (b, 0, 0)),
                pl.BlockSpec((K1, 4 * C1), lambda b: (0, 0)),
                pl.BlockSpec((1, 4 * C1), lambda b: (0, 0)),
                pl.BlockSpec((K2, 2 * C2), lambda b: (0, 0)),
                pl.BlockSpec((1, 2 * C2), lambda b: (0, 0)),
            ],
            out_specs=pl.BlockSpec((1, H2 * P2, C2), lambda b: (b, 0, 0)),
            scratch_shapes=[
                pltpu.VMEM((FH2, 2 * C1), jnp.float32),       # conv2 padded input slab
                pltpu.VMEM((M2, K2), jnp.bfloat16),           # conv2 tap-concat LHS
            ],
        ),
        compiler_params=pltpu.CompilerParams(
            dimension_semantics=("parallel",)),
    )(xcat1, w1, b1, w2, b2)


# ----------------------------------------------------------------------------
# Fused fc1 (+ReLU) + fc2: K-streamed fc1 weight, f32 accumulator, bf16 fc2 epilogue.
# ----------------------------------------------------------------------------
def _fc_kernel(x_ref, w1_ref, b1_ref, w2_ref, b2_ref, o_ref, acc_ref):
    k = pl.program_id(0)

    @pl.when(k == 0)
    def _():
        acc_ref[...] = jnp.zeros_like(acc_ref)

    acc_ref[...] += jnp.dot(x_ref[...], w1_ref[...],
                            preferred_element_type=jnp.float32)

    @pl.when(k == pl.num_programs(0) - 1)
    def _():
        h = jnp.maximum(acc_ref[...] + b1_ref[...], 0.0)      # fc1 bias + ReLU (f32)
        o_ref[...] = (jnp.dot(h.astype(jnp.bfloat16), w2_ref[...],
                              preferred_element_type=jnp.float32)
                      + b2_ref[...]).astype(o_ref.dtype)


def fc1_relu_fc2(x, w1, b1, w2, b2, *, tk=2048):
    B, K = x.shape
    N1 = w1.shape[1]
    N2 = w2.shape[1]
    if K % tk != 0:
        tk = K
    # TODO(synk): hide the fc1 weight stream behind the conv kernel with a cross-call
    # DMA future instead of splitting the reduction across v7x's two TensorCores.
    return pl.pallas_call(
        _fc_kernel,
        out_shape=jax.ShapeDtypeStruct((B, N2), jnp.float32),
        grid_spec=pltpu.PrefetchScalarGridSpec(
            num_scalar_prefetch=0,
            grid=(K // tk,),
            in_specs=[
                pl.BlockSpec((B, tk), lambda k: (0, k)),
                pl.BlockSpec((tk, N1), lambda k: (k, 0)),
                pl.BlockSpec((1, N1), lambda k: (0, 0)),
                pl.BlockSpec((N1, N2), lambda k: (0, 0)),
                pl.BlockSpec((1, N2), lambda k: (0, 0)),
            ],
            out_specs=pl.BlockSpec((B, N2), lambda k: (0, 0)),
            scratch_shapes=[pltpu.VMEM((B, N1), jnp.float32)],
        ),
        compiler_params=pltpu.CompilerParams(
            dimension_semantics=("arbitrary",)),
    )(x, w1, b1, w2, b2)


# ----------------------------------------------------------------------------
# PyTorch-shaped parameters and one-time packing for the kernels.
# ----------------------------------------------------------------------------
def init_params(key):
    ks = jax.random.split(key, 8)

    def u(k, shape, fan_in):
        bound = 1.0 / (fan_in ** 0.5)
        return jax.random.uniform(k, shape, jnp.float32, -bound, bound)

    return {
        "conv1_w": u(ks[0], (C1, C0, 3, 3), C0 * 9),
        "conv1_b": u(ks[1], (C1,), C0 * 9),
        "conv2_w": u(ks[2], (C2, C1, 3, 3), C1 * 9),
        "conv2_b": u(ks[3], (C2,), C1 * 9),
        "fc1_w": u(ks[4], (128, C2 * H2 * W2), C2 * H2 * W2),
        "fc1_b": u(ks[5], (128,), C2 * H2 * W2),
        "fc2_w": u(ks[6], (2, 128), 128),
        "fc2_b": u(ks[7], (2,), 128),
    }


def prepare_params(p):
    """One-time packing: quad/tap conv weights, fc1 flatten permutation, bf16 casts."""
    # conv1: output cols grouped in quads (4q-2 .. 4q+1); K rows = (dh, s, pos, ci).
    w1t = np.asarray(p["conv1_w"], np.float32)               # (co, ci, kh, kw)
    w1cat = np.zeros((3, 3, 2, C0, 4, C1), np.float32)       # (dh, s, pos, ci, lane-blk, co)
    for dh in range(3):
        for s in range(3):
            for pos in range(2):
                for lb in range(4):
                    dw = 2 * s + pos - _DPERM[lb]
                    if 0 <= dw <= 2:
                        w1cat[dh, s, pos, :, lb, :] = w1t[:, :, dh, dw].T
    w1cat = np.pad(w1cat.reshape(54, 4 * C1), ((0, K1 - 54), (0, 0)))

    # conv2: pair-packed taps; K rows = (dh, s, pos, ci) = 6 * 64 = 384.
    w2t = np.asarray(p["conv2_w"], np.float32)               # (co, ci, kh, kw)
    w2cat = np.zeros((3, 2, 2, C1, 2, C2), np.float32)       # (dh, s, pos, ci, d, co)
    for dh in range(3):
        for s in range(2):
            for pos in range(2):
                for d in range(2):
                    dw = 2 * s + pos - d
                    if 0 <= dw <= 2:
                        w2cat[dh, s, pos, :, d, :] = w2t[:, :, dh, dw].T
    w2cat = w2cat.reshape(K2, 2 * C2)

    # fc1: fold torch's NCHW flatten into the rows; zero rows for the alignment-pad pairs.
    wfc1 = np.asarray(p["fc1_w"], np.float32).reshape(128, C2, H2, W2)
    wfc1 = np.transpose(wfc1, (2, 3, 1, 0))                  # (H, W, C, N)
    wfc1 = np.pad(wfc1, ((0, 0), (0, P2 - W2), (0, 0), (0, 0)))
    wfc1 = wfc1.reshape(NF, 128)

    return {
        "c1_w": jnp.asarray(w1cat, jnp.bfloat16),
        "c1_b": jnp.asarray(np.tile(np.asarray(p["conv1_b"], np.float32), 4)
                            .reshape(1, 4 * C1)),
        "c2_w": jnp.asarray(w2cat, jnp.bfloat16),
        "c2_b": jnp.asarray(np.tile(np.asarray(p["conv2_b"], np.float32), 2)
                            .reshape(1, 2 * C2)),
        "fc1_w": jnp.asarray(wfc1, jnp.bfloat16),
        "fc1_b": jnp.asarray(np.asarray(p["fc1_b"], np.float32).reshape(1, 128)),
        "fc2_w": jnp.asarray(np.asarray(p["fc2_w"], np.float32).T, jnp.bfloat16),
        "fc2_b": jnp.asarray(np.asarray(p["fc2_b"], np.float32).reshape(1, 2)),
    }


# ----------------------------------------------------------------------------
# Forward pass.
# ----------------------------------------------------------------------------
def _conv1_im2col(x_nhwc):
    """Quad-packed im2col for conv1: (B,48,48,3) -> (B, 768, 64) bf16."""
    B = x_nhwc.shape[0]
    xpad = jnp.pad(x_nhwc.astype(jnp.bfloat16), ((0, 0), (1, 1), (3, 3), (0, 0)))
    xpair = xpad.reshape(B, H0 + 2, (W0 + 6) // 2, 2 * C0)         # (B, 50, 27, 6)
    parts = [xpair[:, dh:dh + H0, s:s + 2 * NQ1 - 1:2, :]          # (B, 48, 13, 6)
             for dh in range(3) for s in range(3)]
    xc = jnp.concatenate(parts, axis=-1)                           # (B, 48, 13, 54)
    xc = jnp.pad(xc, ((0, 0), (0, 0), (0, Q1 - NQ1), (0, K1 - 54)))
    return xc.reshape(B, M1, K1)


@jax.jit
def conv_features(prepared, x_nchw):
    x = jnp.transpose(x_nchw, (0, 2, 3, 1))                        # NCHW -> NHWC
    xcat1 = _conv1_im2col(x)
    return conv_stack(xcat1, prepared["c1_w"], prepared["c1_b"],
                      prepared["c2_w"], prepared["c2_b"])          # (B, 192, 64) bf16


@jax.jit
def simple_cnn_forward(prepared, x_nchw):
    feats = conv_features(prepared, x_nchw)
    feats = feats.reshape(feats.shape[0], NF)                      # free contiguous reshape
    return fc1_relu_fc2(feats, prepared["fc1_w"], prepared["fc1_b"],
                        prepared["fc2_w"], prepared["fc2_b"])      # (B, 2) f32


# ----------------------------------------------------------------------------
# Plain-JAX reference (same bf16 rounding points as the Pallas path).
# ----------------------------------------------------------------------------
@jax.jit
def reference_forward(params, x_nchw):
    f32 = jnp.float32

    def bf(v):
        return v.astype(jnp.bfloat16)

    def conv_block(x_bf, w, b):
        w_hwio = jnp.transpose(bf(w), (2, 3, 1, 0))
        y = jax.lax.conv_general_dilated(
            x_bf, w_hwio, window_strides=(1, 1), padding="SAME",
            dimension_numbers=("NHWC", "HWIO", "NHWC"),
            preferred_element_type=f32)
        y = jnp.maximum(y + b.astype(f32), 0.0)
        y = jax.lax.reduce_window(y, -jnp.inf, jax.lax.max,
                                  (1, 2, 2, 1), (1, 2, 2, 1), "VALID")
        return bf(y)

    x = bf(jnp.transpose(x_nchw, (0, 2, 3, 1)))
    p1 = conv_block(x, params["conv1_w"], params["conv1_b"])
    p2 = conv_block(p1, params["conv2_w"], params["conv2_b"])
    flat = jnp.transpose(p2, (0, 3, 1, 2)).reshape(p2.shape[0], -1)   # torch NCHW flatten
    h = jnp.dot(flat, bf(params["fc1_w"]).T,
                preferred_element_type=f32) + params["fc1_b"]
    h = bf(jnp.maximum(h, 0.0))
    out = jnp.dot(h, bf(params["fc2_w"]).T,
                  preferred_element_type=f32) + params["fc2_b"]
    return out, p2


if __name__ == "__main__":
    key = jax.random.PRNGKey(0)
    pkey, xkey = jax.random.split(key)
    torch_params = init_params(pkey)
    prepared = prepare_params(torch_params)

    # SimpleCNN's fc1 expects 64*12*12 features -> input spatial size must be 48x48.
    x = jax.random.normal(xkey, (2, 3, H0, W0), dtype=jnp.float32)

    out = simple_cnn_forward(prepared, x)
    jax.block_until_ready(out)
    assert out.shape == (2, 2) and out.dtype == jnp.float32

    ref_out, ref_pool2 = reference_forward(torch_params, x)
    jax.block_until_ready(ref_out)

    # Intermediate check (catches conv packing / pooling layout bugs).
    feats = conv_features(prepared, x)
    feats = feats.reshape(2, H2, P2, C2)[:, :, :W2, :].astype(jnp.float32)
    ref_pool2 = ref_pool2.astype(jnp.float32)
    fscale = max(1.0, float(jnp.max(jnp.abs(ref_pool2))))
    ferr = float(jnp.max(jnp.abs(feats - ref_pool2)))
    assert ferr <= 2e-2 * fscale, f"conv feature mismatch: err={ferr}, scale={fscale}"

    scale = max(1.0, float(jnp.max(jnp.abs(ref_out))))
    err = float(jnp.max(jnp.abs(out - ref_out)))
    assert err <= 2e-2 * scale, f"logit mismatch vs reference: err={err}, scale={scale}"

    print("KERNEL_OK")
</pallas_src>

<mosaic_0001>
module attributes {stable_mosaic.version = 11 : i64} {
  func.func @_conv_stack_kernel(%arg0: i32, %arg1: memref<1x768x64xbf16, #tpu.memory_space<vmem>>, %arg2: memref<64x128xbf16, #tpu.memory_space<vmem>>, %arg3: memref<1x128xf32, #tpu.memory_space<vmem>>, %arg4: memref<384x128xbf16, #tpu.memory_space<vmem>>, %arg5: memref<1x128xf32, #tpu.memory_space<vmem>>, %arg6: memref<1x192x64xbf16, #tpu.memory_space<vmem>>, %arg7: memref<432x64xf32, #tpu.memory_space<vmem>>, %arg8: memref<384x384xbf16, #tpu.memory_space<vmem>>) attributes {dimension_semantics = [#tpu.dimension_semantics<parallel>], iteration_bounds = array<i64: 2>, scalar_prefetch = 0 : i64, scratch_operands = 2 : i64, tpu.core_type = #tpu.core_type<tc>, window_params = [{transform_indices = @transform_0, window_bounds = array<i64: 1, 768, 64>}, {pipeline_mode = #tpu.pipeline_mode<synchronous>, transform_indices = @transform_1, window_bounds = array<i64: 64, 128>}, {pipeline_mode = #tpu.pipeline_mode<synchronous>, transform_indices = @transform_2, window_bounds = array<i64: 1, 128>}, {pipeline_mode = #tpu.pipeline_mode<synchronous>, transform_indices = @transform_3, window_bounds = array<i64: 384, 128>}, {pipeline_mode = #tpu.pipeline_mode<synchronous>, transform_indices = @transform_4, window_bounds = array<i64: 1, 128>}, {transform_indices = @transform_5, window_bounds = array<i64: 1, 192, 64>}]} {
    %cst = arith.constant 0.000000e+00 : f32
    %0 = vector.broadcast %cst : f32 to vector<432x64xf32>
    %c0 = arith.constant 0 : index
    %c0_0 = arith.constant 0 : index
    %1 = vector.load %arg7[%c0, %c0_0] : memref<432x64xf32, #tpu.memory_space<vmem>>, vector<432x64xf32>
    tpu.vector_store %arg7[%c0, %c0_0], %0 {strides = array<i32>} : memref<432x64xf32, #tpu.memory_space<vmem>>, vector<432x64xf32>,
    %2 = tpu.iota {dimensions = array<i32: 0>} : vector<16x64xi32>
    %3 = tpu.iota {dimensions = array<i32: 1>} : vector<16x64xi32>
    %c0_i32 = arith.constant 0 : i32
    %4 = vector.broadcast %c0_i32 : i32 to vector<16x64xi32>
    %5 = arith.cmpi eq, %2, %4 : vector<16x64xi32>
    %c32_i32 = arith.constant 32 : i32
    %6 = vector.broadcast %c32_i32 : i32 to vector<16x64xi32>
    %7 = arith.cmpi slt, %3, %6 : vector<16x64xi32>
    %8 = arith.andi %5, %7 : vector<16x64xi1>
    %c12_i32 = arith.constant 12 : i32
    %9 = vector.broadcast %c12_i32 : i32 to vector<16x64xi32>
    %10 = arith.cmpi eq, %2, %9 : vector<16x64xi32>
    %c32_i32_1 = arith.constant 32 : i32
    %11 = vector.broadcast %c32_i32_1 : i32 to vector<16x64xi32>
    %12 = arith.cmpi sge, %3, %11 : vector<16x64xi32>
    %13 = arith.andi %10, %12 : vector<16x64xi1>
    %14 = arith.ori %8, %13 : vector<16x64xi1>
    %c13_i32 = arith.constant 13 : i32
    %15 = vector.broadcast %c13_i32 : i32 to vector<16x64xi32>
    %16 = arith.cmpi sge, %2, %15 : vector<16x64xi32>
    %17 = arith.ori %14, %16 : vector<16x64xi1>
    %cst_2 = arith.constant dense<true> : vector<16x64xi1>
    %18 = arith.xori %17, %cst_2 : vector<16x64xi1>
    %19 = arith.extui %18 : vector<16x64xi1> to vector<16x64xi32>
    %20 = arith.sitofp %19 : vector<16x64xi32> to vector<16x64xf32>
    %c0_3 = arith.constant 0 : index
    %c0_4 = arith.constant 0 : index
    %c0_5 = arith.constant 0 : index
    %21 = vector.load %arg1[%c0_3, %c0_4, %c0_5] : memref<1x768x64xbf16, #tpu.memory_space<vmem>>, vector<1x32x64xbf16>
    %22 = vector.shape_cast %21 : vector<1x32x64xbf16> to vector<32x64xbf16>
    %c0_6 = arith.constant 0 : index
    %c0_7 = arith.constant 0 : index
    %23 = vector.load %arg2[%c0_6, %c0_7] : memref<64x128xbf16, #tpu.memory_space<vmem>>, vector<64x128xbf16>
    %cst_8 = arith.constant dense<0.000000e+00> : vector<32x128xf32>
    %24 = tpu.matmul %22, %23, %cst_8 {dimension_numbers = #tpu.dot_dimension_numbers<[1], [0], [0], [1], [0, 0, 1, 1], [], []>} : vector<32x64xbf16>, vector<64x128xbf16>, vector<32x128xf32> -> vector<32x128xf32>
    %c0_9 = arith.constant 0 : index
    %c0_10 = arith.constant 0 : index
    %25 = vector.load %arg3[%c0_9, %c0_10] : memref<1x128xf32, #tpu.memory_space<vmem>>, vector<1x128xf32>
    %26 = vector.broadcast %25 : vector<1x128xf32> to vector<32x128xf32>
    %27 = arith.addf %24, %26 : vector<32x128xf32>
    %cst_11 = arith.constant 0.000000e+00 : f32
    %28 = vector.broadcast %cst_11 : f32 to vector<32x128xf32>
    %29 = arith.maximumf %27, %28 : vector<32x128xf32>
    %30 = vector.extract_strided_slice %29 {offsets = [0, 0], sizes = [16, 128], strides = [1, 1]} : vector<32x128xf32> to vector<16x128xf32>
    %31 = vector.extract_strided_slice %29 {offsets = [16, 0], sizes = [16, 128], strides = [1, 1]} : vector<32x128xf32> to vector<16x128xf32>
    %32 = arith.maximumf %30, %31 : vector<16x128xf32>
    %33 = vector.extract_strided_slice %32 {offsets = [0, 0], sizes = [16, 64], strides = [1, 1]} : vector<16x128xf32> to vector<16x64xf32>
    %34 = vector.extract_strided_slice %32 {offsets = [0, 64], sizes = [16, 64], strides = [1, 1]} : vector<16x128xf32> to vector<16x64xf32>
    %35 = arith.maximumf %33, %34 : vector<16x64xf32>
    %36 = arith.mulf %35, %20 : vector<16x64xf32>
    %c16 = arith.constant 16 : index
    %c0_12 = arith.constant 0 : index
    %37 = vector.load %arg7[%c16, %c0_12] : memref<432x64xf32, #tpu.memory_space<vmem>>, vector<16x64xf32>
    tpu.vector_store %arg7[%c16, %c0_12], %36 {strides = array<i32>} : memref<432x64xf32, #tpu.memory_space<vmem>>, vector<16x64xf32>,
    %c0_13 = arith.constant 0 : index
    %c32 = arith.constant 32 : index
    %c0_14 = arith.constant 0 : index
    %38 = vector.load %arg1[%c0_13, %c32, %c0_14] : memref<1x768x64xbf16, #tpu.memory_space<vmem>>, vector<1x32x64xbf16>
    %39 = vector.shape_cast %38 : vector<1x32x64xbf16> to vector<32x64xbf16>
    %c0_15 = arith.constant 0 : index
    %c0_16 = arith.constant 0 : index
    %40 = vector.load %arg2[%c0_15, %c0_16] : memref<64x128xbf16, #tpu.memory_space<vmem>>, vector<64x128xbf16>
    %cst_17 = arith.constant dense<0.000000e+00> : vector<32x128xf32>
    %41 = tpu.matmul %39, %40, %cst_17 {dimension_numbers = #tpu.dot_dimension_numbers<[1], [0], [0], [1], [0, 0, 1, 1], [], []>} : vector<32x64xbf16>, vector<64x128xbf16>, vector<32x128xf32> -> vector<32x128xf32>
    %c0_18 = arith.constant 0 : index
    %c0_19 = arith.constant 0 : index
    %42 = vector.load %arg3[%c0_18, %c0_19] : memref<1x128xf32, #tpu.memory_space<vmem>>, vector<1x128xf32>
    %43 = vector.broadcast %42 : vector<1x128xf32> to vector<32x128xf32>
    %44 = arith.addf %41, %43 : vector<32x128xf32>
    %cst_20 = arith.constant 0.000000e+00 : f32
    %45 = vector.broadcast %cst_20 : f32 to vector<32x128xf32>
    %46 = arith.maximumf %44, %45 : vector<32x128xf32>
    %47 = vector.extract_strided_slice %46 {offsets = [0, 0], sizes = [16, 128], strides = [1, 1]} : vector<32x128xf32> to vector<16x128xf32>
    %48 = vector.extract_strided_slice %46 {offsets = [16, 0], sizes = [16, 128], strides = [1, 1]} : vector<32x128xf32> to vector<16x128xf32>
    %49 = arith.maximumf %47, %48 : vector<16x128xf32>
    %50 = vector.extract_strided_slice %49 {offsets = [0, 0], sizes = [16, 64], strides = [1, 1]} : vector<16x128xf32> to vector<16x64xf32>
    %51 = vector.extract_strided_slice %49 {offsets = [0, 64], sizes = [16, 64], strides = [1, 1]} : vector<16x128xf32> to vector<16x64xf32>
    %52 = arith.maximumf %50, %51 : vector<16x64xf32>
    %53 = arith.mulf %52, %20 : vector<16x64xf32>
    %c32_21 = arith.constant 32 : index
    %c0_22 = arith.constant 0 : index
    %54 = vector.load %arg7[%c32_21, %c0_22] : memref<432x64xf32, #tpu.memory_space<vmem>>, vector<16x64xf32>
    tpu.vector_store %arg7[%c32_21, %c0_22], %53 {strides = array<i32>} : memref<432x64xf32, #tpu.memory_space<vmem>>, vector<16x64xf32>,
    %c0_23 = arith.constant 0 : index
    %c64 = arith.constant 64 : index
    %c0_24 = arith.constant 0 : index
    %55 = vector.load %arg1[%c0_23, %c64, %c0_24] : memref<1x768x64xbf16, #tpu.memory_space<vmem>>, vector<1x32x64xbf16>
    %56 = vector.shape_cast %55 : vector<1x32x64xbf16> to vector<32x64xbf16>
    %c0_25 = arith.constant 0 : index
    %c0_26 = arith.constant 0 : index
    %57 = vector.load %arg2[%c0_25, %c0_26] : memref<64x128xbf16, #tpu.memory_space<vmem>>, vector<64x128xbf16>
    %cst_27 = arith.constant dense<0.000000e+00> : vector<32x128xf32>
    %58 = tpu.matmul %56, %57, %cst_27 {dimension_numbers = #tpu.dot_dimension_numbers<[1], [0], [0], [1], [0, 0, 1, 1], [], []>} : vector<32x64xbf16>, vector<64x128xbf16>, vector<32x128xf32> -> vector<32x128xf32>
    %c0_28 = arith.constant 0 : index
    %c0_29 = arith.constant 0 : index
    %59 = vector.load %arg3[%c0_28, %c0_29] : memref<1x128xf32, #tpu.memory_space<vmem>>, vector<1x128xf32>
    %60 = vector.broadcast %59 : vector<1x128xf32> to vector<32x128xf32>
    %61 = arith.addf %58, %60 : vector<32x128xf32>
    %cst_30 = arith.constant 0.000000e+00 : f32
    %62 = vector.broadcast %cst_30 : f32 to vector<32x128xf32>
    %63 = arith.maximumf %61, %62 : vector<32x128xf32>
    %64 = vector.extract_strided_slice %63 {offsets = [0, 0], sizes = [16, 128], strides = [1, 1]} : vector<32x128xf32> to vector<16x128xf32>
    %65 = vector.extract_strided_slice %63 {offsets = [16, 0], sizes = [16, 128], strides = [1, 1]} : vector<32x128xf32> to vector<16x128xf32>
    %66 = arith.maximumf %64, %65 : vector<16x128xf32>
    %67 = vector.extract_strided_slice %66 {offsets = [0, 0], sizes = [16, 64], strides = [1, 1]} : vector<16x128xf32> to vector<16x64xf32>
    %68 = vector.extract_strided_slice %66 {offsets = [0, 64], sizes = [16, 64], strides = [1, 1]} : vector<16x128xf32> to vector<16x64xf32>
    %69 = arith.maximumf %67, %68 : vector<16x64xf32>
    %70 = arith.mulf %69, %20 : vector<16x64xf32>
    %c48 = arith.constant 48 : index
    %c0_31 = arith.constant 0 : index
    %71 = vector.load %arg7[%c48, %c0_31] : memref<432x64xf32, #tpu.memory_space<vmem>>, vector<16x64xf32>
    tpu.vector_store %arg7[%c48, %c0_31], %70 {strides = array<i32>} : memref<432x64xf32, #tpu.memory_space<vmem>>, vector<16x64xf32>,
    %c0_32 = arith.constant 0 : index
    %c96 = arith.constant 96 : index
    %c0_33 = arith.constant 0 : index
    %72 = vector.load %arg1[%c0_32, %c96, %c0_33] : memref<1x768x64xbf16, #tpu.memory_space<vmem>>, vector<1x32x64xbf16>
    %73 = vector.shape_cast %72 : vector<1x32x64xbf16> to vector<32x64xbf16>
    %c0_34 = arith.constant 0 : index
    %c0_35 = arith.constant 0 : index
    %74 = vector.load %arg2[%c0_34, %c0_35] : memref<64x128xbf16, #tpu.memory_space<vmem>>, vector<64x128xbf16>
    %cst_36 = arith.constant dense<0.000000e+00> : vector<32x128xf32>
    %75 = tpu.matmul %73, %74, %cst_36 {dimension_numbers = #tpu.dot_dimension_numbers<[1], [0], [0], [1], [0, 0, 1, 1], [], []>} : vector<32x64xbf16>, vector<64x128xbf16>, vector<32x128xf32> -> vector<32x128xf32>
    %c0_37 = arith.constant 0 : index
    %c0_38 = arith.constant 0 : index
    %76 = vector.load %arg3[%c0_37, %c0_38] : memref<1x128xf32, #tpu.memory_space<vmem>>, vector<1x128xf32>
    %77 = vector.broadcast %76 : vector<1x128xf32> to vector<32x128xf32>
    %78 = arith.addf %75, %77 : vector<32x128xf32>
    %cst_39 = arith.constant 0.000000e+00 : f32
    %79 = vector.broadcast %cst_39 : f32 to vector<32x128xf32>
    %80 = arith.maximumf %78, %79 : vector<32x128xf32>
    %81 = vector.extract_strided_slice %80 {offsets = [0, 0], sizes = [16, 128], strides = [1, 1]} : vector<32x128xf32> to vector<16x128xf32>
    %82 = vector.extract_strided_slice %80 {offsets = [16, 0], sizes = [16, 128], strides = [1, 1]} : vector<32x128xf32> to vector<16x128xf32>
    %83 = arith.maximumf %81, %82 : vector<16x128xf32>
    %84 = vector.extract_strided_slice %83 {offsets = [0, 0], sizes = [16, 64], strides = [1, 1]} : vector<16x128xf32> to vector<16x64xf32>
    %85 = vector.extract_strided_slice %83 {offsets = [0, 64], sizes = [16, 64], strides = [1, 1]} : vector<16x128xf32> to vector<16x64xf32>
    %86 = arith.maximumf %84, %85 : vector<16x64xf32>
    %87 = arith.mulf %86, %20 : vector<16x64xf32>
    %c64_40 = arith.constant 64 : index
    %c0_41 = arith.constant 0 : index
    %88 = vector.load %arg7[%c64_40, %c0_41] : memref<432x64xf32, #tpu.memory_space<vmem>>, vector<16x64xf32>
    tpu.vector_store %arg7[%c64_40, %c0_41], %87 {strides = array<i32>} : memref<432x64xf32, #tpu.memory_space<vmem>>, vector<16x64xf32>,
    %c0_42 = arith.constant 0 : index
    %c128 = arith.constant 128 : index
    %c0_43 = arith.constant 0 : index
    %89 = vector.load %arg1[%c0_42, %c128, %c0_43] : memref<1x768x64xbf16, #tpu.memory_space<vmem>>, vector<1x32x64xbf16>
    %90 = vector.shape_cast %89 : vector<1x32x64xbf16> to vector<32x64xbf16>
    %c0_44 = arith.constant 0 : index
    %c0_45 = arith.constant 0 : index
    %91 = vector.load %arg2[%c0_44, %c0_45] : memref<64x128xbf16, #tpu.memory_space<vmem>>, vector<64x128xbf16>
    %cst_46 = arith.constant dense<0.000000e+00> : vector<32x128xf32>
    %92 = tpu.matmul %90, %91, %cst_46 {dimension_numbers = #tpu.dot_dimension_numbers<[1], [0], [0], [1], [0, 0, 1, 1], [], []>} : vector<32x64xbf16>, vector<64x128xbf16>, vector<32x128xf32> -> vector<32x128xf32>
    %c0_47 = arith.constant 0 : index
    %c0_48 = arith.constant 0 : index
    %93 = vector.load %arg3[%c0_47, %c0_48] : memref<1x128xf32, #tpu.memory_space<vmem>>, vector<1x128xf32>
    %94 = vector.broadcast %93 : vector<1x128xf32> to vector<32x128xf32>
    %95 = arith.addf %92, %94 : vector<32x128xf32>
    %cst_49 = arith.constant 0.000000e+00 : f32
    %96 = vector.broadcast %cst_49 : f32 to vector<32x128xf32>
    %97 = arith.maximumf %95, %96 : vector<32x128xf32>
    %98 = vector.extract_strided_slice %97 {offsets = [0, 0], sizes = [16, 128], strides = [1, 1]} : vector<32x128xf32> to vector<16x128xf32>
    %99 = vector.extract_strided_slice %97 {offsets = [16, 0], sizes = [16, 128], strides = [1, 1]} : vector<32x128xf32> to vector<16x128xf32>
    %100 = arith.maximumf %98, %99 : vector<16x128xf32>
    %101 = vector.extract_strided_slice %100 {offsets = [0, 0], sizes = [16, 64], strides = [1, 1]} : vector<16x128xf32> to vector<16x64xf32>
    %102 = vector.extract_strided_slice %100 {offsets = [0, 64], sizes = [16, 64], strides = [1, 1]} : vector<16x128xf32> to vector<16x64xf32>
    %103 = arith.maximumf %101, %102 : vector<16x64xf32>
    %104 = arith.mulf %103, %20 : vector<16x64xf32>
    %c80 = arith.constant 80 : index
    %c0_50 = arith.constant 0 : index
    %105 = vector.load %arg7[%c80, %c0_50] : memref<432x64xf32, #tpu.memory_space<vmem>>, vector<16x64xf32>
    tpu.vector_store %arg7[%c80, %c0_50], %104 {strides = array<i32>} : memref<432x64xf32, #tpu.memory_space<vmem>>, vector<16x64xf32>,
    %c0_51 = arith.constant 0 : index
    %c160 = arith.constant 160 : index
    %c0_52 = arith.constant 0 : index
    %106 = vector.load %arg1[%c0_51, %c160, %c0_52] : memref<1x768x64xbf16, #tpu.memory_space<vmem>>, vector<1x32x64xbf16>
    %107 = vector.shape_cast %106 : vector<1x32x64xbf16> to vector<32x64xbf16>
    %c0_53 = arith.constant 0 : index
    %c0_54 = arith.constant 0 : index
    %108 = vector.load %arg2[%c0_53, %c0_54] : memref<64x128xbf16, #tpu.memory_space<vmem>>, vector<64x128xbf16>
    %cst_55 = arith.constant dense<0.000000e+00> : vector<32x128xf32>
    %109 = tpu.matmul %107, %108, %cst_55 {dimension_numbers = #tpu.dot_dimension_numbers<[1], [0], [0], [1], [0, 0, 1, 1], [], []>} : vector<32x64xbf16>, vector<64x128xbf16>, vector<32x128xf32> -> vector<32x128xf32>
    %c0_56 = arith.constant 0 : index
    %c0_57 = arith.constant 0 : index
    %110 = vector.load %arg3[%c0_56, %c0_57] : memref<1x128xf32, #tpu.memory_space<vmem>>, vector<1x128xf32>
    %111 = vector.broadcast %110 : vector<1x128xf32> to vector<32x128xf32>
    %112 = arith.addf %109, %111 : vector<32x128xf32>
    %cst_58 = arith.constant 0.000000e+00 : f32
    %113 = vector.broadcast %cst_58 : f32 to vector<32x128xf32>
    %114 = arith.maximumf %112, %113 : vector<32x128xf32>
    %115 = vector.extract_strided_slice %114 {offsets = [0, 0], sizes = [16, 128], strides = [1, 1]} : vector<32x128xf32> to vector<16x128xf32>
    %116 = vector.extract_strided_slice %114 {offsets = [16, 0], sizes = [16, 128], strides = [1, 1]} : vector<32x128xf32> to vector<16x128xf32>
    %117 = arith.maximumf %115, %116 : vector<16x128xf32>
    %118 = vector.extract_strided_slice %117 {offsets = [0, 0], sizes = [16, 64], strides = [1, 1]} : vector<16x128xf32> to vector<16x64xf32>
    %119 = vector.extract_strided_slice %117 {offsets = [0, 64], sizes = [16, 64], strides = [1, 1]} : vector<16x128xf32> to vector<16x64xf32>
    %120 = arith.maximumf %118, %119 : vector<16x64xf32>
    %121 = arith.mulf %120, %20 : vector<16x64xf32>
    %c96_59 = arith.constant 96 : index
    %c0_60 = arith.constant 0 : index
    %122 = vector.load %arg7[%c96_59, %c0_60] : memref<432x64xf32, #tpu.memory_space<vmem>>, vector<16x64xf32>
    tpu.vector_store %arg7[%c96_59, %c0_60], %121 {strides = array<i32>} : memref<432x64xf32, #tpu.memory_space<vmem>>, vector<16x64xf32>,
    %c0_61 = arith.constant 0 : index
    %c192 = arith.constant 192 : index
    %c0_62 = arith.constant 0 : index
    %123 = vector.load %arg1[%c0_61, %c192, %c0_62] : memref<1x768x64xbf16, #tpu.memory_space<vmem>>, vector<1x32x64xbf16>
    %124 = vector.shape_cast %123 : vector<1x32x64xbf16> to vector<32x64xbf16>
    %c0_63 = arith.constant 0 : index
    %c0_64 = arith.constant 0 : index
    %125 = vector.load %arg2[%c0_63, %c0_64] : memref<64x128xbf16, #tpu.memory_space<vmem>>, vector<64x128xbf16>
    %cst_65 = arith.constant dense<0.000000e+00> : vector<32x128xf32>
    %126 = tpu.matmul %124, %125, %cst_65 {dimension_numbers = #tpu.dot_dimension_numbers<[1], [0], [0], [1], [0, 0, 1, 1], [], []>} : vector<32x64xbf16>, vector<64x128xbf16>, vector<32x128xf32> -> vector<32x128xf32>
    %c0_66 = arith.constant 0 : index
    %c0_67 = arith.constant 0 : index
    %127 = vector.load %arg3[%c0_66, %c0_67] : memref<1x128xf32, #tpu.memory_space<vmem>>, vector<1x128xf32>
    %128 = vector.broadcast %127 : vector<1x128xf32> to vector<32x128xf32>
    %129 = arith.addf %126, %128 : vector<32x128xf32>
    %cst_68 = arith.constant 0.000000e+00 : f32
    %130 = vector.broadcast %cst_68 : f32 to vector<32x128xf32>
    %131 = arith.maximumf %129, %130 : vector<32x128xf32>
    %132 = vector.extract_strided_slice %131 {offsets = [0, 0], sizes = [16, 128], strides = [1, 1]} : vector<32x128xf32> to vector<16x128xf32>
    %133 = vector.extract_strided_slice %131 {offsets = [16, 0], sizes = [16, 128], strides = [1, 1]} : vector<32x128xf32> to vector<16x128xf32>
    %134 = arith.maximumf %132, %133 : vector<16x128xf32>
    %135 = vector.extract_strided_slice %134 {offsets = [0, 0], sizes = [16, 64], strides = [1, 1]} : vector<16x128xf32> to vector<16x64xf32>
    %136 = vector.extract_strided_slice %134 {offsets = [0, 64], sizes = [16, 64], strides = [1, 1]} : vector<16x128xf32> to vector<16x64xf32>
    %137 = arith.maximumf %135, %136 : vector<16x64xf32>
    %138 = arith.mulf %137, %20 : vector<16x64xf32>
    %c112 = arith.constant 112 : index
    %c0_69 = arith.constant 0 : index
    %139 = vector.load %arg7[%c112, %c0_69] : memref<432x64xf32, #tpu.memory_space<vmem>>, vector<16x64xf32>
    tpu.vector_store %arg7[%c112, %c0_69], %138 {strides = array<i32>} : memref<432x64xf32, #tpu.memory_space<vmem>>, vector<16x64xf32>,
    %c0_70 = arith.constant 0 : index
    %c224 = arith.constant 224 : index
    %c0_71 = arith.constant 0 : index
    %140 = vector.load %arg1[%c0_70, %c224, %c0_71] : memref<1x768x64xbf16, #tpu.memory_space<vmem>>, vector<1x32x64xbf16>
    %141 = vector.shape_cast %140 : vector<1x32x64xbf16> to vector<32x64xbf16>
    %c0_72 = arith.constant 0 : index
    %c0_73 = arith.constant 0 : index
    %142 = vector.load %arg2[%c0_72, %c0_73] : memref<64x128xbf16, #tpu.memory_space<vmem>>, vector<64x128xbf16>
    %cst_74 = arith.constant dense<0.000000e+00> : vector<32x128xf32>
    %143 = tpu.matmul %141, %142, %cst_74 {dimension_numbers = #tpu.dot_dimension_numbers<[1], [0], [0], [1], [0, 0, 1, 1], [], []>} : vector<32x64xbf16>, vector<64x128xbf16>, vector<32x128xf32> -> vector<32x128xf32>
    %c0_75 = arith.constant 0 : index
    %c0_76 = arith.constant 0 : index
    %144 = vector.load %arg3[%c0_75, %c0_76] : memref<1x128xf32, #tpu.memory_space<vmem>>, vector<1x128xf32>
    %145 = vector.broadcast %144 : vector<1x128xf32> to vector<32x128xf32>
    %146 = arith.addf %143, %145 : vector<32x128xf32>
    %cst_77 = arith.constant 0.000000e+00 : f32
    %147 = vector.broadcast %cst_77 : f32 to vector<32x128xf32>
    %148 = arith.maximumf %146, %147 : vector<32x128xf32>
    %149 = vector.extract_strided_slice %148 {offsets = [0, 0], sizes = [16, 128], strides = [1, 1]} : vector<32x128xf32> to vector<16x128xf32>
    %150 = vector.extract_strided_slice %148 {offsets = [16, 0], sizes = [16, 128], strides = [1, 1]} : vector<32x128xf32> to vector<16x128xf32>
    %151 = arith.maximumf %149, %150 : vector<16x128xf32>
    %152 = vector.extract_strided_slice %151 {offsets = [0, 0], sizes = [16, 64], strides = [1, 1]} : vector<16x128xf32> to vector<16x64xf32>
    %153 = vector.extract_strided_slice %151 {offsets = [0, 64], sizes = [16, 64], strides = [1, 1]} : vector<16x128xf32> to vector<16x64xf32>
    %154 = arith.maximumf %152, %153 : vector<16x64xf32>
    %155 = arith.mulf %154, %20 : vector<16x64xf32>
    %c128_78 = arith.constant 128 : index
    %c0_79 = arith.constant 0 : index
    %156 = vector.load %arg7[%c128_78, %c0_79] : memref<432x64xf32, #tpu.memory_space<vmem>>, vector<16x64xf32>
    tpu.vector_store %arg7[%c128_78, %c0_79], %155 {strides = array<i32>} : memref<432x64xf32, #tpu.memory_space<vmem>>, vector<16x64xf32>,
    %c0_80 = arith.constant 0 : index
    %c256 = arith.constant 256 : index
    %c0_81 = arith.constant 0 : index
    %157 = vector.load %arg1[%c0_80, %c256, %c0_81] : memref<1x768x64xbf16, #tpu.memory_space<vmem>>, vector<1x32x64xbf16>
    %158 = vector.shape_cast %157 : vector<1x32x64xbf16> to vector<32x64xbf16>
    %c0_82 = arith.constant 0 : index
    %c0_83 = arith.constant 0 : index
    %159 = vector.load %arg2[%c0_82, %c0_83] : memref<64x128xbf16, #tpu.memory_space<vmem>>, vector<64x128xbf16>
    %cst_84 = arith.constant dense<0.000000e+00> : vector<32x128xf32>
    %160 = tpu.matmul %158, %159, %cst_84 {dimension_numbers = #tpu.dot_dimension_numbers<[1], [0], [0], [1], [0, 0, 1, 1], [], []>} : vector<32x64xbf16>, vector<64x128xbf16>, vector<32x128xf32> -> vector<32x128xf32>
    %c0_85 = arith.constant 0 : index
    %c0_86 = arith.constant 0 : index
    %161 = vector.load %arg3[%c0_85, %c0_86] : memref<1x128xf32, #tpu.memory_space<vmem>>, vector<1x128xf32>
    %162 = vector.broadcast %161 : vector<1x128xf32> to vector<32x128xf32>
    %163 = arith.addf %160, %162 : vector<32x128xf32>
    %cst_87 = arith.constant 0.000000e+00 : f32
    %164 = vector.broadcast %cst_87 : f32 to vector<32x128xf32>
    %165 = arith.maximumf %163, %164 : vector<32x128xf32>
    %166 = vector.extract_strided_slice %165 {offsets = [0, 0], sizes = [16, 128], strides = [1, 1]} : vector<32x128xf32> to vector<16x128xf32>
    %167 = vector.extract_strided_slice %165 {offsets = [16, 0], sizes = [16, 128], strides = [1, 1]} : vector<32x128xf32> to vector<16x128xf32>
    %168 = arith.maximumf %166, %167 : vector<16x128xf32>
    %169 = vector.extract_strided_slice %168 {offsets = [0, 0], sizes = [16, 64], strides = [1, 1]} : vector<16x128xf32> to vector<16x64xf32>
    %170 = vector.extract_strided_slice %168 {offsets = [0, 64], sizes = [16, 64], strides = [1, 1]} : vector<16x128xf32> to vector<16x64xf32>
    %171 = arith.maximumf %169, %170 : vector<16x64xf32>
    %172 = arith.mulf %171, %20 : vector<16x64xf32>
    %c144 = arith.constant 144 : index
    %c0_88 = arith.constant 0 : index
    %173 = vector.load %arg7[%c144, %c0_88] : memref<432x64xf32, #tpu.memory_space<vmem>>, vector<16x64xf32>
    tpu.vector_store %arg7[%c144, %c0_88], %172 {strides = array<i32>} : memref<432x64xf32, #tpu.memory_space<vmem>>, vector<16x64xf32>,
    %c0_89 = arith.constant 0 : index
    %c288 = arith.constant 288 : index
    %c0_90 = arith.constant 0 : index
    %174 = vector.load %arg1[%c0_89, %c288, %c0_90] : memref<1x768x64xbf16, #tpu.memory_space<vmem>>, vector<1x32x64xbf16>
    %175 = vector.shape_cast %174 : vector<1x32x64xbf16> to vector<32x64xbf16>
    %c0_91 = arith.constant 0 : index
    %c0_92 = arith.constant 0 : index
    %176 = vector.load %arg2[%c0_91, %c0_92] : memref<64x128xbf16, #tpu.memory_space<vmem>>, vector<64x128xbf16>
    %cst_93 = arith.constant dense<0.000000e+00> : vector<32x128xf32>
    %177 = tpu.matmul %175, %176, %cst_93 {dimension_numbers = #tpu.dot_dimension_numbers<[1], [0], [0], [1], [0, 0, 1, 1], [], []>} : vector<32x64xbf16>, vector<64x128xbf16>, vector<32x128xf32> -> vector<32x128xf32>
    %c0_94 = arith.constant 0 : index
    %c0_95 = arith.constant 0 : index
    %178 = vector.load %arg3[%c0_94, %c0_95] : memref<1x128xf32, #tpu.memory_space<vmem>>, vector<1x128xf32>
    %179 = vector.broadcast %178 : vector<1x128xf32> to vector<32x128xf32>
    %180 = arith.addf %177, %179 : vector<32x128xf32>
    %cst_96 = arith.constant 0.000000e+00 : f32
    %181 = vector.broadcast %cst_96 : f32 to vector<32x128xf32>
    %182 = arith.maximumf %180, %181 : vector<32x128xf32>
    %183 = vector.extract_strided_slice %182 {offsets = [0, 0], sizes = [16, 128], strides = [1, 1]} : vector<32x128xf32> to vector<16x128xf32>
    %184 = vector.extract_strided_slice %182 {offsets = [16, 0], sizes = [16, 128], strides = [1, 1]} : vector<32x128xf32> to vector<16x128xf32>
    %185 = arith.maximumf %183, %184 : vector<16x128xf32>
    %186 = vector.extract_strided_slice %185 {offsets = [0, 0], sizes = [16, 64], strides = [1, 1]} : vector<16x128xf32> to vector<16x64xf32>
    %187 = vector.extract_strided_slice %185 {offsets = [0, 64], sizes = [16, 64], strides = [1, 1]} : vector<16x128xf32> to vector<16x64xf32>
    %188 = arith.maximumf %186, %187 : vector<16x64xf32>
    %189 = arith.mulf %188, %20 : vector<16x64xf32>
    %c160_97 = arith.constant 160 : index
    %c0_98 = arith.constant 0 : index
    %190 = vector.load %arg7[%c160_97, %c0_98] : memref<432x64xf32, #tpu.memory_space<vmem>>, vector<16x64xf32>
    tpu.vector_store %arg7[%c160_97, %c0_98], %189 {strides = array<i32>} : memref<432x64xf32, #tpu.memory_space<vmem>>, vector<16x64xf32>,
    %c0_99 = arith.constant 0 : index
    %c320 = arith.constant 320 : index
    %c0_100 = arith.constant 0 : index
    %191 = vector.load %arg1[%c0_99, %c320, %c0_100] : memref<1x768x64xbf16, #tpu.memory_space<vmem>>, vector<1x32x64xbf16>
    %192 = vector.shape_cast %191 : vector<1x32x64xbf16> to vector<32x64xbf16>
    %c0_101 = arith.constant 0 : index
    %c0_102 = arith.constant 0 : index
    %193 = vector.load %arg2[%c0_101, %c0_102] : memref<64x128xbf16, #tpu.memory_space<vmem>>, vector<64x128xbf16>
    %cst_103 = arith.constant dense<0.000000e+00> : vector<32x128xf32>
    %194 = tpu.matmul %192, %193, %cst_103 {dimension_numbers = #tpu.dot_dimension_numbers<[1], [0], [0], [1], [0, 0, 1, 1], [], []>} : vector<32x64xbf16>, vector<64x128xbf16>, vector<32x128xf32> -> vector<32x128xf32>
    %c0_104 = arith.constant 0 : index
    %c0_105 = arith.constant 0 : index
    %195 = vector.load %arg3[%c0_104, %c0_105] : memref<1x128xf32, #tpu.memory_space<vmem>>, vector<1x128xf32>
    %196 = vector.broadcast %195 : vector<1x128xf32> to vector<32x128xf32>
    %197 = arith.addf %194, %196 : vector<32x128xf32>
    %cst_106 = arith.constant 0.000000e+00 : f32
    %198 = vector.broadcast %cst_106 : f32 to vector<32x128xf32>
    %199 = arith.maximumf %197, %198 : vector<32x128xf32>
    %200 = vector.extract_strided_slice %199 {offsets = [0, 0], sizes = [16, 128], strides = [1, 1]} : vector<32x128xf32> to vector<16x128xf32>
    %201 = vector.extract_strided_slice %199 {offsets = [16, 0], sizes = [16, 128], strides = [1, 1]} : vector<32x128xf32> to vector<16x128xf32>
    %202 = arith.maximumf %200, %201 : vector<16x128xf32>
    %203 = vector.extract_strided_slice %202 {offsets = [0, 0], sizes = [16, 64], strides = [1, 1]} : vector<16x128xf32> to vector<16x64xf32>
    %204 = vector.extract_strided_slice %202 {offsets = [0, 64], sizes = [16, 64], strides = [1, 1]} : vector<16x128xf32> to vector<16x64xf32>
    %205 = arith.maximumf %203, %204 : vector<16x64xf32>
    %206 = arith.mulf %205, %20 : vector<16x64xf32>
    %c176 = arith.constant 176 : index
    %c0_107 = arith.constant 0 : index
    %207 = vector.load %arg7[%c176, %c0_107] : memref<432x64xf32, #tpu.memory_space<vmem>>, vector<16x64xf32>
    tpu.vector_store %arg7[%c176, %c0_107], %206 {strides = array<i32>} : memref<432x64xf32, #tpu.memory_space<vmem>>, vector<16x64xf32>,
    %c0_108 = arith.constant 0 : index
    %c352 = arith.constant 352 : index
    %c0_109 = arith.constant 0 : index
    %208 = vector.load %arg1[%c0_108, %c352, %c0_109] : memref<1x768x64xbf16, #tpu.memory_space<vmem>>, vector<1x32x64xbf16>
    %209 = vector.shape_cast %208 : vector<1x32x64xbf16> to vector<32x64xbf16>
    %c0_110 = arith.constant 0 : index
    %c0_111 = arith.constant 0 : index
    %210 = vector.load %arg2[%c0_110, %c0_111] : memref<64x128xbf16, #tpu.memory_space<vmem>>, vector<64x128xbf16>
    %cst_112 = arith.constant dense<0.000000e+00> : vector<32x128xf32>
    %211 = tpu.matmul %209, %210, %cst_112 {dimension_numbers = #tpu.dot_dimension_numbers<[1], [0], [0], [1], [0, 0, 1, 1], [], []>} : vector<32x64xbf16>, vector<64x128xbf16>, vector<32x128xf32> -> vector<32x128xf32>
    %c0_113 = arith.constant 0 : index
    %c0_114 = arith.constant 0 : index
    %212 = vector.load %arg3[%c0_113, %c0_114] : memref<1x128xf32, #tpu.memory_space<vmem>>, vector<1x128xf32>
    %213 = vector.broadcast %212 : vector<1x128xf32> to vector<32x128xf32>
    %214 = arith.addf %211, %213 : vector<32x128xf32>
    %cst_115 = arith.constant 0.000000e+00 : f32
    %215 = vector.broadcast %cst_115 : f32 to vector<32x128xf32>
    %216 = arith.maximumf %214, %215 : vector<32x128xf32>
    %217 = vector.extract_strided_slice %216 {offsets = [0, 0], sizes = [16, 128], strides = [1, 1]} : vector<32x128xf32> to vector<16x128xf32>
    %218 = vector.extract_strided_slice %216 {offsets = [16, 0], sizes = [16, 128], strides = [1, 1]} : vector<32x128xf32> to vector<16x128xf32>
    %219 = arith.maximumf %217, %218 : vector<16x128xf32>
    %220 = vector.extract_strided_slice %219 {offsets = [0, 0], sizes = [16, 64], strides = [1, 1]} : vector<16x128xf32> to vector<16x64xf32>
    %221 = vector.extract_strided_slice %219 {offsets = [0, 64], sizes = [16, 64], strides = [1, 1]} : vector<16x128xf32> to vector<16x64xf32>
    %222 = arith.maximumf %220, %221 : vector<16x64xf32>
    %223 = arith.mulf %222, %20 : vector<16x64xf32>
    %c192_116 = arith.constant 192 : index
    %c0_117 = arith.constant 0 : index
    %224 = vector.load %arg7[%c192_116, %c0_117] : memref<432x64xf32, #tpu.memory_space<vmem>>, vector<16x64xf32>
    tpu.vector_store %arg7[%c192_116, %c0_117], %223 {strides = array<i32>} : memref<432x64xf32, #tpu.memory_space<vmem>>, vector<16x64xf32>,
    %c0_118 = arith.constant 0 : index
    %c384 = arith.constant 384 : index
    %c0_119 = arith.constant 0 : index
    %225 = vector.load %arg1[%c0_118, %c384, %c0_119] : memref<1x768x64xbf16, #tpu.memory_space<vmem>>, vector<1x32x64xbf16>
    %226 = vector.shape_cast %225 : vector<1x32x64xbf16> to vector<32x64xbf16>
    %c0_120 = arith.constant 0 : index
    %c0_121 = arith.constant 0 : index
    %227 = vector.load %arg2[%c0_120, %c0_121] : memref<64x128xbf16, #tpu.memory_space<vmem>>, vector<64x128xbf16>
    %cst_122 = arith.constant dense<0.000000e+00> : vector<32x128xf32>
    %228 = tpu.matmul %226, %227, %cst_122 {dimension_numbers = #tpu.dot_dimension_numbers<[1], [0], [0], [1], [0, 0, 1, 1], [], []>} : vector<32x64xbf16>, vector<64x128xbf16>, vector<32x128xf32> -> vector<32x128xf32>
    %c0_123 = arith.constant 0 : index
    %c0_124 = arith.constant 0 : index
    %229 = vector.load %arg3[%c0_123, %c0_124] : memref<1x128xf32, #tpu.memory_space<vmem>>, vector<1x128xf32>
    %230 = vector.broadcast %229 : vector<1x128xf32> to vector<32x128xf32>
    %231 = arith.addf %228, %230 : vector<32x128xf32>
    %cst_125 = arith.constant 0.000000e+00 : f32
    %232 = vector.broadcast %cst_125 : f32 to vector<32x128xf32>
    %233 = arith.maximumf %231, %232 : vector<32x128xf32>
    %234 = vector.extract_strided_slice %233 {offsets = [0, 0], sizes = [16, 128], strides = [1, 1]} : vector<32x128xf32> to vector<16x128xf32>
    %235 = vector.extract_strided_slice %233 {offsets = [16, 0], sizes = [16, 128], strides = [1, 1]} : vector<32x128xf32> to vector<16x128xf32>
    %236 = arith.maximumf %234, %235 : vector<16x128xf32>
    %237 = vector.extract_strided_slice %236 {offsets = [0, 0], sizes = [16, 64], strides = [1, 1]} : vector<16x128xf32> to vector<16x64xf32>
    %238 = vector.extract_strided_slice %236 {offsets = [0, 64], sizes = [16, 64], strides = [1, 1]} : vector<16x128xf32> to vector<16x64xf32>
    %239 = arith.maximumf %237, %238 : vector<16x64xf32>
    %240 = arith.mulf %239, %20 : vector<16x64xf32>
    %c208 = arith.constant 208 : index
    %c0_126 = arith.constant 0 : index
    %241 = vector.load %arg7[%c208, %c0_126] : memref<432x64xf32, #tpu.memory_space<vmem>>, vector<16x64xf32>
    tpu.vector_store %arg7[%c208, %c0_126], %240 {strides = array<i32>} : memref<432x64xf32, #tpu.memory_space<vmem>>, vector<16x64xf32>,
    %c0_127 = arith.constant 0 : index
    %c416 = arith.constant 416 : index
    %c0_128 = arith.constant 0 : index
    %242 = vector.load %arg1[%c0_127, %c416, %c0_128] : memref<1x768x64xbf16, #tpu.memory_space<vmem>>, vector<1x32x64xbf16>
    %243 = vector.shape_cast %242 : vector<1x32x64xbf16> to vector<32x64xbf16>
    %c0_129 = arith.constant 0 : index
    %c0_130 = arith.constant 0 : index
    %244 = vector.load %arg2[%c0_129, %c0_130] : memref<64x128xbf16, #tpu.memory_space<vmem>>, vector<64x128xbf16>
    %cst_131 = arith.constant dense<0.000000e+00> : vector<32x128xf32>
    %245 = tpu.matmul %243, %244, %cst_131 {dimension_numbers = #tpu.dot_dimension_numbers<[1], [0], [0], [1], [0, 0, 1, 1], [], []>} : vector<32x64xbf16>, vector<64x128xbf16>, vector<32x128xf32> -> vector<32x128xf32>
    %c0_132 = arith.constant 0 : index
    %c0_133 = arith.constant 0 : index
    %246 = vector.load %arg3[%c0_132, %c0_133] : memref<1x128xf32, #tpu.memory_space<vmem>>, vector<1x128xf32>
    %247 = vector.broadcast %246 : vector<1x128xf32> to vector<32x128xf32>
    %248 = arith.addf %245, %247 : vector<32x128xf32>
    %cst_134 = arith.constant 0.000000e+00 : f32
    %249 = vector.broadcast %cst_134 : f32 to vector<32x128xf32>
    %250 = arith.maximumf %248, %249 : vector<32x128xf32>
    %251 = vector.extract_strided_slice %250 {offsets = [0, 0], sizes = [16, 128], strides = [1, 1]} : vector<32x128xf32> to vector<16x128xf32>
    %252 = vector.extract_strided_slice %250 {offsets = [16, 0], sizes = [16, 128], strides = [1, 1]} : vector<32x128xf32> to vector<16x128xf32>
    %253 = arith.maximumf %251, %252 : vector<16x128xf32>
    %254 = vector.extract_strided_slice %253 {offsets = [0, 0], sizes = [16, 64], strides = [1, 1]} : vector<16x128xf32> to vector<16x64xf32>
    %255 = vector.extract_strided_slice %253 {offsets = [0, 64], sizes = [16, 64], strides = [1, 1]} : vector<16x128xf32> to vector<16x64xf32>
    %256 = arith.maximumf %254, %255 : vector<16x64xf32>
    %257 = arith.mulf %256, %20 : vector<16x64xf32>
    %c224_135 = arith.constant 224 : index
    %c0_136 = arith.constant 0 : index
    %258 = vector.load %arg7[%c224_135, %c0_136] : memref<432x64xf32, #tpu.memory_space<vmem>>, vector<16x64xf32>
    tpu.vector_store %arg7[%c224_135, %c0_136], %257 {strides = array<i32>} : memref<432x64xf32, #tpu.memory_space<vmem>>, vector<16x64xf32>,
    %c0_137 = arith.constant 0 : index
    %c448 = arith.constant 448 : index
    %c0_138 = arith.constant 0 : index
    %259 = vector.load %arg1[%c0_137, %c448, %c0_138] : memref<1x768x64xbf16, #tpu.memory_space<vmem>>, vector<1x32x64xbf16>
    %260 = vector.shape_cast %259 : vector<1x32x64xbf16> to vector<32x64xbf16>
    %c0_139 = arith.constant 0 : index
    %c0_140 = arith.constant 0 : index
    %261 = vector.load %arg2[%c0_139, %c0_140] : memref<64x128xbf16, #tpu.memory_space<vmem>>, vector<64x128xbf16>
    %cst_141 = arith.constant dense<0.000000e+00> : vector<32x128xf32>
    %262 = tpu.matmul %260, %261, %cst_141 {dimension_numbers = #tpu.dot_dimension_numbers<[1], [0], [0], [1], [0, 0, 1, 1], [], []>} : vector<32x64xbf16>, vector<64x128xbf16>, vector<32x128xf32> -> vector<32x128xf32>
    %c0_142 = arith.constant 0 : index
    %c0_143 = arith.constant 0 : index
    %263 = vector.load %arg3[%c0_142, %c0_143] : memref<1x128xf32, #tpu.memory_space<vmem>>, vector<1x128xf32>
    %264 = vector.broadcast %263 : vector<1x128xf32> to vector<32x128xf32>
    %265 = arith.addf %262, %264 : vector<32x128xf32>
    %cst_144 = arith.constant 0.000000e+00 : f32
    %266 = vector.broadcast %cst_144 : f32 to vector<32x128xf32>
    %267 = arith.maximumf %265, %266 : vector<32x128xf32>
    %268 = vector.extract_strided_slice %267 {offsets = [0, 0], sizes = [16, 128], strides = [1, 1]} : vector<32x128xf32> to vector<16x128xf32>
    %269 = vector.extract_strided_slice %267 {offsets = [16, 0], sizes = [16, 128], strides = [1, 1]} : vector<32x128xf32> to vector<16x128xf32>
    %270 = arith.maximumf %268, %269 : vector<16x128xf32>
    %271 = vector.extract_strided_slice %270 {offsets = [0, 0], sizes = [16, 64], strides = [1, 1]} : vector<16x128xf32> to vector<16x64xf32>
    %272 = vector.extract_strided_slice %270 {offsets = [0, 64], sizes = [16, 64], strides = [1, 1]} : vector<16x128xf32> to vector<16x64xf32>
    %273 = arith.maximumf %271, %272 : vector<16x64xf32>
    %274 = arith.mulf %273, %20 : vector<16x64xf32>
    %c240 = arith.constant 240 : index
    %c0_145 = arith.constant 0 : index
    %275 = vector.load %arg7[%c240, %c0_145] : memref<432x64xf32, #tpu.memory_space<vmem>>, vector<16x64xf32>
    tpu.vector_store %arg7[%c240, %c0_145], %274 {strides = array<i32>} : memref<432x64xf32, #tpu.memory_space<vmem>>, vector<16x64xf32>,
    %c0_146 = arith.constant 0 : index
    %c480 = arith.constant 480 : index
    %c0_147 = arith.constant 0 : index
    %276 = vector.load %arg1[%c0_146, %c480, %c0_147] : memref<1x768x64xbf16, #tpu.memory_space<vmem>>, vector<1x32x64xbf16>
    %277 = vector.shape_cast %276 : vector<1x32x64xbf16> to vector<32x64xbf16>
    %c0_148 = arith.constant 0 : index
    %c0_149 = arith.constant 0 : index
    %278 = vector.load %arg2[%c0_148, %c0_149] : memref<64x128xbf16, #tpu.memory_space<vmem>>, vector<64x128xbf16>
    %cst_150 = arith.constant dense<0.000000e+00> : vector<32x128xf32>
    %279 = tpu.matmul %277, %278, %cst_150 {dimension_numbers = #tpu.dot_dimension_numbers<[1], [0], [0], [1], [0, 0, 1, 1], [], []>} : vector<32x64xbf16>, vector<64x128xbf16>, vector<32x128xf32> -> vector<32x128xf32>
    %c0_151 = arith.constant 0 : index
    %c0_152 = arith.constant 0 : index
    %280 = vector.load %arg3[%c0_151, %c0_152] : memref<1x128xf32, #tpu.memory_space<vmem>>, vector<1x128xf32>
    %281 = vector.broadcast %280 : vector<1x128xf32> to vector<32x128xf32>
    %282 = arith.addf %279, %281 : vector<32x128xf32>
    %cst_153 = arith.constant 0.000000e+00 : f32
    %283 = vector.broadcast %cst_153 : f32 to vector<32x128xf32>
    %284 = arith.maximumf %282, %283 : vector<32x128xf32>
    %285 = vector.extract_strided_slice %284 {offsets = [0, 0], sizes = [16, 128], strides = [1, 1]} : vector<32x128xf32> to vector<16x128xf32>
    %286 = vector.extract_strided_slice %284 {offsets = [16, 0], sizes = [16, 128], strides = [1, 1]} : vector<32x128xf32> to vector<16x128xf32>
    %287 = arith.maximumf %285, %286 : vector<16x128xf32>
    %288 = vector.extract_strided_slice %287 {offsets = [0, 0], sizes = [16, 64], strides = [1, 1]} : vector<16x128xf32> to vector<16x64xf32>
    %289 = vector.extract_strided_slice %287 {offsets = [0, 64], sizes = [16, 64], strides = [1, 1]} : vector<16x128xf32> to vector<16x64xf32>
    %290 = arith.maximumf %288, %289 : vector<16x64xf32>
    %291 = arith.mulf %290, %20 : vector<16x64xf32>
    %c256_154 = arith.constant 256 : index
    %c0_155 = arith.constant 0 : index
    %292 = vector.load %arg7[%c256_154, %c0_155] : memref<432x64xf32, #tpu.memory_space<vmem>>, vector<16x64xf32>
    tpu.vector_store %arg7[%c256_154, %c0_155], %291 {strides = array<i32>} : memref<432x64xf32, #tpu.memory_space<vmem>>, vector<16x64xf32>,
    %c0_156 = arith.constant 0 : index
    %c512 = arith.constant 512 : index
    %c0_157 = arith.constant 0 : index
    %293 = vector.load %arg1[%c0_156, %c512, %c0_157] : memref<1x768x64xbf16, #tpu.memory_space<vmem>>, vector<1x32x64xbf16>
    %294 = vector.shape_cast %293 : vector<1x32x64xbf16> to vector<32x64xbf16>
    %c0_158 = arith.constant 0 : index
    %c0_159 = arith.constant 0 : index
    %295 = vector.load %arg2[%c0_158, %c0_159] : memref<64x128xbf16, #tpu.memory_space<vmem>>, vector<64x128xbf16>
    %cst_160 = arith.constant dense<0.000000e+00> : vector<32x128xf32>
    %296 = tpu.matmul %294, %295, %cst_160 {dimension_numbers = #tpu.dot_dimension_numbers<[1], [0], [0], [1], [0, 0, 1, 1], [], []>} : vector<32x64xbf16>, vector<64x128xbf16>, vector<32x128xf32> -> vector<32x128xf32>
    %c0_161 = arith.constant 0 : index
    %c0_162 = arith.constant 0 : index
    %297 = vector.load %arg3[%c0_161, %c0_162] : memref<1x128xf32, #tpu.memory_space<vmem>>, vector<1x128xf32>
    %298 = vector.broadcast %297 : vector<1x128xf32> to vector<32x128xf32>
    %299 = arith.addf %296, %298 : vector<32x128xf32>
    %cst_163 = arith.constant 0.000000e+00 : f32
    %300 = vector.broadcast %cst_163 : f32 to vector<32x128xf32>
    %301 = arith.maximumf %299, %300 : vector<32x128xf32>
    %302 = vector.extract_strided_slice %301 {offsets = [0, 0], sizes = [16, 128], strides = [1, 1]} : vector<32x128xf32> to vector<16x128xf32>
    %303 = vector.extract_strided_slice %301 {offsets = [16, 0], sizes = [16, 128], strides = [1, 1]} : vector<32x128xf32> to vector<16x128xf32>
    %304 = arith.maximumf %302, %303 : vector<16x128xf32>
    %305 = vector.extract_strided_slice %304 {offsets = [0, 0], sizes = [16, 64], strides = [1, 1]} : vector<16x128xf32> to vector<16x64xf32>
    %306 = vector.extract_strided_slice %304 {offsets = [0, 64], sizes = [16, 64], strides = [1, 1]} : vector<16x128xf32> to vector<16x64xf32>
    %307 = arith.maximumf %305, %306 : vector<16x64xf32>
    %308 = arith.mulf %307, %20 : vector<16x64xf32>
    %c272 = arith.constant 272 : index
    %c0_164 = arith.constant 0 : index
    %309 = vector.load %arg7[%c272, %c0_164] : memref<432x64xf32, #tpu.memory_space<vmem>>, vector<16x64xf32>
    tpu.vector_store %arg7[%c272, %c0_164], %308 {strides = array<i32>} : memref<432x64xf32, #tpu.memory_space<vmem>>, vector<16x64xf32>,
    %c0_165 = arith.constant 0 : index
    %c544 = arith.constant 544 : index
    %c0_166 = arith.constant 0 : index
    %310 = vector.load %arg1[%c0_165, %c544, %c0_166] : memref<1x768x64xbf16, #tpu.memory_space<vmem>>, vector<1x32x64xbf16>
    %311 = vector.shape_cast %310 : vector<1x32x64xbf16> to vector<32x64xbf16>
    %c0_167 = arith.constant 0 : index
    %c0_168 = arith.constant 0 : index
    %312 = vector.load %arg2[%c0_167, %c0_168] : memref<64x128xbf16, #tpu.memory_space<vmem>>, vector<64x128xbf16>
    %cst_169 = arith.constant dense<0.000000e+00> : vector<32x128xf32>
    %313 = tpu.matmul %311, %312, %cst_169 {dimension_numbers = #tpu.dot_dimension_numbers<[1], [0], [0], [1], [0, 0, 1, 1], [], []>} : vector<32x64xbf16>, vector<64x128xbf16>, vector<32x128xf32> -> vector<32x128xf32>
    %c0_170 = arith.constant 0 : index
    %c0_171 = arith.constant 0 : index
    %314 = vector.load %arg3[%c0_170, %c0_171] : memref<1x128xf32, #tpu.memory_space<vmem>>, vector<1x128xf32>
    %315 = vector.broadcast %314 : vector<1x128xf32> to vector<32x128xf32>
    %316 = arith.addf %313, %315 : vector<32x128xf32>
    %cst_172 = arith.constant 0.000000e+00 : f32
    %317 = vector.broadcast %cst_172 : f32 to vector<32x128xf32>
    %318 = arith.maximumf %316, %317 : vector<32x128xf32>
    %319 = vector.extract_strided_slice %318 {offsets = [0, 0], sizes = [16, 128], strides = [1, 1]} : vector<32x128xf32> to vector<16x128xf32>
    %320 = vector.extract_strided_slice %318 {offsets = [16, 0], sizes = [16, 128], strides = [1, 1]} : vector<32x128xf32> to vector<16x128xf32>
    %321 = arith.maximumf %319, %320 : vector<16x128xf32>
    %322 = vector.extract_strided_slice %321 {offsets = [0, 0], sizes = [16, 64], strides = [1, 1]} : vector<16x128xf32> to vector<16x64xf32>
    %323 = vector.extract_strided_slice %321 {offsets = [0, 64], sizes = [16, 64], strides = [1, 1]} : vector<16x128xf32> to vector<16x64xf32>
    %324 = arith.maximumf %322, %323 : vector<16x64xf32>
    %325 = arith.mulf %324, %20 : vector<16x64xf32>
    %c288_173 = arith.constant 288 : index
    %c0_174 = arith.constant 0 : index
    %326 = vector.load %arg7[%c288_173, %c0_174] : memref<432x64xf32, #tpu.memory_space<vmem>>, vector<16x64xf32>
    tpu.vector_store %arg7[%c288_173, %c0_174], %325 {strides = array<i32>} : memref<432x64xf32, #tpu.memory_space<vmem>>, vector<16x64xf32>,
    %c0_175 = arith.constant 0 : index
    %c576 = arith.constant 576 : index
    %c0_176 = arith.constant 0 : index
    %327 = vector.load %arg1[%c0_175, %c576, %c0_176] : memref<1x768x64xbf16, #tpu.memory_space<vmem>>, vector<1x32x64xbf16>
    %328 = vector.shape_cast %327 : vector<1x32x64xbf16> to vector<32x64xbf16>
    %c0_177 = arith.constant 0 : index
    %c0_178 = arith.constant 0 : index
    %329 = vector.load %arg2[%c0_177, %c0_178] : memref<64x128xbf16, #tpu.memory_space<vmem>>, vector<64x128xbf16>
    %cst_179 = arith.constant dense<0.000000e+00> : vector<32x128xf32>
    %330 = tpu.matmul %328, %329, %cst_179 {dimension_numbers = #tpu.dot_dimension_numbers<[1], [0], [0], [1], [0, 0, 1, 1], [], []>} : vector<32x64xbf16>, vector<64x128xbf16>, vector<32x128xf32> -> vector<32x128xf32>
    %c0_180 = arith.constant 0 : index
    %c0_181 = arith.constant 0 : index
    %331 = vector.load %arg3[%c0_180, %c0_181] : memref<1x128xf32, #tpu.memory_space<vmem>>, vector<1x128xf32>
    %332 = vector.broadcast %331 : vector<1x128xf32> to vector<32x128xf32>
    %333 = arith.addf %330, %332 : vector<32x128xf32>
    %cst_182 = arith.constant 0.000000e+00 : f32
    %334 = vector.broadcast %cst_182 : f32 to vector<32x128xf32>
    %335 = arith.maximumf %333, %334 : vector<32x128xf32>
    %336 = vector.extract_strided_slice %335 {offsets = [0, 0], sizes = [16, 128], strides = [1, 1]} : vector<32x128xf32> to vector<16x128xf32>
    %337 = vector.extract_strided_slice %335 {offsets = [16, 0], sizes = [16, 128], strides = [1, 1]} : vector<32x128xf32> to vector<16x128xf32>
    %338 = arith.maximumf %336, %337 : vector<16x128xf32>
    %339 = vector.extract_strided_slice %338 {offsets = [0, 0], sizes = [16, 64], strides = [1, 1]} : vector<16x128xf32> to vector<16x64xf32>
    %340 = vector.extract_strided_slice %338 {offsets = [0, 64], sizes = [16, 64], strides = [1, 1]} : vector<16x128xf32> to vector<16x64xf32>
    %341 = arith.maximumf %339, %340 : vector<16x64xf32>
    %342 = arith.mulf %341, %20 : vector<16x64xf32>
    %c304 = arith.constant 304 : index
    %c0_183 = arith.constant 0 : index
    %343 = vector.load %arg7[%c304, %c0_183] : memref<432x64xf32, #tpu.memory_space<vmem>>, vector<16x64xf32>
    tpu.vector_store %arg7[%c304, %c0_183], %342 {strides = array<i32>} : memref<432x64xf32, #tpu.memory_space<vmem>>, vector<16x64xf32>,
    %c0_184 = arith.constant 0 : index
    %c608 = arith.constant 608 : index
    %c0_185 = arith.constant 0 : index
    %344 = vector.load %arg1[%c0_184, %c608, %c0_185] : memref<1x768x64xbf16, #tpu.memory_space<vmem>>, vector<1x32x64xbf16>
    %345 = vector.shape_cast %344 : vector<1x32x64xbf16> to vector<32x64xbf16>
    %c0_186 = arith.constant 0 : index
    %c0_187 = arith.constant 0 : index
    %346 = vector.load %arg2[%c0_186, %c0_187] : memref<64x128xbf16, #tpu.memory_space<vmem>>, vector<64x128xbf16>
    %cst_188 = arith.constant dense<0.000000e+00> : vector<32x128xf32>
    %347 = tpu.matmul %345, %346, %cst_188 {dimension_numbers = #tpu.dot_dimension_numbers<[1], [0], [0], [1], [0, 0, 1, 1], [], []>} : vector<32x64xbf16>, vector<64x128xbf16>, vector<32x128xf32> -> vector<32x128xf32>
    %c0_189 = arith.constant 0 : index
    %c0_190 = arith.constant 0 : index
    %348 = vector.load %arg3[%c0_189, %c0_190] : memref<1x128xf32, #tpu.memory_space<vmem>>, vector<1x128xf32>
    %349 = vector.broadcast %348 : vector<1x128xf32> to vector<32x128xf32>
    %350 = arith.addf %347, %349 : vector<32x128xf32>
    %cst_191 = arith.constant 0.000000e+00 : f32
    %351 = vector.broadcast %cst_191 : f32 to vector<32x128xf32>
    %352 = arith.maximumf %350, %351 : vector<32x128xf32>
    %353 = vector.extract_strided_slice %352 {offsets = [0, 0], sizes = [16, 128], strides = [1, 1]} : vector<32x128xf32> to vector<16x128xf32>
    %354 = vector.extract_strided_slice %352 {offsets = [16, 0], sizes = [16, 128], strides = [1, 1]} : vector<32x128xf32> to vector<16x128xf32>
    %355 = arith.maximumf %353, %354 : vector<16x128xf32>
    %356 = vector.extract_strided_slice %355 {offsets = [0, 0], sizes = [16, 64], strides = [1, 1]} : vector<16x128xf32> to vector<16x64xf32>
    %357 = vector.extract_strided_slice %355 {offsets = [0, 64], sizes = [16, 64], strides = [1, 1]} : vector<16x128xf32> to vector<16x64xf32>
    %358 = arith.maximumf %356, %357 : vector<16x64xf32>
    %359 = arith.mulf %358, %20 : vector<16x64xf32>
    %c320_192 = arith.constant 320 : index
    %c0_193 = arith.constant 0 : index
    %360 = vector.load %arg7[%c320_192, %c0_193] : memref<432x64xf32, #tpu.memory_space<vmem>>, vector<16x64xf32>
    tpu.vector_store %arg7[%c320_192, %c0_193], %359 {strides = array<i32>} : memref<432x64xf32, #tpu.memory_space<vmem>>, vector<16x64xf32>,
    %c0_194 = arith.constant 0 : index
    %c640 = arith.constant 640 : index
    %c0_195 = arith.constant 0 : index
    %361 = vector.load %arg1[%c0_194, %c640, %c0_195] : memref<1x768x64xbf16, #tpu.memory_space<vmem>>, vector<1x32x64xbf16>
    %362 = vector.shape_cast %361 : vector<1x32x64xbf16> to vector<32x64xbf16>
    %c0_196 = arith.constant 0 : index
    %c0_197 = arith.constant 0 : index
    %363 = vector.load %arg2[%c0_196, %c0_197] : memref<64x128xbf16, #tpu.memory_space<vmem>>, vector<64x128xbf16>
    %cst_198 = arith.constant dense<0.000000e+00> : vector<32x128xf32>
    %364 = tpu.matmul %362, %363, %cst_198 {dimension_numbers = #tpu.dot_dimension_numbers<[1], [0], [0], [1], [0, 0, 1, 1], [], []>} : vector<32x64xbf16>, vector<64x128xbf16>, vector<32x128xf32> -> vector<32x128xf32>
    %c0_199 = arith.constant 0 : index
    %c0_200 = arith.constant 0 : index
    %365 = vector.load %arg3[%c0_199, %c0_200] : memref<1x128xf32, #tpu.memory_space<vmem>>, vector<1x128xf32>
    %366 = vector.broadcast %365 : vector<1x128xf32> to vector<32x128xf32>
    %367 = arith.addf %364, %366 : vector<32x128xf32>
    %cst_201 = arith.constant 0.000000e+00 : f32
    %368 = vector.broadcast %cst_201 : f32 to vector<32x128xf32>
    %369 = arith.maximumf %367, %368 : vector<32x128xf32>
    %370 = vector.extract_strided_slice %369 {offsets = [0, 0], sizes = [16, 128], strides = [1, 1]} : vector<32x128xf32> to vector<16x128xf32>
    %371 = vector.extract_strided_slice %369 {offsets = [16, 0], sizes = [16, 128], strides = [1, 1]} : vector<32x128xf32> to vector<16x128xf32>
    %372 = arith.maximumf %370, %371 : vector<16x128xf32>
    %373 = vector.extract_strided_slice %372 {offsets = [0, 0], sizes = [16, 64], strides = [1, 1]} : vector<16x128xf32> to vector<16x64xf32>
    %374 = vector.extract_strided_slice %372 {offsets = [0, 64], sizes = [16, 64], strides = [1, 1]} : vector<16x128xf32> to vector<16x64xf32>
    %375 = arith.maximumf %373, %374 : vector<16x64xf32>
    %376 = arith.mulf %375, %20 : vector<16x64xf32>
    %c336 = arith.constant 336 : index
    %c0_202 = arith.constant 0 : index
    %377 = vector.load %arg7[%c336, %c0_202] : memref<432x64xf32, #tpu.memory_space<vmem>>, vector<16x64xf32>
    tpu.vector_store %arg7[%c336, %c0_202], %376 {strides = array<i32>} : memref<432x64xf32, #tpu.memory_space<vmem>>, vector<16x64xf32>,
    %c0_203 = arith.constant 0 : index
    %c672 = arith.constant 672 : index
    %c0_204 = arith.constant 0 : index
    %378 = vector.load %arg1[%c0_203, %c672, %c0_204] : memref<1x768x64xbf16, #tpu.memory_space<vmem>>, vector<1x32x64xbf16>
    %379 = vector.shape_cast %378 : vector<1x32x64xbf16> to vector<32x64xbf16>
    %c0_205 = arith.constant 0 : index
    %c0_206 = arith.constant 0 : index
    %380 = vector.load %arg2[%c0_205, %c0_206] : memref<64x128xbf16, #tpu.memory_space<vmem>>, vector<64x128xbf16>
    %cst_207 = arith.constant dense<0.000000e+00> : vector<32x128xf32>
    %381 = tpu.matmul %379, %380, %cst_207 {dimension_numbers = #tpu.dot_dimension_numbers<[1], [0], [0], [1], [0, 0, 1, 1], [], []>} : vector<32x64xbf16>, vector<64x128xbf16>, vector<32x128xf32> -> vector<32x128xf32>
    %c0_208 = arith.constant 0 : index
    %c0_209 = arith.constant 0 : index
    %382 = vector.load %arg3[%c0_208, %c0_209] : memref<1x128xf32, #tpu.memory_space<vmem>>, vector<1x128xf32>
    %383 = vector.broadcast %382 : vector<1x128xf32> to vector<32x128xf32>
    %384 = arith.addf %381, %383 : vector<32x128xf32>
    %cst_210 = arith.constant 0.000000e+00 : f32
    %385 = vector.broadcast %cst_210 : f32 to vector<32x128xf32>
    %386 = arith.maximumf %384, %385 : vector<32x128xf32>
    %387 = vector.extract_strided_slice %386 {offsets = [0, 0], sizes = [16, 128], strides = [1, 1]} : vector<32x128xf32> to vector<16x128xf32>
    %388 = vector.extract_strided_slice %386 {offsets = [16, 0], sizes = [16, 128], strides = [1, 1]} : vector<32x128xf32> to vector<16x128xf32>
    %389 = arith.maximumf %387, %388 : vector<16x128xf32>
    %390 = vector.extract_strided_slice %389 {offsets = [0, 0], sizes = [16, 64], strides = [1, 1]} : vector<16x128xf32> to vector<16x64xf32>
    %391 = vector.extract_strided_slice %389 {offsets = [0, 64], sizes = [16, 64], strides = [1, 1]} : vector<16x128xf32> to vector<16x64xf32>
    %392 = arith.maximumf %390, %391 : vector<16x64xf32>
    %393 = arith.mulf %392, %20 : vector<16x64xf32>
    %c352_211 = arith.constant 352 : index
    %c0_212 = arith.constant 0 : index
    %394 = vector.load %arg7[%c352_211, %c0_212] : memref<432x64xf32, #tpu.memory_space<vmem>>, vector<16x64xf32>
    tpu.vector_store %arg7[%c352_211, %c0_212], %393 {strides = array<i32>} : memref<432x64xf32, #tpu.memory_space<vmem>>, vector<16x64xf32>,
    %c0_213 = arith.constant 0 : index
    %c704 = arith.constant 704 : index
    %c0_214 = arith.constant 0 : index
    %395 = vector.load %arg1[%c0_213, %c704, %c0_214] : memref<1x768x64xbf16, #tpu.memory_space<vmem>>, vector<1x32x64xbf16>
    %396 = vector.shape_cast %395 : vector<1x32x64xbf16> to vector<32x64xbf16>
    %c0_215 = arith.constant 0 : index
    %c0_216 = arith.constant 0 : index
    %397 = vector.load %arg2[%c0_215, %c0_216] : memref<64x128xbf16, #tpu.memory_space<vmem>>, vector<64x128xbf16>
    %cst_217 = arith.constant dense<0.000000e+00> : vector<32x128xf32>
    %398 = tpu.matmul %396, %397, %cst_217 {dimension_numbers = #tpu.dot_dimension_numbers<[1], [0], [0], [1], [0, 0, 1, 1], [], []>} : vector<32x64xbf16>, vector<64x128xbf16>, vector<32x128xf32> -> vector<32x128xf32>
    %c0_218 = arith.constant 0 : index
    %c0_219 = arith.constant 0 : index
    %399 = vector.load %arg3[%c0_218, %c0_219] : memref<1x128xf32, #tpu.memory_space<vmem>>, vector<1x128xf32>
    %400 = vector.broadcast %399 : vector<1x128xf32> to vector<32x128xf32>
    %401 = arith.addf %398, %400 : vector<32x128xf32>
    %cst_220 = arith.constant 0.000000e+00 : f32
    %402 = vector.broadcast %cst_220 : f32 to vector<32x128xf32>
    %403 = arith.maximumf %401, %402 : vector<32x128xf32>
    %404 = vector.extract_strided_slice %403 {offsets = [0, 0], sizes = [16, 128], strides = [1, 1]} : vector<32x128xf32> to vector<16x128xf32>
    %405 = vector.extract_strided_slice %403 {offsets = [16, 0], sizes = [16, 128], strides = [1, 1]} : vector<32x128xf32> to vector<16x128xf32>
    %406 = arith.maximumf %404, %405 : vector<16x128xf32>
    %407 = vector.extract_strided_slice %406 {offsets = [0, 0], sizes = [16, 64], strides = [1, 1]} : vector<16x128xf32> to vector<16x64xf32>
    %408 = vector.extract_strided_slice %406 {offsets = [0, 64], sizes = [16, 64], strides = [1, 1]} : vector<16x128xf32> to vector<16x64xf32>
    %409 = arith.maximumf %407, %408 : vector<16x64xf32>
    %410 = arith.mulf %409, %20 : vector<16x64xf32>
    %c368 = arith.constant 368 : index
    %c0_221 = arith.constant 0 : index
    %411 = vector.load %arg7[%c368, %c0_221] : memref<432x64xf32, #tpu.memory_space<vmem>>, vector<16x64xf32>
    tpu.vector_store %arg7[%c368, %c0_221], %410 {strides = array<i32>} : memref<432x64xf32, #tpu.memory_space<vmem>>, vector<16x64xf32>,
    %c0_222 = arith.constant 0 : index
    %c736 = arith.constant 736 : index
    %c0_223 = arith.constant 0 : index
    %412 = vector.load %arg1[%c0_222, %c736, %c0_223] : memref<1x768x64xbf16, #tpu.memory_space<vmem>>, vector<1x32x64xbf16>
    %413 = vector.shape_cast %412 : vector<1x32x64xbf16> to vector<32x64xbf16>
    %c0_224 = arith.constant 0 : index
    %c0_225 = arith.constant 0 : index
    %414 = vector.load %arg2[%c0_224, %c0_225] : memref<64x128xbf16, #tpu.memory_space<vmem>>, vector<64x128xbf16>
    %cst_226 = arith.constant dense<0.000000e+00> : vector<32x128xf32>
    %415 = tpu.matmul %413, %414, %cst_226 {dimension_numbers = #tpu.dot_dimension_numbers<[1], [0], [0], [1], [0, 0, 1, 1], [], []>} : vector<32x64xbf16>, vector<64x128xbf16>, vector<32x128xf32> -> vector<32x128xf32>
    %c0_227 = arith.constant 0 : index
    %c0_228 = arith.constant 0 : index
    %416 = vector.load %arg3[%c0_227, %c0_228] : memref<1x128xf32, #tpu.memory_space<vmem>>, vector<1x128xf32>
    %417 = vector.broadcast %416 : vector<1x128xf32> to vector<32x128xf32>
    %418 = arith.addf %415, %417 : vector<32x128xf32>
    %cst_229 = arith.constant 0.000000e+00 : f32
    %419 = vector.broadcast %cst_229 : f32 to vector<32x128xf32>
    %420 = arith.maximumf %418, %419 : vector<32x128xf32>
    %421 = vector.extract_strided_slice %420 {offsets = [0, 0], sizes = [16, 128], strides = [1, 1]} : vector<32x128xf32> to vector<16x128xf32>
    %422 = vector.extract_strided_slice %420 {offsets = [16, 0], sizes = [16, 128], strides = [1, 1]} : vector<32x128xf32> to vector<16x128xf32>
    %423 = arith.maximumf %421, %422 : vector<16x128xf32>
    %424 = vector.extract_strided_slice %423 {offsets = [0, 0], sizes = [16, 64], strides = [1, 1]} : vector<16x128xf32> to vector<16x64xf32>
    %425 = vector.extract_strided_slice %423 {offsets = [0, 64], sizes = [16, 64], strides = [1, 1]} : vector<16x128xf32> to vector<16x64xf32>
    %426 = arith.maximumf %424, %425 : vector<16x64xf32>
    %427 = arith.mulf %426, %20 : vector<16x64xf32>
    %c384_230 = arith.constant 384 : index
    %c0_231 = arith.constant 0 : index
    %428 = vector.load %arg7[%c384_230, %c0_231] : memref<432x64xf32, #tpu.memory_space<vmem>>, vector<16x64xf32>
    tpu.vector_store %arg7[%c384_230, %c0_231], %427 {strides = array<i32>} : memref<432x64xf32, #tpu.memory_space<vmem>>, vector<16x64xf32>,
    %c0_232 = arith.constant 0 : index
    %c0_233 = arith.constant 0 : index
    %429 = vector.load %arg7[%c0_232, %c0_233] : memref<432x64xf32, #tpu.memory_space<vmem>>, vector<384x64xf32>
    %430 = arith.truncf %429 : vector<384x64xf32> to vector<384x64xbf16>
    %c0_234 = arith.constant 0 : index
    %c0_235 = arith.constant 0 : index
    %431 = vector.load %arg8[%c0_234, %c0_235] : memref<384x384xbf16, #tpu.memory_space<vmem>>, vector<384x64xbf16>
    tpu.vector_store %arg8[%c0_234, %c0_235], %430 {strides = array<i32>} : memref<384x384xbf16, #tpu.memory_space<vmem>>, vector<384x64xbf16>,
    %c1 = arith.constant 1 : index
    %c0_236 = arith.constant 0 : index
    %432 = vector.load %arg7[%c1, %c0_236] : memref<432x64xf32, #tpu.memory_space<vmem>>, vector<384x64xf32>
    %433 = arith.truncf %432 : vector<384x64xf32> to vector<384x64xbf16>
    %c0_237 = arith.constant 0 : index
    %c64_238 = arith.constant 64 : index
    %434 = vector.load %arg8[%c0_237, %c64_238] : memref<384x384xbf16, #tpu.memory_space<vmem>>, vector<384x64xbf16>
    tpu.vector_store %arg8[%c0_237, %c64_238], %433 {strides = array<i32>} : memref<384x384xbf16, #tpu.memory_space<vmem>>, vector<384x64xbf16>,
    %c16_239 = arith.constant 16 : index
    %c0_240 = arith.constant 0 : index
    %435 = vector.load %arg7[%c16_239, %c0_240] : memref<432x64xf32, #tpu.memory_space<vmem>>, vector<384x64xf32>
    %436 = arith.truncf %435 : vector<384x64xf32> to vector<384x64xbf16>
    %c0_241 = arith.constant 0 : index
    %c128_242 = arith.constant 128 : index
    %437 = vector.load %arg8[%c0_241, %c128_242] : memref<384x384xbf16, #tpu.memory_space<vmem>>, vector<384x64xbf16>
    tpu.vector_store %arg8[%c0_241, %c128_242], %436 {strides = array<i32>} : memref<384x384xbf16, #tpu.memory_space<vmem>>, vector<384x64xbf16>,
    %c17 = arith.constant 17 : index
    %c0_243 = arith.constant 0 : index
    %438 = vector.load %arg7[%c17, %c0_243] : memref<432x64xf32, #tpu.memory_space<vmem>>, vector<384x64xf32>
    %439 = arith.truncf %438 : vector<384x64xf32> to vector<384x64xbf16>
    %c0_244 = arith.constant 0 : index
    %c192_245 = arith.constant 192 : index
    %440 = vector.load %arg8[%c0_244, %c192_245] : memref<384x384xbf16, #tpu.memory_space<vmem>>, vector<384x64xbf16>
    tpu.vector_store %arg8[%c0_244, %c192_245], %439 {strides = array<i32>} : memref<384x384xbf16, #tpu.memory_space<vmem>>, vector<384x64xbf16>,
    %c32_246 = arith.constant 32 : index
    %c0_247 = arith.constant 0 : index
    %441 = vector.load %arg7[%c32_246, %c0_247] : memref<432x64xf32, #tpu.memory_space<vmem>>, vector<384x64xf32>
    %442 = arith.truncf %441 : vector<384x64xf32> to vector<384x64xbf16>
    %c0_248 = arith.constant 0 : index
    %c256_249 = arith.constant 256 : index
    %443 = vector.load %arg8[%c0_248, %c256_249] : memref<384x384xbf16, #tpu.memory_space<vmem>>, vector<384x64xbf16>
    tpu.vector_store %arg8[%c0_248, %c256_249], %442 {strides = array<i32>} : memref<384x384xbf16, #tpu.memory_space<vmem>>, vector<384x64xbf16>,
    %c33 = arith.constant 33 : index
    %c0_250 = arith.constant 0 : index
    %444 = vector.load %arg7[%c33, %c0_250] : memref<432x64xf32, #tpu.memory_space<vmem>>, vector<384x64xf32>
    %445 = arith.truncf %444 : vector<384x64xf32> to vector<384x64xbf16>
    %c0_251 = arith.constant 0 : index
    %c320_252 = arith.constant 320 : index
    %446 = vector.load %arg8[%c0_251, %c320_252] : memref<384x384xbf16, #tpu.memory_space<vmem>>, vector<384x64xbf16>
    tpu.vector_store %arg8[%c0_251, %c320_252], %445 {strides = array<i32>} : memref<384x384xbf16, #tpu.memory_space<vmem>>, vector<384x64xbf16>,
    %447 = tpu.iota {dimensions = array<i32: 0>} : vector<16x64xi32>
    %c12_i32_253 = arith.constant 12 : i32
    %448 = vector.broadcast %c12_i32_253 : i32 to vector<16x64xi32>
    %449 = arith.cmpi slt, %447, %448 : vector<16x64xi32>
    %450 = arith.extui %449 : vector<16x64xi1> to vector<16x64xi32>
    %451 = arith.sitofp %450 : vector<16x64xi32> to vector<16x64xf32>
    %c0_254 = arith.constant 0 : index
    %c0_255 = arith.constant 0 : index
    %452 = vector.load %arg8[%c0_254, %c0_255] : memref<384x384xbf16, #tpu.memory_space<vmem>>, vector<32x384xbf16>
    %c0_256 = arith.constant 0 : index
    %c0_257 = arith.constant 0 : index
    %453 = vector.load %arg4[%c0_256, %c0_257] : memref<384x128xbf16, #tpu.memory_space<vmem>>, vector<384x128xbf16>
    %cst_258 = arith.constant dense<0.000000e+00> : vector<32x128xf32>
    %454 = tpu.matmul %452, %453, %cst_258 {dimension_numbers = #tpu.dot_dimension_numbers<[1], [0], [0], [1], [0, 0, 1, 1], [], []>} : vector<32x384xbf16>, vector<384x128xbf16>, vector<32x128xf32> -> vector<32x128xf32>
    %c0_259 = arith.constant 0 : index
    %c0_260 = arith.constant 0 : index
    %455 = vector.load %arg5[%c0_259, %c0_260] : memref<1x128xf32, #tpu.memory_space<vmem>>, vector<1x128xf32>
    %456 = vector.broadcast %455 : vector<1x128xf32> to vector<32x128xf32>
    %457 = arith.addf %454, %456 : vector<32x128xf32>
    %cst_261 = arith.constant 0.000000e+00 : f32
    %458 = vector.broadcast %cst_261 : f32 to vector<32x128xf32>
    %459 = arith.maximumf %457, %458 : vector<32x128xf32>
    %460 = vector.extract_strided_slice %459 {offsets = [0, 0], sizes = [16, 128], strides = [1, 1]} : vector<32x128xf32> to vector<16x128xf32>
    %461 = vector.extract_strided_slice %459 {offsets = [16, 0], sizes = [16, 128], strides = [1, 1]} : vector<32x128xf32> to vector<16x128xf32>
    %462 = arith.maximumf %460, %461 : vector<16x128xf32>
    %463 = vector.extract_strided_slice %462 {offsets = [0, 0], sizes = [16, 64], strides = [1, 1]} : vector<16x128xf32> to vector<16x64xf32>
    %464 = vector.extract_strided_slice %462 {offsets = [0, 64], sizes = [16, 64], strides = [1, 1]} : vector<16x128xf32> to vector<16x64xf32>
    %465 = arith.maximumf %463, %464 : vector<16x64xf32>
    %466 = arith.mulf %465, %451 : vector<16x64xf32>
    %467 = arith.truncf %466 : vector<16x64xf32> to vector<16x64xbf16>
    %c0_262 = arith.constant 0 : index
    %c0_263 = arith.constant 0 : index
    %c0_264 = arith.constant 0 : index
    %468 = vector.load %arg6[%c0_262, %c0_263, %c0_264] : memref<1x192x64xbf16, #tpu.memory_space<vmem>>, vector<1x16x64xbf16>
    %469 = vector.shape_cast %468 : vector<1x16x64xbf16> to vector<16x64xbf16>
    %470 = vector.shape_cast %467 : vector<16x64xbf16> to vector<1x16x64xbf16>
    tpu.vector_store %arg6[%c0_262, %c0_263, %c0_264], %470 {strides = array<i32>} : memref<1x192x64xbf16, #tpu.memory_space<vmem>>, vector<1x16x64xbf16>,
    %c32_265 = arith.constant 32 : index
    %c0_266 = arith.constant 0 : index
    %471 = vector.load %arg8[%c32_265, %c0_266] : memref<384x384xbf16, #tpu.memory_space<vmem>>, vector<32x384xbf16>
    %c0_267 = arith.constant 0 : index
    %c0_268 = arith.constant 0 : index
    %472 = vector.load %arg4[%c0_267, %c0_268] : memref<384x128xbf16, #tpu.memory_space<vmem>>, vector<384x128xbf16>
    %cst_269 = arith.constant dense<0.000000e+00> : vector<32x128xf32>
    %473 = tpu.matmul %471, %472, %cst_269 {dimension_numbers = #tpu.dot_dimension_numbers<[1], [0], [0], [1], [0, 0, 1, 1], [], []>} : vector<32x384xbf16>, vector<384x128xbf16>, vector<32x128xf32> -> vector<32x128xf32>
    %c0_270 = arith.constant 0 : index
    %c0_271 = arith.constant 0 : index
    %474 = vector.load %arg5[%c0_270, %c0_271] : memref<1x128xf32, #tpu.memory_space<vmem>>, vector<1x128xf32>
    %475 = vector.broadcast %474 : vector<1x128xf32> to vector<32x128xf32>
    %476 = arith.addf %473, %475 : vector<32x128xf32>
    %cst_272 = arith.constant 0.000000e+00 : f32
    %477 = vector.broadcast %cst_272 : f32 to vector<32x128xf32>
    %478 = arith.maximumf %476, %477 : vector<32x128xf32>
    %479 = vector.extract_strided_slice %478 {offsets = [0, 0], sizes = [16, 128], strides = [1, 1]} : vector<32x128xf32> to vector<16x128xf32>
    %480 = vector.extract_strided_slice %478 {offsets = [16, 0], sizes = [16, 128], strides = [1, 1]} : vector<32x128xf32> to vector<16x128xf32>
    %481 = arith.maximumf %479, %480 : vector<16x128xf32>
    %482 = vector.extract_strided_slice %481 {offsets = [0, 0], sizes = [16, 64], strides = [1, 1]} : vector<16x128xf32> to vector<16x64xf32>
    %483 = vector.extract_strided_slice %481 {offsets = [0, 64], sizes = [16, 64], strides = [1, 1]} : vector<16x128xf32> to vector<16x64xf32>
    %484 = arith.maximumf %482, %483 : vector<16x64xf32>
    %485 = arith.mulf %484, %451 : vector<16x64xf32>
    %486 = arith.truncf %485 : vector<16x64xf32> to vector<16x64xbf16>
    %c0_273 = arith.constant 0 : index
    %c16_274 = arith.constant 16 : index
    %c0_275 = arith.constant 0 : index
    %487 = vector.load %arg6[%c0_273, %c16_274, %c0_275] : memref<1x192x64xbf16, #tpu.memory_space<vmem>>, vector<1x16x64xbf16>
    %488 = vector.shape_cast %487 : vector<1x16x64xbf16> to vector<16x64xbf16>
    %489 = vector.shape_cast %486 : vector<16x64xbf16> to vector<1x16x64xbf16>
    tpu.vector_store %arg6[%c0_273, %c16_274, %c0_275], %489 {strides = array<i32>} : memref<1x192x64xbf16, #tpu.memory_space<vmem>>, vector<1x16x64xbf16>,
    %c64_276 = arith.constant 64 : index
    %c0_277 = arith.constant 0 : index
    %490 = vector.load %arg8[%c64_276, %c0_277] : memref<384x384xbf16, #tpu.memory_space<vmem>>, vector<32x384xbf16>
    %c0_278 = arith.constant 0 : index
    %c0_279 = arith.constant 0 : index
    %491 = vector.load %arg4[%c0_278, %c0_279] : memref<384x128xbf16, #tpu.memory_space<vmem>>, vector<384x128xbf16>
    %cst_280 = arith.constant dense<0.000000e+00> : vector<32x128xf32>
    %492 = tpu.matmul %490, %491, %cst_280 {dimension_numbers = #tpu.dot_dimension_numbers<[1], [0], [0], [1], [0, 0, 1, 1], [], []>} : vector<32x384xbf16>, vector<384x128xbf16>, vector<32x128xf32> -> vector<32x128xf32>
    %c0_281 = arith.constant 0 : index
    %c0_282 = arith.constant 0 : index
    %493 = vector.load %arg5[%c0_281, %c0_282] : memref<1x128xf32, #tpu.memory_space<vmem>>, vector<1x128xf32>
    %494 = vector.broadcast %493 : vector<1x128xf32> to vector<32x128xf32>
    %495 = arith.addf %492, %494 : vector<32x128xf32>
    %cst_283 = arith.constant 0.000000e+00 : f32
    %496 = vector.broadcast %cst_283 : f32 to vector<32x128xf32>
    %497 = arith.maximumf %495, %496 : vector<32x128xf32>
    %498 = vector.extract_strided_slice %497 {offsets = [0, 0], sizes = [16, 128], strides = [1, 1]} : vector<32x128xf32> to vector<16x128xf32>
    %499 = vector.extract_strided_slice %497 {offsets = [16, 0], sizes = [16, 128], strides = [1, 1]} : vector<32x128xf32> to vector<16x128xf32>
    %500 = arith.maximumf %498, %499 : vector<16x128xf32>
    %501 = vector.extract_strided_slice %500 {offsets = [0, 0], sizes = [16, 64], strides = [1, 1]} : vector<16x128xf32> to vector<16x64xf32>
    %502 = vector.extract_strided_slice %500 {offsets = [0, 64], sizes = [16, 64], strides = [1, 1]} : vector<16x128xf32> to vector<16x64xf32>
    %503 = arith.maximumf %501, %502 : vector<16x64xf32>
    %504 = arith.mulf %503, %451 : vector<16x64xf32>
    %505 = arith.truncf %504 : vector<16x64xf32> to vector<16x64xbf16>
    %c0_284 = arith.constant 0 : index
    %c32_285 = arith.constant 32 : index
    %c0_286 = arith.constant 0 : index
    %506 = vector.load %arg6[%c0_284, %c32_285, %c0_286] : memref<1x192x64xbf16, #tpu.memory_space<vmem>>, vector<1x16x64xbf16>
    %507 = vector.shape_cast %506 : vector<1x16x64xbf16> to vector<16x64xbf16>
    %508 = vector.shape_cast %505 : vector<16x64xbf16> to vector<1x16x64xbf16>
    tpu.vector_store %arg6[%c0_284, %c32_285, %c0_286], %508 {strides = array<i32>} : memref<1x192x64xbf16, #tpu.memory_space<vmem>>, vector<1x16x64xbf16>,
    %c96_287 = arith.constant 96 : index
    %c0_288 = arith.constant 0 : index
    %509 = vector.load %arg8[%c96_287, %c0_288] : memref<384x384xbf16, #tpu.memory_space<vmem>>, vector<32x384xbf16>
    %c0_289 = arith.constant 0 : index
    %c0_290 = arith.constant 0 : index
    %510 = vector.load %arg4[%c0_289, %c0_290] : memref<384x128xbf16, #tpu.memory_space<vmem>>, vector<384x128xbf16>
    %cst_291 = arith.constant dense<0.000000e+00> : vector<32x128xf32>
    %511 = tpu.matmul %509, %510, %cst_291 {dimension_numbers = #tpu.dot_dimension_numbers<[1], [0], [0], [1], [0, 0, 1, 1], [], []>} : vector<32x384xbf16>, vector<384x128xbf16>, vector<32x128xf32> -> vector<32x128xf32>
    %c0_292 = arith.constant 0 : index
    %c0_293 = arith.constant 0 : index
    %512 = vector.load %arg5[%c0_292, %c0_293] : memref<1x128xf32, #tpu.memory_space<vmem>>, vector<1x128xf32>
    %513 = vector.broadcast %512 : vector<1x128xf32> to vector<32x128xf32>
    %514 = arith.addf %511, %513 : vector<32x128xf32>
    %cst_294 = arith.constant 0.000000e+00 : f32
    %515 = vector.broadcast %cst_294 : f32 to vector<32x128xf32>
    %516 = arith.maximumf %514, %515 : vector<32x128xf32>
    %517 = vector.extract_strided_slice %516 {offsets = [0, 0], sizes = [16, 128], strides = [1, 1]} : vector<32x128xf32> to vector<16x128xf32>
    %518 = vector.extract_strided_slice %516 {offsets = [16, 0], sizes = [16, 128], strides = [1, 1]} : vector<32x128xf32> to vector<16x128xf32>
    %519 = arith.maximumf %517, %518 : vector<16x128xf32>
    %520 = vector.extract_strided_slice %519 {offsets = [0, 0], sizes = [16, 64], strides = [1, 1]} : vector<16x128xf32> to vector<16x64xf32>
    %521 = vector.extract_strided_slice %519 {offsets = [0, 64], sizes = [16, 64], strides = [1, 1]} : vector<16x128xf32> to vector<16x64xf32>
    %522 = arith.maximumf %520, %521 : vector<16x64xf32>
    %523 = arith.mulf %522, %451 : vector<16x64xf32>
    %524 = arith.truncf %523 : vector<16x64xf32> to vector<16x64xbf16>
    %c0_295 = arith.constant 0 : index
    %c48_296 = arith.constant 48 : index
    %c0_297 = arith.constant 0 : index
    %525 = vector.load %arg6[%c0_295, %c48_296, %c0_297] : memref<1x192x64xbf16, #tpu.memory_space<vmem>>, vector<1x16x64xbf16>
    %526 = vector.shape_cast %525 : vector<1x16x64xbf16> to vector<16x64xbf16>
    %527 = vector.shape_cast %524 : vector<16x64xbf16> to vector<1x16x64xbf16>
    tpu.vector_store %arg6[%c0_295, %c48_296, %c0_297], %527 {strides = array<i32>} : memref<1x192x64xbf16, #tpu.memory_space<vmem>>, vector<1x16x64xbf16>,
    %c128_298 = arith.constant 128 : index
    %c0_299 = arith.constant 0 : index
    %528 = vector.load %arg8[%c128_298, %c0_299] : memref<384x384xbf16, #tpu.memory_space<vmem>>, vector<32x384xbf16>
    %c0_300 = arith.constant 0 : index
    %c0_301 = arith.constant 0 : index
    %529 = vector.load %arg4[%c0_300, %c0_301] : memref<384x128xbf16, #tpu.memory_space<vmem>>, vector<384x128xbf16>
    %cst_302 = arith.constant dense<0.000000e+00> : vector<32x128xf32>
    %530 = tpu.matmul %528, %529, %cst_302 {dimension_numbers = #tpu.dot_dimension_numbers<[1], [0], [0], [1], [0, 0, 1, 1], [], []>} : vector<32x384xbf16>, vector<384x128xbf16>, vector<32x128xf32> -> vector<32x128xf32>
    %c0_303 = arith.constant 0 : index
    %c0_304 = arith.constant 0 : index
    %531 = vector.load %arg5[%c0_303, %c0_304] : memref<1x128xf32, #tpu.memory_space<vmem>>, vector<1x128xf32>
    %532 = vector.broadcast %531 : vector<1x128xf32> to vector<32x128xf32>
    %533 = arith.addf %530, %532 : vector<32x128xf32>
    %cst_305 = arith.constant 0.000000e+00 : f32
    %534 = vector.broadcast %cst_305 : f32 to vector<32x128xf32>
    %535 = arith.maximumf %533, %534 : vector<32x128xf32>
    %536 = vector.extract_strided_slice %535 {offsets = [0, 0], sizes = [16, 128], strides = [1, 1]} : vector<32x128xf32> to vector<16x128xf32>
    %537 = vector.extract_strided_slice %535 {offsets = [16, 0], sizes = [16, 128], strides = [1, 1]} : vector<32x128xf32> to vector<16x128xf32>
    %538 = arith.maximumf %536, %537 : vector<16x128xf32>
    %539 = vector.extract_strided_slice %538 {offsets = [0, 0], sizes = [16, 64], strides = [1, 1]} : vector<16x128xf32> to vector<16x64xf32>
    %540 = vector.extract_strided_slice %538 {offsets = [0, 64], sizes = [16, 64], strides = [1, 1]} : vector<16x128xf32> to vector<16x64xf32>
    %541 = arith.maximumf %539, %540 : vector<16x64xf32>
    %542 = arith.mulf %541, %451 : vector<16x64xf32>
    %543 = arith.truncf %542 : vector<16x64xf32> to vector<16x64xbf16>
    %c0_306 = arith.constant 0 : index
    %c64_307 = arith.constant 64 : index
    %c0_308 = arith.constant 0 : index
    %544 = vector.load %arg6[%c0_306, %c64_307, %c0_308] : memref<1x192x64xbf16, #tpu.memory_space<vmem>>, vector<1x16x64xbf16>
    %545 = vector.shape_cast %544 : vector<1x16x64xbf16> to vector<16x64xbf16>
    %546 = vector.shape_cast %543 : vector<16x64xbf16> to vector<1x16x64xbf16>
    tpu.vector_store %arg6[%c0_306, %c64_307, %c0_308], %546 {strides = array<i32>} : memref<1x192x64xbf16, #tpu.memory_space<vmem>>, vector<1x16x64xbf16>,
    %c160_309 = arith.constant 160 : index
    %c0_310 = arith.constant 0 : index
    %547 = vector.load %arg8[%c160_309, %c0_310] : memref<384x384xbf16, #tpu.memory_space<vmem>>, vector<32x384xbf16>
    %c0_311 = arith.constant 0 : index
    %c0_312 = arith.constant 0 : index
    %548 = vector.load %arg4[%c0_311, %c0_312] : memref<384x128xbf16, #tpu.memory_space<vmem>>, vector<384x128xbf16>
    %cst_313 = arith.constant dense<0.000000e+00> : vector<32x128xf32>
    %549 = tpu.matmul %547, %548, %cst_313 {dimension_numbers = #tpu.dot_dimension_numbers<[1], [0], [0], [1], [0, 0, 1, 1], [], []>} : vector<32x384xbf16>, vector<384x128xbf16>, vector<32x128xf32> -> vector<32x128xf32>
    %c0_314 = arith.constant 0 : index
    %c0_315 = arith.constant 0 : index
    %550 = vector.load %arg5[%c0_314, %c0_315] : memref<1x128xf32, #tpu.memory_space<vmem>>, vector<1x128xf32>
    %551 = vector.broadcast %550 : vector<1x128xf32> to vector<32x128xf32>
    %552 = arith.addf %549, %551 : vector<32x128xf32>
    %cst_316 = arith.constant 0.000000e+00 : f32
    %553 = vector.broadcast %cst_316 : f32 to vector<32x128xf32>
    %554 = arith.maximumf %552, %553 : vector<32x128xf32>
    %555 = vector.extract_strided_slice %554 {offsets = [0, 0], sizes = [16, 128], strides = [1, 1]} : vector<32x128xf32> to vector<16x128xf32>
    %556 = vector.extract_strided_slice %554 {offsets = [16, 0], sizes = [16, 128], strides = [1, 1]} : vector<32x128xf32> to vector<16x128xf32>
    %557 = arith.maximumf %555, %556 : vector<16x128xf32>
    %558 = vector.extract_strided_slice %557 {offsets = [0, 0], sizes = [16, 64], strides = [1, 1]} : vector<16x128xf32> to vector<16x64xf32>
    %559 = vector.extract_strided_slice %557 {offsets = [0, 64], sizes = [16, 64], strides = [1, 1]} : vector<16x128xf32> to vector<16x64xf32>
    %560 = arith.maximumf %558, %559 : vector<16x64xf32>
    %561 = arith.mulf %560, %451 : vector<16x64xf32>
    %562 = arith.truncf %561 : vector<16x64xf32> to vector<16x64xbf16>
    %c0_317 = arith.constant 0 : index
    %c80_318 = arith.constant 80 : index
    %c0_319 = arith.constant 0 : index
    %563 = vector.load %arg6[%c0_317, %c80_318, %c0_319] : memref<1x192x64xbf16, #tpu.memory_space<vmem>>, vector<1x16x64xbf16>
    %564 = vector.shape_cast %563 : vector<1x16x64xbf16> to vector<16x64xbf16>
    %565 = vector.shape_cast %562 : vector<16x64xbf16> to vector<1x16x64xbf16>
    tpu.vector_store %arg6[%c0_317, %c80_318, %c0_319], %565 {strides = array<i32>} : memref<1x192x64xbf16, #tpu.memory_space<vmem>>, vector<1x16x64xbf16>,
    %c192_320 = arith.constant 192 : index
    %c0_321 = arith.constant 0 : index
    %566 = vector.load %arg8[%c192_320, %c0_321] : memref<384x384xbf16, #tpu.memory_space<vmem>>, vector<32x384xbf16>
    %c0_322 = arith.constant 0 : index
    %c0_323 = arith.constant 0 : index
    %567 = vector.load %arg4[%c0_322, %c0_323] : memref<384x128xbf16, #tpu.memory_space<vmem>>, vector<384x128xbf16>
    %cst_324 = arith.constant dense<0.000000e+00> : vector<32x128xf32>
    %568 = tpu.matmul %566, %567, %cst_324 {dimension_numbers = #tpu.dot_dimension_numbers<[1], [0], [0], [1], [0, 0, 1, 1], [], []>} : vector<32x384xbf16>, vector<384x128xbf16>, vector<32x128xf32> -> vector<32x128xf32>
    %c0_325 = arith.constant 0 : index
    %c0_326 = arith.constant 0 : index
    %569 = vector.load %arg5[%c0_325, %c0_326] : memref<1x128xf32, #tpu.memory_space<vmem>>, vector<1x128xf32>
    %570 = vector.broadcast %569 : vector<1x128xf32> to vector<32x128xf32>
    %571 = arith.addf %568, %570 : vector<32x128xf32>
    %cst_327 = arith.constant 0.000000e+00 : f32
    %572 = vector.broadcast %cst_327 : f32 to vector<32x128xf32>
    %573 = arith.maximumf %571, %572 : vector<32x128xf32>
    %574 = vector.extract_strided_slice %573 {offsets = [0, 0], sizes = [16, 128], strides = [1, 1]} : vector<32x128xf32> to vector<16x128xf32>
    %575 = vector.extract_strided_slice %573 {offsets = [16, 0], sizes = [16, 128], strides = [1, 1]} : vector<32x128xf32> to vector<16x128xf32>
    %576 = arith.maximumf %574, %575 : vector<16x128xf32>
    %577 = vector.extract_strided_slice %576 {offsets = [0, 0], sizes = [16, 64], strides = [1, 1]} : vector<16x128xf32> to vector<16x64xf32>
    %578 = vector.extract_strided_slice %576 {offsets = [0, 64], sizes = [16, 64], strides = [1, 1]} : vector<16x128xf32> to vector<16x64xf32>
    %579 = arith.maximumf %577, %578 : vector<16x64xf32>
    %580 = arith.mulf %579, %451 : vector<16x64xf32>
    %581 = arith.truncf %580 : vector<16x64xf32> to vector<16x64xbf16>
    %c0_328 = arith.constant 0 : index
    %c96_329 = arith.constant 96 : index
    %c0_330 = arith.constant 0 : index
    %582 = vector.load %arg6[%c0_328, %c96_329, %c0_330] : memref<1x192x64xbf16, #tpu.memory_space<vmem>>, vector<1x16x64xbf16>
    %583 = vector.shape_cast %582 : vector<1x16x64xbf16> to vector<16x64xbf16>
    %584 = vector.shape_cast %581 : vector<16x64xbf16> to vector<1x16x64xbf16>
    tpu.vector_store %arg6[%c0_328, %c96_329, %c0_330], %584 {strides = array<i32>} : memref<1x192x64xbf16, #tpu.memory_space<vmem>>, vector<1x16x64xbf16>,
    %c224_331 = arith.constant 224 : index
    %c0_332 = arith.constant 0 : index
    %585 = vector.load %arg8[%c224_331, %c0_332] : memref<384x384xbf16, #tpu.memory_space<vmem>>, vector<32x384xbf16>
    %c0_333 = arith.constant 0 : index
    %c0_334 = arith.constant 0 : index
    %586 = vector.load %arg4[%c0_333, %c0_334] : memref<384x128xbf16, #tpu.memory_space<vmem>>, vector<384x128xbf16>
    %cst_335 = arith.constant dense<0.000000e+00> : vector<32x128xf32>
    %587 = tpu.matmul %585, %586, %cst_335 {dimension_numbers = #tpu.dot_dimension_numbers<[1], [0], [0], [1], [0, 0, 1, 1], [], []>} : vector<32x384xbf16>, vector<384x128xbf16>, vector<32x128xf32> -> vector<32x128xf32>
    %c0_336 = arith.constant 0 : index
    %c0_337 = arith.constant 0 : index
    %588 = vector.load %arg5[%c0_336, %c0_337] : memref<1x128xf32, #tpu.memory_space<vmem>>, vector<1x128xf32>
    %589 = vector.broadcast %588 : vector<1x128xf32> to vector<32x128xf32>
    %590 = arith.addf %587, %589 : vector<32x128xf32>
    %cst_338 = arith.constant 0.000000e+00 : f32
    %591 = vector.broadcast %cst_338 : f32 to vector<32x128xf32>
    %592 = arith.maximumf %590, %591 : vector<32x128xf32>
    %593 = vector.extract_strided_slice %592 {offsets = [0, 0], sizes = [16, 128], strides = [1, 1]} : vector<32x128xf32> to vector<16x128xf32>
    %594 = vector.extract_strided_slice %592 {offsets = [16, 0], sizes = [16, 128], strides = [1, 1]} : vector<32x128xf32> to vector<16x128xf32>
    %595 = arith.maximumf %593, %594 : vector<16x128xf32>
    %596 = vector.extract_strided_slice %595 {offsets = [0, 0], sizes = [16, 64], strides = [1, 1]} : vector<16x128xf32> to vector<16x64xf32>
    %597 = vector.extract_strided_slice %595 {offsets = [0, 64], sizes = [16, 64], strides = [1, 1]} : vector<16x128xf32> to vector<16x64xf32>
    %598 = arith.maximumf %596, %597 : vector<16x64xf32>
    %599 = arith.mulf %598, %451 : vector<16x64xf32>
    %600 = arith.truncf %599 : vector<16x64xf32> to vector<16x64xbf16>
    %c0_339 = arith.constant 0 : index
    %c112_340 = arith.constant 112 : index
    %c0_341 = arith.constant 0 : index
    %601 = vector.load %arg6[%c0_339, %c112_340, %c0_341] : memref<1x192x64xbf16, #tpu.memory_space<vmem>>, vector<1x16x64xbf16>
    %602 = vector.shape_cast %601 : vector<1x16x64xbf16> to vector<16x64xbf16>
    %603 = vector.shape_cast %600 : vector<16x64xbf16> to vector<1x16x64xbf16>
    tpu.vector_store %arg6[%c0_339, %c112_340, %c0_341], %603 {strides = array<i32>} : memref<1x192x64xbf16, #tpu.memory_space<vmem>>, vector<1x16x64xbf16>,
    %c256_342 = arith.constant 256 : index
    %c0_343 = arith.constant 0 : index
    %604 = vector.load %arg8[%c256_342, %c0_343] : memref<384x384xbf16, #tpu.memory_space<vmem>>, vector<32x384xbf16>
    %c0_344 = arith.constant 0 : index
    %c0_345 = arith.constant 0 : index
    %605 = vector.load %arg4[%c0_344, %c0_345] : memref<384x128xbf16, #tpu.memory_space<vmem>>, vector<384x128xbf16>
    %cst_346 = arith.constant dense<0.000000e+00> : vector<32x128xf32>
    %606 = tpu.matmul %604, %605, %cst_346 {dimension_numbers = #tpu.dot_dimension_numbers<[1], [0], [0], [1], [0, 0, 1, 1], [], []>} : vector<32x384xbf16>, vector<384x128xbf16>, vector<32x128xf32> -> vector<32x128xf32>
    %c0_347 = arith.constant 0 : index
    %c0_348 = arith.constant 0 : index
    %607 = vector.load %arg5[%c0_347, %c0_348] : memref<1x128xf32, #tpu.memory_space<vmem>>, vector<1x128xf32>
    %608 = vector.broadcast %607 : vector<1x128xf32> to vector<32x128xf32>
    %609 = arith.addf %606, %608 : vector<32x128xf32>
    %cst_349 = arith.constant 0.000000e+00 : f32
    %610 = vector.broadcast %cst_349 : f32 to vector<32x128xf32>
    %611 = arith.maximumf %609, %610 : vector<32x128xf32>
    %612 = vector.extract_strided_slice %611 {offsets = [0, 0], sizes = [16, 128], strides = [1, 1]} : vector<32x128xf32> to vector<16x128xf32>
    %613 = vector.extract_strided_slice %611 {offsets = [16, 0], sizes = [16, 128], strides = [1, 1]} : vector<32x128xf32> to vector<16x128xf32>
    %614 = arith.maximumf %612, %613 : vector<16x128xf32>
    %615 = vector.extract_strided_slice %614 {offsets = [0, 0], sizes = [16, 64], strides = [1, 1]} : vector<16x128xf32> to vector<16x64xf32>
    %616 = vector.extract_strided_slice %614 {offsets = [0, 64], sizes = [16, 64], strides = [1, 1]} : vector<16x128xf32> to vector<16x64xf32>
    %617 = arith.maximumf %615, %616 : vector<16x64xf32>
    %618 = arith.mulf %617, %451 : vector<16x64xf32>
    %619 = arith.truncf %618 : vector<16x64xf32> to vector<16x64xbf16>
    %c0_350 = arith.constant 0 : index
    %c128_351 = arith.constant 128 : index
    %c0_352 = arith.constant 0 : index
    %620 = vector.load %arg6[%c0_350, %c128_351, %c0_352] : memref<1x192x64xbf16, #tpu.memory_space<vmem>>, vector<1x16x64xbf16>
    %621 = vector.shape_cast %620 : vector<1x16x64xbf16> to vector<16x64xbf16>
    %622 = vector.shape_cast %619 : vector<16x64xbf16> to vector<1x16x64xbf16>
    tpu.vector_store %arg6[%c0_350, %c128_351, %c0_352], %622 {strides = array<i32>} : memref<1x192x64xbf16, #tpu.memory_space<vmem>>, vector<1x16x64xbf16>,
    %c288_353 = arith.constant 288 : index
    %c0_354 = arith.constant 0 : index
    %623 = vector.load %arg8[%c288_353, %c0_354] : memref<384x384xbf16, #tpu.memory_space<vmem>>, vector<32x384xbf16>
    %c0_355 = arith.constant 0 : index
    %c0_356 = arith.constant 0 : index
    %624 = vector.load %arg4[%c0_355, %c0_356] : memref<384x128xbf16, #tpu.memory_space<vmem>>, vector<384x128xbf16>
    %cst_357 = arith.constant dense<0.000000e+00> : vector<32x128xf32>
    %625 = tpu.matmul %623, %624, %cst_357 {dimension_numbers = #tpu.dot_dimension_numbers<[1], [0], [0], [1], [0, 0, 1, 1], [], []>} : vector<32x384xbf16>, vector<384x128xbf16>, vector<32x128xf32> -> vector<32x128xf32>
    %c0_358 = arith.constant 0 : index
    %c0_359 = arith.constant 0 : index
    %626 = vector.load %arg5[%c0_358, %c0_359] : memref<1x128xf32, #tpu.memory_space<vmem>>, vector<1x128xf32>
    %627 = vector.broadcast %626 : vector<1x128xf32> to vector<32x128xf32>
    %628 = arith.addf %625, %627 : vector<32x128xf32>
    %cst_360 = arith.constant 0.000000e+00 : f32
    %629 = vector.broadcast %cst_360 : f32 to vector<32x128xf32>
    %630 = arith.maximumf %628, %629 : vector<32x128xf32>
    %631 = vector.extract_strided_slice %630 {offsets = [0, 0], sizes = [16, 128], strides = [1, 1]} : vector<32x128xf32> to vector<16x128xf32>
    %632 = vector.extract_strided_slice %630 {offsets = [16, 0], sizes = [16, 128], strides = [1, 1]} : vector<32x128xf32> to vector<16x128xf32>
    %633 = arith.maximumf %631, %632 : vector<16x128xf32>
    %634 = vector.extract_strided_slice %633 {offsets = [0, 0], sizes = [16, 64], strides = [1, 1]} : vector<16x128xf32> to vector<16x64xf32>
    %635 = vector.extract_strided_slice %633 {offsets = [0, 64], sizes = [16, 64], strides = [1, 1]} : vector<16x128xf32> to vector<16x64xf32>
    %636 = arith.maximumf %634, %635 : vector<16x64xf32>
    %637 = arith.mulf %636, %451 : vector<16x64xf32>
    %638 = arith.truncf %637 : vector<16x64xf32> to vector<16x64xbf16>
    %c0_361 = arith.constant 0 : index
    %c144_362 = arith.constant 144 : index
    %c0_363 = arith.constant 0 : index
    %639 = vector.load %arg6[%c0_361, %c144_362, %c0_363] : memref<1x192x64xbf16, #tpu.memory_space<vmem>>, vector<1x16x64xbf16>
    %640 = vector.shape_cast %639 : vector<1x16x64xbf16> to vector<16x64xbf16>
    %641 = vector.shape_cast %638 : vector<16x64xbf16> to vector<1x16x64xbf16>
    tpu.vector_store %arg6[%c0_361, %c144_362, %c0_363], %641 {strides = array<i32>} : memref<1x192x64xbf16, #tpu.memory_space<vmem>>, vector<1x16x64xbf16>,
    %c320_364 = arith.constant 320 : index
    %c0_365 = arith.constant 0 : index
    %642 = vector.load %arg8[%c320_364, %c0_365] : memref<384x384xbf16, #tpu.memory_space<vmem>>, vector<32x384xbf16>
    %c0_366 = arith.constant 0 : index
    %c0_367 = arith.constant 0 : index
    %643 = vector.load %arg4[%c0_366, %c0_367] : memref<384x128xbf16, #tpu.memory_space<vmem>>, vector<384x128xbf16>
    %cst_368 = arith.constant dense<0.000000e+00> : vector<32x128xf32>
    %644 = tpu.matmul %642, %643, %cst_368 {dimension_numbers = #tpu.dot_dimension_numbers<[1], [0], [0], [1], [0, 0, 1, 1], [], []>} : vector<32x384xbf16>, vector<384x128xbf16>, vector<32x128xf32> -> vector<32x128xf32>
    %c0_369 = arith.constant 0 : index
    %c0_370 = arith.constant 0 : index
    %645 = vector.load %arg5[%c0_369, %c0_370] : memref<1x128xf32, #tpu.memory_space<vmem>>, vector<1x128xf32>
    %646 = vector.broadcast %645 : vector<1x128xf32> to vector<32x128xf32>
    %647 = arith.addf %644, %646 : vector<32x128xf32>
    %cst_371 = arith.constant 0.000000e+00 : f32
    %648 = vector.broadcast %cst_371 : f32 to vector<32x128xf32>
    %649 = arith.maximumf %647, %648 : vector<32x128xf32>
    %650 = vector.extract_strided_slice %649 {offsets = [0, 0], sizes = [16, 128], strides = [1, 1]} : vector<32x128xf32> to vector<16x128xf32>
    %651 = vector.extract_strided_slice %649 {offsets = [16, 0], sizes = [16, 128], strides = [1, 1]} : vector<32x128xf32> to vector<16x128xf32>
    %652 = arith.maximumf %650, %651 : vector<16x128xf32>
    %653 = vector.extract_strided_slice %652 {offsets = [0, 0], sizes = [16, 64], strides = [1, 1]} : vector<16x128xf32> to vector<16x64xf32>
    %654 = vector.extract_strided_slice %652 {offsets = [0, 64], sizes = [16, 64], strides = [1, 1]} : vector<16x128xf32> to vector<16x64xf32>
    %655 = arith.maximumf %653, %654 : vector<16x64xf32>
    %656 = arith.mulf %655, %451 : vector<16x64xf32>
    %657 = arith.truncf %656 : vector<16x64xf32> to vector<16x64xbf16>
    %c0_372 = arith.constant 0 : index
    %c160_373 = arith.constant 160 : index
    %c0_374 = arith.constant 0 : index
    %658 = vector.load %arg6[%c0_372, %c160_373, %c0_374] : memref<1x192x64xbf16, #tpu.memory_space<vmem>>, vector<1x16x64xbf16>
    %659 = vector.shape_cast %658 : vector<1x16x64xbf16> to vector<16x64xbf16>
    %660 = vector.shape_cast %657 : vector<16x64xbf16> to vector<1x16x64xbf16>
    tpu.vector_store %arg6[%c0_372, %c160_373, %c0_374], %660 {strides = array<i32>} : memref<1x192x64xbf16, #tpu.memory_space<vmem>>, vector<1x16x64xbf16>,
    %c352_375 = arith.constant 352 : index
    %c0_376 = arith.constant 0 : index
    %661 = vector.load %arg8[%c352_375, %c0_376] : memref<384x384xbf16, #tpu.memory_space<vmem>>, vector<32x384xbf16>
    %c0_377 = arith.constant 0 : index
    %c0_378 = arith.constant 0 : index
    %662 = vector.load %arg4[%c0_377, %c0_378] : memref<384x128xbf16, #tpu.memory_space<vmem>>, vector<384x128xbf16>
    %cst_379 = arith.constant dense<0.000000e+00> : vector<32x128xf32>
    %663 = tpu.matmul %661, %662, %cst_379 {dimension_numbers = #tpu.dot_dimension_numbers<[1], [0], [0], [1], [0, 0, 1, 1], [], []>} : vector<32x384xbf16>, vector<384x128xbf16>, vector<32x128xf32> -> vector<32x128xf32>
    %c0_380 = arith.constant 0 : index
    %c0_381 = arith.constant 0 : index
    %664 = vector.load %arg5[%c0_380, %c0_381] : memref<1x128xf32, #tpu.memory_space<vmem>>, vector<1x128xf32>
    %665 = vector.broadcast %664 : vector<1x128xf32> to vector<32x128xf32>
    %666 = arith.addf %663, %665 : vector<32x128xf32>
    %cst_382 = arith.constant 0.000000e+00 : f32
    %667 = vector.broadcast %cst_382 : f32 to vector<32x128xf32>
    %668 = arith.maximumf %666, %667 : vector<32x128xf32>
    %669 = vector.extract_strided_slice %668 {offsets = [0, 0], sizes = [16, 128], strides = [1, 1]} : vector<32x128xf32> to vector<16x128xf32>
    %670 = vector.extract_strided_slice %668 {offsets = [16, 0], sizes = [16, 128], strides = [1, 1]} : vector<32x128xf32> to vector<16x128xf32>
    %671 = arith.maximumf %669, %670 : vector<16x128xf32>
    %672 = vector.extract_strided_slice %671 {offsets = [0, 0], sizes = [16, 64], strides = [1, 1]} : vector<16x128xf32> to vector<16x64xf32>
    %673 = vector.extract_strided_slice %671 {offsets = [0, 64], sizes = [16, 64], strides = [1, 1]} : vector<16x128xf32> to vector<16x64xf32>
    %674 = arith.maximumf %672, %673 : vector<16x64xf32>
    %675 = arith.mulf %674, %451 : vector<16x64xf32>
    %676 = arith.truncf %675 : vector<16x64xf32> to vector<16x64xbf16>
    %c0_383 = arith.constant 0 : index
    %c176_384 = arith.constant 176 : index
    %c0_385 = arith.constant 0 : index
    %677 = vector.load %arg6[%c0_383, %c176_384, %c0_385] : memref<1x192x64xbf16, #tpu.memory_space<vmem>>, vector<1x16x64xbf16>
    %678 = vector.shape_cast %677 : vector<1x16x64xbf16> to vector<16x64xbf16>
    %679 = vector.shape_cast %676 : vector<16x64xbf16> to vector<1x16x64xbf16>
    tpu.vector_store %arg6[%c0_383, %c176_384, %c0_385], %679 {strides = array<i32>} : memref<1x192x64xbf16, #tpu.memory_space<vmem>>, vector<1x16x64xbf16>,
    return
  }
  func.func @transform_0(%arg0: i32) -> (i32, i32, i32) {
    %c0_i32 = arith.constant 0 : i32
    %c0_i32_0 = arith.constant 0 : i32
    %c0_i32_1 = arith.constant 0 : i32
    return %arg0, %c0_i32, %c0_i32_0 : i32, i32, i32
  }
  func.func @transform_1(%arg0: i32) -> (i32, i32) {
    %c0_i32 = arith.constant 0 : i32
    %c0_i32_0 = arith.constant 0 : i32
    %c0_i32_1 = arith.constant 0 : i32
    return %c0_i32, %c0_i32_0 : i32, i32
  }
  func.func @transform_2(%arg0: i32) -> (i32, i32) {
    %c0_i32 = arith.constant 0 : i32
    %c0_i32_0 = arith.constant 0 : i32
    %c0_i32_1 = arith.constant 0 : i32
    return %c0_i32, %c0_i32_0 : i32, i32
  }
  func.func @transform_3(%arg0: i32) -> (i32, i32) {
    %c0_i32 = arith.constant 0 : i32
    %c0_i32_0 = arith.constant 0 : i32
    %c0_i32_1 = arith.constant 0 : i32
    return %c0_i32, %c0_i32_0 : i32, i32
  }
  func.func @transform_4(%arg0: i32) -> (i32, i32) {
    %c0_i32 = arith.constant 0 : i32
    %c0_i32_0 = arith.constant 0 : i32
    %c0_i32_1 = arith.constant 0 : i32
    return %c0_i32, %c0_i32_0 : i32, i32
  }
  func.func @transform_5(%arg0: i32) -> (i32, i32, i32) {
    %c0_i32 = arith.constant 0 : i32
    %c0_i32_0 = arith.constant 0 : i32
    %c0_i32_1 = arith.constant 0 : i32
    return %arg0, %c0_i32, %c0_i32_0 : i32, i32, i32
  }
}

</mosaic_0001>

<bundles_post_ra>
// kernel: conv_features.1
= control target key start
LH: loop header
LB: loop body
LE: loop exit
PB: predicated region body
PF: predicated region fallthrough
CT: control target
= control target key end

     0   :  { %s10499_s18 = smov 0   ;;  %s12941_s0 = inlined_call_operand.vmem [shape: bf16[2,768,64], index: 0, kind: input, shape index: {}]   ;;  %s12942_s1 = inlined_call_operand.vmem [shape: bf16[64,128], index: 1, kind: input, shape index: {}]   ;;  %s12943_s2 = inlined_call_operand.vmem [shape: f32[1,128], index: 2, kind: input, shape index: {}]   ;;  %s12944_s3 = inlined_call_operand.vmem [shape: bf16[384,128], index: 3, kind: input, shape index: {}]   ;;  %s12945_s4 = inlined_call_operand.vmem [shape: f32[1,128], index: 4, kind: input, shape index: {}]   ;;  %s12946_s5 = inlined_call_operand.vmem [shape: bf16[2,192,64], index: 5, kind: output, shape index: {}]  }
   0x1 LB: > { %s8279_s19 = sadd.s32 4294967295, %s10464_s18   ;;  %p8283_p0 = scmp.ge.s32.totalorder %s10464_s18, 1  ;;  %s10464_s18 = sphi %s10499_s18, %s15_s18  }
   0x2   : > { %p187_p1 = scmp.lt.s32.totalorder %s10464_s18, 3 }
   0x4   : > { %p188_p2 = pnand %p8283_p0, %p187_p1 }
   0x5   : > { %v10026_v0 = vld [vmem:[%s12942_s1] sm:$0xff] (!%p188_p2)   ;;  %p215_p3 = scmp.lt.s32.totalorder (!%p188_p2), %s8279_s19, 1  ;;  %v10028_v2 = vld [vmem:[%s12942_s1 + $0x8] sm:$0xff] (!%p188_p2)   ;;  %v10030_v4 = vld [vmem:[%s12942_s1 + $0x10] sm:$0xff] (!%p188_p2)   ;;  %vm226_vm0 = vcmask (!%p188_p2), 523264   ;;  %s10467_s13 = smov (!%p188_p2), 64  }
   0x6   : > { %191 = sbr.rel (%p188_p2) target bundleno = 1412 (0x584), region = 40  ;;  %v10027_v1 = vld [vmem:[%s12942_s1] sm:$0xff] (!%p188_p2)   ;;  %9455 = vmatprep.subr.bf16.mxu0 (!%p188_p2), %v10026_v0  ;;  %v10029_v3 = vld [vmem:[%s12942_s1 + $0x8] sm:$0xff] (!%p188_p2)   ;;  %v10031_v5 = vld [vmem:[%s12942_s1 + $0x10] sm:$0xff] (!%p188_p2)   ;;  %vm10468_vm4 = vmmov (!%p188_p2), 1   ;;  %vm3644_vm12 = vcmask (!%p188_p2), 1048064  }
   0x7   : > { %9467 = vmatprep.subr.bf16.mxu1 (!%p188_p2), %v10027_v1  ;;  %9456 = vmatpush3.bf16.msra.mxu0 (!%p188_p2), %v10026_v0  ;;  %v10032_v6 = vld [vmem:[%s12942_s1 + $0x18] sm:$0xff] (!%p188_p2)   ;;  %v10038_v10 = vld [vmem:[%s12942_s1] sm:$0xff] (!%p188_p2)   ;;  %v10039_v14 = vld [vmem:[%s12942_s1 + $0x8] sm:$0xff] (!%p188_p2)   ;;  %vm4580_vm14 = vcmask (!%p188_p2), 519168  }
   0x8   : > { %9468 = vmatpush3.bf16.msra.mxu1 (!%p188_p2), %v10027_v1  ;;  %9457 = vmatprep.subr.bf16.mxu0 (!%p188_p2), %v10028_v2  ;;  %v10033_v7 = vld [vmem:[%s12942_s1 + $0x18] sm:$0xff] (!%p188_p2)   ;;  %v10040_v12 = vld [vmem:[%s12942_s1] sm:$0xff] (!%p188_p2)   ;;  %v10042_v15 = vld [vmem:[%s12942_s1 + $0x8] sm:$0xff] (!%p188_p2)  }
   0x9   : > { %9469 = vmatprep.subr.bf16.mxu1 (!%p188_p2), %v10029_v3  ;;  %v10041_v17 = vld [vmem:[%s12942_s1 + $0x10] sm:$0xff] (!%p188_p2)   ;;  %v10043_v20 = vld [vmem:[%s12942_s1 + $0x18] sm:$0xff] (!%p188_p2)   ;;  %v10048_v23 = vld [vmem:[%s12942_s1] sm:$0xff] (!%p188_p2)  }
   0xa   : > { %v10044_v18 = vld [vmem:[%s12942_s1 + $0x10] sm:$0xff] (!%p188_p2)   ;;  %v10047_v21 = vld [vmem:[%s12942_s1 + $0x18] sm:$0xff] (!%p188_p2)   ;;  %v10052_v24 = vld [vmem:[%s12942_s1] sm:$0xff] (!%p188_p2)  }
   0xb   : > { %9458 = vmatpush3.bf16.msra.mxu0 (!%p188_p2), %v10028_v2  ;;  %v10051_v26 = vld [vmem:[%s12942_s1 + $0x8] sm:$0xff] (!%p188_p2)   ;;  %v10053_v30 = vld [vmem:[%s12942_s1 + $0x10] sm:$0xff] (!%p188_p2)   ;;  %v10055_v32 = vld [vmem:[%s12942_s1 + $0x18] sm:$0xff] (!%p188_p2)  }
   0xc   : > { %9470 = vmatpush3.bf16.msra.mxu1 (!%p188_p2), %v10029_v3  ;;  %9459 = vmatprep.subr.bf16.mxu0 (!%p188_p2), %v10030_v4  ;;  %v10054_v27 = vld [vmem:[%s12942_s1 + $0x8] sm:$0xff] (!%p188_p2)   ;;  %v10056_v31 = vld [vmem:[%s12942_s1 + $0x10] sm:$0xff] (!%p188_p2)   ;;  %v10059_v33 = vld [vmem:[%s12942_s1 + $0x18] sm:$0xff] (!%p188_p2)  }
   0xd   : > { %s12954_s19 = smov (!%p215_p3, %s8279_s19), 1  ;;  %9471 = vmatprep.subr.bf16.mxu1 %v10031_v5  ;;  %v10062_v35 = vld [vmem:[%s12942_s1] sm:$0xff]   ;;  %v10063_v38 = vld [vmem:[%s12942_s1 + $0x8] sm:$0xff]   ;;  %v10065_v42 = vld [vmem:[%s12942_s1 + $0x10] sm:$0xff]  }
   0xe   : > { %s9983_s30 = smul.u32 384, %s12954_s19  ;;  %v10064_v36 = vld [vmem:[%s12942_s1] sm:$0xff]   ;;  %v10066_v39 = vld [vmem:[%s12942_s1 + $0x8] sm:$0xff]   ;;  %v10068_v43 = vld [vmem:[%s12942_s1 + $0x10] sm:$0xff]  }
   0xf   : > { %9460 = vmatpush3.bf16.msra.mxu0 %v10030_v4  ;;  %v10067_v44 = vld [vmem:[%s12942_s1 + $0x18] sm:$0xff]   ;;  %v10074_v47 = vld [vmem:[%s12942_s1] sm:$0xff]   ;;  %v10075_v50 = vld [vmem:[%s12942_s1 + $0x8] sm:$0xff]   ;;  %s9984_s28 = smul.u32 96, %s12954_s19 }
  0x10   : > { %s10534_s12 = scalar_lea.vmem %s12941_s0, %s9983_s30  ;;  %9472 = vmatpush3.bf16.msra.mxu1 %v10031_v5  ;;  %9461 = vmatprep.subr.bf16.mxu0 %v10032_v6  ;;  %v10071_v45 = vld [vmem:[%s12942_s1 + $0x18] sm:$0xff]   ;;  %v10076_v48 = vld [vmem:[%s12942_s1] sm:$0xff]   ;;  %v10078_v51 = vld [vmem:[%s12942_s1 + $0x8] sm:$0xff]  }
  0x11   : > { %v10034_v8 = vld [vmem:[%s10534_s12] sm:$0xff]   ;;  %v10035_v9 = vld [vmem:[%s10534_s12 + $0x10] sm:$0xff]   ;;  %9473 = vmatprep.subr.bf16.mxu1 %v10033_v7  ;;  %v10036_v11 = vld [vmem:[%s10534_s12 + $0x8] sm:$0xff]   ;;  %s12739_s11 = scalar_lea.vmem %s12946_s5, %s9984_s28 }
  0x12   : > { %9463 = vmatprep.mubr.msk.bf16.mxu0 %vm226_vm0, %v10034_v8  ;;  %9475 = vmatprep.mubr.msk.bf16.mxu1 %vm226_vm0, %v10035_v9  ;;  %v10037_v13 = vld [vmem:[%s10534_s12 + $0x18] sm:$0xff]   ;;  %v10045_v16 = vld [vmem:[%s10534_s12 + $0x20] sm:$0xff]   ;;  %v10049_v19 = vld [vmem:[%s10534_s12 + $0x30] sm:$0xff]  }
  0x13   : > { %9462 = vmatpush3.bf16.msra.mxu0 %v10032_v6  ;;  %v10046_v22 = vld [vmem:[%s10534_s12 + $0x28] sm:$0xff]   ;;  %v10050_v25 = vld [vmem:[%s10534_s12 + $0x38] sm:$0xff]   ;;  %v10057_v28 = vld [vmem:[%s10534_s12 + $0x40] sm:$0xff]  }
  0x14   : > { %9474 = vmatpush3.bf16.msra.mxu1 %v10033_v7  ;;  %9479 = vmatprep.subr.bf16.mxu0 %v10038_v10  ;;  %v10060_v29 = vld [vmem:[%s10534_s12 + $0x50] sm:$0xff]   ;;  %v10058_v34 = vld [vmem:[%s10534_s12 + $0x48] sm:$0xff]   ;;  %v10061_v37 = vld [vmem:[%s10534_s12 + $0x58] sm:$0xff]  }
  0x15   : > { %9491 = vmatprep.subr.bf16.mxu1 %v10040_v12  ;;  %v10069_v40 = vld [vmem:[%s10534_s12 + $0x60] sm:$0xff]   ;;  %v10072_v41 = vld [vmem:[%s10534_s12 + $0x70] sm:$0xff]   ;;  %v10070_v46 = vld [vmem:[%s10534_s12 + $0x68] sm:$0xff]  }
  0x16   : > { %9464 = vmatmul.mubr.msk.bf16.vlgmr.msra.gmra.mrb[0].mxu0 %vm226_vm0, %v10036_v11  ;;  %v10073_v49 = vld [vmem:[%s10534_s12 + $0x78] sm:$0xff]   ;;  %v10081_v52 = vld [vmem:[%s10534_s12 + $0x80] sm:$0xff]   ;;  %v10085_v53 = vld [vmem:[%s10534_s12 + $0x90] sm:$0xff]  }
  0x17   : > { %9476 = vmatmul.mubr.msk.bf16.vlgmr.msra.gmra.mrb[0].mxu1 %vm226_vm0, %v10037_v13  ;;  %9480 = vmatpush3.bf16.msra.mxu0 %v10038_v10  ;;  %v10077_v54 = vld [vmem:[%s12942_s1 + $0x10] sm:$0xff]   ;;  %v10079_v56 = vld [vmem:[%s12942_s1 + $0x18] sm:$0xff]   ;;  %v10084_v58 = vld [vmem:[%s12942_s1] sm:$0xff]  }
  0x18   : > { %9481 = vmatprep.subr.bf16.mxu0 %v10039_v14  ;;  %9492 = vmatpush3.bf16.msra.mxu1 %v10040_v12  ;;  %v10080_v55 = vld [vmem:[%s12942_s1 + $0x10] sm:$0xff]   ;;  %v10083_v57 = vld [vmem:[%s12942_s1 + $0x18] sm:$0xff]   ;;  %v10088_v59 = vld [vmem:[%s12942_s1] sm:$0xff]   ;;  %v10466_v12 = vmov 0.0  }
  0x19   : > { %9493 = vmatprep.subr.bf16.mxu1 %v10042_v15  ;;  %9487 = vmatprep.mubr.msk.bf16.mxu0 %vm226_vm0, %v10045_v16  ;;  %v10082_v60 = vld [vmem:[%s10534_s12 + $0x88] sm:$0xff]   ;;  %v10086_v61 = vld [vmem:[%s10534_s12 + $0x98] sm:$0xff]   ;;  %v10093_v0 = vld [vmem:[%s10534_s12 + $0xa0] sm:$0xff]   ;;  %231 = vst.msk [vmem:[#allocation2 + $0x20] sm:$0xff] %vm226_vm0, %v10466_v12 }
  0x1a   : > { %9499 = vmatprep.mubr.msk.bf16.mxu1 %vm226_vm0, %v10049_v19  ;;  %v10087_v62 = vld [vmem:[%s12942_s1 + $0x8] sm:$0xff]   ;;  %v10096_v1 = vld [vmem:[%s10534_s12 + $0xb0] sm:$0xff]   ;;  %v10091_v4 = vld [vmem:[%s12942_s1 + $0x18] sm:$0xff]   ;;  %227 = vst.msk [vmem:[#allocation2] sm:$0xff] %vm226_vm0, %v10466_v12 }
  0x1b   : > { %9482 = vmatpush3.bf16.msra.mxu0 %v10039_v14  ;;  %v10090_v63 = vld [vmem:[%s12942_s1 + $0x8] sm:$0xff]   ;;  %v10089_v2 = vld [vmem:[%s12942_s1 + $0x10] sm:$0xff]   ;;  %v10095_v5 = vld [vmem:[%s12942_s1 + $0x18] sm:$0xff]   ;;  %228 = vst.msk [vmem:[#allocation2 + $0x8] sm:$0xff] %vm226_vm0, %v10466_v12 }
  0x1c   : > { %9483 = vmatprep.subr.bf16.mxu0 %v10041_v17  ;;  %9494 = vmatpush3.bf16.msra.mxu1 %v10042_v15  ;;  %v10092_v3 = vld [vmem:[%s12942_s1 + $0x10] sm:$0xff]   ;;  %v10094_v6 = vld [vmem:[%s10534_s12 + $0xa8] sm:$0xff]   ;;  %v10097_v7 = vld [vmem:[%s10534_s12 + $0xb8] sm:$0xff]   ;;  %229 = vst.msk [vmem:[#allocation2 + $0x10] sm:$0xff] %vm226_vm0, %v10466_v12 }
  0x1d   : > { %9495 = vmatprep.subr.bf16.mxu1 %v10044_v18  ;;  %v10098_v8 = vld [vmem:[%s12942_s1] sm:$0xff]   ;;  %v10713_v9 = vld [vmem:[%s12942_s1 + $0x8] sm:$0xff]   ;;  %230 = vst.msk [vmem:[#allocation2 + $0x18] sm:$0xff] %vm226_vm0, %v10466_v12  ;;  %232 = vst.msk [vmem:[#allocation2 + $0x28] sm:$0xff] %vm226_vm0, %v10466_v12 }
  0x1e   : > { %v10100_v10 = vld [vmem:[%s12942_s1] sm:$0xff]   ;;  %v10721_v11 = vld [vmem:[%s12942_s1 + $0x8] sm:$0xff]   ;;  %233 = vst.msk [vmem:[#allocation2 + $0x30] sm:$0xff] %vm226_vm0, %v10466_v12  ;;  %234 = vst.msk [vmem:[#allocation2 + $0x38] sm:$0xff] %vm226_vm0, %v10466_v12 }
  0x1f   : > { %9484 = vmatpush3.bf16.msra.mxu0 %v10041_v17  ;;  %235 = vst.msk [vmem:[#allocation2 + $0x40] sm:$0xff] %vm226_vm0, %v10466_v12  ;;  %236 = vst.msk [vmem:[#allocation2 + $0x48] sm:$0xff] %vm226_vm0, %v10466_v12  ;;  %v10105_v13 = vld [vmem:[%s10534_s12 + $0xc0] sm:$0xff]   ;;  %v10108_v14 = vld [vmem:[%s10534_s12 + $0xd0] sm:$0xff]  }
  0x20   : > { %9485 = vmatprep.subr.bf16.mxu0 %v10043_v20  ;;  %9496 = vmatpush3.bf16.msra.mxu1 %v10044_v18  ;;  %237 = vst.msk [vmem:[#allocation2 + $0x50] sm:$0xff] %vm226_vm0, %v10466_v12  ;;  %238 = vst.msk [vmem:[#allocation2 + $0x58] sm:$0xff] %vm226_vm0, %v10466_v12  ;;  %v10101_v15 = vld [vmem:[%s12942_s1 + $0x10] sm:$0xff]   ;;  %v10103_v17 = vld [vmem:[%s12942_s1 + $0x18] sm:$0xff]  }
  0x21   : > { %9497 = vmatprep.subr.bf16.mxu1 %v10047_v21  ;;  %239 = vst.msk [vmem:[#allocation2 + $0x60] sm:$0xff] %vm226_vm0, %v10466_v12  ;;  %240 = vst.msk [vmem:[#allocation2 + $0x68] sm:$0xff] %vm226_vm0, %v10466_v12  ;;  %v10104_v16 = vld [vmem:[%s12942_s1 + $0x10] sm:$0xff]   ;;  %v10107_v18 = vld [vmem:[%s12942_s1 + $0x18] sm:$0xff]  }
  0x22   : > { %241 = vst.msk [vmem:[#allocation2 + $0x70] sm:$0xff] %vm226_vm0, %v10466_v12  ;;  %242 = vst.msk [vmem:[#allocation2 + $0x78] sm:$0xff] %vm226_vm0, %v10466_v12  ;;  %v10110_v19 = vld [vmem:[%s12942_s1] sm:$0xff]  }
  0x23   : > { %9486 = vmatpush3.bf16.msra.mxu0 %v10043_v20  ;;  %243 = vst.msk [vmem:[#allocation2 + $0x80] sm:$0xff] %vm226_vm0, %v10466_v12  ;;  %244 = vst.msk [vmem:[#allocation2 + $0x88] sm:$0xff] %vm226_vm0, %v10466_v12  ;;  %v10106_v20 = vld [vmem:[%s10534_s12 + $0xc8] sm:$0xff]  }
  0x24   : > { %9503 = vmatprep.subr.bf16.mxu0 %v10048_v23  ;;  %9498 = vmatpush3.bf16.msra.mxu1 %v10047_v21  ;;  %245 = vst.msk [vmem:[#allocation2 + $0x90] sm:$0xff] %vm226_vm0, %v10466_v12  ;;  %246 = vst.msk [vmem:[#allocation2 + $0x98] sm:$0xff] %vm226_vm0, %v10466_v12  ;;  %v10112_v21 = vld [vmem:[%s12942_s1] sm:$0xff]  }
  0x25   : > { %9515 = vmatprep.subr.bf16.mxu1 %v10052_v24  ;;  %247 = vst.msk [vmem:[#allocation2 + $0xa0] sm:$0xff] %vm226_vm0, %v10466_v12  ;;  %248 = vst.msk [vmem:[#allocation2 + $0xa8] sm:$0xff] %vm226_vm0, %v10466_v12 }
  0x26   : > { %9488 = vmatmul.mubr.msk.bf16.vlgmr.msra.gmra.mrb[4].mxu0 %vm226_vm0, %v10046_v22  ;;  %249 = vst.msk [vmem:[#allocation2 + $0xb0] sm:$0xff] %vm226_vm0, %v10466_v12  ;;  %250 = vst.msk [vmem:[#allocation2 + $0xb8] sm:$0xff] %vm226_vm0, %v10466_v12  ;;  %v10109_v22 = vld [vmem:[%s10534_s12 + $0xd8] sm:$0xff]  }
  0x27   : > { %9504 = vmatpush3.bf16.msra.mxu0 %v10048_v23  ;;  %9500 = vmatmul.mubr.msk.bf16.vlgmr.msra.gmra.mrb[4].mxu1 %vm226_vm0, %v10050_v25  ;;  %251 = vst.msk [vmem:[#allocation2 + $0xc0] sm:$0xff] %vm226_vm0, %v10466_v12  ;;  %252 = vst.msk [vmem:[#allocation2 + $0xc8] sm:$0xff] %vm226_vm0, %v10466_v12  ;;  %v10111_v23 = vld [vmem:[%s12942_s1 + $0x8] sm:$0xff]   ;;  %v10117_v25 = vld [vmem:[%s10534_s12 + $0xe0] sm:$0xff]  }
  0x28   : > { %9505 = vmatprep.subr.bf16.mxu0 %v10051_v26  ;;  %9516 = vmatpush3.bf16.msra.mxu1 %v10052_v24  ;;  %253 = vst.msk [vmem:[#allocation2 + $0xd0] sm:$0xff] %vm226_vm0, %v10466_v12  ;;  %254 = vst.msk [vmem:[#allocation2 + $0xd8] sm:$0xff] %vm226_vm0, %v10466_v12  ;;  %v10114_v24 = vld [vmem:[%s12942_s1 + $0x8] sm:$0xff]  }
  0x29   : > { %9517 = vmatprep.subr.bf16.mxu1 %v10054_v27  ;;  %9511 = vmatprep.mubr.msk.bf16.mxu0 %vm226_vm0, %v10057_v28  ;;  %255 = vst.msk [vmem:[#allocation2 + $0xe0] sm:$0xff] %vm226_vm0, %v10466_v12  ;;  %256 = vst.msk [vmem:[#allocation2 + $0xe8] sm:$0xff] %vm226_vm0, %v10466_v12  ;;  %v10116_v28 = vld [vmem:[%s12942_s1 + $0x10] sm:$0xff]  }
  0x2a   : > { %9523 = vmatprep.mubr.msk.bf16.mxu1 %vm226_vm0, %v10060_v29  ;;  %257 = vst.msk [vmem:[#allocation2 + $0xf0] sm:$0xff] %vm226_vm0, %v10466_v12  ;;  %258 = vst.msk [vmem:[#allocation2 + $0xf8] sm:$0xff] %vm226_vm0, %v10466_v12  ;;  %v10115_v29 = vld [vmem:[%s12942_s1 + $0x18] sm:$0xff]  }
  0x2b   : > { %9506 = vmatpush3.bf16.msra.mxu0 %v10051_v26  ;;  %259 = vst.msk [vmem:[#allocation2 + $0x100] sm:$0xff] %vm226_vm0, %v10466_v12  ;;  %260 = vst.msk [vmem:[#allocation2 + $0x108] sm:$0xff] %vm226_vm0, %v10466_v12  ;;  %v10121_v26 = vld [vmem:[%s10534_s12 + $0xf0] sm:$0xff]  }
  0x2c   : > { %9507 = vmatprep.subr.bf16.mxu0 %v10053_v30  ;;  %9518 = vmatpush3.bf16.msra.mxu1 %v10054_v27  ;;  %261 = vst.msk [vmem:[#allocation2 + $0x110] sm:$0xff] %vm226_vm0, %v10466_v12  ;;  %262 = vst.msk [vmem:[#allocation2 + $0x118] sm:$0xff] %vm226_vm0, %v10466_v12  ;;  %v10113_v27 = vld [vmem:[%s12942_s1 + $0x10] sm:$0xff]  }
  0x2d   : > { %9519 = vmatprep.subr.bf16.mxu1 %v10056_v31  ;;  %263 = vst.msk [vmem:[#allocation2 + $0x120] sm:$0xff] %vm226_vm0, %v10466_v12  ;;  %264 = vst.msk [vmem:[#allocation2 + $0x128] sm:$0xff] %vm226_vm0, %v10466_v12 }
  0x2e   : > { %265 = vst.msk [vmem:[#allocation2 + $0x130] sm:$0xff] %vm226_vm0, %v10466_v12  ;;  %266 = vst.msk [vmem:[#allocation2 + $0x138] sm:$0xff] %vm226_vm0, %v10466_v12 }
  0x2f   : > { %9508 = vmatpush3.bf16.msra.mxu0 %v10053_v30  ;;  %267 = vst.msk [vmem:[#allocation2 + $0x140] sm:$0xff] %vm226_vm0, %v10466_v12  ;;  %268 = vst.msk [vmem:[#allocation2 + $0x148] sm:$0xff] %vm226_vm0, %v10466_v12  ;;  %v10119_v30 = vld [vmem:[%s12942_s1 + $0x18] sm:$0xff]  }
  0x30   : > { %9509 = vmatprep.subr.bf16.mxu0 %v10055_v32  ;;  %9520 = vmatpush3.bf16.msra.mxu1 %v10056_v31  ;;  %269 = vst.msk [vmem:[#allocation2 + $0x150] sm:$0xff] %vm226_vm0, %v10466_v12  ;;  %270 = vst.msk [vmem:[#allocation2 + $0x158] sm:$0xff] %vm226_vm0, %v10466_v12  ;;  %v10120_v31 = vld [vmem:[%s12942_s1] sm:$0xff]  }
  0x31   : > { %9521 = vmatprep.subr.bf16.mxu1 %v10059_v33  ;;  %271 = vst.msk [vmem:[#allocation2 + $0x160] sm:$0xff] %vm226_vm0, %v10466_v12  ;;  %272 = vst.msk [vmem:[#allocation2 + $0x168] sm:$0xff] %vm226_vm0, %v10466_v12 }
  0x32   : > { %273 = vst.msk [vmem:[#allocation2 + $0x170] sm:$0xff] %vm226_vm0, %v10466_v12  ;;  %274 = vst.msk [vmem:[#allocation2 + $0x178] sm:$0xff] %vm226_vm0, %v10466_v12 }
  0x33   : > { %9510 = vmatpush3.bf16.msra.mxu0 %v10055_v32  ;;  %275 = vst.msk [vmem:[#allocation2 + $0x180] sm:$0xff] %vm226_vm0, %v10466_v12  ;;  %276 = vst.msk [vmem:[#allocation2 + $0x188] sm:$0xff] %vm226_vm0, %v10466_v12  ;;  %v10124_v32 = vld [vmem:[%s12942_s1] sm:$0xff]  }
  0x34   : > { %9522 = vmatpush3.bf16.msra.mxu1 %v10059_v33  ;;  %9527 = vmatprep.subr.bf16.mxu0 %v10062_v35  ;;  %277 = vst.msk [vmem:[#allocation2 + $0x190] sm:$0xff] %vm226_vm0, %v10466_v12  ;;  %278 = vst.msk [vmem:[#allocation2 + $0x198] sm:$0xff] %vm226_vm0, %v10466_v12  ;;  %v10118_v33 = vld [vmem:[%s10534_s12 + $0xe8] sm:$0xff]  }
  0x35   : > { %9539 = vmatprep.subr.bf16.mxu1 %v10064_v36  ;;  %279 = vst.msk [vmem:[#allocation2 + $0x1a0] sm:$0xff] %vm226_vm0, %v10466_v12 }
  0x36   : > { %9512 = vmatmul.mubr.msk.bf16.vlgmr.msra.gmra.mrb[8].mxu0 %vm226_vm0, %v10058_v34  ;;  %v10122_v34 = vld [vmem:[%s10534_s12 + $0xf8] sm:$0xff]  }
  0x37   : > { %9524 = vmatmul.mubr.msk.bf16.vlgmr.msra.gmra.mrb[8].mxu1 %vm226_vm0, %v10061_v37  ;;  %9528 = vmatpush3.bf16.msra.mxu0 %v10062_v35  ;;  %v10123_v35 = vld [vmem:[%s12942_s1 + $0x8] sm:$0xff]   ;;  %v10129_v37 = vld [vmem:[%s10534_s12 + $0x100] sm:$0xff]  }
  0x38   : > { %9529 = vmatprep.subr.bf16.mxu0 %v10063_v38  ;;  %9540 = vmatpush3.bf16.msra.mxu1 %v10064_v36  ;;  %v10126_v36 = vld [vmem:[%s12942_s1 + $0x8] sm:$0xff]  }
  0x39   : > { %9541 = vmatprep.subr.bf16.mxu1 %v10066_v39  ;;  %9535 = vmatprep.mubr.msk.bf16.mxu0 %vm226_vm0, %v10069_v40  ;;  %v10128_v40 = vld [vmem:[%s12942_s1 + $0x10] sm:$0xff]  }
  0x3a   : > { %9547 = vmatprep.mubr.msk.bf16.mxu1 %vm226_vm0, %v10072_v41  ;;  %v10127_v41 = vld [vmem:[%s12942_s1 + $0x18] sm:$0xff]  }
  0x3b   : > { %9530 = vmatpush3.bf16.msra.mxu0 %v10063_v38  ;;  %v10132_v38 = vld [vmem:[%s10534_s12 + $0x110] sm:$0xff]  }
  0x3c   : > { %9531 = vmatprep.subr.bf16.mxu0 %v10065_v42  ;;  %9542 = vmatpush3.bf16.msra.mxu1 %v10066_v39  ;;  %v10125_v39 = vld [vmem:[%s12942_s1 + $0x10] sm:$0xff]  }
  0x3d   : > { %9543 = vmatprep.subr.bf16.mxu1 %v10068_v43 }
  0x3f   : > { %9532 = vmatpush3.bf16.msra.mxu0 %v10065_v42  ;;  %v10131_v42 = vld [vmem:[%s12942_s1 + $0x18] sm:$0xff]  }
  0x40   : > { %9533 = vmatprep.subr.bf16.mxu0 %v10067_v44  ;;  %9544 = vmatpush3.bf16.msra.mxu1 %v10068_v43  ;;  %v10130_v43 = vld [vmem:[%s10534_s12 + $0x108] sm:$0xff]  }
  0x41   : > { %9545 = vmatprep.subr.bf16.mxu1 %v10071_v45 }
  0x43   : > { %9534 = vmatpush3.bf16.msra.mxu0 %v10067_v44  ;;  %v10133_v44 = vld [vmem:[%s10534_s12 + $0x118] sm:$0xff]  }
  0x44   : > { %9546 = vmatpush3.bf16.msra.mxu1 %v10071_v45  ;;  %9551 = vmatprep.subr.bf16.mxu0 %v10074_v47  ;;  %v10920_v45 = vld [vmem:[%s12943_s2] ss:$0 sm:$0xff] }
  0x45   : > { %9563 = vmatprep.subr.bf16.mxu1 %v10076_v48 }
  0x46   : > { %9536 = vmatmul.mubr.msk.bf16.vlgmr.msra.gmra.mrb[12].mxu0 %vm226_vm0, %v10070_v46 }
  0x47   : > { %9548 = vmatmul.mubr.msk.bf16.vlgmr.msra.gmra.mrb[12].mxu1 %vm226_vm0, %v10073_v49  ;;  %9552 = vmatpush3.bf16.msra.mxu0 %v10074_v47 }
  0x48   : > { %9553 = vmatprep.subr.bf16.mxu0 %v10075_v50  ;;  %9564 = vmatpush3.bf16.msra.mxu1 %v10076_v48 }
  0x49   : > { %9565 = vmatprep.subr.bf16.mxu1 %v10078_v51  ;;  %9559 = vmatprep.mubr.msk.bf16.mxu0 %vm226_vm0, %v10081_v52 }
  0x4a   : > { %9571 = vmatprep.mubr.msk.bf16.mxu1 %vm226_vm0, %v10085_v53 }
  0x4b   : > { %9554 = vmatpush3.bf16.msra.mxu0 %v10075_v50 }
  0x4c   : > { %9555 = vmatprep.subr.bf16.mxu0 %v10077_v54  ;;  %9566 = vmatpush3.bf16.msra.mxu1 %v10078_v51 }
  0x4d   : > { %9567 = vmatprep.subr.bf16.mxu1 %v10080_v55 }
  0x4f   : > { %9556 = vmatpush3.bf16.msra.mxu0 %v10077_v54 }
  0x50   : > { %9557 = vmatprep.subr.bf16.mxu0 %v10079_v56  ;;  %9568 = vmatpush3.bf16.msra.mxu1 %v10080_v55 }
  0x51   : > { %9569 = vmatprep.subr.bf16.mxu1 %v10083_v57 }
  0x53   : > { %9558 = vmatpush3.bf16.msra.mxu0 %v10079_v56 }
  0x54   : > { %9570 = vmatpush3.bf16.msra.mxu1 %v10083_v57  ;;  %9575 = vmatprep.subr.bf16.mxu0 %v10084_v58 }
  0x55   : > { %9587 = vmatprep.subr.bf16.mxu1 %v10088_v59 }
  0x56   : > { %9560 = vmatmul.mubr.msk.bf16.vlgmr.msra.gmra.mrb[16].mxu0 %vm226_vm0, %v10082_v60 }
  0x57   : > { %9576 = vmatpush3.bf16.msra.mxu0 %v10084_v58  ;;  %9572 = vmatmul.mubr.msk.bf16.vlgmr.msra.gmra.mrb[16].mxu1 %vm226_vm0, %v10086_v61 }
  0x58   : > { %9577 = vmatprep.subr.bf16.mxu0 %v10087_v62  ;;  %9588 = vmatpush3.bf16.msra.mxu1 %v10088_v59 }
  0x59   : > { %9589 = vmatprep.subr.bf16.mxu1 %v10090_v63  ;;  %9583 = vmatprep.mubr.msk.bf16.mxu0 %vm226_vm0, %v10093_v0 }
  0x5a   : > { %9595 = vmatprep.mubr.msk.bf16.mxu1 %vm226_vm0, %v10096_v1 }
  0x5b   : > { %9578 = vmatpush3.bf16.msra.mxu0 %v10087_v62 }
  0x5c   : > { %9579 = vmatprep.subr.bf16.mxu0 %v10089_v2  ;;  %9590 = vmatpush3.bf16.msra.mxu1 %v10090_v63 }
  0x5d   : > { %9591 = vmatprep.subr.bf16.mxu1 %v10092_v3 }
  0x5f   : > { %9580 = vmatpush3.bf16.msra.mxu0 %v10089_v2 }
  0x60   : > { %9581 = vmatprep.subr.bf16.mxu0 %v10091_v4  ;;  %9592 = vmatpush3.bf16.msra.mxu1 %v10092_v3 }
  0x61   : > { %9593 = vmatprep.subr.bf16.mxu1 %v10095_v5 }
  0x63   : > { %9582 = vmatpush3.bf16.msra.mxu0 %v10091_v4 }
  0x64   : > { %9594 = vmatpush3.bf16.msra.mxu1 %v10095_v5  ;;  %9599 = vmatprep.subr.bf16.mxu0 %v10098_v8 }
  0x65   : > { %9611 = vmatprep.subr.bf16.mxu1 %v10100_v10 }
  0x66   : > { %9584 = vmatmul.mubr.msk.bf16.vlgmr.msra.gmra.mrb[20].mxu0 %vm226_vm0, %v10094_v6 }
  0x67   : > { %9596 = vmatmul.mubr.msk.bf16.vlgmr.msra.gmra.mrb[20].mxu1 %vm226_vm0, %v10097_v7  ;;  %9600 = vmatpush3.bf16.msra.mxu0 %v10098_v8 }
  0x68   : > { %9612 = vmatpush3.bf16.msra.mxu1 %v10100_v10  ;;  %9601 = vmatprep.subr.bf16.mxu0 %v10713_v9 }
  0x69   : > { %9613 = vmatprep.subr.bf16.mxu1 %v10721_v11  ;;  %9607 = vmatprep.mubr.msk.bf16.mxu0 %vm226_vm0, %v10105_v13 }
  0x6a   : > { %9619 = vmatprep.mubr.msk.bf16.mxu1 %vm226_vm0, %v10108_v14 }
  0x6b   : > { %9602 = vmatpush3.bf16.msra.mxu0 %v10713_v9 }
  0x6c   : > { %9614 = vmatpush3.bf16.msra.mxu1 %v10721_v11  ;;  %9603 = vmatprep.subr.bf16.mxu0 %v10101_v15 }
  0x6d   : > { %9615 = vmatprep.subr.bf16.mxu1 %v10104_v16 }
  0x6f   : > { %9604 = vmatpush3.bf16.msra.mxu0 %v10101_v15 }
  0x70   : > { %9616 = vmatpush3.bf16.msra.mxu1 %v10104_v16  ;;  %9605 = vmatprep.subr.bf16.mxu0 %v10103_v17 }
  0x71   : > { %9617 = vmatprep.subr.bf16.mxu1 %v10107_v18 }
  0x73   : > { %9606 = vmatpush3.bf16.msra.mxu0 %v10103_v17 }
  0x74   : > { %9618 = vmatpush3.bf16.msra.mxu1 %v10107_v18  ;;  %9623 = vmatprep.subr.bf16.mxu0 %v10110_v19 }
  0x75   : > { %9635 = vmatprep.subr.bf16.mxu1 %v10112_v21 }
  0x76   : > { %9608 = vmatmul.mubr.msk.bf16.vlgmr.msra.gmra.mrb[24].mxu0 %vm226_vm0, %v10106_v20 }
  0x77   : > { %9620 = vmatmul.mubr.msk.bf16.vlgmr.msra.gmra.mrb[24].mxu1 %vm226_vm0, %v10109_v22  ;;  %9624 = vmatpush3.bf16.msra.mxu0 %v10110_v19 }
  0x78   : > { %9636 = vmatpush3.bf16.msra.mxu1 %v10112_v21  ;;  %9625 = vmatprep.subr.bf16.mxu0 %v10111_v23 }
  0x79   : > { %9637 = vmatprep.subr.bf16.mxu1 %v10114_v24  ;;  %9631 = vmatprep.mubr.msk.bf16.mxu0 %vm226_vm0, %v10117_v25 }
  0x7a   : > { %9643 = vmatprep.mubr.msk.bf16.mxu1 %vm226_vm0, %v10121_v26 }
  0x7b   : > { %9626 = vmatpush3.bf16.msra.mxu0 %v10111_v23 }
  0x7c   : > { %9638 = vmatpush3.bf16.msra.mxu1 %v10114_v24  ;;  %9627 = vmatprep.subr.bf16.mxu0 %v10113_v27 }
  0x7d   : > { %9639 = vmatprep.subr.bf16.mxu1 %v10116_v28 }
  0x7f   : > { %9628 = vmatpush3.bf16.msra.mxu0 %v10113_v27 }
  0x80   : > { %9640 = vmatpush3.bf16.msra.mxu1 %v10116_v28  ;;  %9629 = vmatprep.subr.bf16.mxu0 %v10115_v29 }
  0x81   : > { %9641 = vmatprep.subr.bf16.mxu1 %v10119_v30 }
  0x83   : > { %9630 = vmatpush3.bf16.msra.mxu0 %v10115_v29 }
  0x84   : > { %9642 = vmatpush3.bf16.msra.mxu1 %v10119_v30  ;;  %9647 = vmatprep.subr.bf16.mxu0 %v10120_v31 }
  0x85   : > { %9659 = vmatprep.subr.bf16.mxu1 %v10124_v32 }
  0x86   : > { %9632 = vmatmul.mubr.msk.bf16.vlgmr.msra.gmra.mrb[28].mxu0 %vm226_vm0, %v10118_v33 }
  0x87   : > { %9644 = vmatmul.mubr.msk.bf16.vlgmr.msra.gmra.mrb[28].mxu1 %vm226_vm0, %v10122_v34  ;;  %9648 = vmatpush3.bf16.msra.mxu0 %v10120_v31 }
  0x88   : > { %9660 = vmatpush3.bf16.msra.mxu1 %v10124_v32  ;;  %9649 = vmatprep.subr.bf16.mxu0 %v10123_v35 }
  0x89   : > { %9661 = vmatprep.subr.bf16.mxu1 %v10126_v36  ;;  %9655 = vmatprep.mubr.msk.bf16.mxu0 %vm226_vm0, %v10129_v37 }
  0x8a   : > { %9667 = vmatprep.mubr.msk.bf16.mxu1 %vm226_vm0, %v10132_v38 }
  0x8b   : > { %9650 = vmatpush3.bf16.msra.mxu0 %v10123_v35 }
  0x8c   : > { %9662 = vmatpush3.bf16.msra.mxu1 %v10126_v36  ;;  %9651 = vmatprep.subr.bf16.mxu0 %v10125_v39 }
  0x8d   : > { %9663 = vmatprep.subr.bf16.mxu1 %v10128_v40 }
  0x8f   : > { %9652 = vmatpush3.bf16.msra.mxu0 %v10125_v39 }
  0x90   : > { %9664 = vmatpush3.bf16.msra.mxu1 %v10128_v40  ;;  %9653 = vmatprep.subr.bf16.mxu0 %v10127_v41 }
  0x91   : > { %9665 = vmatprep.subr.bf16.mxu1 %v10131_v42 }
  0x93   : > { %9654 = vmatpush3.bf16.msra.mxu0 %v10127_v41 }
  0x94   : > { %9666 = vmatpush3.bf16.msra.mxu1 %v10131_v42 }
  0x96   : > { %9656 = vmatmul.mubr.msk.bf16.vlgmr.msra.gmra.mrb[32].mxu0 %vm226_vm0, %v10130_v43 }
  0x97   : > { %9668 = vmatmul.mubr.msk.bf16.vlgmr.msra.gmra.mrb[32].mxu1 %vm226_vm0, %v10133_v44 }
  0xe9   : > { %v9465_v46 = vpop.f32.mrb[0].mxu0 }
  0xea   : > { %v410_v47 = vadd.f32 %v9465_v46, %v10920_v45  ;;  %v9477_v48 = vpop.f32.mrb[0].mxu1  ;;  %v401_v49 = vpop.f32.mrb[1].mxu0 }
  0xeb   : > { %v538_v50 = vadd.f32 %v9477_v48, %v10920_v45  ;;  %v402_v51 = vadd.f32 %v10920_v45, %v401_v49  ;;  %v529_v52 = vpop.f32.mrb[1].mxu1  ;;  %v9466_v53 = vpop.f32.mrb[2].mxu0 }
  0xec   : > { %v418_v54 = vmax.f32 %v410_v47, 0.0  ;;  %v530_v55 = vadd.f32 %v10920_v45, %v529_v52  ;;  %v413_v56 = vadd.f32 %v9466_v53, %v10920_v45  ;;  %v404_v57 = vpop.f32.mrb[3].mxu0  ;;  %v9478_v58 = vpop.f32.mrb[2].mxu1 }
  0xed   : > { %v546_v59 = vmax.f32 %v538_v50, 0.0  ;;  %v416_v60 = vmax.f32 %v402_v51, 0.0  ;;  %v405_v61 = vadd.f32 %v10920_v45, %v404_v57  ;;  %v541_v62 = vadd.f32 %v9478_v58, %v10920_v45  ;;  %v532_v63 = vpop.f32.mrb[3].mxu1 }
  0xee   : > { %v544_v0 = vmax.f32 %v530_v55, 0.0  ;;  %v419_v1 = vmax.f32 %v413_v56, 0.0  ;;  %v533_v2 = vadd.f32 %v10920_v45, %v532_v63 }
  0xef   : > { %v417_v3 = vmax.f32 %v405_v61, 0.0  ;;  %v547_v4 = vmax.f32 %v541_v62, 0.0  ;;  %v10930_v5 = vmax.f32 %v416_v60, %v418_v54 }
  0xf0   : > { %v545_v6 = vmax.f32 %v533_v2, 0.0  ;;  %v10932_v7 = vmax.f32 %v544_v0, %v546_v59 }
  0xf1   : > { %v10934_v8 = vmax.f32 %v417_v3, %v419_v1  ;;  %424 = vrot.lane.b32.xlu0 %v10930_v5, %s10467_s13 }
  0xf2   : > { %v10938_v9 = vmax.f32 %v545_v6, %v547_v4  ;;  %552 = vrot.lane.b32.xlu1 %v10932_v7, %s10467_s13 }
  0xf5   : > { %426 = vrot.lane.b32.xlu0 %v10934_v8, %s10467_s13 }
  0xf6   : > { %554 = vrot.lane.b32.xlu1 %v10938_v9, %s10467_s13 }
  0xf9   : > { %v9489_v10 = vpop.f32.mrb[4].mxu0 }
  0xfa   : > { %v666_v11 = vadd.f32 %v9489_v10, %v10920_v45  ;;  %v657_v13 = vpop.f32.mrb[5].mxu0  ;;  %v9501_v14 = vpop.f32.mrb[4].mxu1 }
  0xfb   : > { %v658_v15 = vadd.f32 %v10920_v45, %v657_v13  ;;  %v9490_v16 = vpop.f32.mrb[6].mxu0  ;;  %v794_v17 = vadd.f32 %v9501_v14, %v10920_v45  ;;  %v785_v18 = vpop.f32.mrb[5].mxu1 }
  0xfc   : > { %v674_v19 = vmax.f32 %v666_v11, 0.0  ;;  %v669_v20 = vadd.f32 %v9490_v16, %v10920_v45  ;;  %v660_v21 = vpop.f32.mrb[7].mxu0  ;;  %v786_v22 = vadd.f32 %v10920_v45, %v785_v18  ;;  %v9502_v23 = vpop.f32.mrb[6].mxu1 }
  0xfd   : > { %v672_v24 = vmax.f32 %v658_v15, 0.0  ;;  %v661_v25 = vadd.f32 %v10920_v45, %v660_v21  ;;  %v802_v26 = vmax.f32 %v794_v17, 0.0  ;;  %v797_v27 = vadd.f32 %v9502_v23, %v10920_v45  ;;  %v788_v28 = vpop.f32.mrb[7].mxu1 }
  0xfe   : > { %v675_v29 = vmax.f32 %v669_v20, 0.0  ;;  %v800_v30 = vmax.f32 %v786_v22, 0.0  ;;  %v789_v31 = vadd.f32 %v10920_v45, %v788_v28 }
  0xff   : > { %v10954_v32 = vmax.f32 %v672_v24, %v674_v19  ;;  %v673_v33 = vmax.f32 %v661_v25, 0.0  ;;  %v803_v34 = vmax.f32 %v797_v27, 0.0 }
 0x100   : > { %v10956_v35 = vmax.f32 %v800_v30, %v802_v26  ;;  %v801_v36 = vmax.f32 %v789_v31, 0.0  ;;  %v10134_v30 = vld [vmem:[%s12942_s1] sm:$0xff]  }
 0x101   : > { %v10958_v37 = vmax.f32 %v673_v33, %v675_v29  ;;  %680 = vrot.lane.b32.xlu0 %v10954_v32, %s10467_s13  ;;  %9671 = vmatprep.subr.bf16.mxu0 %v10134_v30 }
 0x102   : > { %v10962_v38 = vmax.f32 %v801_v36, %v803_v34  ;;  %9672 = vmatpush3.bf16.msra.mxu0 %v10134_v30 }
 0x103   : > { %682 = vrot.lane.b32.xlu1 %v10958_v37, %s10467_s13 }
 0x105   : > { %808 = vrot.lane.b32.xlu0 %v10956_v35, %s10467_s13 }
 0x107   : > { %810 = vrot.lane.b32.xlu1 %v10962_v38, %s10467_s13 }
 0x109   : > { %v9513_v39 = vpop.f32.mrb[8].mxu0 }
 0x10a   : > { %v922_v40 = vadd.f32 %v9513_v39, %v10920_v45  ;;  %v913_v41 = vpop.f32.mrb[9].mxu0  ;;  %v9525_v42 = vpop.f32.mrb[8].mxu1 }
 0x10b   : > { %v914_v43 = vadd.f32 %v10920_v45, %v913_v41  ;;  %v9514_v44 = vpop.f32.mrb[10].mxu0  ;;  %v1050_v46 = vadd.f32 %v9525_v42, %v10920_v45  ;;  %v1041_v47 = vpop.f32.mrb[9].mxu1  ;;  %v10135_v42 = vld [vmem:[%s12942_s1 + $0x8] sm:$0xff]  }
 0x10c   : > { %v930_v48 = vmax.f32 %v922_v40, 0.0  ;;  %v925_v49 = vadd.f32 %v9514_v44, %v10920_v45  ;;  %v916_v50 = vpop.f32.mrb[11].mxu0  ;;  %v1042_v51 = vadd.f32 %v10920_v45, %v1041_v47  ;;  %v9526_v52 = vpop.f32.mrb[10].mxu1  ;;  %9673 = vmatprep.subr.bf16.mxu0 %v10135_v42  ;;  %v10136_v44 = vld [vmem:[%s12942_s1 + $0x10] sm:$0xff]  }
 0x10d   : > { %v928_v53 = vmax.f32 %v914_v43, 0.0  ;;  %v917_v54 = vadd.f32 %v10920_v45, %v916_v50  ;;  %v1058_v55 = vmax.f32 %v1050_v46, 0.0  ;;  %v1053_v56 = vadd.f32 %v9526_v52, %v10920_v45  ;;  %v1044_v57 = vpop.f32.mrb[11].mxu1  ;;  %9674 = vmatpush3.bf16.msra.mxu0 %v10135_v42  ;;  %v10138_v52 = vld [vmem:[%s12942_s1] sm:$0xff]   ;;  %v10147_v42 = vld [vmem:[%s12942_s1 + $0x18] sm:$0xff]  }
 0x10e   : > { %v931_v58 = vmax.f32 %v925_v49, 0.0  ;;  %v1056_v59 = vmax.f32 %v1042_v51, 0.0  ;;  %v1045_v60 = vadd.f32 %v10920_v45, %v1044_v57  ;;  %v281_v43 = vlaneseq  ;;  %9675 = vmatprep.subr.bf16.mxu0 %v10136_v44  ;;  %v10137_v51 = vld [vmem:[%s12942_s1 + $0x18] sm:$0xff]   ;;  %9683 = vmatprep.subr.bf16.mxu1 %v10138_v52 }
 0x10f   : > { %v10978_v61 = vmax.f32 %v928_v53, %v930_v48  ;;  %v929_v62 = vmax.f32 %v917_v54, 0.0  ;;  %v1059_v63 = vmax.f32 %v1053_v56, 0.0  ;;  %v10139_v53 = vld [vmem:[%s10534_s12 + $0x120] sm:$0xff]   ;;  %9684 = vmatpush3.bf16.msra.mxu1 %v10138_v52 }
 0x110   : > { %v10980_v0 = vmax.f32 %v1056_v59, %v1058_v55  ;;  %v1057_v1 = vmax.f32 %v1045_v60, 0.0  ;;  %v282_v47 = vshrl.u32 %v281_v43, 7  ;;  %v11025_v54 = vand.u32 127, %v281_v43  ;;  %v10140_v59 = vld [vmem:[%s12942_s1] sm:$0xff]   ;;  %v10142_v60 = vld [vmem:[%s12942_s1 + $0x8] sm:$0xff]   ;;  %9679 = vmatprep.mubr.msk.bf16.mxu0 %vm226_vm0, %v10139_v53 }
 0x111   : > { %v10982_v2 = vmax.f32 %v929_v62, %v931_v58  ;;  %936 = vrot.lane.b32.xlu0 %v10978_v61, %s10467_s13  ;;  %9676 = vmatpush3.bf16.msra.mxu0 %v10136_v44  ;;  %v10149_v43 = vld [vmem:[%s12942_s1] sm:$0xff]   ;;  %v3381_v53 = vld [vmem:[#allocation2 + $0x8] sm:$0xff] }
 0x112   : > { %v10986_v3 = vmax.f32 %v1057_v1, %v1059_v63  ;;  %9677 = vmatprep.subr.bf16.mxu0 %v10137_v51  ;;  %vm286_vm1 = vcmp.eq.s32.totalorder %v282_v47, 0  ;;  %vm288_vm2 = vcmp.lt.s32.totalorder %v11025_v54, 32  ;;  %9685 = vmatprep.subr.bf16.mxu1 %v10142_v60  ;;  %vm293_vm7 = vcmp.ge.s32.totalorder %v11025_v54, 32  ;;  %v3380_v52 = vld [vmem:[#allocation2] sm:$0xff]  ;;  %v10162_v54 = vld [vmem:[%s10534_s12 + $0x158] sm:$0xff]  }
 0x113   : > { %938 = vrot.lane.b32.xlu1 %v10982_v2, %s10467_s13  ;;  %vm289_vm3 = vmand %vm286_vm1, %vm288_vm2  ;;  %9686 = vmatpush3.bf16.msra.mxu1 %v10142_v60 }
 0x114   : > { %vm302_vm5 = vmxor %vm289_vm3, %vm10468_vm4 }
 0x115   : > { %1064 = vrot.lane.b32.xlu0 %v10980_v0, %s10467_s13  ;;  %9678 = vmatpush3.bf16.msra.mxu0 %v10137_v51  ;;  %v11079_v44 = vsel %vm302_vm5, 1.0, %v10466_v12  ;;  %v10160_v51 = vld [vmem:[%s10534_s12 + $0x150] sm:$0xff]  }
 0x116   : > { %9695 = vmatprep.subr.bf16.mxu0 %v10140_v59 }
 0x119   : > { %v9537_v4 = vpop.f32.mrb[12].mxu0 }
 0x11a   : > { %v1178_v6 = vadd.f32 %v9537_v4, %v10920_v45  ;;  %v1169_v10 = vpop.f32.mrb[13].mxu0  ;;  %v9549_v11 = vpop.f32.mrb[12].mxu1 }
 0x11b   : > { %v1170_v13 = vadd.f32 %v10920_v45, %v1169_v10  ;;  %v9538_v14 = vpop.f32.mrb[14].mxu0  ;;  %v1306_v15 = vadd.f32 %v9549_v11, %v10920_v45  ;;  %v1297_v16 = vpop.f32.mrb[13].mxu1  ;;  %v10141_v10 = vld [vmem:[%s10534_s12 + $0x128] sm:$0xff]  }
 0x11c   : > { %v1186_v17 = vmax.f32 %v1178_v6, 0.0  ;;  %v1181_v18 = vadd.f32 %v9538_v14, %v10920_v45  ;;  %v1172_v19 = vpop.f32.mrb[15].mxu0  ;;  %v1298_v20 = vadd.f32 %v10920_v45, %v1297_v16  ;;  %v9550_v21 = vpop.f32.mrb[14].mxu1  ;;  %9680 = vmatmul.mubr.msk.bf16.vlgmr.msra.gmra.mrb[36].mxu0 %vm226_vm0, %v10141_v10 }
 0x11d   : > { %v1184_v22 = vmax.f32 %v1170_v13, 0.0  ;;  %v1173_v23 = vadd.f32 %v10920_v45, %v1172_v19  ;;  %v1314_v24 = vmax.f32 %v1306_v15, 0.0  ;;  %v1309_v25 = vadd.f32 %v9550_v21, %v10920_v45  ;;  %v1300_v26 = vpop.f32.mrb[15].mxu1  ;;  %v10143_v21 = vld [vmem:[%s12942_s1 + $0x8] sm:$0xff]   ;;  %9696 = vmatpush3.bf16.msra.mxu0 %v10140_v59 }
 0x11e   : > { %v1187_v27 = vmax.f32 %v1181_v18, 0.0  ;;  %v1312_v28 = vmax.f32 %v1298_v20, 0.0  ;;  %v1301_v29 = vadd.f32 %v10920_v45, %v1300_v26  ;;  %v10144_v26 = vld [vmem:[%s12942_s1 + $0x10] sm:$0xff]   ;;  %9697 = vmatprep.subr.bf16.mxu0 %v10143_v21  ;;  %v3428_v59 = vpack.c.bf16 %v3381_v53, %v3380_v52  ;;  %v10164_v52 = vld [vmem:[%s12944_s3 + $0x40] sm:$0xff]   ;;  %v10167_v53 = vld [vmem:[%s12942_s1 + $0x8] sm:$0xff]  }
 0x11f   : > { %v11003_v31 = vmax.f32 %v1184_v22, %v1186_v17  ;;  %v1185_v33 = vmax.f32 %v1173_v23, 0.0  ;;  %v1315_v34 = vmax.f32 %v1309_v25, 0.0  ;;  %v10148_v17 = vld [vmem:[%s10534_s12 + $0x130] sm:$0xff]   ;;  %v10151_v22 = vld [vmem:[%s10534_s12 + $0x140] sm:$0xff]   ;;  %9687 = vmatprep.subr.bf16.mxu1 %v10144_v26 }
 0x120   : > { %v11005_v36 = vmax.f32 %v1312_v28, %v1314_v24  ;;  %v1313_v39 = vmax.f32 %v1301_v29, 0.0  ;;  %9691 = vmatprep.mubr.msk.bf16.mxu1 %vm226_vm0, %v10148_v17  ;;  %9703 = vmatprep.mubr.msk.bf16.mxu0 %vm226_vm0, %v10151_v22  ;;  %3452 = vst.msk [vmem:[#allocation3] sm:$0xff] %vm226_vm0, %v3428_v59  ;;  %v10170_v59 = vld [vmem:[%s12942_s1 + $0x10] sm:$0xff]  }
 0x121   : > { %v11007_v40 = vmax.f32 %v1185_v33, %v1187_v27  ;;  %v10145_v33 = vld [vmem:[%s12942_s1 + $0x10] sm:$0xff]   ;;  %9698 = vmatpush3.bf16.msra.mxu0 %v10143_v21  ;;  %9688 = vmatpush3.bf16.msra.mxu1 %v10144_v26 }
 0x122   : > { %v11009_v41 = vmax.f32 %v1313_v39, %v1315_v34  ;;  %v10146_v34 = vld [vmem:[%s12942_s1 + $0x18] sm:$0xff]   ;;  %v11070_v39 = vadd.s32 8, %v282_v47  ;;  %9699 = vmatprep.subr.bf16.mxu0 %v10145_v33 }
 0x123   : > { %9689 = vmatprep.subr.bf16.mxu1 %v10146_v34  ;;  %v10150_v47 = vld [vmem:[%s10534_s12 + $0x138] sm:$0xff]  }
 0x124   : > { %vm292_vm6 = vcmp.eq.s32.totalorder %v11070_v39, 12  ;;  %vm299_vm9 = vcmp.ge.s32.totalorder %v11070_v39, 13  ;;  %vm4246_vm13 = vcmp.lt.s32.totalorder %v11070_v39, 12 }
 0x125   : > { %9700 = vmatpush3.bf16.msra.mxu0 %v10145_v33  ;;  %9690 = vmatpush3.bf16.msra.mxu1 %v10146_v34  ;;  %v10157_v34 = vld [vmem:[%s12942_s1 + $0x10] sm:$0xff]   ;;  %vm11135_vm8 = vmand %vm292_vm6, %vm293_vm7 }
 0x126   : > { %9701 = vmatprep.subr.bf16.mxu0 %v10147_v42  ;;  %9707 = vmatprep.subr.bf16.mxu1 %v10149_v43  ;;  %vm11169_vm10 = vmor %vm11135_vm8, %vm299_vm9 }
 0x127   : > { %vm11206_vm11 = vmxor %vm11169_vm10, %vm10468_vm4 }
 0x128   : > { %9692 = vmatmul.mubr.msk.bf16.vlgmr.msra.gmra.mrb[36].mxu1 %vm226_vm0, %v10150_v47  ;;  %v10158_v47 = vld [vmem:[%s12942_s1 + $0x18] sm:$0xff]  }
 0x129   : > { %v9561_v46 = vpop.f32.mrb[16].mxu0  ;;  %9702 = vmatpush3.bf16.msra.mxu0 %v10147_v42  ;;  %9708 = vmatpush3.bf16.msra.mxu1 %v10149_v43 }
 0x12a   : > { %v1434_v48 = vadd.f32 %v9561_v46, %v10920_v45  ;;  %v1425_v49 = vpop.f32.mrb[17].mxu0  ;;  %v9573_v50 = vpop.f32.mrb[16].mxu1  ;;  %v11084_v46 = vld [vmem:[%s12943_s2] ss:$0 sm:$0xff]  ;;  %9715 = vmatprep.mubr.msk.bf16.mxu1 %vm226_vm0, %v10160_v51 }
 0x12b   : > { %v1426_v55 = vadd.f32 %v10920_v45, %v1425_v49  ;;  %v9562_v56 = vpop.f32.mrb[18].mxu0  ;;  %v1562_v57 = vadd.f32 %v9573_v50, %v10920_v45  ;;  %v1553_v58 = vpop.f32.mrb[17].mxu1  ;;  %v10154_v50 = vld [vmem:[%s12942_s1 + $0x8] sm:$0xff]  }
 0x12c   : > { %v1442_v62 = vmax.f32 %v1434_v48, 0.0  ;;  %v1437_v63 = vadd.f32 %v9562_v56, %v10920_v45  ;;  %v1428_v1 = vpop.f32.mrb[19].mxu0  ;;  %v1554_v4 = vadd.f32 %v10920_v45, %v1553_v58  ;;  %v9574_v6 = vpop.f32.mrb[18].mxu1  ;;  %v10152_v48 = vld [vmem:[%s12942_s1] sm:$0xff]   ;;  %v10153_v58 = vld [vmem:[%s10534_s12 + $0x148] sm:$0xff]   ;;  %9709 = vmatprep.subr.bf16.mxu1 %v10154_v50 }
 0x12d   : > { %v1440_v11 = vmax.f32 %v1426_v55, 0.0  ;;  %v1429_v13 = vadd.f32 %v10920_v45, %v1428_v1  ;;  %v1570_v14 = vmax.f32 %v1562_v57, 0.0  ;;  %v1565_v15 = vadd.f32 %v9574_v6, %v10920_v45  ;;  %v1556_v16 = vpop.f32.mrb[19].mxu1  ;;  %9719 = vmatprep.subr.bf16.mxu0 %v10152_v48  ;;  %9704 = vmatmul.mubr.msk.bf16.vlgmr.msra.gmra.mrb[40].mxu0 %vm226_vm0, %v10153_v58  ;;  %v10168_v58 = vld [vmem:[%s12944_s3 + $0x48] sm:$0xff]  }
 0x12e   : > { %v1443_v18 = vmax.f32 %v1437_v63, 0.0  ;;  %v1568_v19 = vmax.f32 %v1554_v4, 0.0  ;;  %v1557_v20 = vadd.f32 %v10920_v45, %v1556_v16  ;;  %9720 = vmatpush3.bf16.msra.mxu0 %v10152_v48  ;;  %9710 = vmatpush3.bf16.msra.mxu1 %v10154_v50  ;;  %v10159_v48 = vld [vmem:[%s12942_s1 + $0x18] sm:$0xff]   ;;  %v10161_v50 = vld [vmem:[%s12942_s1] sm:$0xff]  }
 0x12f   : > { %v11048_v23 = vmax.f32 %v1440_v11, %v1442_v62  ;;  %v1441_v24 = vmax.f32 %v1429_v13, 0.0  ;;  %v1571_v25 = vmax.f32 %v1565_v15, 0.0  ;;  %v10155_v13 = vld [vmem:[%s12942_s1 + $0x8] sm:$0xff]  }
 0x130   : > { %v11054_v27 = vmax.f32 %v1568_v19, %v1570_v14  ;;  %v1569_v28 = vmax.f32 %v1557_v20, 0.0  ;;  %v10163_v19 = vld [vmem:[%s10534_s12 + $0x160] sm:$0xff]   ;;  %9721 = vmatprep.subr.bf16.mxu0 %v10155_v13 }
 0x131   : > { %v11057_v29 = vmax.f32 %v1441_v24, %v1443_v18  ;;  %v10156_v18 = vld [vmem:[%s12942_s1 + $0x10] sm:$0xff]   ;;  %9727 = vmatprep.mubr.msk.bf16.mxu0 %vm226_vm0, %v10163_v19 }
 0x132   : > { %v11061_v30 = vmax.f32 %v1569_v28, %v1571_v25  ;;  %9711 = vmatprep.subr.bf16.mxu1 %v10156_v18  ;;  %9722 = vmatpush3.bf16.msra.mxu0 %v10155_v13  ;;  %v10178_v13 = vld [vmem:[%s10534_s12 + $0x178] sm:$0xff]  }
 0x133   : > { %9712 = vmatpush3.bf16.msra.mxu1 %v10156_v18  ;;  %9723 = vmatprep.subr.bf16.mxu0 %v10157_v34 }
 0x134   : > { %9713 = vmatprep.subr.bf16.mxu1 %v10158_v47 }
 0x136   : > { %9724 = vmatpush3.bf16.msra.mxu0 %v10157_v34 }
 0x137   : > { %9714 = vmatpush3.bf16.msra.mxu1 %v10158_v47  ;;  %9725 = vmatprep.subr.bf16.mxu0 %v10159_v48  ;;  %v10185_v47 = vld [vmem:[%s12944_s3 + $0x70] sm:$0xff]  }
 0x138   : > { %9731 = vmatprep.subr.bf16.mxu1 %v10161_v50 }
 0x139   : > { %v9585_v49 = vpop.f32.mrb[20].mxu0 }
 0x13a   : > { %v1690_v55 = vadd.f32 %v9585_v49, %v10920_v45  ;;  %v1681_v56 = vpop.f32.mrb[21].mxu0  ;;  %v9597_v57 = vpop.f32.mrb[20].mxu1  ;;  %9726 = vmatpush3.bf16.msra.mxu0 %v10159_v48  ;;  %9716 = vmatmul.mubr.msk.bf16.vlgmr.msra.gmra.mrb[40].mxu1 %vm226_vm0, %v10162_v54  ;;  %v10186_v48 = vld [vmem:[%s12944_s3 + $0x30] sm:$0xff]  }
 0x13b   : > { %v1682_v60 = vadd.f32 %v10920_v45, %v1681_v56  ;;  %v9586_v62 = vpop.f32.mrb[22].mxu0  ;;  %v1818_v63 = vadd.f32 %v9597_v57, %v11084_v46  ;;  %v1809_v1 = vpop.f32.mrb[21].mxu1  ;;  %v10165_v56 = vld [vmem:[%s10534_s12 + $0x168] sm:$0xff]   ;;  %v10166_v57 = vld [vmem:[%s12944_s3] sm:$0xff]   ;;  %9732 = vmatpush3.bf16.msra.mxu1 %v10161_v50  ;;  %8999 = vmatprep.subr.bf16.mxu0 %v10164_v52 }
 0x13c   : > { %v1698_v4 = vmax.f32 %v1690_v55, 0.0  ;;  %v1693_v6 = vadd.f32 %v9586_v62, %v10920_v45  ;;  %v1684_v10 = vpop.f32.mrb[23].mxu0  ;;  %v1810_v11 = vadd.f32 %v11084_v46, %v1809_v1  ;;  %v9598_v14 = vpop.f32.mrb[22].mxu1  ;;  %v10176_v55 = vld [vmem:[%s10534_s12 + $0x170] sm:$0xff]   ;;  %9733 = vmatprep.subr.bf16.mxu1 %v10167_v53  ;;  %v10169_v62 = vld [vmem:[%s12944_s3 + $0x8] sm:$0xff]   ;;  %v10173_v1 = vld [vmem:[%s12942_s1 + $0x18] sm:$0xff]  }
 0x13d   : > { %v1696_v15 = vmax.f32 %v1682_v60, 0.0  ;;  %v1685_v16 = vadd.f32 %v10920_v45, %v1684_v10  ;;  %v1826_v17 = vmax.f32 %v1818_v63, 0.0  ;;  %v1821_v20 = vadd.f32 %v9598_v14, %v11084_v46  ;;  %v1812_v21 = vpop.f32.mrb[23].mxu1  ;;  %9739 = vmatprep.mubr.msk.bf16.mxu1 %vm226_vm0, %v10176_v55  ;;  %9728 = vmatmul.mubr.msk.bf16.vlgmr.msra.gmra.mrb[44].mxu0 %vm226_vm0, %v10165_v56  ;;  %v10171_v63 = vld [vmem:[%s12944_s3 + $0x50] sm:$0xff]   ;;  %v10177_v10 = vld [vmem:[%s12944_s3 + $0x80] sm:$0xff]  }
 0x13e   : > { %v1699_v22 = vmax.f32 %v1693_v6, 0.0  ;;  %v1824_v24 = vmax.f32 %v1810_v11, 0.0  ;;  %v1813_v25 = vadd.f32 %v11084_v46, %v1812_v21  ;;  %9000 = vmatpush3.bf16.msra.mxu0 %v10166_v57  ;;  %v10174_v6 = vld [vmem:[%s12944_s3 + $0x58] sm:$0xff]   ;;  %v10179_v14 = vld [vmem:[%s12944_s3 + $0x60] sm:$0xff]   ;;  %v10182_v21 = vld [vmem:[%s12944_s3 + $0x68] sm:$0xff]  }
 0x13f   : > { %v11114_v26 = vmax.f32 %v1696_v15, %v1698_v4  ;;  %v1697_v45 = vmax.f32 %v1685_v16, 0.0  ;;  %v1827_v28 = vmax.f32 %v1821_v20, 0.0  ;;  %9734 = vmatpush3.bf16.msra.mxu1 %v10167_v53  ;;  %9001 = vmatprep.subr.bf16.mxu0 %v10168_v58  ;;  %v10172_v4 = vld [vmem:[%s12944_s3 + $0x10] sm:$0xff]   ;;  %v10175_v11 = vld [vmem:[%s12944_s3 + $0x18] sm:$0xff]   ;;  %v10181_v15 = vld [vmem:[%s12944_s3 + $0x88] sm:$0xff]  }
 0x140   : > { %v11117_v33 = vmax.f32 %v1824_v24, %v1826_v17  ;;  %v1825_v42 = vmax.f32 %v1813_v25, 0.0  ;;  %9735 = vmatprep.subr.bf16.mxu1 %v10170_v59  ;;  %v10180_v17 = vld [vmem:[%s12944_s3 + $0x20] sm:$0xff]   ;;  %v11222_v24 = vsel %vm11206_vm11, 1.0, %v10466_v12  ;;  %v10183_v25 = vld [vmem:[%s12944_s3 + $0x28] sm:$0xff]   ;;  %v10189_v53 = vld [vmem:[%s12944_s3 + $0x38] sm:$0xff]  }
 0x141   : > { %v11123_v43 = vmax.f32 %v1697_v45, %v1699_v22  ;;  %v10184_v45 = vld [vmem:[%s12944_s3 + $0x90] sm:$0xff]   ;;  %v3476_v52 = vld [vmem:[#allocation2 + $0x1] sm:$0xff] }
 0x142   : > { %v11129_v49 = vmax.f32 %v1825_v42, %v1827_v28  ;;  %9002 = vmatpush3.bf16.msra.mxu0 %v10169_v62  ;;  %v10190_v56 = vld [vmem:[%s12944_s3 + $0xa0] sm:$0xff]  }
 0x143   : > { %9736 = vmatpush3.bf16.msra.mxu1 %v10170_v59  ;;  %9003 = vmatprep.subr.bf16.mxu0 %v10171_v63  ;;  %v10191_v58 = vld [vmem:[%s12944_s3 + $0x40] sm:$0xff]  }
 0x144   : > { %9737 = vmatprep.subr.bf16.mxu1 %v10173_v1 }
 0x146   : > { %9004 = vmatpush3.bf16.msra.mxu0 %v10172_v4 }
 0x147   : > { %9738 = vmatpush3.bf16.msra.mxu1 %v10173_v1  ;;  %9005 = vmatprep.subr.bf16.mxu0 %v10174_v6 }
 0x148   : > { %9743 = vmatprep.subr.bf16.mxu1 %v10177_v10 }
 0x14a   : > { %9006 = vmatpush3.bf16.msra.mxu0 %v10175_v11  ;;  %9740 = vmatmul.mubr.msk.bf16.vlgmr.msra.gmra.mrb[44].mxu1 %vm226_vm0, %v10178_v13  ;;  %v10193_v11 = vld [vmem:[%s12944_s3 + $0xa8] sm:$0xff]  }
 0x14b   : > { %9007 = vmatprep.subr.bf16.mxu0 %v10179_v14  ;;  %9744 = vmatpush3.bf16.msra.mxu1 %v10177_v10 }
 0x14c   : > { %9745 = vmatprep.subr.bf16.mxu1 %v10181_v15 }
 0x14e   : > { %9008 = vmatpush3.bf16.msra.mxu0 %v10180_v17 }
 0x14f   : > { %9746 = vmatpush3.bf16.msra.mxu1 %v10181_v15  ;;  %9009 = vmatprep.subr.bf16.mxu0 %v10182_v21 }
 0x150   : > { %9747 = vmatprep.subr.bf16.mxu1 %v10184_v45 }
 0x152   : > { %9010 = vmatpush3.bf16.msra.mxu0 %v10183_v25 }
 0x153   : > { %9748 = vmatpush3.bf16.msra.mxu1 %v10184_v45  ;;  %9011 = vmatprep.subr.bf16.mxu0 %v10185_v47  ;;  %v10199_v45 = vld [vmem:[%s12944_s3 + $0xb8] sm:$0xff]  }
 0x156   : > { %9012 = vmatpush3.bf16.msra.mxu0 %v10186_v48 }
 0x163   : > { %v425_v18 = vpop.permute.xlu0 %424 }
 0x164   : > { %v553_v19 = vpop.permute.xlu1 %552  ;;  %v430_v20 = vmax.f32 %v10930_v5, %v425_v18 }
 0x165   : > { %v558_v22 = vmax.f32 %v10932_v7, %v553_v19  ;;  %v10196_v19 = vld [vmem:[%s12944_s3 + $0xb0] sm:$0xff]  }
 0x166   : > { %v432_v5 = vmul.f32 %v11079_v44, %v430_v20 }
 0x167   : > { %v560_v28 = vmul.f32 %v11079_v44, %v558_v22  ;;  %v427_v34 = vpop.permute.xlu0 %426 }
 0x168   : > { %434 = vst.msk [vmem:[#allocation2 + $0x10] sm:$0xff] %vm226_vm0, %v432_v5  ;;  %v555_v7 = vpop.permute.xlu1 %554  ;;  %v431_v42 = vmax.f32 %v10934_v8, %v427_v34  ;;  %v10187_v8 = vld [vmem:[%s12944_s3 + $0x98] sm:$0xff]  }
 0x169   : > { %562 = vst.msk [vmem:[#allocation2 + $0x20] sm:$0xff] %vm226_vm0, %v560_v28  ;;  %v559_v51 = vmax.f32 %v10938_v9, %v555_v7  ;;  %v10188_v9 = vld [vmem:[%s12944_s3 + $0x78] sm:$0xff]   ;;  %9749 = vmatprep.subr.bf16.mxu1 %v10187_v8  ;;  %v11303_v28 = vld [vmem:[%s12944_s3 + $0x80] sm:$0xff]   ;;  %v9609_v7 = vpop.f32.mrb[24].mxu0 }
 0x16a   : > { %v433_v50 = vmul.f32 %v11222_v24, %v431_v42  ;;  %9013 = vmatprep.subr.bf16.mxu0 %v10188_v9  ;;  %9750 = vmatpush3.bf16.msra.mxu1 %v10187_v8 }
 0x16b   : > { %v561_v54 = vmul.f32 %v11222_v24, %v559_v51  ;;  %9014 = vmatpush3.bf16.msra.mxu0 %v10189_v53  ;;  %9751 = vmatprep.subr.bf16.mxu1 %v10190_v56  ;;  %v1946_v51 = vadd.f32 %v9609_v7, %v11084_v46 }
 0x16c   : > { %435 = vst.msk [vmem:[#allocation2 + $0x18] sm:$0xff] %vm226_vm0, %v433_v50  ;;  %9037 = vmatprep.subr.bf16.mxu0 %v10191_v58  ;;  %v1937_v50 = vpop.f32.mrb[25].mxu0 }
 0x16d   : > { %563 = vst.msk [vmem:[#allocation2 + $0x28] sm:$0xff] %vm226_vm0, %v561_v54  ;;  %v9610_v9 = vpop.f32.mrb[26].mxu0  ;;  %v1954_v58 = vmax.f32 %v1946_v51, 0.0 }
 0x16e   : > { %9752 = vmatpush3.bf16.msra.mxu1 %v10190_v56  ;;  %v1940_v56 = vpop.f32.mrb[27].mxu0 }
 0x16f   : > { %v3477_v55 = vld [vmem:[#allocation2 + $0x9] sm:$0xff]  ;;  %9753 = vmatprep.subr.bf16.mxu1 %v10193_v11 }
 0x170   : > { %v3524_v57 = vpack.c.bf16 %v3477_v55, %v3476_v52  ;;  %v3669_v59 = vld [vmem:[#allocation2 + $0x10] sm:$0xff]  ;;  %v3957_v13 = vld [vmem:[#allocation2 + $0x20] sm:$0xff] }
 0x172   : > { %3572 = vrot.lane.b32.xlu0 %v3524_v57, %s10467_s13  ;;  %9754 = vmatpush3.bf16.msra.mxu1 %v10193_v11 }
 0x173   : > { %v681_v60 = vpop.permute.xlu0 %680  ;;  %v3765_v62 = vld [vmem:[#allocation2 + $0x11] sm:$0xff]  ;;  %v3766_v63 = vld [vmem:[#allocation2 + $0x19] sm:$0xff]  ;;  %9755 = vmatprep.subr.bf16.mxu1 %v10196_v19 }
 0x174   : > { %v3670_v1 = vld [vmem:[#allocation2 + $0x18] sm:$0xff]  ;;  %v686_v4 = vmax.f32 %v10954_v32, %v681_v60  ;;  %v11263_v6 = vpack.c.bf16 %v3766_v63, %v3765_v62  ;;  %v3958_v14 = vld [vmem:[#allocation2 + $0x28] sm:$0xff]  ;;  %v1949_v60 = vadd.f32 %v9610_v9, %v11084_v46  ;;  %v1941_v62 = vadd.f32 %v11084_v46, %v1940_v56  ;;  %v9621_v63 = vpop.f32.mrb[24].mxu1  ;;  %v9633_v9 = vpop.f32.mrb[28].mxu0 }
 0x175   : > { %v3717_v10 = vpack.c.bf16 %v3670_v1, %v3669_v59  ;;  %v683_v15 = vpop.permute.xlu1 %682  ;;  %v4005_v16 = vpack.c.bf16 %v3958_v14, %v3957_v13  ;;  %v1938_v59 = vadd.f32 %v11084_v46, %v1937_v50  ;;  %v2065_v11 = vpop.f32.mrb[25].mxu1 }
 0x176   : > { %v688_v17 = vmul.f32 %v11079_v44, %v686_v4  ;;  %v687_v18 = vmax.f32 %v10958_v37, %v683_v15  ;;  %1192 = vrot.lane.b32.xlu0 %v11003_v31, %s10467_s13  ;;  %3861 = vrot.lane.b32.xlu1 %v11263_v6, %s10467_s13 }
 0x177   : > { %3741 = vst.msk [vmem:[#allocation3 + $0x8] sm:$0xff] %vm226_vm0, %v3717_v10  ;;  %3453 = vst.msk [vmem:[#allocation3 + $0x18] sm:$0xff] %vm226_vm0, %v3717_v10  ;;  %v809_v32 = vpop.permute.xlu0 %808  ;;  %9756 = vmatpush3.bf16.msra.mxu1 %v10196_v19  ;;  %v2074_v10 = vadd.f32 %v9621_v63, %v11084_v46  ;;  %v1952_v15 = vmax.f32 %v1938_v59, 0.0 }
 0x178   : > { %4029 = vst.msk [vmem:[#allocation3 + $0x10] sm:$0xff] %vm226_vm0, %v4005_v16  ;;  %3742 = vst.msk [vmem:[#allocation3 + $0x20] sm:$0xff] %vm226_vm0, %v4005_v16  ;;  %v689_v37 = vmul.f32 %v11222_v24, %v687_v18  ;;  %v814_v20 = vmax.f32 %v10956_v35, %v809_v32  ;;  %9757 = vmatprep.subr.bf16.mxu1 %v10199_v45  ;;  %v9622_v18 = vpop.f32.mrb[26].mxu1 }
 0x179   : > { %3454 = vst.msk [vmem:[#allocation3 + $0x30] sm:$0xff] %vm226_vm0, %v4005_v16  ;;  %690 = vst.msk [vmem:[#allocation2 + $0x30] sm:$0xff] %vm226_vm0, %v688_v17  ;;  %v811_v21 = vpop.permute.xlu1 %810  ;;  %v1955_v16 = vmax.f32 %v1949_v60, 0.0  ;;  %v1953_v17 = vmax.f32 %v1941_v62, 0.0 }
 0x17a   : > { %691 = vst.msk [vmem:[#allocation2 + $0x38] sm:$0xff] %vm226_vm0, %v689_v37  ;;  %v816_v22 = vmul.f32 %v11079_v44, %v814_v20  ;;  %v815_v25 = vmax.f32 %v10962_v38, %v811_v21  ;;  %1320 = vrot.lane.b32.xlu0 %v11005_v36, %s10467_s13  ;;  %1066 = vrot.lane.b32.xlu1 %v10986_v3, %s10467_s13  ;;  %v4053_v38 = vld [vmem:[#allocation2 + $0x21] sm:$0xff]  ;;  %v2082_v37 = vmax.f32 %v2074_v10, 0.0  ;;  %v2068_v20 = vpop.f32.mrb[27].mxu1 }
 0x17b   : > { %9758 = vmatpush3.bf16.msra.mxu1 %v10199_v45  ;;  %v11326_v21 = vmax.f32 %v1952_v15, %v1954_v58  ;;  %v2077_v45 = vadd.f32 %v9622_v18, %v11084_v46  ;;  %v9645_v10 = vpop.f32.mrb[28].mxu1 }
 0x17c   : > { %818 = vst.msk [vmem:[#allocation2 + $0x40] sm:$0xff] %vm226_vm0, %v816_v22  ;;  %v817_v35 = vmul.f32 %v11222_v24, %v815_v25  ;;  %9763 = vmatprep.subr.bf16.mxu1 %v11303_v28  ;;  %v11328_v22 = vmax.f32 %v1953_v17, %v1955_v16  ;;  %v2066_v25 = vadd.f32 %v11084_v46, %v2065_v11 }
 0x17e   : > { %819 = vst.msk [vmem:[#allocation2 + $0x48] sm:$0xff] %vm226_vm0, %v817_v35  ;;  %1194 = vrot.lane.b32.xlu1 %v11007_v40, %s10467_s13  ;;  %v2069_v35 = vadd.f32 %v11084_v46, %v2068_v20 }
 0x180   : > { %v4054_v5 = vld [vmem:[#allocation2 + $0x29] sm:$0xff]  ;;  %v2081_v7 = vmax.f32 %v2069_v35, 0.0 }
 0x181   : > { %v4101_v34 = vpack.c.bf16 %v4054_v5, %v4053_v38  ;;  %v3959_v42 = vld [vmem:[#allocation2 + $0x30] sm:$0xff]  ;;  %v3960_v47 = vld [vmem:[#allocation2 + $0x38] sm:$0xff]  ;;  %v2080_v38 = vmax.f32 %v2066_v25, 0.0  ;;  %v2083_v5 = vmax.f32 %v2077_v45, 0.0 }
 0x182   : > { %v4006_v48 = vpack.c.bf16 %v3960_v47, %v3959_v42  ;;  %v4055_v52 = vld [vmem:[#allocation2 + $0x31] sm:$0xff] }
 0x183   : > { %4149 = vrot.lane.b32.xlu1 %v4101_v34, %s10467_s13  ;;  %v937_v54 = vpop.permute.xlu0 %936  ;;  %v4056_v8 = vld [vmem:[#allocation2 + $0x39] sm:$0xff]  ;;  %v11343_v42 = vmax.f32 %v2080_v38, %v2082_v37  ;;  %v11348_v47 = vmax.f32 %v2081_v7, %v2083_v5 }
 0x184   : > { %v942_v53 = vmax.f32 %v10978_v61, %v937_v54  ;;  %v11309_v55 = vpack.c.bf16 %v4056_v8, %v4055_v52  ;;  %4030 = vst.msk [vmem:[#allocation3 + $0x28] sm:$0xff] %vm226_vm0, %v4006_v48  ;;  %3743 = vst.msk [vmem:[#allocation3 + $0x38] sm:$0xff] %vm226_vm0, %v4006_v48  ;;  %v3961_v13 = vld [vmem:[#allocation2 + $0x40] sm:$0xff] }
 0x185   : > { %3455 = vst.msk [vmem:[#allocation3 + $0x48] sm:$0xff] %vm226_vm0, %v4006_v48  ;;  %v939_v57 = vpop.permute.xlu1 %938  ;;  %v3962_v1 = vld [vmem:[#allocation2 + $0x48] sm:$0xff] }
 0x186   : > { %v944_v61 = vmul.f32 %v11079_v44, %v942_v53  ;;  %v943_v4 = vmax.f32 %v10982_v2, %v939_v57  ;;  %4151 = vrot.lane.b32.xlu0 %v11309_v55, %s10467_s13  ;;  %v4007_v32 = vpack.c.bf16 %v3962_v1, %v3961_v13  ;;  %v4057_v50 = vld [vmem:[#allocation2 + $0x41] sm:$0xff]  ;;  %v2193_v53 = vpop.f32.mrb[29].mxu0  ;;  %v11368_v57 = vld [vmem:[%s12943_s2] ss:$0 sm:$0xff] }
 0x187   : > { %3863 = vrot.lane.b32.xlu1 %v4101_v34, %s10467_s13  ;;  %v1065_v14 = vpop.permute.xlu0 %1064  ;;  %v9634_v56 = vpop.f32.mrb[30].mxu0  ;;  %v2202_v59 = vadd.f32 %v9633_v9, %v11368_v57  ;;  %v2194_v60 = vadd.f32 %v11368_v57, %v2193_v53  ;;  %v2330_v13 = vadd.f32 %v9645_v10, %v11368_v57 }
 0x188   : > { %946 = vst.msk [vmem:[#allocation2 + $0x50] sm:$0xff] %vm226_vm0, %v944_v61  ;;  %v945_v19 = vmul.f32 %v11222_v24, %v943_v4  ;;  %v1070_v2 = vmax.f32 %v10980_v0, %v1065_v14  ;;  %4031 = vst.msk [vmem:[#allocation3 + $0x40] sm:$0xff] %vm226_vm0, %v4007_v32  ;;  %v2196_v58 = vpop.f32.mrb[31].mxu0  ;;  %v2205_v62 = vadd.f32 %v9634_v56, %v11368_v57  ;;  %v2321_v14 = vpop.f32.mrb[29].mxu1 }
 0x189   : > { %3744 = vst.msk [vmem:[#allocation3 + $0x50] sm:$0xff] %vm226_vm0, %v4007_v32  ;;  %3456 = vst.msk [vmem:[#allocation3 + $0x60] sm:$0xff] %vm226_vm0, %v4007_v32  ;;  %v2197_v63 = vadd.f32 %v11368_v57, %v2196_v58  ;;  %v2210_v1 = vmax.f32 %v2202_v59, 0.0  ;;  %v2208_v61 = vmax.f32 %v2194_v60, 0.0  ;;  %v2322_v15 = vadd.f32 %v11368_v57, %v2321_v14  ;;  %v9657_v20 = vpop.f32.mrb[32].mxu0 }
 0x18a   : > { %947 = vst.msk [vmem:[#allocation2 + $0x58] sm:$0xff] %vm226_vm0, %v945_v19  ;;  %v1072_v0 = vmul.f32 %v11079_v44, %v1070_v2  ;;  %3574 = vrot.lane.b32.xlu0 %v11263_v6, %s10467_s13  ;;  %v2211_v4 = vmax.f32 %v2205_v62, 0.0  ;;  %v2338_v17 = vmax.f32 %v2330_v13, 0.0  ;;  %v9646_v19 = vpop.f32.mrb[30].mxu1  ;;  %v2458_v45 = vadd.f32 %v9657_v20, %v11368_v57  ;;  %v10192_v20 = vld [vmem:[%s12944_s3] sm:$0xff]  }
 0x18b   : > { %3865 = vrot.lane.b32.xlu1 %v11309_v55, %s10467_s13  ;;  %v2209_v11 = vmax.f32 %v2197_v63, 0.0  ;;  %v2336_v18 = vmax.f32 %v2322_v15, 0.0  ;;  %v2333_v2 = vadd.f32 %v9646_v19, %v11368_v57  ;;  %v2324_v37 = vpop.f32.mrb[31].mxu1 }
 0x18c   : > { %1074 = vst.msk [vmem:[#allocation2 + $0x60] sm:$0xff] %vm226_vm0, %v1072_v0  ;;  %v2325_v25 = vadd.f32 %v11368_v57, %v2324_v37  ;;  %v2449_v0 = vpop.f32.mrb[33].mxu0  ;;  %v2466_v7 = vmax.f32 %v2458_v45, 0.0  ;;  %v9669_v9 = vpop.f32.mrb[32].mxu1  ;;  %v10194_v45 = vld [vmem:[%s12944_s3 + $0x48] sm:$0xff]  }
 0x18d   : > { %v11385_v16 = vmax.f32 %v2209_v11, %v2211_v4  ;;  %v11391_v32 = vmax.f32 %v2336_v18, %v2338_v17  ;;  %v2339_v35 = vmax.f32 %v2333_v2, 0.0  ;;  %v2450_v38 = vadd.f32 %v11368_v57, %v2449_v0  ;;  %v2577_v58 = vpop.f32.mrb[33].mxu1 }
 0x18e   : > { %3576 = vrot.lane.b32.xlu0 %v4101_v34, %s10467_s13  ;;  %v2337_v5 = vmax.f32 %v2325_v25, 0.0  ;;  %v2586_v56 = vadd.f32 %v9669_v9, %v11368_v57  ;;  %v2578_v62 = vadd.f32 %v11368_v57, %v2577_v58  ;;  %v9670_v19 = vpop.f32.mrb[34].mxu1 }
 0x18f   : > { %1322 = vrot.lane.b32.xlu1 %v11009_v41, %s10467_s13  ;;  %v4058_v6 = vld [vmem:[#allocation2 + $0x49] sm:$0xff]  ;;  %v2589_v0 = vadd.f32 %v9670_v19, %v11368_v57 }
 0x190   : > { %v3963_v51 = vld [vmem:[#allocation2 + $0x50] sm:$0xff]  ;;  %v4103_v54 = vpack.c.bf16 %v4058_v6, %v4057_v50  ;;  %v9658_v6 = vpop.f32.mrb[34].mxu0  ;;  %v11400_v50 = vmax.f32 %v2337_v5, %v2339_v35  ;;  %v2594_v60 = vmax.f32 %v2586_v56, 0.0  ;;  %v2592_v63 = vmax.f32 %v2578_v62, 0.0  ;;  %v2580_v5 = vpop.f32.mrb[35].mxu1 }
 0x191   : > { %v3964_v48 = vld [vmem:[#allocation2 + $0x58] sm:$0xff] }
 0x192   : > { %1448 = vrot.lane.b32.xlu0 %v11048_v23, %s10467_s13  ;;  %v4008_v46 = vpack.c.bf16 %v3964_v48, %v3963_v51  ;;  %v4059_v52 = vld [vmem:[#allocation2 + $0x51] sm:$0xff]  ;;  %v2464_v51 = vmax.f32 %v2450_v38, 0.0  ;;  %v2461_v48 = vadd.f32 %v9658_v6, %v11368_v57  ;;  %v10195_v38 = vld [vmem:[%s12944_s3 + $0x8] sm:$0xff]  }
 0x193   : > { %1450 = vrot.lane.b32.xlu1 %v11057_v29, %s10467_s13  ;;  %v4060_v34 = vld [vmem:[#allocation2 + $0x59] sm:$0xff]  ;;  %v10197_v6 = vld [vmem:[%s12944_s3 + $0x50] sm:$0xff]  }
 0x194   : > { %4032 = vst.msk [vmem:[#allocation3 + $0x58] sm:$0xff] %vm226_vm0, %v4008_v46  ;;  %3745 = vst.msk [vmem:[#allocation3 + $0x68] sm:$0xff] %vm226_vm0, %v4008_v46  ;;  %v11360_v8 = vpack.c.bf16 %v4060_v34, %v4059_v52  ;;  %v11403_v34 = vmax.f32 %v2464_v51, %v2466_v7  ;;  %v2467_v52 = vmax.f32 %v2461_v48, 0.0  ;;  %v2595_v51 = vmax.f32 %v2589_v0, 0.0 }
 0x195   : > { %3457 = vst.msk [vmem:[#allocation3 + $0x78] sm:$0xff] %vm226_vm0, %v4008_v46  ;;  %v2452_v46 = vpop.f32.mrb[35].mxu0 }
 0x196   : > { %1576 = vrot.lane.b32.xlu0 %v11054_v27, %s10467_s13 }
 0x197   : > { %4153 = vrot.lane.b32.xlu1 %v4103_v54, %s10467_s13 }
 0x19a   : > { %4155 = vrot.lane.b32.xlu0 %v11360_v8, %s10467_s13 }
 0x19b   : > { %3867 = vrot.lane.b32.xlu1 %v4103_v54, %s10467_s13 }
 0x19e   : > { %3578 = vrot.lane.b32.xlu0 %v11309_v55, %s10467_s13  ;;  %v11382_v55 = vmax.f32 %v2208_v61, %v2210_v1  ;;  %v11409_v1 = vmax.f32 %v2592_v63, %v2594_v60 }
 0x19f   : > { %3869 = vrot.lane.b32.xlu1 %v11360_v8, %s10467_s13 }
 0x1a2   : > { %3580 = vrot.lane.b32.xlu0 %v4103_v54, %s10467_s13  ;;  %v2453_v54 = vadd.f32 %v11368_v57, %v2452_v46  ;;  %v10198_v46 = vld [vmem:[%s12944_s3 + $0x10] sm:$0xff]  }
 0x1a3   : > { %1578 = vrot.lane.b32.xlu1 %v11061_v30, %s10467_s13 }
 0x1a4   : > { %v2465_v53 = vmax.f32 %v2453_v54, 0.0  ;;  %v10200_v54 = vld [vmem:[%s12944_s3 + $0x58] sm:$0xff]  }
 0x1a6   : > { %1704 = vrot.lane.b32.xlu0 %v11114_v26, %s10467_s13  ;;  %v11406_v59 = vmax.f32 %v2465_v53, %v2467_v52  ;;  %v3965_v52 = vld [vmem:[#allocation2 + $0x60] sm:$0xff] }
 0x1a7   : > { %1706 = vrot.lane.b32.xlu1 %v11123_v43, %s10467_s13 }
 0x1aa   : > { %1832 = vrot.lane.b32.xlu0 %v11117_v33, %s10467_s13 }
 0x1e4   : > { %v3573_v61 = vpop.permute.xlu0 %3572 }
 0x1e5   : > { %3645 = vst.msk [vmem:[#allocation3] sm:$0xff] %vm3644_vm12, %v3573_v61 }
 0x1e8   : > { %v3862_v4 = vpop.permute.xlu1 %3861  ;;  %v1193_v10 = vpop.permute.xlu0 %1192 }
 0x1e9   : > { %3933 = vst.msk [vmem:[#allocation3 + $0x8] sm:$0xff] %vm3644_vm12, %v3862_v4  ;;  %v1198_v11 = vmax.f32 %v11003_v31, %v1193_v10  ;;  %v10201_v4 = vld [vmem:[%s12944_s3 + $0x18] sm:$0xff]   ;;  %v10203_v10 = vld [vmem:[%s12944_s3 + $0x60] sm:$0xff]  }
 0x1eb   : > { %v1200_v13 = vmul.f32 %v11079_v44, %v1198_v11 }
 0x1ec   : > { %v1067_v14 = vpop.permute.xlu1 %1066  ;;  %v1321_v15 = vpop.permute.xlu0 %1320 }
 0x1ed   : > { %1202 = vst.msk [vmem:[#allocation2 + $0x70] sm:$0xff] %vm226_vm0, %v1200_v13  ;;  %v1071_v17 = vmax.f32 %v10986_v3, %v1067_v14  ;;  %v1326_v18 = vmax.f32 %v11005_v36, %v1321_v15  ;;  %v4251_v36 = vld [vmem:[#allocation3] sm:$0xff] }
 0x1ef   : > { %v1073_v2 = vmul.f32 %v11222_v24, %v1071_v17  ;;  %v1328_v37 = vmul.f32 %v11079_v44, %v1326_v18 }
 0x1f0   : > { %v1195_v31 = vpop.permute.xlu1 %1194  ;;  %v4252_v25 = vld [vmem:[#allocation3 + $0x8] sm:$0xff] }
 0x1f1   : > { %1075 = vst.msk [vmem:[#allocation2 + $0x68] sm:$0xff] %vm226_vm0, %v1073_v2  ;;  %1330 = vst.msk [vmem:[#allocation2 + $0x80] sm:$0xff] %vm226_vm0, %v1328_v37  ;;  %v1199_v3 = vmax.f32 %v11007_v40, %v1195_v31  ;;  %4488 = vmatprep.mubr.bf16.mxu0 %v4252_v25  ;;  %v2581_v40 = vadd.f32 %v11368_v57, %v2580_v5 }
 0x1f2   : > { %4489 = vmatmul.mubr.bf16.vlgmr.msra.gmra.mrb[48].mxu0 %v4251_v36 }
 0x1f3   : > { %v1201_v35 = vmul.f32 %v11222_v24, %v1199_v3  ;;  %9038 = vmatpush3.bf16.msra.mxu0 %v10192_v20  ;;  %v2593_v48 = vmax.f32 %v2581_v40, 0.0  ;;  %v10204_v20 = vld [vmem:[%s12944_s3 + $0x20] sm:$0xff]   ;;  %v10205_v3 = vld [vmem:[%s12944_s3 + $0x88] sm:$0xff]  }
 0x1f4   : > { %9039 = vmatprep.subr.bf16.mxu0 %v10194_v45  ;;  %v3967_v19 = vld [vmem:[#allocation2 + $0x70] sm:$0xff] }
 0x1f5   : > { %v4150_v7 = vpop.permute.xlu1 %4149  ;;  %1203 = vst.msk [vmem:[#allocation2 + $0x78] sm:$0xff] %vm226_vm0, %v1201_v35  ;;  %v11446_v62 = vmax.f32 %v2593_v48, %v2595_v51  ;;  %v10206_v35 = vld [vmem:[%s12944_s3 + $0x68] sm:$0xff]  }
 0x1f6   : > { %4221 = vst.msk [vmem:[#allocation3 + $0x10] sm:$0xff] %vm3644_vm12, %v4150_v7 }
 0x1f7   : > { %9040 = vmatpush3.bf16.msra.mxu0 %v10195_v38 }
 0x1f8   : > { %v4152_v53 = vpop.permute.xlu0 %4151  ;;  %9041 = vmatprep.subr.bf16.mxu0 %v10197_v6  ;;  %v4061_v56 = vld [vmem:[#allocation2 + $0x61] sm:$0xff]  ;;  %v4062_v58 = vld [vmem:[#allocation2 + $0x69] sm:$0xff] }
 0x1f9   : > { %v3864_v9 = vpop.permute.xlu1 %3863  ;;  %v3966_v60 = vld [vmem:[#allocation2 + $0x68] sm:$0xff]  ;;  %4222 = vst.msk [vmem:[#allocation3 + $0x28] sm:$0xff] %vm3644_vm12, %v4152_v53  ;;  %v11450_v63 = vpack.c.bf16 %v4062_v58, %v4061_v56  ;;  %v10212_v56 = vld [vmem:[%s12944_s3 + $0x78] sm:$0xff]  }
 0x1fa   : > { %3934 = vst.msk [vmem:[#allocation3 + $0x20] sm:$0xff] %vm3644_vm12, %v3864_v9  ;;  %v4009_v61 = vpack.c.bf16 %v3966_v60, %v3965_v52  ;;  %v10211_v9 = vld [vmem:[%s12944_s3 + $0x98] sm:$0xff]  }
 0x1fb   : > { %9042 = vmatpush3.bf16.msra.mxu0 %v10198_v46  ;;  %4157 = vrot.lane.b32.xlu1 %v11450_v63, %s10467_s13  ;;  %v10213_v60 = vld [vmem:[%s12944_s3 + $0x38] sm:$0xff]  }
 0x1fc   : > { %4033 = vst.msk [vmem:[#allocation3 + $0x70] sm:$0xff] %vm226_vm0, %v4009_v61  ;;  %3746 = vst.msk [vmem:[#allocation3 + $0x80] sm:$0xff] %vm226_vm0, %v4009_v61  ;;  %v3575_v13 = vpop.permute.xlu0 %3574  ;;  %9043 = vmatprep.subr.bf16.mxu0 %v10200_v54  ;;  %v4063_v15 = vld [vmem:[#allocation2 + $0x71] sm:$0xff]  ;;  %v4064_v17 = vld [vmem:[#allocation2 + $0x79] sm:$0xff] }
 0x1fd   : > { %3458 = vst.msk [vmem:[#allocation3 + $0x90] sm:$0xff] %vm226_vm0, %v4009_v61  ;;  %v3866_v11 = vpop.permute.xlu1 %3865  ;;  %v4253_v14 = vld [vmem:[#allocation3 + $0x10] sm:$0xff]  ;;  %v11465_v18 = vpack.c.bf16 %v4064_v17, %v4063_v15  ;;  %v3968_v2 = vld [vmem:[#allocation2 + $0x78] sm:$0xff]  ;;  %v10217_v15 = vld [vmem:[%s12944_s3 + $0xa8] sm:$0xff]  }
 0x1fe   : > { %3935 = vst.msk [vmem:[#allocation3 + $0x38] sm:$0xff] %vm3644_vm12, %v3866_v11  ;;  %3646 = vst.msk [vmem:[#allocation3 + $0x18] sm:$0xff] %vm3644_vm12, %v3575_v13  ;;  %9759 = vmatprep.mubr.bf16.mxu1 %v4253_v14  ;;  %v4010_v37 = vpack.c.bf16 %v3968_v2, %v3967_v19  ;;  %v10216_v14 = vld [vmem:[%s12944_s3] sm:$0xff]   ;;  %v10218_v17 = vld [vmem:[%s12944_s3 + $0x48] sm:$0xff]  }
 0x1ff   : > { %9044 = vmatpush3.bf16.msra.mxu0 %v10201_v4  ;;  %3871 = vrot.lane.b32.xlu1 %v11450_v63, %s10467_s13  ;;  %v10215_v4 = vld [vmem:[%s12944_s3 + $0x40] sm:$0xff]  }
 0x200   : > { %4159 = vrot.lane.b32.xlu0 %v11465_v18, %s10467_s13  ;;  %v3577_v25 = vpop.permute.xlu0 %3576  ;;  %v4256_v0 = vld [vmem:[#allocation3 + $0x28] sm:$0xff]  ;;  %9045 = vmatprep.subr.bf16.mxu0 %v10203_v10  ;;  %4034 = vst.msk [vmem:[#allocation3 + $0x88] sm:$0xff] %vm226_vm0, %v4010_v37  ;;  %3747 = vst.msk [vmem:[#allocation3 + $0x98] sm:$0xff] %vm226_vm0, %v4010_v37  ;;  %v3969_v10 = vld [vmem:[#allocation2 + $0x80] sm:$0xff] }
 0x201   : > { %v1323_v31 = vpop.permute.xlu1 %1322  ;;  %v4255_v45 = vld [vmem:[#allocation3 + $0x20] sm:$0xff]  ;;  %3459 = vst.msk [vmem:[#allocation3 + $0xa8] sm:$0xff] %vm226_vm0, %v4010_v37  ;;  %9760 = vmatmul.mubr.bf16.vlgmr.msra.gmra.mrb[48].mxu1 %v4256_v0 }
 0x202   : > { %v1327_v36 = vmax.f32 %v11009_v41, %v1323_v31  ;;  %3647 = vst.msk [vmem:[#allocation3 + $0x30] sm:$0xff] %vm3644_vm12, %v3577_v25  ;;  %4496 = vmatprep.mubr.bf16.mxu0 %v4255_v45  ;;  %9764 = vmatpush3.bf16.msra.mxu1 %v11303_v28  ;;  %v10207_v41 = vld [vmem:[%s12944_s3 + $0x28] sm:$0xff]   ;;  %v10208_v28 = vld [vmem:[%s12944_s3 + $0x90] sm:$0xff]  }
 0x203   : > { %9046 = vmatpush3.bf16.msra.mxu0 %v10204_v20  ;;  %3873 = vrot.lane.b32.xlu1 %v11465_v18, %s10467_s13 }
 0x204   : > { %v1329_v38 = vmul.f32 %v11222_v24, %v1327_v36  ;;  %3582 = vrot.lane.b32.xlu0 %v11360_v8, %s10467_s13  ;;  %9765 = vmatprep.subr.bf16.mxu1 %v10205_v3  ;;  %v1449_v7 = vpop.permute.xlu0 %1448  ;;  %v10209_v8 = vld [vmem:[%s12944_s3 + $0x70] sm:$0xff]   ;;  %v9681_v36 = vpop.f32.mrb[36].mxu0 }
 0x205   : > { %v1451_v5 = vpop.permute.xlu1 %1450  ;;  %v4254_v6 = vld [vmem:[#allocation3 + $0x18] sm:$0xff]  ;;  %v1454_v48 = vmax.f32 %v11048_v23, %v1449_v7  ;;  %9047 = vmatprep.subr.bf16.mxu0 %v10206_v35  ;;  %v10210_v23 = vld [vmem:[%s12944_s3 + $0x30] sm:$0xff]  }
 0x206   : > { %v4584_v51 = vld [vmem:[#allocation3 + $0x38] sm:$0xff]  ;;  %1331 = vst.msk [vmem:[#allocation2 + $0x88] sm:$0xff] %vm226_vm0, %v1329_v38  ;;  %v1455_v40 = vmax.f32 %v11057_v29, %v1451_v5  ;;  %4497 = vmatmul.mubr.bf16.gmra.mrb[52].mxu0 %v4254_v6  ;;  %9766 = vmatpush3.bf16.msra.mxu1 %v10205_v3  ;;  %v2714_v5 = vadd.f32 %v9681_v36, %v11368_v57 }
 0x207   : > { %4820 = vmatprep.mubr.bf16.mxu0 %v4584_v51  ;;  %v1456_v54 = vmul.f32 %v11079_v44, %v1454_v48  ;;  %9048 = vmatpush3.bf16.msra.mxu0 %v10207_v41  ;;  %v10219_v38 = vld [vmem:[%s12944_s3 + $0x8] sm:$0xff]   ;;  %v10220_v41 = vld [vmem:[%s12944_s3 + $0xb0] sm:$0xff]  }
 0x208   : > { %v1457_v46 = vmul.f32 %v11222_v24, %v1455_v40  ;;  %1834 = vrot.lane.b32.xlu1 %v11129_v49, %s10467_s13  ;;  %3584 = vrot.lane.b32.xlu0 %v11450_v63, %s10467_s13  ;;  %v1577_v52 = vpop.permute.xlu0 %1576 }
 0x209   : > { %v4154_v29 = vpop.permute.xlu1 %4153  ;;  %9767 = vmatprep.subr.bf16.mxu1 %v10208_v28  ;;  %1458 = vst.msk [vmem:[#allocation2 + $0x90] sm:$0xff] %vm226_vm0, %v1456_v54  ;;  %v1582_v53 = vmax.f32 %v11054_v27, %v1577_v52  ;;  %9049 = vmatprep.subr.bf16.mxu0 %v10209_v8  ;;  %v10214_v27 = vld [vmem:[%s12944_s3 + $0xa0] sm:$0xff]   ;;  %v2705_v54 = vpop.f32.mrb[37].mxu0  ;;  %v2722_v52 = vmax.f32 %v2714_v5, 0.0 }
 0x20a   : > { %1459 = vst.msk [vmem:[#allocation2 + $0x98] sm:$0xff] %vm226_vm0, %v1457_v46  ;;  %9768 = vmatpush3.bf16.msra.mxu1 %v10208_v28  ;;  %v4583_v25 = vld [vmem:[#allocation3 + $0x30] sm:$0xff]  ;;  %v10221_v46 = vld [vmem:[%s12944_s3 + $0x50] sm:$0xff]  }
 0x20b   : > { %4223 = vst.msk [vmem:[#allocation3 + $0x40] sm:$0xff] %vm3644_vm12, %v4154_v29  ;;  %v1584_v58 = vmul.f32 %v11079_v44, %v1582_v53  ;;  %9050 = vmatpush3.bf16.msra.mxu0 %v10210_v23  ;;  %9769 = vmatprep.subr.bf16.mxu1 %v10211_v9  ;;  %v9682_v23 = vpop.f32.mrb[38].mxu0 }
 0x20c   : > { %1962 = vrot.lane.b32.xlu1 %v11328_v22, %s10467_s13  ;;  %1960 = vrot.lane.b32.xlu0 %v11326_v21, %s10467_s13  ;;  %v4156_v61 = vpop.permute.xlu0 %4155  ;;  %v2717_v53 = vadd.f32 %v9682_v23, %v11368_v57 }
 0x20d   : > { %v3868_v63 = vpop.permute.xlu1 %3867  ;;  %v3970_v11 = vld [vmem:[#allocation2 + $0x88] sm:$0xff]  ;;  %1586 = vst.msk [vmem:[#allocation2 + $0xa0] sm:$0xff] %vm226_vm0, %v1584_v58  ;;  %9051 = vmatprep.subr.bf16.mxu0 %v10212_v56  ;;  %v2708_v56 = vpop.f32.mrb[39].mxu0 }
 0x20e   : > { %3936 = vst.msk [vmem:[#allocation3 + $0x50] sm:$0xff] %vm3644_vm12, %v3868_v63  ;;  %4224 = vst.msk [vmem:[#allocation3 + $0x58] sm:$0xff] %vm3644_vm12, %v4156_v61  ;;  %v4011_v13 = vpack.c.bf16 %v3970_v11, %v3969_v10  ;;  %9770 = vmatpush3.bf16.msra.mxu1 %v10211_v9  ;;  %v4065_v20 = vld [vmem:[#allocation2 + $0x81] sm:$0xff]  ;;  %v2706_v9 = vadd.f32 %v11368_v57, %v2705_v54  ;;  %v2709_v61 = vadd.f32 %v11368_v57, %v2708_v56  ;;  %v10223_v11 = vld [vmem:[%s12944_s3 + $0xb8] sm:$0xff]  }
 0x20f   : > { %9052 = vmatpush3.bf16.msra.mxu0 %v10213_v60  ;;  %9771 = vmatprep.subr.bf16.mxu1 %v10214_v27  ;;  %v10236_v54 = vld [vmem:[%s12944_s3 + $0x90] sm:$0xff]  }
 0x210   : > { %4035 = vst.msk [vmem:[#allocation3 + $0xa0] sm:$0xff] %vm226_vm0, %v4011_v13  ;;  %3748 = vst.msk [vmem:[#allocation3 + $0xb0] sm:$0xff] %vm226_vm0, %v4011_v13  ;;  %2088 = vrot.lane.b32.xlu0 %v11343_v42, %s10467_s13  ;;  %v3579_v2 = vpop.permute.xlu0 %3578  ;;  %9075 = vmatprep.subr.bf16.mxu0 %v10215_v4  ;;  %v4066_v31 = vld [vmem:[#allocation2 + $0x89] sm:$0xff] }
 0x211   : > { %3460 = vst.msk [vmem:[#allocation3 + $0xc0] sm:$0xff] %vm226_vm0, %v4011_v13  ;;  %v3870_v19 = vpop.permute.xlu1 %3869  ;;  %v11555_v45 = vpack.c.bf16 %v4066_v31, %v4065_v20  ;;  %v3971_v0 = vld [vmem:[#allocation2 + $0x90] sm:$0xff]  ;;  %v3972_v3 = vld [vmem:[#allocation2 + $0x98] sm:$0xff] }
 0x212   : > { %v4585_v37 = vld [vmem:[#allocation3 + $0x40] sm:$0xff]  ;;  %3937 = vst.msk [vmem:[#allocation3 + $0x68] sm:$0xff] %vm3644_vm12, %v3870_v19  ;;  %3648 = vst.msk [vmem:[#allocation3 + $0x48] sm:$0xff] %vm3644_vm12, %v3579_v2  ;;  %4821 = vmatmul.mubr.bf16.vlgmr.msra.gmra.mrb[56].mxu0 %v4583_v25  ;;  %9772 = vmatpush3.bf16.msra.mxu1 %v10214_v27  ;;  %v4012_v35 = vpack.c.bf16 %v3972_v3, %v3971_v0  ;;  %v10224_v13 = vld [vmem:[%s12944_s3 + $0x58] sm:$0xff]   ;;  %v9693_v19 = vpop.f32.mrb[36].mxu1 }
 0x213   : > { %9779 = vmatprep.mubr.bf16.mxu1 %v4585_v37  ;;  %9076 = vmatpush3.bf16.msra.mxu0 %v10216_v14  ;;  %v4067_v28 = vld [vmem:[#allocation2 + $0x91] sm:$0xff]  ;;  %v2720_v14 = vmax.f32 %v2706_v9, 0.0  ;;  %v10234_v37 = vld [vmem:[%s12944_s3 + $0x80] sm:$0xff]   ;;  %v2833_v31 = vpop.f32.mrb[37].mxu1  ;;  %v2842_v3 = vadd.f32 %v9693_v19, %v11368_v57 }
 0x214   : > { %4161 = vrot.lane.b32.xlu1 %v11555_v45, %s10467_s13  ;;  %9773 = vmatprep.subr.bf16.mxu1 %v10217_v15  ;;  %v3581_v6 = vpop.permute.xlu0 %3580  ;;  %v4068_v40 = vld [vmem:[#allocation2 + $0x99] sm:$0xff]  ;;  %4036 = vst.msk [vmem:[#allocation3 + $0xb8] sm:$0xff] %vm226_vm0, %v4012_v35  ;;  %3749 = vst.msk [vmem:[#allocation3 + $0xc8] sm:$0xff] %vm226_vm0, %v4012_v35  ;;  %v2834_v36 = vadd.f32 %v11368_v57, %v2833_v31  ;;  %v10230_v9 = vld [vmem:[%s12944_s3 + $0x70] sm:$0xff]  }
 0x215   : > { %v1579_v7 = vpop.permute.xlu1 %1578  ;;  %v4587_v51 = vld [vmem:[#allocation3 + $0x50] sm:$0xff]  ;;  %9077 = vmatprep.subr.bf16.mxu0 %v10218_v17  ;;  %3461 = vst.msk [vmem:[#allocation3 + $0xd8] sm:$0xff] %vm226_vm0, %v4012_v35  ;;  %v11571_v8 = vpack.c.bf16 %v4068_v40, %v4067_v28  ;;  %v2721_v17 = vmax.f32 %v2709_v61, 0.0  ;;  %v11604_v20 = vmax.f32 %v2720_v14, %v2722_v52  ;;  %v10243_v31 = vld [vmem:[%s12944_s3 + $0xa8] sm:$0xff]  }
 0x216   : > { %v1583_v48 = vmax.f32 %v11061_v30, %v1579_v7  ;;  %3649 = vst.msk [vmem:[#allocation3 + $0x60] sm:$0xff] %vm3644_vm12, %v3581_v6  ;;  %4828 = vmatprep.mubr.bf16.mxu0 %v4587_v51  ;;  %9774 = vmatpush3.bf16.msra.mxu1 %v10217_v15  ;;  %v10222_v30 = vld [vmem:[%s12944_s3 + $0x10] sm:$0xff]   ;;  %v2723_v15 = vmax.f32 %v2717_v53, 0.0  ;;  %v10227_v7 = vld [vmem:[%s12944_s3 + $0x20] sm:$0xff]   ;;  %v4588_v6 = vld [vmem:[#allocation3 + $0x58] sm:$0xff] }
 0x217   : > { %9078 = vmatpush3.bf16.msra.mxu0 %v10219_v38  ;;  %4163 = vrot.lane.b32.xlu0 %v11571_v8, %s10467_s13  ;;  %v2850_v38 = vmax.f32 %v2842_v3, 0.0  ;;  %v3973_v28 = vld [vmem:[#allocation2 + $0xa0] sm:$0xff] }
 0x218   : > { %v1585_v29 = vmul.f32 %v11222_v24, %v1583_v48  ;;  %3875 = vrot.lane.b32.xlu1 %v11555_v45, %s10467_s13  ;;  %9775 = vmatprep.subr.bf16.mxu1 %v10220_v41  ;;  %v1705_v60 = vpop.permute.xlu0 %1704  ;;  %v11610_v0 = vmax.f32 %v2721_v17, %v2723_v15  ;;  %v10228_v48 = vld [vmem:[%s12944_s3 + $0x68] sm:$0xff]   ;;  %v10238_v17 = vld [vmem:[%s12944_s3 + $0x40] sm:$0xff]  }
 0x219   : > { %v1707_v58 = vpop.permute.xlu1 %1706  ;;  %v4586_v27 = vld [vmem:[#allocation3 + $0x48] sm:$0xff]  ;;  %v1710_v10 = vmax.f32 %v11114_v26, %v1705_v60  ;;  %9079 = vmatprep.subr.bf16.mxu0 %v10221_v46  ;;  %v11697_v3 = vld [vmem:[%s12943_s2] ss:$0 sm:$0xff] }
 0x21a   : > { %v4915_v63 = vld [vmem:[#allocation3 + $0x68] sm:$0xff]  ;;  %1587 = vst.msk [vmem:[#allocation2 + $0xa8] sm:$0xff] %vm226_vm0, %v1585_v29  ;;  %v1711_v4 = vmax.f32 %v11123_v43, %v1707_v58  ;;  %4829 = vmatmul.mubr.bf16.gmra.mrb[60].mxu0 %v4586_v27  ;;  %9776 = vmatpush3.bf16.msra.mxu1 %v10220_v41  ;;  %v2848_v41 = vmax.f32 %v2834_v36, 0.0  ;;  %v10231_v58 = vld [vmem:[%s12944_s3 + $0x30] sm:$0xff]  }
 0x21b   : > { %v1712_v43 = vmul.f32 %v11079_v44, %v1710_v10  ;;  %9080 = vmatpush3.bf16.msra.mxu0 %v10222_v30  ;;  %5151 = vmatprep.mubr.bf16.mxu0 %v4915_v63  ;;  %v10225_v26 = vld [vmem:[%s12944_s3 + $0x18] sm:$0xff]  }
 0x21c   : > { %v1713_v2 = vmul.f32 %v11222_v24, %v1711_v4  ;;  %3586 = vrot.lane.b32.xlu0 %v11465_v18, %s10467_s13  ;;  %3877 = vrot.lane.b32.xlu1 %v11571_v8, %s10467_s13  ;;  %v1833_v25 = vpop.permute.xlu0 %1832  ;;  %v10226_v18 = vld [vmem:[%s12944_s3 + $0x60] sm:$0xff]   ;;  %v11631_v51 = vmax.f32 %v2848_v41, %v2850_v38  ;;  %v10237_v60 = vld [vmem:[%s12944_s3 + $0x98] sm:$0xff]  }
 0x21d   : > { %1714 = vst.msk [vmem:[#allocation2 + $0xb0] sm:$0xff] %vm226_vm0, %v1712_v43  ;;  %9777 = vmatprep.subr.bf16.mxu1 %v10223_v11  ;;  %v1838_v35 = vmax.f32 %v11117_v33, %v1833_v25  ;;  %9081 = vmatprep.subr.bf16.mxu0 %v10224_v13  ;;  %v10235_v33 = vld [vmem:[%s12944_s3 + $0x88] sm:$0xff]   ;;  %v10232_v4 = vld [vmem:[%s12944_s3 + $0x78] sm:$0xff]   ;;  %v9694_v13 = vpop.f32.mrb[38].mxu1  ;;  %v4914_v41 = vld [vmem:[#allocation3 + $0x60] sm:$0xff] }
 0x21e   : > { %1715 = vst.msk [vmem:[#allocation2 + $0xb8] sm:$0xff] %vm226_vm0, %v1713_v2  ;;  %9778 = vmatpush3.bf16.msra.mxu1 %v10223_v11  ;;  %v10233_v10 = vld [vmem:[%s12944_s3 + $0x38] sm:$0xff]   ;;  %v10240_v11 = vld [vmem:[%s12944_s3 + $0xa0] sm:$0xff]   ;;  %v2845_v14 = vadd.f32 %v9694_v13, %v11368_v57  ;;  %v2836_v15 = vpop.f32.mrb[39].mxu1  ;;  %v9705_v2 = vpop.f32.mrb[40].mxu0 }
 0x21f   : > { %v1840_v5 = vmul.f32 %v11079_v44, %v1838_v35  ;;  %9082 = vmatpush3.bf16.msra.mxu0 %v10225_v26  ;;  %9783 = vmatprep.subr.bf16.mxu1 %v10234_v37  ;;  %v2837_v19 = vadd.f32 %v11368_v57, %v2836_v15  ;;  %v2961_v26 = vpop.f32.mrb[41].mxu0  ;;  %v2970_v36 = vadd.f32 %v9705_v2, %v11697_v3 }
 0x220   : > { %3588 = vrot.lane.b32.xlu0 %v11555_v45, %s10467_s13  ;;  %2090 = vrot.lane.b32.xlu1 %v11348_v47, %s10467_s13  ;;  %v10229_v45 = vld [vmem:[%s12944_s3 + $0x28] sm:$0xff]   ;;  %v2851_v43 = vmax.f32 %v2845_v14, 0.0  ;;  %v9706_v57 = vpop.f32.mrb[42].mxu0  ;;  %v2962_v35 = vadd.f32 %v11697_v3, %v2961_v26 }
 0x221   : > { %v3974_v40 = vld [vmem:[#allocation2 + $0xa8] sm:$0xff]  ;;  %1842 = vst.msk [vmem:[#allocation2 + $0xc0] sm:$0xff] %vm226_vm0, %v1840_v5  ;;  %9780 = vmatmul.mubr.bf16.vlgmr.msra.gmra.mrb[52].mxu1 %v4588_v6  ;;  %9083 = vmatprep.subr.bf16.mxu0 %v10226_v18  ;;  %v2849_v25 = vmax.f32 %v2837_v19, 0.0  ;;  %v2973_v18 = vadd.f32 %v9706_v57, %v11697_v3  ;;  %v2964_v38 = vpop.f32.mrb[43].mxu0  ;;  %v10251_v19 = vld [vmem:[%s12944_s3 + $0x20] sm:$0xff]  }
 0x222   : > { %v4013_v46 = vpack.c.bf16 %v3974_v40, %v3973_v28  ;;  %9784 = vmatpush3.bf16.msra.mxu1 %v10234_v37  ;;  %v4069_v23 = vld [vmem:[#allocation2 + $0xa1] sm:$0xff]  ;;  %v2976_v6 = vmax.f32 %v2962_v35, 0.0 }
 0x223   : > { %9084 = vmatpush3.bf16.msra.mxu0 %v10227_v7  ;;  %9785 = vmatprep.subr.bf16.mxu1 %v10235_v33  ;;  %v10239_v37 = vld [vmem:[%s12944_s3] sm:$0xff]   ;;  %v10241_v5 = vld [vmem:[%s12944_s3 + $0x48] sm:$0xff]   ;;  %v11709_v7 = vmax.f32 %v2849_v25, %v2851_v43  ;;  %v2979_v28 = vmax.f32 %v2973_v18, 0.0 }
 0x224   : > { %4037 = vst.msk [vmem:[#allocation3 + $0xd0] sm:$0xff] %vm226_vm0, %v4013_v46  ;;  %3750 = vst.msk [vmem:[#allocation3 + $0xe0] sm:$0xff] %vm226_vm0, %v4013_v46  ;;  %2216 = vrot.lane.b32.xlu0 %v11382_v55, %s10467_s13  ;;  %2218 = vrot.lane.b32.xlu1 %v11385_v16, %s10467_s13  ;;  %v4070_v29 = vld [vmem:[#allocation2 + $0xa9] sm:$0xff] }
 0x225   : > { %3462 = vst.msk [vmem:[#allocation3 + $0xf0] sm:$0xff] %vm226_vm0, %v4013_v46  ;;  %v3975_v30 = vld [vmem:[#allocation2 + $0xb0] sm:$0xff]  ;;  %9085 = vmatprep.subr.bf16.mxu0 %v10228_v48  ;;  %v11650_v52 = vpack.c.bf16 %v4070_v29, %v4069_v23  ;;  %v3976_v53 = vld [vmem:[#allocation2 + $0xb8] sm:$0xff]  ;;  %v10242_v40 = vld [vmem:[%s12944_s3 + $0x8] sm:$0xff]  }
 0x226   : > { %9786 = vmatpush3.bf16.msra.mxu1 %v10235_v33  ;;  %v4014_v56 = vpack.c.bf16 %v3976_v53, %v3975_v30  ;;  %v4071_v27 = vld [vmem:[#allocation2 + $0xb1] sm:$0xff]  ;;  %v2978_v33 = vmax.f32 %v2970_v36, 0.0  ;;  %v10252_v26 = vld [vmem:[%s12944_s3 + $0x68] sm:$0xff]  }
 0x227   : > { %9086 = vmatpush3.bf16.msra.mxu0 %v10229_v45  ;;  %9787 = vmatprep.subr.bf16.mxu1 %v10236_v54  ;;  %v10246_v48 = vld [vmem:[%s12944_s3 + $0xb0] sm:$0xff]   ;;  %v9717_v45 = vpop.f32.mrb[40].mxu1  ;;  %v10254_v18 = vld [vmem:[%s12944_s3 + $0x28] sm:$0xff]  }
 0x228   : > { %2344 = vrot.lane.b32.xlu0 %v11391_v32, %s10467_s13  ;;  %4165 = vrot.lane.b32.xlu1 %v11650_v52, %s10467_s13  ;;  %v4072_v63 = vld [vmem:[#allocation2 + $0xb9] sm:$0xff]  ;;  %4038 = vst.msk [vmem:[#allocation3 + $0xe8] sm:$0xff] %vm226_vm0, %v4014_v56  ;;  %3751 = vst.msk [vmem:[#allocation3 + $0xf8] sm:$0xff] %vm226_vm0, %v4014_v56  ;;  %v3098_v23 = vadd.f32 %v9717_v45, %v11697_v3  ;;  %v3089_v29 = vpop.f32.mrb[41].mxu1  ;;  %v10244_v30 = vld [vmem:[%s12944_s3 + $0x50] sm:$0xff]  }
 0x229   : > { %3463 = vst.msk [vmem:[#allocation3 + $0x108] sm:$0xff] %vm226_vm0, %v4014_v56  ;;  %9087 = vmatprep.subr.bf16.mxu0 %v10230_v9  ;;  %v11668_v61 = vpack.c.bf16 %v4072_v63, %v4071_v27  ;;  %v3090_v53 = vadd.f32 %v11697_v3, %v3089_v29  ;;  %v10247_v27 = vld [vmem:[%s12944_s3 + $0x58] sm:$0xff]   ;;  %v9718_v13 = vpop.f32.mrb[42].mxu1  ;;  %v10257_v29 = vld [vmem:[%s12944_s3 + $0x30] sm:$0xff]  }
 0x22a   : > { %9788 = vmatpush3.bf16.msra.mxu1 %v10236_v54  ;;  %v11722_v54 = vmax.f32 %v2976_v6, %v2978_v33  ;;  %v3106_v56 = vmax.f32 %v3098_v23, 0.0  ;;  %v3101_v14 = vadd.f32 %v9718_v13, %v11697_v3  ;;  %v3092_v15 = vpop.f32.mrb[43].mxu1 }
 0x22b   : > { %9088 = vmatpush3.bf16.msra.mxu0 %v10231_v58  ;;  %9789 = vmatprep.subr.bf16.mxu1 %v10237_v60  ;;  %v10249_v58 = vld [vmem:[%s12944_s3 + $0xb8] sm:$0xff]   ;;  %v3093_v2 = vadd.f32 %v11697_v3, %v3092_v15 }
 0x22c   : > { %3879 = vrot.lane.b32.xlu1 %v11650_v52, %s10467_s13  ;;  %4167 = vrot.lane.b32.xlu0 %v11668_v61, %s10467_s13 }
 0x22d   : > { %9089 = vmatprep.subr.bf16.mxu0 %v10232_v4  ;;  %v10248_v4 = vld [vmem:[%s12944_s3 + $0x18] sm:$0xff]  }
 0x22e   : > { %9790 = vmatpush3.bf16.msra.mxu1 %v10237_v60  ;;  %v3104_v60 = vmax.f32 %v3090_v53, 0.0  ;;  %v10258_v53 = vld [vmem:[%s12944_s3 + $0x78] sm:$0xff]  }
 0x22f   : > { %9090 = vmatpush3.bf16.msra.mxu0 %v10233_v10  ;;  %9791 = vmatprep.subr.bf16.mxu1 %v10240_v11  ;;  %v11752_v10 = vld [vmem:[%s12944_s3 + $0x80] sm:$0xff]  }
 0x230   : > { %3590 = vrot.lane.b32.xlu0 %v11571_v8, %s10467_s13  ;;  %3881 = vrot.lane.b32.xlu1 %v11668_v61, %s10467_s13  ;;  %v2965_v8 = vadd.f32 %v11697_v3, %v2964_v38  ;;  %v11744_v63 = vmax.f32 %v3104_v60, %v3106_v56  ;;  %v10260_v60 = vld [vmem:[%s12944_s3 + $0x38] sm:$0xff]  }
 0x231   : > { %9113 = vmatprep.subr.bf16.mxu0 %v10238_v17  ;;  %v9729_v17 = vpop.f32.mrb[44].mxu0 }
 0x232   : > { %5152 = vmatmul.mubr.bf16.vlgmr.msra.gmra.mrb[64].mxu0 %v4914_v41  ;;  %9792 = vmatpush3.bf16.msra.mxu1 %v10240_v11  ;;  %v2977_v46 = vmax.f32 %v2965_v8, 0.0  ;;  %v10250_v11 = vld [vmem:[%s12944_s3 + $0x60] sm:$0xff]   ;;  %v3226_v43 = vadd.f32 %v9729_v17, %v11697_v3  ;;  %v3217_v25 = vpop.f32.mrb[45].mxu0  ;;  %v10255_v8 = vld [vmem:[%s12944_s3 + $0x70] sm:$0xff]  }
 0x233   : > { %9114 = vmatpush3.bf16.msra.mxu0 %v10239_v37  ;;  %9793 = vmatprep.subr.bf16.mxu1 %v10243_v31  ;;  %v3107_v37 = vmax.f32 %v3101_v14, 0.0  ;;  %v3218_v36 = vadd.f32 %v11697_v3, %v3217_v25  ;;  %v9730_v35 = vpop.f32.mrb[46].mxu0 }
 0x234   : > { %3592 = vrot.lane.b32.xlu0 %v11650_v52, %s10467_s13  ;;  %2346 = vrot.lane.b32.xlu1 %v11400_v50, %s10467_s13  ;;  %v11728_v9 = vmax.f32 %v2977_v46, %v2979_v28  ;;  %v10245_v52 = vld [vmem:[%s12944_s3 + $0x10] sm:$0xff]   ;;  %v3234_v57 = vmax.f32 %v3226_v43, 0.0  ;;  %v3229_v41 = vadd.f32 %v9730_v35, %v11697_v3  ;;  %v10256_v35 = vld [vmem:[%s12944_s3 + $0x88] sm:$0xff]  }
 0x235   : > { %9115 = vmatprep.subr.bf16.mxu0 %v10241_v5  ;;  %v3220_v5 = vpop.f32.mrb[47].mxu0  ;;  %v3232_v33 = vmax.f32 %v3218_v36, 0.0 }
 0x236   : > { %9794 = vmatpush3.bf16.msra.mxu1 %v10243_v31  ;;  %v3105_v31 = vmax.f32 %v3093_v2, 0.0  ;;  %v3221_v6 = vadd.f32 %v11697_v3, %v3220_v5  ;;  %v3235_v28 = vmax.f32 %v3229_v41, 0.0 }
 0x237   : > { %9116 = vmatpush3.bf16.msra.mxu0 %v10242_v40  ;;  %9795 = vmatprep.subr.bf16.mxu1 %v10246_v48  ;;  %v9741_v40 = vpop.f32.mrb[44].mxu1 }
 0x238   : > { %2472 = vrot.lane.b32.xlu0 %v11403_v34, %s10467_s13  ;;  %2474 = vrot.lane.b32.xlu1 %v11406_v59, %s10467_s13  ;;  %v11773_v38 = vmax.f32 %v3105_v31, %v3107_v37  ;;  %v3233_v46 = vmax.f32 %v3221_v6, 0.0  ;;  %v3354_v45 = vadd.f32 %v9741_v40, %v11697_v3  ;;  %v3345_v23 = vpop.f32.mrb[45].mxu1 }
 0x239   : > { %9117 = vmatprep.subr.bf16.mxu0 %v10244_v30  ;;  %v3346_v30 = vadd.f32 %v11697_v3, %v3345_v23 }
 0x23a   : > { %9796 = vmatpush3.bf16.msra.mxu1 %v10246_v48  ;;  %v11780_v48 = vmax.f32 %v3232_v33, %v3234_v57  ;;  %v11790_v56 = vmax.f32 %v3233_v46, %v3235_v28  ;;  %v10259_v28 = vld [vmem:[%s12944_s3 + $0x90] sm:$0xff]  }
 0x23b   : > { %9118 = vmatpush3.bf16.msra.mxu0 %v10245_v52  ;;  %9797 = vmatprep.subr.bf16.mxu1 %v10249_v58  ;;  %v3362_v52 = vmax.f32 %v3354_v45, 0.0 }
 0x23c   : > { %2600 = vrot.lane.b32.xlu0 %v11409_v1, %s10467_s13  ;;  %9119 = vmatprep.subr.bf16.mxu0 %v10247_v27 }
 0x23e   : > { %9798 = vmatpush3.bf16.msra.mxu1 %v10249_v58  ;;  %v3360_v58 = vmax.f32 %v3346_v30, 0.0 }
 0x23f   : > { %9120 = vmatpush3.bf16.msra.mxu0 %v10248_v4  ;;  %9803 = vmatprep.subr.bf16.mxu1 %v11752_v10  ;;  %v10262_v4 = vld [vmem:[%s12944_s3 + $0x40] sm:$0xff]  }
 0x240   : > { %9121 = vmatprep.subr.bf16.mxu0 %v10250_v11  ;;  %v11795_v27 = vmax.f32 %v3360_v58, %v3362_v52  ;;  %v9742_v11 = vpop.f32.mrb[46].mxu1 }
 0x241   : > { %v3357_v13 = vadd.f32 %v9742_v11, %v11697_v3  ;;  %v3348_v14 = vpop.f32.mrb[47].mxu1 }
 0x242   : > { %v3349_v15 = vadd.f32 %v11697_v3, %v3348_v14  ;;  %v10266_v14 = vld [vmem:[%s12944_s3 + $0x8] sm:$0xff]  }
 0x243   : > { %9122 = vmatpush3.bf16.msra.mxu0 %v10251_v19  ;;  %v3363_v17 = vmax.f32 %v3357_v13, 0.0 }
 0x244   : > { %9123 = vmatprep.subr.bf16.mxu0 %v10252_v26  ;;  %v3361_v19 = vmax.f32 %v3349_v15, 0.0 }
 0x246   : > { %v11802_v2 = vmax.f32 %v3361_v19, %v3363_v17  ;;  %v10267_v17 = vld [vmem:[%s12944_s3 + $0xa8] sm:$0xff]   ;;  %v10268_v19 = vld [vmem:[%s12944_s3 + $0x50] sm:$0xff]  }
 0x247   : > { %9124 = vmatpush3.bf16.msra.mxu0 %v10254_v18 }
 0x248   : > { %9125 = vmatprep.subr.bf16.mxu0 %v10255_v8 }
 0x24b   : > { %9126 = vmatpush3.bf16.msra.mxu0 %v10257_v29  ;;  %v10261_v29 = vld [vmem:[%s12944_s3 + $0x98] sm:$0xff]  }
 0x24c   : > { %9127 = vmatprep.subr.bf16.mxu0 %v10258_v53  ;;  %v10264_v53 = vld [vmem:[%s12944_s3 + $0xa0] sm:$0xff]  }
 0x24f   : > { %9128 = vmatpush3.bf16.msra.mxu0 %v10260_v60  ;;  %v10265_v60 = vld [vmem:[%s12944_s3 + $0x48] sm:$0xff]  }
 0x250   : > { %9151 = vmatprep.subr.bf16.mxu0 %v10262_v4  ;;  %v3977_v4 = vld [vmem:[#allocation2 + $0xc0] sm:$0xff] }
 0x26d   : > { %v4158_v43 = vpop.permute.xlu1 %4157 }
 0x26e   : > { %4225 = vst.msk [vmem:[#allocation3 + $0x70] sm:$0xff] %vm3644_vm12, %v4158_v43 }
 0x271   : > { %v3872_v26 = vpop.permute.xlu1 %3871 }
 0x272   : > { %3938 = vst.msk [vmem:[#allocation3 + $0x80] sm:$0xff] %vm3644_vm12, %v3872_v26  ;;  %v4160_v37 = vpop.permute.xlu0 %4159 }
 0x273   : > { %4226 = vst.msk [vmem:[#allocation3 + $0x88] sm:$0xff] %vm3644_vm12, %v4160_v37 }
 0x275   : > { %v3874_v31 = vpop.permute.xlu1 %3873  ;;  %v4916_v25 = vld [vmem:[#allocation3 + $0x70] sm:$0xff] }
 0x276   : > { %3939 = vst.msk [vmem:[#allocation3 + $0x98] sm:$0xff] %vm3644_vm12, %v3874_v31  ;;  %v3583_v57 = vpop.permute.xlu0 %3582  ;;  %9799 = vmatprep.mubr.bf16.mxu1 %v4916_v25 }
 0x277   : > { %3650 = vst.msk [vmem:[#allocation3 + $0x78] sm:$0xff] %vm3644_vm12, %v3583_v57 }
 0x279   : > { %v4918_v36 = vld [vmem:[#allocation3 + $0x80] sm:$0xff] }
 0x27a   : > { %v1835_v3 = vpop.permute.xlu1 %1834  ;;  %v3585_v41 = vpop.permute.xlu0 %3584  ;;  %5159 = vmatprep.mubr.bf16.mxu0 %v4918_v36  ;;  %v4919_v5 = vld [vmem:[#allocation3 + $0x88] sm:$0xff]  ;;  %v10269_v36 = vld [vmem:[%s12944_s3 + $0x10] sm:$0xff]  }
 0x27b   : > { %v1839_v18 = vmax.f32 %v11129_v49, %v1835_v3  ;;  %3651 = vst.msk [vmem:[#allocation3 + $0x90] sm:$0xff] %vm3644_vm12, %v3585_v41  ;;  %9800 = vmatmul.mubr.bf16.vlgmr.msra.gmra.mrb[56].mxu1 %v4919_v5 }
 0x27c   : > { %9804 = vmatpush3.bf16.msra.mxu1 %v11752_v10 }
 0x27d   : > { %v1841_v8 = vmul.f32 %v11222_v24, %v1839_v18  ;;  %9805 = vmatprep.subr.bf16.mxu1 %v10256_v35  ;;  %v5246_v6 = vld [vmem:[#allocation3 + $0x98] sm:$0xff]  ;;  %v10270_v18 = vld [vmem:[%s12944_s3 + $0xb0] sm:$0xff]  }
 0x27e   : > { %v1963_v33 = vpop.permute.xlu1 %1962  ;;  %v1961_v40 = vpop.permute.xlu0 %1960  ;;  %v4917_v46 = vld [vmem:[#allocation3 + $0x78] sm:$0xff] }
 0x27f   : > { %1843 = vst.msk [vmem:[#allocation2 + $0xc8] sm:$0xff] %vm226_vm0, %v1841_v8  ;;  %v1967_v49 = vmax.f32 %v11328_v22, %v1963_v33  ;;  %v1966_v45 = vmax.f32 %v11326_v21, %v1961_v40  ;;  %5160 = vmatmul.mubr.bf16.gmra.mrb[68].mxu0 %v4917_v46  ;;  %v10263_v21 = vld [vmem:[%s12944_s3] sm:$0xff]  }
 0x280   : > { %9806 = vmatpush3.bf16.msra.mxu1 %v10256_v35  ;;  %5482 = vmatprep.mubr.bf16.mxu0 %v5246_v6  ;;  %v10271_v6 = vld [vmem:[%s12944_s3 + $0x58] sm:$0xff]  }
 0x281   : > { %v1969_v23 = vmul.f32 %v11222_v24, %v1967_v49  ;;  %v1968_v10 = vmul.f32 %v11079_v44, %v1966_v45  ;;  %9807 = vmatprep.subr.bf16.mxu1 %v10259_v28  ;;  %v10272_v49 = vld [vmem:[%s12944_s3 + $0x18] sm:$0xff]  }
 0x282   : > { %v2089_v30 = vpop.permute.xlu0 %2088 }
 0x283   : > { %1971 = vst.msk [vmem:[#allocation2 + $0xd8] sm:$0xff] %vm226_vm0, %v1969_v23  ;;  %1970 = vst.msk [vmem:[#allocation2 + $0xd0] sm:$0xff] %vm226_vm0, %v1968_v10  ;;  %v2094_v22 = vmax.f32 %v11343_v42, %v2089_v30  ;;  %v5245_v42 = vld [vmem:[#allocation3 + $0x90] sm:$0xff]  ;;  %v10273_v23 = vld [vmem:[%s12944_s3 + $0xb8] sm:$0xff]  }
 0x284   : > { %9808 = vmatpush3.bf16.msra.mxu1 %v10259_v28  ;;  %v10274_v10 = vld [vmem:[%s12944_s3 + $0x60] sm:$0xff]  }
 0x285   : > { %v2096_v52 = vmul.f32 %v11079_v44, %v2094_v22  ;;  %9809 = vmatprep.subr.bf16.mxu1 %v10261_v29  ;;  %v10275_v30 = vld [vmem:[%s12944_s3 + $0x20] sm:$0xff]  }
 0x286   : > { %v4162_v58 = vpop.permute.xlu1 %4161  ;;  %v3978_v11 = vld [vmem:[#allocation2 + $0xc8] sm:$0xff] }
 0x287   : > { %4227 = vst.msk [vmem:[#allocation3 + $0xa0] sm:$0xff] %vm3644_vm12, %v4162_v58  ;;  %v4015_v13 = vpack.c.bf16 %v3978_v11, %v3977_v4  ;;  %5483 = vmatmul.mubr.bf16.vlgmr.msra.gmra.mrb[72].mxu0 %v5245_v42  ;;  %v4073_v37 = vld [vmem:[#allocation2 + $0xc1] sm:$0xff] }
 0x288   : > { %2098 = vst.msk [vmem:[#allocation2 + $0xe0] sm:$0xff] %vm226_vm0, %v2096_v52  ;;  %9810 = vmatpush3.bf16.msra.mxu1 %v10261_v29  ;;  %9152 = vmatpush3.bf16.msra.mxu0 %v10263_v21  ;;  %v10276_v58 = vld [vmem:[%s12944_s3 + $0x68] sm:$0xff]  }
 0x289   : > { %4039 = vst.msk [vmem:[#allocation3 + $0x100] sm:$0xff] %vm226_vm0, %v4015_v13  ;;  %3752 = vst.msk [vmem:[#allocation3 + $0x110] sm:$0xff] %vm226_vm0, %v4015_v13  ;;  %9811 = vmatprep.subr.bf16.mxu1 %v10264_v53  ;;  %9153 = vmatprep.subr.bf16.mxu0 %v10265_v60  ;;  %v4164_v26 = vpop.permute.xlu0 %4163  ;;  %v10278_v11 = vld [vmem:[%s12944_s3 + $0x28] sm:$0xff]  }
 0x28a   : > { %3464 = vst.msk [vmem:[#allocation3 + $0x120] sm:$0xff] %vm226_vm0, %v4015_v13  ;;  %v3876_v15 = vpop.permute.xlu1 %3875  ;;  %v3980_v43 = vld [vmem:[#allocation2 + $0xd8] sm:$0xff]  ;;  %v4074_v31 = vld [vmem:[#allocation2 + $0xc9] sm:$0xff] }
 0x28b   : > { %3940 = vst.msk [vmem:[#allocation3 + $0xb0] sm:$0xff] %vm3644_vm12, %v3876_v15  ;;  %v3979_v25 = vld [vmem:[#allocation2 + $0xd0] sm:$0xff]  ;;  %4228 = vst.msk [vmem:[#allocation3 + $0xb8] sm:$0xff] %vm3644_vm12, %v4164_v26  ;;  %v4111_v57 = vpack.c.bf16 %v4074_v31, %v4073_v37  ;;  %v10282_v37 = vld [vmem:[%s12944_s3 + $0x78] sm:$0xff]  }
 0x28c   : > { %v4016_v3 = vpack.c.bf16 %v3980_v43, %v3979_v25  ;;  %9812 = vmatpush3.bf16.msra.mxu1 %v10264_v53  ;;  %9154 = vmatpush3.bf16.msra.mxu0 %v10266_v14  ;;  %v4075_v8 = vld [vmem:[#allocation2 + $0xd1] sm:$0xff] }
 0x28d   : > { %4169 = vrot.lane.b32.xlu1 %v4111_v57, %s10467_s13  ;;  %9813 = vmatprep.subr.bf16.mxu1 %v10267_v17  ;;  %v10281_v43 = vld [vmem:[%s12944_s3 + $0x30] sm:$0xff]  }
 0x28e   : > { %v5247_v35 = vld [vmem:[#allocation3 + $0xa0] sm:$0xff]  ;;  %4040 = vst.msk [vmem:[#allocation3 + $0x118] sm:$0xff] %vm226_vm0, %v4016_v3  ;;  %3753 = vst.msk [vmem:[#allocation3 + $0x128] sm:$0xff] %vm226_vm0, %v4016_v3  ;;  %v3878_v41 = vpop.permute.xlu1 %3877  ;;  %9155 = vmatprep.subr.bf16.mxu0 %v10268_v19  ;;  %v3587_v5 = vpop.permute.xlu0 %3586 }
 0x28f   : > { %3465 = vst.msk [vmem:[#allocation3 + $0x138] sm:$0xff] %vm226_vm0, %v4016_v3  ;;  %9819 = vmatprep.mubr.bf16.mxu1 %v5247_v35  ;;  %v4076_v33 = vld [vmem:[#allocation2 + $0xd9] sm:$0xff]  ;;  %v10283_v25 = vld [vmem:[%s12944_s3 + $0x90] sm:$0xff]  }
 0x290   : > { %3941 = vst.msk [vmem:[#allocation3 + $0xc8] sm:$0xff] %vm3644_vm12, %v3878_v41  ;;  %3652 = vst.msk [vmem:[#allocation3 + $0xa8] sm:$0xff] %vm3644_vm12, %v3587_v5  ;;  %v11871_v28 = vpack.c.bf16 %v4076_v33, %v4075_v8  ;;  %9814 = vmatpush3.bf16.msra.mxu1 %v10267_v17  ;;  %9156 = vmatpush3.bf16.msra.mxu0 %v10269_v36  ;;  %v10280_v17 = vld [vmem:[%s12944_s3 + $0x88] sm:$0xff]   ;;  %v10284_v35 = vld [vmem:[%s12944_s3 + $0x38] sm:$0xff]  }
 0x291   : > { %3883 = vrot.lane.b32.xlu1 %v4111_v57, %s10467_s13  ;;  %9815 = vmatprep.subr.bf16.mxu1 %v10270_v18  ;;  %v10286_v41 = vld [vmem:[%s12944_s3 + $0x40] sm:$0xff]  }
 0x292   : > { %4171 = vrot.lane.b32.xlu0 %v11871_v28, %s10467_s13  ;;  %v5249_v40 = vld [vmem:[#allocation3 + $0xb0] sm:$0xff]  ;;  %v2091_v46 = vpop.permute.xlu1 %2090  ;;  %9157 = vmatprep.subr.bf16.mxu0 %v10271_v6  ;;  %v3589_v45 = vpop.permute.xlu0 %3588  ;;  %v5250_v14 = vld [vmem:[#allocation3 + $0xb8] sm:$0xff] }
 0x293   : > { %v2095_v29 = vmax.f32 %v11348_v47, %v2091_v46  ;;  %3653 = vst.msk [vmem:[#allocation3 + $0xc0] sm:$0xff] %vm3644_vm12, %v3589_v45  ;;  %5490 = vmatprep.mubr.bf16.mxu0 %v5249_v40 }
 0x294   : > { %9816 = vmatpush3.bf16.msra.mxu1 %v10270_v18  ;;  %9158 = vmatpush3.bf16.msra.mxu0 %v10272_v49  ;;  %v10285_v18 = vld [vmem:[%s12944_s3 + $0x98] sm:$0xff]  }
 0x295   : > { %v2097_v22 = vmul.f32 %v11222_v24, %v2095_v29  ;;  %3885 = vrot.lane.b32.xlu1 %v11871_v28, %s10467_s13  ;;  %9817 = vmatprep.subr.bf16.mxu1 %v10273_v23  ;;  %v10287_v29 = vld [vmem:[%s12944_s3] sm:$0xff]  }
 0x296   : > { %3594 = vrot.lane.b32.xlu0 %v11668_v61, %s10467_s13  ;;  %v2219_v21 = vpop.permute.xlu1 %2218  ;;  %9159 = vmatprep.subr.bf16.mxu0 %v10274_v10  ;;  %v2217_v47 = vpop.permute.xlu0 %2216  ;;  %v10277_v61 = vld [vmem:[%s12944_s3 + $0x80] sm:$0xff]  }
 0x297   : > { %v5248_v53 = vld [vmem:[#allocation3 + $0xa8] sm:$0xff]  ;;  %2099 = vst.msk [vmem:[#allocation2 + $0xe8] sm:$0xff] %vm226_vm0, %v2097_v22  ;;  %v2223_v60 = vmax.f32 %v11385_v16, %v2219_v21  ;;  %v2222_v4 = vmax.f32 %v11382_v55, %v2217_v47  ;;  %v10279_v55 = vld [vmem:[%s12944_s3 + $0x70] sm:$0xff]  }
 0x298   : > { %v5577_v52 = vld [vmem:[#allocation3 + $0xc8] sm:$0xff]  ;;  %5491 = vmatmul.mubr.bf16.gmra.mrb[76].mxu0 %v5248_v53  ;;  %9818 = vmatpush3.bf16.msra.mxu1 %v10273_v23 }
 0x299   : > { %9160 = vmatpush3.bf16.msra.mxu0 %v10275_v30  ;;  %v2225_v42 = vmul.f32 %v11222_v24, %v2223_v60  ;;  %v2224_v13 = vmul.f32 %v11079_v44, %v2222_v4  ;;  %5813 = vmatprep.mubr.bf16.mxu0 %v5577_v52  ;;  %v10288_v30 = vld [vmem:[%s12944_s3 + $0xa0] sm:$0xff]   ;;  %v10289_v4 = vld [vmem:[%s12944_s3 + $0x48] sm:$0xff]  }
 0x29a   : > { %3596 = vrot.lane.b32.xlu0 %v4111_v57, %s10467_s13  ;;  %2602 = vrot.lane.b32.xlu1 %v11446_v62, %s10467_s13  ;;  %v4166_v16 = vpop.permute.xlu1 %4165  ;;  %v2345_v15 = vpop.permute.xlu0 %2344  ;;  %v3981_v57 = vld [vmem:[#allocation2 + $0xe0] sm:$0xff]  ;;  %v5576_v10 = vld [vmem:[#allocation3 + $0xc0] sm:$0xff] }
 0x29b   : > { %9161 = vmatprep.subr.bf16.mxu0 %v10276_v58  ;;  %2227 = vst.msk [vmem:[#allocation2 + $0xf8] sm:$0xff] %vm226_vm0, %v2225_v42  ;;  %2226 = vst.msk [vmem:[#allocation2 + $0xf0] sm:$0xff] %vm226_vm0, %v2224_v13  ;;  %9820 = vmatmul.mubr.bf16.vlgmr.msra.gmra.mrb[60].mxu1 %v5250_v14  ;;  %v2350_v19 = vmax.f32 %v11391_v32, %v2345_v15  ;;  %v10291_v13 = vld [vmem:[%s12944_s3 + $0xa8] sm:$0xff]   ;;  %v10292_v14 = vld [vmem:[%s12944_s3 + $0x50] sm:$0xff]  }
 0x29c   : > { %4229 = vst.msk [vmem:[#allocation3 + $0xd0] sm:$0xff] %vm3644_vm12, %v4166_v16  ;;  %9823 = vmatprep.subr.bf16.mxu1 %v10277_v61 }
 0x29d   : > { %9162 = vmatpush3.bf16.msra.mxu0 %v10278_v11  ;;  %9824 = vmatpush3.bf16.msra.mxu1 %v10277_v61  ;;  %v2352_v26 = vmul.f32 %v11079_v44, %v2350_v19 }
 0x29e   : > { %2728 = vrot.lane.b32.xlu0 %v11604_v20, %s10467_s13  ;;  %9163 = vmatprep.subr.bf16.mxu0 %v10279_v55  ;;  %v3880_v32 = vpop.permute.xlu1 %3879  ;;  %v4168_v31 = vpop.permute.xlu0 %4167  ;;  %v3982_v3 = vld [vmem:[#allocation2 + $0xe8] sm:$0xff] }
 0x29f   : > { %2730 = vrot.lane.b32.xlu1 %v11610_v0, %s10467_s13  ;;  %9825 = vmatprep.subr.bf16.mxu1 %v10280_v17  ;;  %2354 = vst.msk [vmem:[#allocation2 + $0x100] sm:$0xff] %vm226_vm0, %v2352_v26  ;;  %v4017_v36 = vpack.c.bf16 %v3982_v3, %v3981_v57  ;;  %v4077_v6 = vld [vmem:[#allocation2 + $0xe1] sm:$0xff] }
 0x2a0   : > { %3942 = vst.msk [vmem:[#allocation3 + $0xe0] sm:$0xff] %vm3644_vm12, %v3880_v32  ;;  %4230 = vst.msk [vmem:[#allocation3 + $0xe8] sm:$0xff] %vm3644_vm12, %v4168_v31  ;;  %v10296_v31 = vld [vmem:[%s12944_s3 + $0x18] sm:$0xff]   ;;  %v10298_v3 = vld [vmem:[%s12944_s3 + $0x60] sm:$0xff]  }
 0x2a1   : > { %9164 = vmatpush3.bf16.msra.mxu0 %v10281_v43  ;;  %9826 = vmatpush3.bf16.msra.mxu1 %v10280_v17  ;;  %4041 = vst.msk [vmem:[#allocation3 + $0x130] sm:$0xff] %vm226_vm0, %v4017_v36  ;;  %3754 = vst.msk [vmem:[#allocation3 + $0x140] sm:$0xff] %vm226_vm0, %v4017_v36  ;;  %v10294_v43 = vld [vmem:[%s12944_s3 + $0xb0] sm:$0xff]  }
 0x2a2   : > { %2856 = vrot.lane.b32.xlu0 %v11631_v51, %s10467_s13  ;;  %9165 = vmatprep.subr.bf16.mxu0 %v10282_v37  ;;  %3466 = vst.msk [vmem:[#allocation3 + $0x150] sm:$0xff] %vm226_vm0, %v4017_v36  ;;  %v3882_v5 = vpop.permute.xlu1 %3881  ;;  %v3591_v8 = vpop.permute.xlu0 %3590  ;;  %v4078_v49 = vld [vmem:[#allocation2 + $0xe9] sm:$0xff]  ;;  %v3984_v45 = vld [vmem:[#allocation2 + $0xf8] sm:$0xff] }
 0x2a3   : > { %9827 = vmatprep.subr.bf16.mxu1 %v10283_v25  ;;  %v5578_v33 = vld [vmem:[#allocation3 + $0xd0] sm:$0xff]  ;;  %3943 = vst.msk [vmem:[#allocation3 + $0xf8] sm:$0xff] %vm3644_vm12, %v3882_v5  ;;  %3654 = vst.msk [vmem:[#allocation3 + $0xd8] sm:$0xff] %vm3644_vm12, %v3591_v8  ;;  %v11955_v40 = vpack.c.bf16 %v4078_v49, %v4077_v6  ;;  %v3983_v46 = vld [vmem:[#allocation2 + $0xf0] sm:$0xff] }
 0x2a4   : > { %9839 = vmatprep.mubr.bf16.mxu1 %v5578_v33  ;;  %v4018_v23 = vpack.c.bf16 %v3984_v45, %v3983_v46  ;;  %v4079_v53 = vld [vmem:[#allocation2 + $0xf1] sm:$0xff]  ;;  %v10306_v6 = vld [vmem:[%s12944_s3 + $0x80] sm:$0xff]   ;;  %v10301_v46 = vld [vmem:[%s12944_s3 + $0x28] sm:$0xff]  }
 0x2a5   : > { %9166 = vmatpush3.bf16.msra.mxu0 %v10284_v35  ;;  %9828 = vmatpush3.bf16.msra.mxu1 %v10283_v25  ;;  %v10299_v35 = vld [vmem:[%s12944_s3 + $0x20] sm:$0xff]   ;;  %v10302_v45 = vld [vmem:[%s12944_s3 + $0x70] sm:$0xff]  }
 0x2a6   : > { %4173 = vrot.lane.b32.xlu1 %v11955_v40, %s10467_s13  ;;  %9829 = vmatprep.subr.bf16.mxu1 %v10285_v18  ;;  %v2347_v22 = vpop.permute.xlu1 %2346  ;;  %v3593_v21 = vpop.permute.xlu0 %3592  ;;  %v4080_v52 = vld [vmem:[#allocation2 + $0xf9] sm:$0xff]  ;;  %4042 = vst.msk [vmem:[#allocation3 + $0x148] sm:$0xff] %vm226_vm0, %v4018_v23  ;;  %3755 = vst.msk [vmem:[#allocation3 + $0x158] sm:$0xff] %vm226_vm0, %v4018_v23 }
 0x2a7   : > { %9189 = vmatprep.subr.bf16.mxu0 %v10286_v41  ;;  %v5580_v47 = vld [vmem:[#allocation3 + $0xe0] sm:$0xff]  ;;  %3467 = vst.msk [vmem:[#allocation3 + $0x168] sm:$0xff] %vm226_vm0, %v4018_v23  ;;  %v2351_v58 = vmax.f32 %v11400_v50, %v2347_v22  ;;  %v11970_v60 = vpack.c.bf16 %v4080_v52, %v4079_v53  ;;  %v10290_v50 = vld [vmem:[%s12944_s3 + $0x8] sm:$0xff]   ;;  %v3985_v25 = vld [vmem:[#allocation2 + $0x100] sm:$0xff] }
 0x2a8   : > { %5814 = vmatmul.mubr.bf16.vlgmr.msra.gmra.mrb[80].mxu0 %v5576_v10  ;;  %3655 = vst.msk [vmem:[#allocation3 + $0xf0] sm:$0xff] %vm3644_vm12, %v3593_v21  ;;  %v5581_v23 = vld [vmem:[#allocation3 + $0xe8] sm:$0xff]  ;;  %v10307_v22 = vld [vmem:[%s12944_s3 + $0x88] sm:$0xff]   ;;  %v10303_v21 = vld [vmem:[%s12944_s3 + $0x30] sm:$0xff]  }
 0x2a9   : > { %5821 = vmatprep.mubr.bf16.mxu0 %v5580_v47  ;;  %9830 = vmatpush3.bf16.msra.mxu1 %v10285_v18  ;;  %v2353_v61 = vmul.f32 %v11222_v24, %v2351_v58  ;;  %v10300_v18 = vld [vmem:[%s12944_s3 + $0x68] sm:$0xff]   ;;  %v10304_v47 = vld [vmem:[%s12944_s3 + $0x78] sm:$0xff]   ;;  %v10308_v53 = vld [vmem:[%s12944_s3 + $0x90] sm:$0xff]  }
 0x2aa   : > { %9190 = vmatpush3.bf16.msra.mxu0 %v10287_v29  ;;  %3887 = vrot.lane.b32.xlu1 %v11955_v40, %s10467_s13  ;;  %v2475_v11 = vpop.permute.xlu1 %2474  ;;  %v2473_v42 = vpop.permute.xlu0 %2472  ;;  %v5908_v37 = vld [vmem:[#allocation3 + $0xf8] sm:$0xff]  ;;  %v10305_v52 = vld [vmem:[%s12944_s3 + $0x38] sm:$0xff]  }
 0x2ab   : > { %4175 = vrot.lane.b32.xlu0 %v11970_v60, %s10467_s13  ;;  %9831 = vmatprep.subr.bf16.mxu1 %v10288_v30  ;;  %2355 = vst.msk [vmem:[#allocation2 + $0x108] sm:$0xff] %vm226_vm0, %v2353_v61  ;;  %v2479_v55 = vmax.f32 %v11406_v59, %v2475_v11  ;;  %v2478_v16 = vmax.f32 %v11403_v34, %v2473_v42  ;;  %v10293_v59 = vld [vmem:[%s12944_s3 + $0x10] sm:$0xff]   ;;  %v5579_v34 = vld [vmem:[#allocation3 + $0xd8] sm:$0xff]  ;;  %v10309_v58 = vld [vmem:[%s12944_s3 + $0x98] sm:$0xff]  }
 0x2ac   : > { %9191 = vmatprep.subr.bf16.mxu0 %v10289_v4  ;;  %v10310_v4 = vld [vmem:[%s12944_s3 + $0x40] sm:$0xff]  }
 0x2ad   : > { %9832 = vmatpush3.bf16.msra.mxu1 %v10288_v30  ;;  %v2481_v15 = vmul.f32 %v11222_v24, %v2479_v55  ;;  %v2480_v17 = vmul.f32 %v11079_v44, %v2478_v16  ;;  %v12092_v11 = vld [vmem:[%s12945_s4] ss:$0 sm:$0xff] }
 0x2ae   : > { %9192 = vmatpush3.bf16.msra.mxu0 %v10290_v50  ;;  %3889 = vrot.lane.b32.xlu1 %v11970_v60, %s10467_s13  ;;  %v2601_v19 = vpop.permute.xlu0 %2600  ;;  %v10312_v42 = vld [vmem:[%s12944_s3 + $0xa0] sm:$0xff]  }
 0x2af   : > { %3598 = vrot.lane.b32.xlu0 %v11871_v28, %s10467_s13  ;;  %9833 = vmatprep.subr.bf16.mxu1 %v10291_v13  ;;  %2483 = vst.msk [vmem:[#allocation2 + $0x118] sm:$0xff] %vm226_vm0, %v2481_v15  ;;  %2482 = vst.msk [vmem:[#allocation2 + $0x110] sm:$0xff] %vm226_vm0, %v2480_v17  ;;  %v2606_v26 = vmax.f32 %v11409_v1, %v2601_v19  ;;  %v10295_v28 = vld [vmem:[%s12944_s3 + $0x58] sm:$0xff]   ;;  %v10315_v19 = vld [vmem:[%s12944_s3 + $0xa8] sm:$0xff]  }
 0x2b0   : > { %5822 = vmatmul.mubr.bf16.gmra.mrb[84].mxu0 %v5579_v34  ;;  %9193 = vmatprep.subr.bf16.mxu0 %v10292_v14  ;;  %v10297_v1 = vld [vmem:[%s12944_s3 + $0xb8] sm:$0xff]   ;;  %v10313_v14 = vld [vmem:[%s12944_s3 + $0x48] sm:$0xff]  }
 0x2b1   : > { %9834 = vmatpush3.bf16.msra.mxu1 %v10291_v13  ;;  %6144 = vmatprep.mubr.bf16.mxu0 %v5908_v37  ;;  %v2608_v32 = vmul.f32 %v11079_v44, %v2606_v26  ;;  %v5907_v13 = vld [vmem:[#allocation3 + $0xf0] sm:$0xff]  ;;  %v10314_v34 = vld [vmem:[%s12944_s3 + $0x8] sm:$0xff]   ;;  %v10317_v37 = vld [vmem:[%s12944_s3 + $0x10] sm:$0xff]  }
 0x2b2   : > { %9194 = vmatpush3.bf16.msra.mxu0 %v10293_v59  ;;  %2858 = vrot.lane.b32.xlu1 %v11709_v7, %s10467_s13  ;;  %v3986_v57 = vld [vmem:[#allocation2 + $0x108] sm:$0xff] }
 0x2b3   : > { %3600 = vrot.lane.b32.xlu0 %v11955_v40, %s10467_s13  ;;  %9835 = vmatprep.subr.bf16.mxu1 %v10294_v43  ;;  %2610 = vst.msk [vmem:[#allocation2 + $0x120] sm:$0xff] %vm226_vm0, %v2608_v32  ;;  %v4019_v36 = vpack.c.bf16 %v3986_v57, %v3985_v25  ;;  %v4081_v41 = vld [vmem:[#allocation2 + $0x101] sm:$0xff]  ;;  %v10319_v32 = vld [vmem:[%s12944_s3 + $0x58] sm:$0xff]  }
 0x2b4   : > { %9195 = vmatprep.subr.bf16.mxu0 %v10295_v28  ;;  %v10318_v28 = vld [vmem:[%s12944_s3 + $0xb0] sm:$0xff]   ;;  %v10322_v25 = vld [vmem:[%s12944_s3 + $0x60] sm:$0xff]  }
 0x2b5   : > { %9836 = vmatpush3.bf16.msra.mxu1 %v10294_v43  ;;  %4043 = vst.msk [vmem:[#allocation3 + $0x160] sm:$0xff] %vm226_vm0, %v4019_v36  ;;  %3756 = vst.msk [vmem:[#allocation3 + $0x170] sm:$0xff] %vm226_vm0, %v4019_v36  ;;  %v10316_v43 = vld [vmem:[%s12944_s3 + $0x50] sm:$0xff]  }
 0x2b6   : > { %9196 = vmatpush3.bf16.msra.mxu0 %v10296_v31  ;;  %2986 = vrot.lane.b32.xlu1 %v11728_v9, %s10467_s13  ;;  %3468 = vst.msk [vmem:[#allocation3 + $0x180] sm:$0xff] %vm226_vm0, %v4019_v36  ;;  %v4082_v5 = vld [vmem:[#allocation2 + $0x109] sm:$0xff]  ;;  %v3988_v49 = vld [vmem:[#allocation2 + $0x118] sm:$0xff]  ;;  %v10323_v36 = vld [vmem:[%s12944_s3 + $0x20] sm:$0xff]  }
 0x2b7   : > { %2984 = vrot.lane.b32.xlu0 %v11722_v54, %s10467_s13  ;;  %9837 = vmatprep.subr.bf16.mxu1 %v10297_v1  ;;  %v3987_v8 = vld [vmem:[#allocation2 + $0x110] sm:$0xff]  ;;  %v4115_v33 = vpack.c.bf16 %v4082_v5, %v4081_v41  ;;  %v10320_v31 = vld [vmem:[%s12944_s3 + $0x18] sm:$0xff]   ;;  %v10324_v5 = vld [vmem:[%s12944_s3 + $0x68] sm:$0xff]  }
 0x2b8   : > { %9197 = vmatprep.subr.bf16.mxu0 %v10298_v3  ;;  %v4020_v40 = vpack.c.bf16 %v3988_v49, %v3987_v8  ;;  %v4083_v10 = vld [vmem:[#allocation2 + $0x111] sm:$0xff] }
 0x2b9   : > { %9838 = vmatpush3.bf16.msra.mxu1 %v10297_v1  ;;  %v10321_v1 = vld [vmem:[%s12944_s3 + $0xb8] sm:$0xff]  }
 0x2ba   : > { %9198 = vmatpush3.bf16.msra.mxu0 %v10299_v35  ;;  %4177 = vrot.lane.b32.xlu1 %v4115_v33, %s10467_s13  ;;  %v4084_v29 = vld [vmem:[#allocation2 + $0x119] sm:$0xff]  ;;  %4044 = vst.msk [vmem:[#allocation3 + $0x178] sm:$0xff] %vm226_vm0, %v4020_v40  ;;  %3757 = vst.msk [vmem:[#allocation3 + $0x188] sm:$0xff] %vm226_vm0, %v4020_v40 }
 0x2bb   : > { %3112 = vrot.lane.b32.xlu0 %v11744_v63, %s10467_s13  ;;  %9199 = vmatprep.subr.bf16.mxu0 %v10300_v18  ;;  %3469 = vst.msk [vmem:[#allocation3 + $0x198] sm:$0xff] %vm226_vm0, %v4020_v40  ;;  %v12053_v30 = vpack.c.bf16 %v4084_v29, %v4083_v10  ;;  %v12141_v35 = vld [vmem:[%s12944_s3 + $0x80] sm:$0xff]   ;;  %v10326_v40 = vld [vmem:[%s12944_s3 + $0x28] sm:$0xff]  }
 0x2bc   : > { %9840 = vmatmul.mubr.bf16.vlgmr.msra.gmra.mrb[64].mxu1 %v5581_v23  ;;  %9843 = vmatprep.subr.bf16.mxu1 %v10306_v6  ;;  %v10327_v23 = vld [vmem:[%s12944_s3 + $0x70] sm:$0xff]  }
 0x2bd   : > { %9844 = vmatpush3.bf16.msra.mxu1 %v10306_v6 }
 0x2be   : > { %9200 = vmatpush3.bf16.msra.mxu0 %v10301_v46  ;;  %3891 = vrot.lane.b32.xlu1 %v4115_v33, %s10467_s13 }
 0x2bf   : > { %4179 = vrot.lane.b32.xlu0 %v12053_v30, %s10467_s13  ;;  %9201 = vmatprep.subr.bf16.mxu0 %v10302_v45 }
 0x2c0   : > { %9845 = vmatprep.subr.bf16.mxu1 %v10307_v22 }
 0x2c1   : > { %9846 = vmatpush3.bf16.msra.mxu1 %v10307_v22 }
 0x2c2   : > { %9202 = vmatpush3.bf16.msra.mxu0 %v10303_v21  ;;  %3893 = vrot.lane.b32.xlu1 %v12053_v30, %s10467_s13  ;;  %v10329_v21 = vld [vmem:[%s12944_s3 + $0x30] sm:$0xff]  }
 0x2c3   : > { %3602 = vrot.lane.b32.xlu0 %v11970_v60, %s10467_s13  ;;  %9203 = vmatprep.subr.bf16.mxu0 %v10304_v47  ;;  %v10311_v60 = vld [vmem:[%s12944_s3] sm:$0xff]  }
 0x2c4   : > { %9847 = vmatprep.subr.bf16.mxu1 %v10308_v53 }
 0x2c5   : > { %9848 = vmatpush3.bf16.msra.mxu1 %v10308_v53  ;;  %v9015_v61 = vpop.f32.mrb[48].mxu0 }
 0x2c6   : > { %9204 = vmatpush3.bf16.msra.mxu0 %v10305_v52  ;;  %3114 = vrot.lane.b32.xlu1 %v11773_v38, %s10467_s13  ;;  %v9016_v50 = vpop.f32.mrb[49].mxu0  ;;  %v10330_v52 = vld [vmem:[%s12944_s3 + $0x78] sm:$0xff]  }
 0x2c7   : > { %3604 = vrot.lane.b32.xlu0 %v4115_v33, %s10467_s13  ;;  %9849 = vmatprep.subr.bf16.mxu1 %v10309_v58  ;;  %v9017_v55 = vadd.f32 %v9016_v50, %v9015_v61  ;;  %v9018_v16 = vpop.f32.mrb[50].mxu0 }
 0x2c8   : > { %9227 = vmatprep.subr.bf16.mxu0 %v10310_v4  ;;  %v9019_v15 = vpop.f32.mrb[51].mxu0 }
 0x2c9   : > { %6145 = vmatmul.mubr.bf16.vlgmr.msra.gmra.mrb[88].mxu0 %v5907_v13  ;;  %9850 = vmatpush3.bf16.msra.mxu1 %v10309_v58  ;;  %v9020_v17 = vadd.f32 %v9019_v15, %v9018_v16  ;;  %v4491_v59 = vadd.f32 %v9017_v55, %v12092_v11  ;;  %v10334_v55 = vld [vmem:[%s12944_s3 + $0x40] sm:$0xff]  }
 0x2ca   : > { %3242 = vrot.lane.b32.xlu1 %v11790_v56, %s10467_s13  ;;  %9228 = vmatpush3.bf16.msra.mxu0 %v10311_v60  ;;  %v10332_v60 = vld [vmem:[%s12944_s3 + $0x38] sm:$0xff]  }
 0x2cb   : > { %3240 = vrot.lane.b32.xlu0 %v11780_v48, %s10467_s13  ;;  %9851 = vmatprep.subr.bf16.mxu1 %v10312_v42  ;;  %v4494_v26 = vadd.f32 %v9020_v17, %v12092_v11 }
 0x2cc   : > { %9229 = vmatprep.subr.bf16.mxu0 %v10313_v14 }
 0x2cd   : > { %9852 = vmatpush3.bf16.msra.mxu1 %v10312_v42 }
 0x2ce   : > { %9230 = vmatpush3.bf16.msra.mxu0 %v10314_v34  ;;  %9853 = vmatprep.subr.bf16.mxu1 %v10315_v19 }
 0x2cf   : > { %3368 = vrot.lane.b32.xlu0 %v11795_v27, %s10467_s13  ;;  %9231 = vmatprep.subr.bf16.mxu0 %v10316_v43 }
 0x2d1   : > { %9854 = vmatpush3.bf16.msra.mxu1 %v10315_v19 }
 0x2d2   : > { %9232 = vmatpush3.bf16.msra.mxu0 %v10317_v37  ;;  %9855 = vmatprep.subr.bf16.mxu1 %v10318_v28 }
 0x2d3   : > { %9233 = vmatprep.subr.bf16.mxu0 %v10319_v32 }
 0x2d4   : > { %v9761_v57 = vpop.f32.mrb[48].mxu1 }
 0x2d5   : > { %9856 = vmatpush3.bf16.msra.mxu1 %v10318_v28  ;;  %v4539_v3 = vpop.f32.mrb[49].mxu1 }
 0x2d6   : > { %9234 = vmatpush3.bf16.msra.mxu0 %v10320_v31  ;;  %9857 = vmatprep.subr.bf16.mxu1 %v10321_v1  ;;  %v4540_v18 = vadd.f32 %v4539_v3, %v4491_v59  ;;  %v9762_v41 = vpop.f32.mrb[50].mxu1 }
 0x2d7   : > { %9235 = vmatprep.subr.bf16.mxu0 %v10322_v25  ;;  %v4542_v8 = vpop.f32.mrb[51].mxu1 }
 0x2d8   : > { %v4543_v33 = vadd.f32 %v4542_v8, %v4494_v26  ;;  %v4554_v58 = vmax.f32 %v4540_v18, 0.0 }
 0x2d9   : > { %v9021_v6 = vpop.f32.mrb[52].mxu0  ;;  %9858 = vmatpush3.bf16.msra.mxu1 %v10321_v1 }
 0x2da   : > { %v9022_v49 = vpop.f32.mrb[53].mxu0  ;;  %9236 = vmatpush3.bf16.msra.mxu0 %v10323_v36  ;;  %9863 = vmatprep.subr.bf16.mxu1 %v12141_v35  ;;  %v4555_v50 = vmax.f32 %v4543_v33, 0.0 }
 0x2db   : > { %v9023_v46 = vadd.f32 %v9022_v49, %v9021_v6  ;;  %v9024_v45 = vpop.f32.mrb[54].mxu0  ;;  %9237 = vmatprep.subr.bf16.mxu0 %v10324_v5 }
 0x2dc   : > { %v9025_v10 = vpop.f32.mrb[55].mxu0 }
 0x2dd   : > { %v4499_v29 = vadd.f32 %v9023_v46, %v12092_v11  ;;  %v9026_v22 = vadd.f32 %v9025_v10, %v9024_v45 }
 0x2de   : > { %9238 = vmatpush3.bf16.msra.mxu0 %v10326_v40 }
 0x2df   : > { %v4548_v47 = vadd.f32 %v9761_v57, %v4499_v29  ;;  %v4502_v53 = vadd.f32 %v9026_v22, %v12092_v11  ;;  %9239 = vmatprep.subr.bf16.mxu0 %v10327_v23 }
 0x2e1   : > { %v4556_v4 = vmax.f32 %v4548_v47, 0.0  ;;  %v4551_v61 = vadd.f32 %v9762_v41, %v4502_v53 }
 0x2e2   : > { %9240 = vmatpush3.bf16.msra.mxu0 %v10329_v21 }
 0x2e3   : > { %v4557_v42 = vmax.f32 %v4551_v61, 0.0  ;;  %v12164_v13 = vmax.f32 %v4554_v58, %v4556_v4  ;;  %9241 = vmatprep.subr.bf16.mxu0 %v10330_v52 }
 0x2e5   : > { %v12169_v16 = vmax.f32 %v4555_v50, %v4557_v42  ;;  %v9053_v14 = vpop.f32.mrb[56].mxu0 }
 0x2e6   : > { %9242 = vmatpush3.bf16.msra.mxu0 %v10332_v60  ;;  %v9054_v15 = vpop.f32.mrb[57].mxu0 }
 0x2e7   : > { %9265 = vmatprep.subr.bf16.mxu0 %v10334_v55  ;;  %v9055_v17 = vadd.f32 %v9054_v15, %v9053_v14  ;;  %v9056_v59 = vpop.f32.mrb[58].mxu0  ;;  %v10328_v55 = vld [vmem:[%s12944_s3 + $0x88] sm:$0xff]  }
 0x2e8   : > { %v9057_v34 = vpop.f32.mrb[59].mxu0 }
 0x2e9   : > { %v9058_v19 = vadd.f32 %v9057_v34, %v9056_v59  ;;  %v4823_v43 = vadd.f32 %v9055_v17, %v12092_v11 }
 0x2eb   : > { %v4826_v8 = vadd.f32 %v9058_v19, %v12092_v11  ;;  %v10331_v19 = vld [vmem:[%s12944_s3 + $0x90] sm:$0xff]  }
 0x2ed   : > { %v9059_v26 = vpop.f32.mrb[60].mxu0 }
 0x2ee   : > { %v9060_v37 = vpop.f32.mrb[61].mxu0 }
 0x2ef   : > { %v9061_v28 = vadd.f32 %v9060_v37, %v9059_v26  ;;  %v9062_v32 = vpop.f32.mrb[62].mxu0 }
 0x2f0   : > { %v9063_v31 = vpop.f32.mrb[63].mxu0 }
 0x2f1   : > { %v9064_v1 = vadd.f32 %v9063_v31, %v9062_v32  ;;  %v4831_v25 = vadd.f32 %v9061_v28, %v12092_v11 }
 0x2f3   : > { %v4834_v18 = vadd.f32 %v9064_v1, %v12092_v11 }
 0x2f4   : > { %v9781_v57 = vpop.f32.mrb[52].mxu1 }
 0x2f5   : > { %v4880_v3 = vadd.f32 %v9781_v57, %v4831_v25  ;;  %v4871_v36 = vpop.f32.mrb[53].mxu1 }
 0x2f6   : > { %v4872_v41 = vadd.f32 %v4871_v36, %v4823_v43  ;;  %v9782_v5 = vpop.f32.mrb[54].mxu1 }
 0x2f7   : > { %v4888_v33 = vmax.f32 %v4880_v3, 0.0  ;;  %v4883_v6 = vadd.f32 %v9782_v5, %v4834_v18  ;;  %v4874_v49 = vpop.f32.mrb[55].mxu1  ;;  %v10336_v3 = vld [vmem:[%s12944_s3 + $0xa0] sm:$0xff]  }
 0x2f8   : > { %v4886_v40 = vmax.f32 %v4872_v41, 0.0  ;;  %v4875_v46 = vadd.f32 %v4874_v49, %v4826_v8  ;;  %v10337_v41 = vld [vmem:[%s12944_s3 + $0x48] sm:$0xff]   ;;  %v3989_v5 = vld [vmem:[#allocation2 + $0x120] sm:$0xff] }
 0x2f9   : > { %v4889_v45 = vmax.f32 %v4883_v6, 0.0  ;;  %v10338_v6 = vld [vmem:[%s12944_s3 + $0x8] sm:$0xff]  }
 0x2fa   : > { %v12175_v23 = vmax.f32 %v4886_v40, %v4888_v33  ;;  %v4887_v10 = vmax.f32 %v4875_v46, 0.0  ;;  %v10339_v49 = vld [vmem:[%s12944_s3 + $0xa8] sm:$0xff]   ;;  %v10340_v46 = vld [vmem:[%s12944_s3 + $0x50] sm:$0xff]  }
 0x2fc   : > { %v12177_v29 = vmax.f32 %v4887_v10, %v4889_v45 }
 0x2ff   : > { %v4170_v22 = vpop.permute.xlu1 %4169 }
 0x300   : > { %4231 = vst.msk [vmem:[#allocation3 + $0x100] sm:$0xff] %vm3644_vm12, %v4170_v22 }
 0x303   : > { %v3884_v21 = vpop.permute.xlu1 %3883 }
 0x304   : > { %v4172_v47 = vpop.permute.xlu0 %4171  ;;  %3944 = vst.msk [vmem:[#allocation3 + $0x110] sm:$0xff] %vm3644_vm12, %v3884_v21 }
 0x305   : > { %4232 = vst.msk [vmem:[#allocation3 + $0x118] sm:$0xff] %vm3644_vm12, %v4172_v47  ;;  %v9091_v11 = vpop.f32.mrb[64].mxu0 }
 0x306   : > { %v9092_v53 = vpop.f32.mrb[65].mxu0 }
 0x307   : > { %v12182_v52 = vadd.f32 %v9092_v53, %v9091_v11  ;;  %v9094_v58 = vpop.f32.mrb[66].mxu0  ;;  %v3886_v4 = vpop.permute.xlu1 %3885  ;;  %v5909_v61 = vld [vmem:[#allocation3 + $0x100] sm:$0xff] }
 0x308   : > { %3945 = vst.msk [vmem:[#allocation3 + $0x128] sm:$0xff] %vm3644_vm12, %v3886_v4  ;;  %v3595_v60 = vpop.permute.xlu0 %3594  ;;  %v9095_v50 = vpop.f32.mrb[67].mxu0  ;;  %9859 = vmatprep.mubr.bf16.mxu1 %v5909_v61  ;;  %v10341_v53 = vld [vmem:[%s12944_s3 + $0x10] sm:$0xff]  }
 0x309   : > { %3656 = vst.msk [vmem:[#allocation3 + $0x108] sm:$0xff] %vm3644_vm12, %v3595_v60  ;;  %v12186_v42 = vadd.f32 %v9095_v50, %v9094_v58  ;;  %v10342_v58 = vld [vmem:[%s12944_s3 + $0xb0] sm:$0xff]  }
 0x30b   : > { %v5911_v14 = vld [vmem:[#allocation3 + $0x110] sm:$0xff] }
 0x30c   : > { %v5912_v15 = vld [vmem:[#allocation3 + $0x118] sm:$0xff]  ;;  %v2603_v17 = vpop.permute.xlu1 %2602  ;;  %v3597_v59 = vpop.permute.xlu0 %3596  ;;  %6152 = vmatprep.mubr.bf16.mxu0 %v5911_v14 }
 0x30d   : > { %9860 = vmatmul.mubr.bf16.vlgmr.msra.gmra.mrb[68].mxu1 %v5912_v15  ;;  %v2607_v34 = vmax.f32 %v11446_v62, %v2603_v17  ;;  %3657 = vst.msk [vmem:[#allocation3 + $0x120] sm:$0xff] %vm3644_vm12, %v3597_v59  ;;  %v10343_v15 = vld [vmem:[%s12944_s3 + $0x58] sm:$0xff]  }
 0x30e   : > { %9864 = vmatpush3.bf16.msra.mxu1 %v12141_v35  ;;  %v10333_v35 = vld [vmem:[%s12944_s3 + $0x98] sm:$0xff]  }
 0x30f   : > { %9865 = vmatprep.subr.bf16.mxu1 %v10328_v55  ;;  %v2609_v43 = vmul.f32 %v11222_v24, %v2607_v34  ;;  %v6239_v26 = vld [vmem:[#allocation3 + $0x128] sm:$0xff] }
 0x310   : > { %v2729_v28 = vpop.permute.xlu0 %2728  ;;  %v5910_v32 = vld [vmem:[#allocation3 + $0x108] sm:$0xff] }
 0x311   : > { %v2731_v37 = vpop.permute.xlu1 %2730  ;;  %2611 = vst.msk [vmem:[#allocation2 + $0x128] sm:$0xff] %vm226_vm0, %v2609_v43  ;;  %v2734_v62 = vmax.f32 %v11604_v20, %v2729_v28  ;;  %6153 = vmatmul.mubr.bf16.gmra.mrb[92].mxu0 %v5910_v32  ;;  %v10335_v20 = vld [vmem:[%s12944_s3] sm:$0xff]   ;;  %v10344_v59 = vld [vmem:[%s12944_s3 + $0x18] sm:$0xff]  }
 0x312   : > { %v2735_v31 = vmax.f32 %v11610_v0, %v2731_v37  ;;  %9866 = vmatpush3.bf16.msra.mxu1 %v10328_v55  ;;  %6475 = vmatprep.mubr.bf16.mxu0 %v6239_v26  ;;  %v10345_v34 = vld [vmem:[%s12944_s3 + $0xb8] sm:$0xff]   ;;  %v10346_v28 = vld [vmem:[%s12944_s3 + $0x60] sm:$0xff]  }
 0x313   : > { %9867 = vmatprep.subr.bf16.mxu1 %v10331_v19  ;;  %v2736_v25 = vmul.f32 %v11079_v44, %v2734_v62 }
 0x314   : > { %v2737_v1 = vmul.f32 %v11222_v24, %v2735_v31  ;;  %v2857_v57 = vpop.permute.xlu0 %2856  ;;  %v10347_v31 = vld [vmem:[%s12944_s3 + $0x20] sm:$0xff]  }
 0x315   : > { %2738 = vst.msk [vmem:[#allocation2 + $0x130] sm:$0xff] %vm226_vm0, %v2736_v25  ;;  %v2862_v0 = vmax.f32 %v11631_v51, %v2857_v57  ;;  %v6238_v51 = vld [vmem:[#allocation3 + $0x120] sm:$0xff]  ;;  %v10348_v57 = vld [vmem:[%s12944_s3 + $0x68] sm:$0xff]  }
 0x316   : > { %2739 = vst.msk [vmem:[#allocation2 + $0x138] sm:$0xff] %vm226_vm0, %v2737_v1  ;;  %9868 = vmatpush3.bf16.msra.mxu1 %v10331_v19 }
 0x317   : > { %9869 = vmatprep.subr.bf16.mxu1 %v10333_v35  ;;  %v2864_v36 = vmul.f32 %v11079_v44, %v2862_v0 }
 0x318   : > { %v4174_v18 = vpop.permute.xlu1 %4173  ;;  %v3990_v8 = vld [vmem:[#allocation2 + $0x128] sm:$0xff] }
 0x319   : > { %4233 = vst.msk [vmem:[#allocation3 + $0x130] sm:$0xff] %vm3644_vm12, %v4174_v18  ;;  %6476 = vmatmul.mubr.bf16.vlgmr.msra.gmra.mrb[96].mxu0 %v6238_v51  ;;  %v4021_v33 = vpack.c.bf16 %v3990_v8, %v3989_v5  ;;  %v4085_v10 = vld [vmem:[#allocation2 + $0x121] sm:$0xff]  ;;  %v10351_v18 = vld [vmem:[%s12944_s3 + $0x70] sm:$0xff]  }
 0x31a   : > { %2866 = vst.msk [vmem:[#allocation2 + $0x140] sm:$0xff] %vm226_vm0, %v2864_v36  ;;  %9870 = vmatpush3.bf16.msra.mxu1 %v10333_v35  ;;  %9266 = vmatpush3.bf16.msra.mxu0 %v10335_v20  ;;  %v10353_v8 = vld [vmem:[%s12944_s3 + $0x30] sm:$0xff]  }
 0x31b   : > { %9871 = vmatprep.subr.bf16.mxu1 %v10336_v3  ;;  %9267 = vmatprep.subr.bf16.mxu0 %v10337_v41  ;;  %4045 = vst.msk [vmem:[#allocation3 + $0x190] sm:$0xff] %vm226_vm0, %v4021_v33  ;;  %3758 = vst.msk [vmem:[#allocation3 + $0x1a0] sm:$0xff] %vm226_vm0, %v4021_v33  ;;  %v10352_v41 = vld [vmem:[%s12944_s3 + $0x88] sm:$0xff]  }
 0x31c   : > { %v3888_v40 = vpop.permute.xlu1 %3887  ;;  %3470 = vst.msk [vmem:[#allocation3 + $0x1b0] sm:$0xff] %vm226_vm0, %v4021_v33  ;;  %v4086_v22 = vld [vmem:[#allocation2 + $0x129] sm:$0xff]  ;;  %v10354_v33 = vld [vmem:[%s12944_s3 + $0x78] sm:$0xff]  }
 0x31d   : > { %3946 = vst.msk [vmem:[#allocation3 + $0x140] sm:$0xff] %vm3644_vm12, %v3888_v40  ;;  %v4176_v45 = vpop.permute.xlu0 %4175  ;;  %v3991_v21 = vld [vmem:[#allocation2 + $0x130] sm:$0xff]  ;;  %v4117_v47 = vpack.c.bf16 %v4086_v22, %v4085_v10  ;;  %v3992_v11 = vld [vmem:[#allocation2 + $0x138] sm:$0xff] }
 0x31e   : > { %4234 = vst.msk [vmem:[#allocation3 + $0x148] sm:$0xff] %vm3644_vm12, %v4176_v45  ;;  %9872 = vmatpush3.bf16.msra.mxu1 %v10336_v3  ;;  %9268 = vmatpush3.bf16.msra.mxu0 %v10338_v6  ;;  %v4022_v4 = vpack.c.bf16 %v3992_v11, %v3991_v21  ;;  %v4087_v55 = vld [vmem:[#allocation2 + $0x131] sm:$0xff] }
 0x31f   : > { %9873 = vmatprep.subr.bf16.mxu1 %v10339_v49  ;;  %4181 = vrot.lane.b32.xlu1 %v4117_v47, %s10467_s13  ;;  %v10355_v40 = vld [vmem:[%s12944_s3 + $0x90] sm:$0xff]   ;;  %v10356_v22 = vld [vmem:[%s12944_s3 + $0x38] sm:$0xff]  }
 0x320   : > { %v3890_v61 = vpop.permute.xlu1 %3889  ;;  %9269 = vmatprep.subr.bf16.mxu0 %v10340_v46  ;;  %v6240_v60 = vld [vmem:[#allocation3 + $0x130] sm:$0xff]  ;;  %4046 = vst.msk [vmem:[#allocation3 + $0x1a8] sm:$0xff] %vm226_vm0, %v4022_v4  ;;  %3759 = vst.msk [vmem:[#allocation3 + $0x1b8] sm:$0xff] %vm226_vm0, %v4022_v4  ;;  %v10357_v21 = vld [vmem:[%s12944_s3 + $0x98] sm:$0xff]  }
 0x321   : > { %3947 = vst.msk [vmem:[#allocation3 + $0x158] sm:$0xff] %vm3644_vm12, %v3890_v61  ;;  %v3599_v50 = vpop.permute.xlu0 %3598  ;;  %9879 = vmatprep.mubr.bf16.mxu1 %v6240_v60  ;;  %v4088_v14 = vld [vmem:[#allocation2 + $0x139] sm:$0xff] }
 0x322   : > { %3471 = vst.msk [vmem:[#allocation3 + $0x1c8] sm:$0xff] %vm226_vm0, %v4022_v4  ;;  %9874 = vmatpush3.bf16.msra.mxu1 %v10339_v49  ;;  %v12250_v17 = vpack.c.bf16 %v4088_v14, %v4087_v55  ;;  %9270 = vmatpush3.bf16.msra.mxu0 %v10341_v53  ;;  %v10358_v53 = vld [vmem:[%s12944_s3 + $0x40] sm:$0xff]  }
 0x323   : > { %3658 = vst.msk [vmem:[#allocation3 + $0x138] sm:$0xff] %vm3644_vm12, %v3599_v50  ;;  %9875 = vmatprep.subr.bf16.mxu1 %v10342_v58  ;;  %3895 = vrot.lane.b32.xlu1 %v4117_v47, %s10467_s13 }
 0x324   : > { %4183 = vrot.lane.b32.xlu0 %v12250_v17, %s10467_s13  ;;  %v2859_v19 = vpop.permute.xlu1 %2858  ;;  %v6242_v43 = vld [vmem:[#allocation3 + $0x140] sm:$0xff]  ;;  %9271 = vmatprep.subr.bf16.mxu0 %v10343_v15 }
 0x325   : > { %v2863_v26 = vmax.f32 %v11709_v7, %v2859_v19  ;;  %v3601_v37 = vpop.permute.xlu0 %3600  ;;  %6483 = vmatprep.mubr.bf16.mxu0 %v6242_v43  ;;  %v6243_v36 = vld [vmem:[#allocation3 + $0x148] sm:$0xff]  ;;  %v10360_v19 = vld [vmem:[%s12944_s3 + $0xa0] sm:$0xff]  }
 0x326   : > { %3659 = vst.msk [vmem:[#allocation3 + $0x150] sm:$0xff] %vm3644_vm12, %v3601_v37  ;;  %9876 = vmatpush3.bf16.msra.mxu1 %v10342_v58  ;;  %9272 = vmatpush3.bf16.msra.mxu0 %v10344_v59 }
 0x327   : > { %v2865_v32 = vmul.f32 %v11222_v24, %v2863_v26  ;;  %9877 = vmatprep.subr.bf16.mxu1 %v10345_v34  ;;  %3370 = vrot.lane.b32.xlu1 %v11802_v2, %s10467_s13 }
 0x328   : > { %3606 = vrot.lane.b32.xlu0 %v12053_v30, %s10467_s13  ;;  %v2987_v7 = vpop.permute.xlu1 %2986  ;;  %v6570_v62 = vld [vmem:[#allocation3 + $0x158] sm:$0xff]  ;;  %9273 = vmatprep.subr.bf16.mxu0 %v10346_v28  ;;  %v10349_v30 = vld [vmem:[%s12944_s3 + $0x80] sm:$0xff]  }
 0x329   : > { %2867 = vst.msk [vmem:[#allocation2 + $0x148] sm:$0xff] %vm226_vm0, %v2865_v32  ;;  %v2991_v35 = vmax.f32 %v11728_v9, %v2987_v7  ;;  %v2985_v1 = vpop.permute.xlu0 %2984  ;;  %v10350_v9 = vld [vmem:[%s12944_s3 + $0x28] sm:$0xff]  }
 0x32a   : > { %v6241_v25 = vld [vmem:[#allocation3 + $0x138] sm:$0xff]  ;;  %v2990_v0 = vmax.f32 %v11722_v54, %v2985_v1  ;;  %9878 = vmatpush3.bf16.msra.mxu1 %v10345_v34  ;;  %9274 = vmatpush3.bf16.msra.mxu0 %v10347_v31  ;;  %v10359_v34 = vld [vmem:[%s12944_s3] sm:$0xff]  }
 0x32b   : > { %6484 = vmatmul.mubr.bf16.gmra.mrb[100].mxu0 %v6241_v25  ;;  %v2993_v20 = vmul.f32 %v11222_v24, %v2991_v35  ;;  %3608 = vrot.lane.b32.xlu1 %v4117_v47, %s10467_s13  ;;  %v10361_v7 = vld [vmem:[%s12944_s3 + $0x48] sm:$0xff]  }
 0x32c   : > { %6806 = vmatprep.mubr.bf16.mxu0 %v6570_v62  ;;  %v2992_v3 = vmul.f32 %v11079_v44, %v2990_v0  ;;  %3897 = vrot.lane.b32.xlu0 %v12250_v17, %s10467_s13  ;;  %v4178_v54 = vpop.permute.xlu1 %4177  ;;  %v10362_v35 = vld [vmem:[%s12944_s3 + $0x8] sm:$0xff]  }
 0x32d   : > { %2995 = vst.msk [vmem:[#allocation2 + $0x158] sm:$0xff] %vm226_vm0, %v2993_v20  ;;  %9880 = vmatmul.mubr.bf16.vlgmr.msra.gmra.mrb[72].mxu1 %v6243_v36  ;;  %9275 = vmatprep.subr.bf16.mxu0 %v10348_v57  ;;  %v3113_v51 = vpop.permute.xlu0 %3112  ;;  %v6569_v26 = vld [vmem:[#allocation3 + $0x150] sm:$0xff]  ;;  %v10363_v57 = vld [vmem:[%s12944_s3 + $0xa8] sm:$0xff]   ;;  %v10367_v36 = vld [vmem:[%s12944_s3 + $0x58] sm:$0xff]  }
 0x32e   : > { %4235 = vst.msk [vmem:[#allocation3 + $0x160] sm:$0xff] %vm3644_vm12, %v4178_v54  ;;  %9883 = vmatprep.subr.bf16.mxu1 %v10349_v30  ;;  %v3118_v5 = vmax.f32 %v11744_v63, %v3113_v51  ;;  %9276 = vmatpush3.bf16.msra.mxu0 %v10350_v9  ;;  %v3993_v63 = vld [vmem:[#allocation2 + $0x140] sm:$0xff] }
 0x32f   : > { %2994 = vst.msk [vmem:[#allocation2 + $0x150] sm:$0xff] %vm226_vm0, %v2992_v3  ;;  %9884 = vmatpush3.bf16.msra.mxu1 %v10349_v30  ;;  %9277 = vmatprep.subr.bf16.mxu0 %v10351_v18  ;;  %v10364_v30 = vld [vmem:[%s12944_s3 + $0x50] sm:$0xff]  }
 0x330   : > { %v3120_v6 = vmul.f32 %v11079_v44, %v3118_v5  ;;  %v3892_v49 = vpop.permute.xlu1 %3891  ;;  %9885 = vmatprep.subr.bf16.mxu1 %v10352_v41  ;;  %v3994_v46 = vld [vmem:[#allocation2 + $0x148] sm:$0xff]  ;;  %v10369_v5 = vld [vmem:[%s12944_s3 + $0xb8] sm:$0xff]  }
 0x331   : > { %3948 = vst.msk [vmem:[#allocation3 + $0x170] sm:$0xff] %vm3644_vm12, %v3892_v49  ;;  %v4180_v45 = vpop.permute.xlu0 %4179  ;;  %v4023_v10 = vpack.c.bf16 %v3994_v46, %v3993_v63  ;;  %v4089_v61 = vld [vmem:[#allocation2 + $0x141] sm:$0xff] }
 0x332   : > { %3122 = vst.msk [vmem:[#allocation2 + $0x160] sm:$0xff] %vm226_vm0, %v3120_v6  ;;  %9278 = vmatpush3.bf16.msra.mxu0 %v10353_v8  ;;  %v10372_v49 = vld [vmem:[%s12944_s3 + $0x68] sm:$0xff]  }
 0x333   : > { %4236 = vst.msk [vmem:[#allocation3 + $0x178] sm:$0xff] %vm3644_vm12, %v4180_v45  ;;  %9886 = vmatpush3.bf16.msra.mxu1 %v10352_v41  ;;  %9279 = vmatprep.subr.bf16.mxu0 %v10354_v33 }
 0x334   : > { %4047 = vst.msk [vmem:[#allocation3 + $0x1c0] sm:$0xff] %vm226_vm0, %v4023_v10  ;;  %3760 = vst.msk [vmem:[#allocation3 + $0x1d0] sm:$0xff] %vm226_vm0, %v4023_v10  ;;  %v3894_v47 = vpop.permute.xlu1 %3893  ;;  %9887 = vmatprep.subr.bf16.mxu1 %v10355_v40  ;;  %v3996_v58 = vld [vmem:[#allocation2 + $0x158] sm:$0xff] }
 0x335   : > { %3472 = vst.msk [vmem:[#allocation3 + $0x1e0] sm:$0xff] %vm226_vm0, %v4023_v10  ;;  %v6571_v11 = vld [vmem:[#allocation3 + $0x160] sm:$0xff]  ;;  %v3603_v4 = vpop.permute.xlu0 %3602 }
 0x336   : > { %3949 = vst.msk [vmem:[#allocation3 + $0x188] sm:$0xff] %vm3644_vm12, %v3894_v47  ;;  %9899 = vmatprep.mubr.bf16.mxu1 %v6571_v11  ;;  %v4090_v60 = vld [vmem:[#allocation2 + $0x149] sm:$0xff]  ;;  %3660 = vst.msk [vmem:[#allocation3 + $0x168] sm:$0xff] %vm3644_vm12, %v3603_v4  ;;  %9280 = vmatpush3.bf16.msra.mxu0 %v10356_v22  ;;  %v4091_v28 = vld [vmem:[#allocation2 + $0x151] sm:$0xff] }
 0x337   : > { %v3995_v50 = vld [vmem:[#allocation2 + $0x150] sm:$0xff]  ;;  %v12328_v55 = vpack.c.bf16 %v4090_v60, %v4089_v61  ;;  %9888 = vmatpush3.bf16.msra.mxu1 %v10355_v40  ;;  %9303 = vmatprep.subr.bf16.mxu0 %v10358_v53  ;;  %v10378_v40 = vld [vmem:[%s12944_s3 + $0x80] sm:$0xff]   ;;  %v10373_v47 = vld [vmem:[%s12944_s3 + $0x28] sm:$0xff]  }
 0x338   : > { %v4024_v14 = vpack.c.bf16 %v3996_v58, %v3995_v50  ;;  %v3115_v15 = vpop.permute.xlu1 %3114  ;;  %9889 = vmatprep.subr.bf16.mxu1 %v10357_v21  ;;  %v6573_v59 = vld [vmem:[#allocation3 + $0x170] sm:$0xff]  ;;  %v10374_v53 = vld [vmem:[%s12944_s3 + $0x70] sm:$0xff]   ;;  %v10379_v50 = vld [vmem:[%s12944_s3 + $0x88] sm:$0xff]  }
 0x339   : > { %4185 = vrot.lane.b32.xlu0 %v12328_v55, %s10467_s13  ;;  %v3119_v43 = vmax.f32 %v11773_v38, %v3115_v15  ;;  %v3605_v37 = vpop.permute.xlu0 %3604  ;;  %v4092_v32 = vld [vmem:[#allocation2 + $0x159] sm:$0xff]  ;;  %6807 = vmatmul.mubr.bf16.vlgmr.msra.gmra.mrb[104].mxu0 %v6569_v26  ;;  %v4003_v26 = vld [vmem:[#allocation2 + $0x190] sm:$0xff] }
 0x33a   : > { %4048 = vst.msk [vmem:[#allocation3 + $0x1d8] sm:$0xff] %vm226_vm0, %v4024_v14  ;;  %3761 = vst.msk [vmem:[#allocation3 + $0x1e8] sm:$0xff] %vm226_vm0, %v4024_v14  ;;  %v12343_v31 = vpack.c.bf16 %v4092_v32, %v4091_v28  ;;  %6814 = vmatprep.mubr.bf16.mxu0 %v6573_v59  ;;  %9304 = vmatpush3.bf16.msra.mxu0 %v10359_v34  ;;  %v3997_v8 = vld [vmem:[#allocation2 + $0x160] sm:$0xff]  ;;  %v6574_v58 = vld [vmem:[#allocation3 + $0x178] sm:$0xff] }
 0x33b   : > { %3473 = vst.msk [vmem:[#allocation3 + $0x1f8] sm:$0xff] %vm226_vm0, %v4024_v14  ;;  %v3121_v62 = vmul.f32 %v11222_v24, %v3119_v43  ;;  %9890 = vmatpush3.bf16.msra.mxu1 %v10357_v21  ;;  %9305 = vmatprep.subr.bf16.mxu0 %v10361_v7  ;;  %v12418_v11 = vld [vmem:[%s12945_s4] ss:$0 sm:$0xff]  ;;  %v10375_v59 = vld [vmem:[%s12944_s3 + $0x30] sm:$0xff]  }
 0x33c   : > { %3661 = vst.msk [vmem:[#allocation3 + $0x180] sm:$0xff] %vm3644_vm12, %v3605_v37  ;;  %v3243_v38 = vpop.permute.xlu1 %3242  ;;  %4187 = vrot.lane.b32.xlu1 %v12343_v31, %s10467_s13  ;;  %9891 = vmatprep.subr.bf16.mxu1 %v10360_v19  ;;  %v5154_v14 = vadd.f32 %v12182_v52, %v12418_v11  ;;  %v5157_v43 = vadd.f32 %v12186_v42, %v12418_v11  ;;  %v10376_v52 = vld [vmem:[%s12944_s3 + $0x78] sm:$0xff]   ;;  %v10380_v32 = vld [vmem:[%s12944_s3 + $0x90] sm:$0xff]  }
 0x33d   : > { %3899 = vrot.lane.b32.xlu0 %v12328_v55, %s10467_s13  ;;  %3123 = vst.msk [vmem:[#allocation2 + $0x168] sm:$0xff] %vm226_vm0, %v3121_v62  ;;  %v3247_v1 = vmax.f32 %v11790_v56, %v3243_v38  ;;  %v3241_v25 = vpop.permute.xlu0 %3240  ;;  %v10365_v56 = vld [vmem:[%s12944_s3 + $0x10] sm:$0xff]   ;;  %v6572_v3 = vld [vmem:[#allocation3 + $0x168] sm:$0xff] }
 0x33e   : > { %v3246_v0 = vmax.f32 %v11780_v48, %v3241_v25  ;;  %9306 = vmatpush3.bf16.msra.mxu0 %v10362_v35  ;;  %v10366_v48 = vld [vmem:[%s12944_s3 + $0xb0] sm:$0xff]   ;;  %v6901_v41 = vld [vmem:[#allocation3 + $0x188] sm:$0xff] }
 0x33f   : > { %v3249_v20 = vmul.f32 %v11222_v24, %v3247_v1  ;;  %9892 = vmatpush3.bf16.msra.mxu1 %v10360_v19  ;;  %9307 = vmatprep.subr.bf16.mxu0 %v10364_v30  ;;  %v4004_v37 = vld [vmem:[#allocation2 + $0x198] sm:$0xff] }
 0x340   : > { %v3248_v9 = vmul.f32 %v11079_v44, %v3246_v0  ;;  %3610 = vrot.lane.b32.xlu1 %v12250_v17, %s10467_s13  ;;  %9893 = vmatprep.subr.bf16.mxu1 %v10363_v57  ;;  %v10368_v17 = vld [vmem:[%s12944_s3 + $0x18] sm:$0xff]   ;;  %v4028_v7 = vpack.c.bf16 %v4004_v37, %v4003_v26  ;;  %v10382_v0 = vld [vmem:[%s12944_s3 + $0x40] sm:$0xff]   ;;  %v10399_v26 = vld [vmem:[%s12944_s3 + $0x70] sm:$0xff]  }
 0x341   : > { %3901 = vrot.lane.b32.xlu0 %v12343_v31, %s10467_s13  ;;  %3251 = vst.msk [vmem:[#allocation2 + $0x178] sm:$0xff] %vm226_vm0, %v3249_v20  ;;  %v3369_v54 = vpop.permute.xlu0 %3368  ;;  %6815 = vmatmul.mubr.bf16.gmra.mrb[108].mxu0 %v6572_v3  ;;  %v10377_v35 = vld [vmem:[%s12944_s3 + $0x38] sm:$0xff]  }
 0x342   : > { %3250 = vst.msk [vmem:[#allocation2 + $0x170] sm:$0xff] %vm226_vm0, %v3248_v9  ;;  %v3374_v18 = vmax.f32 %v11795_v27, %v3369_v54  ;;  %7137 = vmatprep.mubr.bf16.mxu0 %v6901_v41  ;;  %9308 = vmatpush3.bf16.msra.mxu0 %v10365_v56  ;;  %v10370_v27 = vld [vmem:[%s12944_s3 + $0x60] sm:$0xff]   ;;  %v10381_v1 = vld [vmem:[%s12944_s3 + $0x98] sm:$0xff]   ;;  %4052 = vst.msk [vmem:[#allocation3 + $0x238] sm:$0xff] %vm226_vm0, %v4028_v7 }
 0x343   : > { %9894 = vmatpush3.bf16.msra.mxu1 %v10363_v57  ;;  %9309 = vmatprep.subr.bf16.mxu0 %v10367_v36  ;;  %v10383_v56 = vld [vmem:[%s12944_s3] sm:$0xff]   ;;  %v4099_v54 = vld [vmem:[#allocation2 + $0x191] sm:$0xff] }
 0x344   : > { %v3376_v51 = vmul.f32 %v11079_v44, %v3374_v18  ;;  %9895 = vmatprep.subr.bf16.mxu1 %v10366_v48  ;;  %v3998_v33 = vld [vmem:[#allocation2 + $0x168] sm:$0xff]  ;;  %3612 = vrot.lane.b32.xlu1 %v12328_v55, %s10467_s13  ;;  %v10371_v44 = vld [vmem:[%s12944_s3 + $0x20] sm:$0xff]   ;;  %v6900_v41 = vld [vmem:[#allocation3 + $0x180] sm:$0xff] }
 0x345   : > { %v4025_v6 = vpack.c.bf16 %v3998_v33, %v3997_v8  ;;  %v4093_v46 = vld [vmem:[#allocation2 + $0x161] sm:$0xff]  ;;  %v4100_v36 = vld [vmem:[#allocation2 + $0x199] sm:$0xff] }
 0x346   : > { %3378 = vst.msk [vmem:[#allocation2 + $0x180] sm:$0xff] %vm226_vm0, %v3376_v51  ;;  %9310 = vmatpush3.bf16.msra.mxu0 %v10368_v17  ;;  %v10385_v18 = vld [vmem:[%s12944_s3 + $0x48] sm:$0xff]  }
 0x347   : > { %9896 = vmatpush3.bf16.msra.mxu1 %v10366_v48  ;;  %4049 = vst.msk [vmem:[#allocation3 + $0x1f0] sm:$0xff] %vm226_vm0, %v4025_v6  ;;  %3762 = vst.msk [vmem:[#allocation3 + $0x200] sm:$0xff] %vm226_vm0, %v4025_v6  ;;  %9311 = vmatprep.subr.bf16.mxu0 %v10370_v27  ;;  %v4124_v27 = vpack.c.bf16 %v4100_v36, %v4099_v54 }
 0x348   : > { %3474 = vst.msk [vmem:[#allocation3 + $0x210] sm:$0xff] %vm226_vm0, %v4025_v6  ;;  %9897 = vmatprep.subr.bf16.mxu1 %v10369_v5  ;;  %v4000_v63 = vld [vmem:[#allocation2 + $0x178] sm:$0xff]  ;;  %v10386_v6 = vld [vmem:[%s12944_s3 + $0x8] sm:$0xff]  }
 0x349   : > { %v4094_v45 = vld [vmem:[#allocation2 + $0x169] sm:$0xff]  ;;  %v4095_v4 = vld [vmem:[#allocation2 + $0x171] sm:$0xff] }
 0x34a   : > { %v3999_v10 = vld [vmem:[#allocation2 + $0x170] sm:$0xff]  ;;  %v12408_v22 = vpack.c.bf16 %v4094_v45, %v4093_v46  ;;  %9312 = vmatpush3.bf16.msra.mxu0 %v10371_v44  ;;  %v10387_v44 = vld [vmem:[%s12944_s3 + $0xa8] sm:$0xff]  }
 0x34b   : > { %v4026_v21 = vpack.c.bf16 %v4000_v63, %v3999_v10  ;;  %9898 = vmatpush3.bf16.msra.mxu1 %v10369_v5  ;;  %9313 = vmatprep.subr.bf16.mxu0 %v10372_v49  ;;  %v10388_v10 = vld [vmem:[%s12944_s3 + $0x50] sm:$0xff]  }
 0x34c   : > { %4189 = vrot.lane.b32.xlu0 %v12408_v22, %s10467_s13  ;;  %9903 = vmatprep.subr.bf16.mxu1 %v10378_v40 }
 0x34d   : > { %4050 = vst.msk [vmem:[#allocation3 + $0x208] sm:$0xff] %vm226_vm0, %v4026_v21  ;;  %3763 = vst.msk [vmem:[#allocation3 + $0x218] sm:$0xff] %vm226_vm0, %v4026_v21  ;;  %v4096_v61 = vld [vmem:[#allocation2 + $0x179] sm:$0xff] }
 0x34e   : > { %3475 = vst.msk [vmem:[#allocation3 + $0x228] sm:$0xff] %vm226_vm0, %v4026_v21  ;;  %9900 = vmatmul.mubr.bf16.vlgmr.msra.gmra.mrb[76].mxu1 %v6574_v58  ;;  %v12426_v60 = vpack.c.bf16 %v4096_v61, %v4095_v4  ;;  %v9801_v55 = vpop.f32.mrb[56].mxu1  ;;  %9314 = vmatpush3.bf16.msra.mxu0 %v10373_v47  ;;  %v10390_v58 = vld [vmem:[%s12944_s3 + $0xb0] sm:$0xff]   ;;  %v10391_v4 = vld [vmem:[%s12944_s3 + $0x58] sm:$0xff]  }
 0x34f   : > { %9904 = vmatpush3.bf16.msra.mxu1 %v10378_v40  ;;  %v5202_v15 = vpop.f32.mrb[57].mxu1  ;;  %9315 = vmatprep.subr.bf16.mxu0 %v10374_v53  ;;  %v10389_v53 = vld [vmem:[%s12944_s3 + $0x10] sm:$0xff]   ;;  %v10392_v61 = vld [vmem:[%s12944_s3 + $0x18] sm:$0xff]  }
 0x350   : > { %3903 = vrot.lane.b32.xlu0 %v12408_v22, %s10467_s13  ;;  %4191 = vrot.lane.b32.xlu1 %v12426_v60, %s10467_s13  ;;  %v5203_v34 = vadd.f32 %v5202_v15, %v5154_v14  ;;  %v9802_v19 = vpop.f32.mrb[58].mxu1  ;;  %v12517_v14 = vld [vmem:[%s12944_s3 + $0x80] sm:$0xff]   ;;  %v10396_v15 = vld [vmem:[%s12944_s3 + $0x68] sm:$0xff]  }
 0x351   : > { %v5205_v28 = vpop.f32.mrb[59].mxu1  ;;  %9905 = vmatprep.subr.bf16.mxu1 %v10379_v50 }
 0x352   : > { %v5206_v62 = vadd.f32 %v5205_v28, %v5157_v43  ;;  %v9097_v38 = vpop.f32.mrb[68].mxu0  ;;  %9316 = vmatpush3.bf16.msra.mxu0 %v10375_v59  ;;  %v5217_v17 = vmax.f32 %v5203_v34, 0.0 }
 0x353   : > { %9906 = vmatpush3.bf16.msra.mxu1 %v10379_v50  ;;  %v9098_v42 = vpop.f32.mrb[69].mxu0  ;;  %9317 = vmatprep.subr.bf16.mxu0 %v10376_v52  ;;  %v10394_v50 = vld [vmem:[%s12944_s3 + $0x60] sm:$0xff]  }
 0x354   : > { %3905 = vrot.lane.b32.xlu0 %v12426_v60, %s10467_s13  ;;  %3614 = vrot.lane.b32.xlu1 %v12343_v31, %s10467_s13  ;;  %v9099_v25 = vadd.f32 %v9098_v42, %v9097_v38  ;;  %v9100_v57 = vpop.f32.mrb[70].mxu0  ;;  %v10384_v31 = vld [vmem:[%s12944_s3 + $0xa0] sm:$0xff]   ;;  %v5218_v49 = vmax.f32 %v5206_v62, 0.0  ;;  %v10401_v42 = vld [vmem:[%s12944_s3 + $0x30] sm:$0xff]  }
 0x355   : > { %v9101_v30 = vpop.f32.mrb[71].mxu0  ;;  %9907 = vmatprep.subr.bf16.mxu1 %v10380_v32 }
 0x356   : > { %v5162_v20 = vadd.f32 %v9099_v25, %v12418_v11  ;;  %v9102_v9 = vadd.f32 %v9101_v30, %v9100_v57  ;;  %9318 = vmatpush3.bf16.msra.mxu0 %v10377_v35  ;;  %v10402_v30 = vld [vmem:[%s12944_s3 + $0x78] sm:$0xff]  }
 0x357   : > { %9908 = vmatpush3.bf16.msra.mxu1 %v10380_v32  ;;  %9341 = vmatprep.subr.bf16.mxu0 %v10382_v0 }
 0x358   : > { %9909 = vmatprep.subr.bf16.mxu1 %v10381_v1  ;;  %v5211_v48 = vadd.f32 %v9801_v55, %v5162_v20  ;;  %v5165_v3 = vadd.f32 %v9102_v9, %v12418_v11  ;;  %3616 = vrot.lane.b32.xlu1 %v12408_v22, %s10467_s13  ;;  %v10395_v55 = vld [vmem:[%s12944_s3 + $0x20] sm:$0xff]  }
 0x359   : > { %7138 = vmatmul.mubr.bf16.vlgmr.msra.gmra.mrb[112].mxu0 %v6900_v41  ;;  %v10406_v41 = vld [vmem:[%s12944_s3 + $0x40] sm:$0xff]  }
 0x35a   : > { %v5219_v51 = vmax.f32 %v5211_v48, 0.0  ;;  %v5214_v5 = vadd.f32 %v9802_v19, %v5165_v3  ;;  %v9129_v8 = vpop.f32.mrb[72].mxu0  ;;  %9342 = vmatpush3.bf16.msra.mxu0 %v10383_v56  ;;  %v10398_v19 = vld [vmem:[%s12944_s3 + $0x28] sm:$0xff]   ;;  %v10404_v3 = vld [vmem:[%s12944_s3 + $0x38] sm:$0xff]  }
 0x35b   : > { %9910 = vmatpush3.bf16.msra.mxu1 %v10381_v1  ;;  %v9130_v33 = vpop.f32.mrb[73].mxu0  ;;  %9343 = vmatprep.subr.bf16.mxu0 %v10385_v18 }
 0x35c   : > { %9911 = vmatprep.subr.bf16.mxu1 %v10384_v31  ;;  %v5220_v40 = vmax.f32 %v5214_v5, 0.0  ;;  %3618 = vrot.lane.b32.xlu1 %v12426_v60, %s10467_s13  ;;  %v9131_v63 = vadd.f32 %v9130_v33, %v9129_v8  ;;  %v9132_v46 = vpop.f32.mrb[74].mxu0  ;;  %v12483_v45 = vmax.f32 %v5217_v17, %v5219_v51  ;;  %v10393_v60 = vld [vmem:[%s12944_s3 + $0xb8] sm:$0xff]  }
 0x35d   : > { %v9133_v22 = vpop.f32.mrb[75].mxu0 }
 0x35e   : > { %v12488_v21 = vmax.f32 %v5218_v49, %v5220_v40  ;;  %v9134_v47 = vadd.f32 %v9133_v22, %v9132_v46  ;;  %9344 = vmatpush3.bf16.msra.mxu0 %v10386_v6  ;;  %v5485_v62 = vadd.f32 %v9131_v63, %v12418_v11 }
 0x35f   : > { %9912 = vmatpush3.bf16.msra.mxu1 %v10384_v31  ;;  %9345 = vmatprep.subr.bf16.mxu0 %v10388_v10 }
 0x360   : > { %9913 = vmatprep.subr.bf16.mxu1 %v10387_v44  ;;  %4195 = vrot.lane.b32.xlu1 %v4124_v27, %s10467_s13  ;;  %v5488_v0 = vadd.f32 %v9134_v47, %v12418_v11 }
 0x362   : > { %9346 = vmatpush3.bf16.msra.mxu0 %v10389_v53 }
 0x363   : > { %9914 = vmatpush3.bf16.msra.mxu1 %v10387_v44  ;;  %9347 = vmatprep.subr.bf16.mxu0 %v10391_v4 }
 0x364   : > { %9915 = vmatprep.subr.bf16.mxu1 %v10390_v58  ;;  %4896 = vrot.lane.b32.xlu1 %v12177_v29, %s10467_s13 }
 0x366   : > { %9348 = vmatpush3.bf16.msra.mxu0 %v10392_v61 }
 0x367   : > { %9916 = vmatpush3.bf16.msra.mxu1 %v10390_v58  ;;  %9349 = vmatprep.subr.bf16.mxu0 %v10394_v50 }
 0x368   : > { %9917 = vmatprep.subr.bf16.mxu1 %v10393_v60 }
 0x36a   : > { %9350 = vmatpush3.bf16.msra.mxu0 %v10395_v55 }
 0x36b   : > { %v9135_v59 = vpop.f32.mrb[76].mxu0  ;;  %9918 = vmatpush3.bf16.msra.mxu1 %v10393_v60  ;;  %9351 = vmatprep.subr.bf16.mxu0 %v10396_v15 }
 0x36c   : > { %v9136_v34 = vpop.f32.mrb[77].mxu0  ;;  %9923 = vmatprep.subr.bf16.mxu1 %v12517_v14 }
 0x36d   : > { %v9137_v43 = vadd.f32 %v9136_v34, %v9135_v59  ;;  %v9138_v52 = vpop.f32.mrb[78].mxu0 }
 0x36e   : > { %v9139_v37 = vpop.f32.mrb[79].mxu0  ;;  %v9821_v7 = vpop.f32.mrb[60].mxu1  ;;  %9352 = vmatpush3.bf16.msra.mxu0 %v10398_v19 }
 0x36f   : > { %v9140_v28 = vadd.f32 %v9139_v37, %v9138_v52  ;;  %v5493_v32 = vadd.f32 %v9137_v43, %v12418_v11  ;;  %v5533_v38 = vpop.f32.mrb[61].mxu1  ;;  %9353 = vmatprep.subr.bf16.mxu0 %v10399_v26 }
 0x370   : > { %v5534_v1 = vadd.f32 %v5533_v38, %v5485_v62  ;;  %v9822_v57 = vpop.f32.mrb[62].mxu1 }
 0x371   : > { %v5542_v35 = vadd.f32 %v9821_v7, %v5493_v32  ;;  %v5496_v25 = vadd.f32 %v9140_v28, %v12418_v11  ;;  %v5536_v20 = vpop.f32.mrb[63].mxu1 }
 0x372   : > { %v5548_v56 = vmax.f32 %v5534_v1, 0.0  ;;  %v5537_v48 = vadd.f32 %v5536_v20, %v5488_v0  ;;  %9354 = vmatpush3.bf16.msra.mxu0 %v10401_v42 }
 0x373   : > { %v5550_v9 = vmax.f32 %v5542_v35, 0.0  ;;  %v5545_v31 = vadd.f32 %v9822_v57, %v5496_v25  ;;  %9355 = vmatprep.subr.bf16.mxu0 %v10402_v30  ;;  %v10400_v30 = vld [vmem:[%s12944_s3 + $0x88] sm:$0xff]  }
 0x374   : > { %v5549_v18 = vmax.f32 %v5537_v48, 0.0 }
 0x375   : > { %v12542_v54 = vmax.f32 %v5548_v56, %v5550_v9  ;;  %v5551_v36 = vmax.f32 %v5545_v31, 0.0 }
 0x376   : > { %9356 = vmatpush3.bf16.msra.mxu0 %v10404_v3 }
 0x377   : > { %v10001_v17 = vpack.i.bf16 %v12542_v54, %v12483_v45  ;;  %v12549_v51 = vmax.f32 %v5549_v18, %v5551_v36  ;;  %9379 = vmatprep.subr.bf16.mxu0 %v10406_v41  ;;  %v10403_v36 = vld [vmem:[%s12944_s3 + $0x90] sm:$0xff]   ;;  %v10405_v41 = vld [vmem:[%s12944_s3 + $0x98] sm:$0xff]  }
 0x379   : > { %10002 = vrot.lane.b32.xlu1 %v10001_v17, %s10467_s13 }
 0x37b   : > { %v9167_v5 = vpop.f32.mrb[80].mxu0 }
 0x37c   : > { %v9168_v8 = vpop.f32.mrb[81].mxu0 }
 0x37d   : > { %v9169_v33 = vadd.f32 %v9168_v8, %v9167_v5  ;;  %v9170_v27 = vpop.f32.mrb[82].mxu0  ;;  %5558 = vrot.lane.b32.xlu1 %v12549_v51, %s10467_s13 }
 0x37e   : > { %v9171_v6 = vpop.f32.mrb[83].mxu0 }
 0x37f   : > { %v9172_v44 = vadd.f32 %v9171_v6, %v9170_v27  ;;  %v5816_v58 = vadd.f32 %v9169_v33, %v12418_v11  ;;  %v3715_v27 = vld [vmem:[#allocation2 + $0x180] sm:$0xff] }
 0x381   : > { %v5819_v15 = vadd.f32 %v9172_v44, %v12418_v11 }
 0x383   : > { %v9173_v49 = vpop.f32.mrb[84].mxu0 }
 0x384   : > { %v9174_v40 = vpop.f32.mrb[85].mxu0 }
 0x385   : > { %v9175_v63 = vadd.f32 %v9174_v40, %v9173_v49  ;;  %v9176_v46 = vpop.f32.mrb[86].mxu0  ;;  %v10408_v49 = vld [vmem:[%s12944_s3 + $0xa0] sm:$0xff]  }
 0x386   : > { %v9177_v10 = vpop.f32.mrb[87].mxu0 }
 0x387   : > { %v9178_v22 = vadd.f32 %v9177_v10, %v9176_v46  ;;  %v5824_v47 = vadd.f32 %v9175_v63, %v12418_v11  ;;  %v10409_v46 = vld [vmem:[%s12944_s3 + $0x48] sm:$0xff]  }
 0x388   : > { %v10410_v10 = vld [vmem:[%s12944_s3 + $0x8] sm:$0xff]  }
 0x389   : > { %v5827_v60 = vadd.f32 %v9178_v22, %v12418_v11  ;;  %v10411_v22 = vld [vmem:[%s12944_s3 + $0xa8] sm:$0xff]  }
 0x38f   : > { %v9841_v53 = vpop.f32.mrb[64].mxu1 }
 0x390   : > { %v5873_v4 = vadd.f32 %v9841_v53, %v5824_v47  ;;  %v5864_v61 = vpop.f32.mrb[65].mxu1  ;;  %v10412_v53 = vld [vmem:[%s12944_s3 + $0x50] sm:$0xff]  }
 0x391   : > { %v5865_v50 = vadd.f32 %v5864_v61, %v5816_v58  ;;  %v9842_v55 = vpop.f32.mrb[66].mxu1  ;;  %v4182_v43 = vpop.permute.xlu1 %4181  ;;  %v10414_v61 = vld [vmem:[%s12944_s3 + $0xb0] sm:$0xff]  }
 0x392   : > { %v5881_v59 = vmax.f32 %v5873_v4, 0.0  ;;  %v5876_v34 = vadd.f32 %v9842_v55, %v5827_v60  ;;  %v5867_v19 = vpop.f32.mrb[67].mxu1  ;;  %4237 = vst.msk [vmem:[#allocation3 + $0x190] sm:$0xff] %vm3644_vm12, %v4182_v43  ;;  %v10413_v4 = vld [vmem:[%s12944_s3 + $0x10] sm:$0xff]   ;;  %v10415_v55 = vld [vmem:[%s12944_s3 + $0x58] sm:$0xff]  }
 0x393   : > { %v5879_v52 = vmax.f32 %v5865_v50, 0.0  ;;  %v5868_v26 = vadd.f32 %v5867_v19, %v5819_v15  ;;  %v9996_v15 = vpack.i.bf16 %v12175_v23, %v12164_v13  ;;  %v10417_v19 = vld [vmem:[%s12944_s3 + $0xb8] sm:$0xff]  }
 0x394   : > { %v5882_v37 = vmax.f32 %v5876_v34, 0.0  ;;  %v10416_v34 = vld [vmem:[%s12944_s3 + $0x18] sm:$0xff]  }
 0x395   : > { %v12559_v28 = vmax.f32 %v5879_v52, %v5881_v59  ;;  %v5880_v32 = vmax.f32 %v5868_v26, 0.0  ;;  %v3896_v7 = vpop.permute.xlu1 %3895  ;;  %v10418_v52 = vld [vmem:[%s12944_s3 + $0x60] sm:$0xff]  }
 0x396   : > { %v4184_v62 = vpop.permute.xlu0 %4183  ;;  %3950 = vst.msk [vmem:[#allocation3 + $0x1a0] sm:$0xff] %vm3644_vm12, %v3896_v7  ;;  %v10420_v7 = vld [vmem:[%s12944_s3 + $0x68] sm:$0xff]  }
 0x397   : > { %v12561_v38 = vmax.f32 %v5880_v32, %v5882_v37  ;;  %4238 = vst.msk [vmem:[#allocation3 + $0x1a8] sm:$0xff] %vm3644_vm12, %v4184_v62  ;;  %v10419_v37 = vld [vmem:[%s12944_s3 + $0x20] sm:$0xff]  }
 0x399   : > { %v3371_v11 = vpop.permute.xlu1 %3370  ;;  %v6902_v35 = vld [vmem:[#allocation3 + $0x190] sm:$0xff] }
 0x39a   : > { %v3607_v42 = vpop.permute.xlu0 %3606  ;;  %v3375_v1 = vmax.f32 %v11802_v2, %v3371_v11  ;;  %9919 = vmatprep.mubr.bf16.mxu1 %v6902_v35  ;;  %v10421_v11 = vld [vmem:[%s12944_s3 + $0x80] sm:$0xff]   ;;  %v10424_v35 = vld [vmem:[%s12944_s3 + $0x88] sm:$0xff]  }
 0x39b   : > { %3662 = vst.msk [vmem:[#allocation3 + $0x198] sm:$0xff] %vm3644_vm12, %v3607_v42  ;;  %v10422_v42 = vld [vmem:[%s12944_s3 + $0x28] sm:$0xff]  }
 0x39c   : > { %v9205_v25 = vpop.f32.mrb[88].mxu0  ;;  %v3377_v57 = vmul.f32 %v11222_v24, %v3375_v1 }
 0x39d   : > { %v9206_v0 = vpop.f32.mrb[89].mxu0  ;;  %v3609_v56 = vpop.permute.xlu1 %3608  ;;  %v6904_v31 = vld [vmem:[#allocation3 + $0x1a0] sm:$0xff] }
 0x39e   : > { %v12571_v20 = vadd.f32 %v9206_v0, %v9205_v25  ;;  %v9208_v9 = vpop.f32.mrb[90].mxu0  ;;  %v6905_v48 = vld [vmem:[#allocation3 + $0x1a8] sm:$0xff]  ;;  %3379 = vst.msk [vmem:[#allocation2 + $0x188] sm:$0xff] %vm226_vm0, %v3377_v57  ;;  %v3898_v3 = vpop.permute.xlu0 %3897  ;;  %7145 = vmatprep.mubr.bf16.mxu0 %v6904_v31  ;;  %v10423_v57 = vld [vmem:[%s12944_s3 + $0x70] sm:$0xff]  }
 0x39f   : > { %v9209_v2 = vpop.f32.mrb[91].mxu0  ;;  %3663 = vst.msk [vmem:[#allocation3 + $0x1b0] sm:$0xff] %vm3644_vm12, %v3609_v56  ;;  %9920 = vmatmul.mubr.bf16.vlgmr.msra.gmra.mrb[80].mxu1 %v6905_v48  ;;  %3951 = vst.msk [vmem:[#allocation3 + $0x1b8] sm:$0xff] %vm3644_vm12, %v3898_v3  ;;  %v10425_v0 = vld [vmem:[%s12944_s3 + $0x30] sm:$0xff]   ;;  %v10426_v56 = vld [vmem:[%s12944_s3 + $0x78] sm:$0xff]  }
 0x3a0   : > { %v12575_v24 = vadd.f32 %v9209_v2, %v9208_v9  ;;  %9924 = vmatpush3.bf16.msra.mxu1 %v12517_v14  ;;  %v10407_v14 = vld [vmem:[%s12944_s3] sm:$0xff]   ;;  %v10428_v48 = vld [vmem:[%s12944_s3 + $0x38] sm:$0xff]  }
 0x3a1   : > { %9925 = vmatprep.subr.bf16.mxu1 %v10400_v30  ;;  %v10429_v2 = vld [vmem:[%s12944_s3 + $0x98] sm:$0xff]  }
 0x3a2   : > { %v6903_v18 = vld [vmem:[#allocation3 + $0x198] sm:$0xff] }
 0x3a3   : > { %7146 = vmatmul.mubr.bf16.gmra.mrb[116].mxu0 %v6903_v18  ;;  %v10430_v18 = vld [vmem:[%s12944_s3 + $0x40] sm:$0xff]  }
 0x3a4   : > { %9926 = vmatpush3.bf16.msra.mxu1 %v10400_v30  ;;  %v10427_v30 = vld [vmem:[%s12944_s3 + $0x90] sm:$0xff]  }
 0x3a5   : > { %9927 = vmatprep.subr.bf16.mxu1 %v10403_v36  ;;  %v3811_v17 = vld [vmem:[#allocation2 + $0x181] sm:$0xff]  ;;  %v3812_v5 = vld [vmem:[#allocation2 + $0x189] sm:$0xff] }
 0x3a6   : > { %v7232_v8 = vld [vmem:[#allocation3 + $0x1b8] sm:$0xff]  ;;  %v3836_v33 = vpack.c.bf16 %v3812_v5, %v3811_v17  ;;  %v7231_v63 = vld [vmem:[#allocation3 + $0x1b0] sm:$0xff] }
 0x3a7   : > { %v3716_v6 = vld [vmem:[#allocation2 + $0x188] sm:$0xff]  ;;  %7468 = vmatprep.mubr.bf16.mxu0 %v7232_v8  ;;  %v10431_v17 = vld [vmem:[%s12944_s3] sm:$0xff]  }
 0x3a8   : > { %9928 = vmatpush3.bf16.msra.mxu1 %v10403_v36  ;;  %v3740_v44 = vpack.c.bf16 %v3716_v6, %v3715_v27  ;;  %3907 = vrot.lane.b32.xlu0 %v3836_v33, %s10467_s13  ;;  %v10432_v8 = vld [vmem:[%s12944_s3 + $0xa0] sm:$0xff]  }
 0x3a9   : > { %9929 = vmatprep.subr.bf16.mxu1 %v10405_v41 }
 0x3aa   : > { %3764 = vst.msk [vmem:[#allocation3 + $0x230] sm:$0xff] %vm226_vm0, %v3740_v44  ;;  %4051 = vst.msk [vmem:[#allocation3 + $0x220] sm:$0xff] %vm226_vm0, %v3740_v44  ;;  %v10435_v44 = vld [vmem:[%s12944_s3 + $0xa8] sm:$0xff]  }
 0x3ab   : > { %v4186_v40 = vpop.permute.xlu0 %4185  ;;  %7469 = vmatmul.mubr.bf16.vlgmr.msra.gmra.mrb[120].mxu0 %v7231_v63  ;;  %v10437_v63 = vld [vmem:[%s12944_s3 + $0x10] sm:$0xff]  }
 0x3ac   : > { %4239 = vst.msk [vmem:[#allocation3 + $0x1c0] sm:$0xff] %vm3644_vm12, %v4186_v40  ;;  %9930 = vmatpush3.bf16.msra.mxu1 %v10405_v41  ;;  %9380 = vmatpush3.bf16.msra.mxu0 %v10407_v14  ;;  %v10434_v14 = vld [vmem:[%s12944_s3 + $0x8] sm:$0xff]  }
 0x3ad   : > { %4193 = vrot.lane.b32.xlu0 %v3836_v33, %s10467_s13  ;;  %9931 = vmatprep.subr.bf16.mxu1 %v10408_v49  ;;  %v10433_v33 = vld [vmem:[%s12944_s3 + $0x48] sm:$0xff]  }
 0x3ae   : > { %9381 = vmatprep.subr.bf16.mxu0 %v10409_v46  ;;  %v4188_v58 = vpop.permute.xlu1 %4187  ;;  %v10438_v46 = vld [vmem:[%s12944_s3 + $0xb0] sm:$0xff]  }
 0x3af   : > { %v3900_v47 = vpop.permute.xlu0 %3899  ;;  %4240 = vst.msk [vmem:[#allocation3 + $0x1d8] sm:$0xff] %vm3644_vm12, %v4188_v58  ;;  %v10440_v58 = vld [vmem:[%s12944_s3 + $0x18] sm:$0xff]  }
 0x3b0   : > { %3952 = vst.msk [vmem:[#allocation3 + $0x1d0] sm:$0xff] %vm3644_vm12, %v3900_v47  ;;  %9932 = vmatpush3.bf16.msra.mxu1 %v10408_v49  ;;  %9382 = vmatpush3.bf16.msra.mxu0 %v10410_v10  ;;  %v10436_v49 = vld [vmem:[%s12944_s3 + $0x50] sm:$0xff]   ;;  %v10439_v10 = vld [vmem:[%s12944_s3 + $0x58] sm:$0xff]  }
 0x3b1   : > { %4564 = vrot.lane.b32.xlu0 %v12169_v16, %s10467_s13  ;;  %9933 = vmatprep.subr.bf16.mxu1 %v10411_v22 }
 0x3b2   : > { %9383 = vmatprep.subr.bf16.mxu0 %v10412_v53  ;;  %v3611_v59 = vpop.permute.xlu1 %3610 }
 0x3b3   : > { %v3902_v60 = vpop.permute.xlu0 %3901  ;;  %v7233_v50 = vld [vmem:[#allocation3 + $0x1c0] sm:$0xff]  ;;  %3664 = vst.msk [vmem:[#allocation3 + $0x1c8] sm:$0xff] %vm3644_vm12, %v3611_v59 }
 0x3b4   : > { %3953 = vst.msk [vmem:[#allocation3 + $0x1e8] sm:$0xff] %vm3644_vm12, %v3902_v60  ;;  %9939 = vmatprep.mubr.bf16.mxu1 %v7233_v50  ;;  %9934 = vmatpush3.bf16.msra.mxu1 %v10411_v22  ;;  %v12723_v60 = vsel %vm4246_vm13, 1.0, %v10466_v12  ;;  %v10444_v12 = vld [vmem:[%s12944_s3 + $0x68] sm:$0xff]  }
 0x3b5   : > { %9384 = vmatpush3.bf16.msra.mxu0 %v10413_v4  ;;  %9997 = vrot.lane.b32.xlu0 %v9996_v15, %s10467_s13  ;;  %v10441_v4 = vld [vmem:[%s12944_s3 + $0xb8] sm:$0xff]   ;;  %v10450_v15 = vld [vmem:[%s12944_s3 + $0x80] sm:$0xff]  }
 0x3b6   : > { %9935 = vmatprep.subr.bf16.mxu1 %v10414_v61  ;;  %9385 = vmatprep.subr.bf16.mxu0 %v10415_v55  ;;  %v3613_v26 = vpop.permute.xlu1 %3612  ;;  %v7236_v1 = vld [vmem:[#allocation3 + $0x1d8] sm:$0xff]  ;;  %v10443_v55 = vld [vmem:[%s12944_s3 + $0x20] sm:$0xff]  }
 0x3b7   : > { %v7235_v43 = vld [vmem:[#allocation3 + $0x1d0] sm:$0xff]  ;;  %3665 = vst.msk [vmem:[#allocation3 + $0x1e0] sm:$0xff] %vm3644_vm12, %v3613_v26  ;;  %v10446_v26 = vld [vmem:[%s12944_s3 + $0x70] sm:$0xff]  }
 0x3b8   : > { %7476 = vmatprep.mubr.bf16.mxu0 %v7235_v43  ;;  %9936 = vmatpush3.bf16.msra.mxu1 %v10414_v61  ;;  %v10442_v61 = vld [vmem:[%s12944_s3 + $0x60] sm:$0xff]   ;;  %v10451_v43 = vld [vmem:[%s12944_s3 + $0x88] sm:$0xff]  }
 0x3b9   : > { %9386 = vmatpush3.bf16.msra.mxu0 %v10416_v34  ;;  %5227 = vrot.lane.b32.xlu0 %v12488_v21, %s10467_s13  ;;  %v10445_v34 = vld [vmem:[%s12944_s3 + $0x28] sm:$0xff]  }
 0x3ba   : > { %9937 = vmatprep.subr.bf16.mxu1 %v10417_v19  ;;  %9387 = vmatprep.subr.bf16.mxu0 %v10418_v52  ;;  %v7234_v62 = vld [vmem:[#allocation3 + $0x1c8] sm:$0xff] }
 0x3bb   : > { %v7563_v32 = vld [vmem:[#allocation3 + $0x1e8] sm:$0xff]  ;;  %7477 = vmatmul.mubr.bf16.gmra.mrb[124].mxu0 %v7234_v62  ;;  %v10447_v62 = vld [vmem:[%s12944_s3 + $0x30] sm:$0xff]  }
 0x3bc   : > { %9938 = vmatpush3.bf16.msra.mxu1 %v10417_v19  ;;  %7799 = vmatprep.mubr.bf16.mxu0 %v7563_v32  ;;  %v12747_v19 = vld [vmem:[%s12945_s4] ss:$0 sm:$0xff] }
 0x3bd   : > { %9388 = vmatpush3.bf16.msra.mxu0 %v10419_v37  ;;  %5889 = vrot.lane.b32.xlu0 %v12561_v38, %s10467_s13  ;;  %v6147_v32 = vadd.f32 %v12571_v20, %v12747_v19  ;;  %v10448_v20 = vld [vmem:[%s12944_s3 + $0x78] sm:$0xff]  }
 0x3be   : > { %9389 = vmatprep.subr.bf16.mxu0 %v10420_v7  ;;  %v4190_v25 = vpop.permute.xlu0 %4189  ;;  %9943 = vmatprep.subr.bf16.mxu1 %v10421_v11  ;;  %v7562_v6 = vld [vmem:[#allocation3 + $0x1e0] sm:$0xff] }
 0x3bf   : > { %9940 = vmatmul.mubr.bf16.vlgmr.msra.gmra.mrb[84].mxu1 %v7236_v1  ;;  %4241 = vst.msk [vmem:[#allocation3 + $0x1f0] sm:$0xff] %vm3644_vm12, %v4190_v25  ;;  %v6150_v1 = vadd.f32 %v12575_v24, %v12747_v19 }
 0x3c0   : > { %9944 = vmatpush3.bf16.msra.mxu1 %v10421_v11  ;;  %v10452_v11 = vld [vmem:[%s12944_s3 + $0x90] sm:$0xff]  }
 0x3c1   : > { %9390 = vmatpush3.bf16.msra.mxu0 %v10422_v42  ;;  %9945 = vmatprep.subr.bf16.mxu1 %v10424_v35 }
 0x3c2   : > { %9391 = vmatprep.subr.bf16.mxu0 %v10423_v57  ;;  %v3904_v9 = vpop.permute.xlu0 %3903  ;;  %v4192_v31 = vpop.permute.xlu1 %4191 }
 0x3c3   : > { %3954 = vst.msk [vmem:[#allocation3 + $0x200] sm:$0xff] %vm3644_vm12, %v3904_v9  ;;  %4242 = vst.msk [vmem:[#allocation3 + $0x208] sm:$0xff] %vm3644_vm12, %v4192_v31  ;;  %v10453_v9 = vld [vmem:[%s12944_s3 + $0x98] sm:$0xff]  }
 0x3c4   : > { %9946 = vmatpush3.bf16.msra.mxu1 %v10424_v35 }
 0x3c5   : > { %9392 = vmatpush3.bf16.msra.mxu0 %v10425_v0  ;;  %9947 = vmatprep.subr.bf16.mxu1 %v10427_v30 }
 0x3c6   : > { %9393 = vmatprep.subr.bf16.mxu0 %v10426_v56  ;;  %v3906_v3 = vpop.permute.xlu0 %3905  ;;  %v7564_v36 = vld [vmem:[#allocation3 + $0x1f0] sm:$0xff]  ;;  %v3615_v41 = vpop.permute.xlu1 %3614 }
 0x3c7   : > { %3955 = vst.msk [vmem:[#allocation3 + $0x218] sm:$0xff] %vm3644_vm12, %v3906_v3  ;;  %9959 = vmatprep.mubr.bf16.mxu1 %v7564_v36  ;;  %3666 = vst.msk [vmem:[#allocation3 + $0x1f8] sm:$0xff] %vm3644_vm12, %v3615_v41  ;;  %v10454_v36 = vld [vmem:[%s12944_s3 + $0xa0] sm:$0xff]  }
 0x3c8   : > { %9948 = vmatpush3.bf16.msra.mxu1 %v10427_v30  ;;  %v10449_v30 = vld [vmem:[%s12944_s3 + $0x38] sm:$0xff]  }
 0x3c9   : > { %9394 = vmatpush3.bf16.msra.mxu0 %v10428_v48  ;;  %9949 = vmatprep.subr.bf16.mxu1 %v10429_v2 }
 0x3ca   : > { %9417 = vmatprep.subr.bf16.mxu0 %v10430_v18  ;;  %v7566_v5 = vld [vmem:[#allocation3 + $0x200] sm:$0xff]  ;;  %v3617_v27 = vpop.permute.xlu1 %3616  ;;  %v7567_v52 = vld [vmem:[#allocation3 + $0x208] sm:$0xff] }
 0x3cb   : > { %3667 = vst.msk [vmem:[#allocation3 + $0x210] sm:$0xff] %vm3644_vm12, %v3617_v27 }
 0x3cc   : > { %7800 = vmatmul.mubr.bf16.vlgmr.msra.gmra.mrb[128].mxu0 %v7562_v6  ;;  %9950 = vmatpush3.bf16.msra.mxu1 %v10429_v2 }
 0x3cd   : > { %7807 = vmatprep.mubr.bf16.mxu0 %v7566_v5  ;;  %9418 = vmatpush3.bf16.msra.mxu0 %v10431_v17 }
 0x3ce   : > { %9951 = vmatprep.subr.bf16.mxu1 %v10432_v8  ;;  %9419 = vmatprep.subr.bf16.mxu0 %v10433_v33  ;;  %v3619_v40 = vpop.permute.xlu1 %3618  ;;  %v7565_v47 = vld [vmem:[#allocation3 + $0x1f8] sm:$0xff] }
 0x3cf   : > { %3668 = vst.msk [vmem:[#allocation3 + $0x228] sm:$0xff] %vm3644_vm12, %v3619_v40  ;;  %v7894_v53 = vld [vmem:[#allocation3 + $0x218] sm:$0xff] }
 0x3d0   : > { %9952 = vmatpush3.bf16.msra.mxu1 %v10432_v8 }
 0x3d1   : > { %9420 = vmatpush3.bf16.msra.mxu0 %v10434_v14  ;;  %9953 = vmatprep.subr.bf16.mxu1 %v10435_v44 }
 0x3d2   : > { %9421 = vmatprep.subr.bf16.mxu0 %v10436_v49  ;;  %v4196_v22 = vpop.permute.xlu1 %4195  ;;  %v7893_v17 = vld [vmem:[#allocation3 + $0x210] sm:$0xff]  ;;  %v10455_v49 = vld [vmem:[%s12944_s3 + $0xa8] sm:$0xff]  }
 0x3d3   : > { %4244 = vst.msk [vmem:[#allocation3 + $0x238] sm:$0xff] %vm3644_vm12, %v4196_v22 }
 0x3d4   : > { %7808 = vmatmul.mubr.bf16.gmra.mrb[132].mxu0 %v7565_v47  ;;  %9954 = vmatpush3.bf16.msra.mxu1 %v10435_v44 }
 0x3d5   : > { %9422 = vmatpush3.bf16.msra.mxu0 %v10437_v63  ;;  %8130 = vmatprep.mubr.bf16.mxu0 %v7894_v53 }
 0x3d6   : > { %9955 = vmatprep.subr.bf16.mxu1 %v10438_v46  ;;  %9423 = vmatprep.subr.bf16.mxu0 %v10439_v10  ;;  %v4897_v39 = vpop.permute.xlu1 %4896 }
 0x3d7   : > { %v4901_v50 = vmax.f32 %v12177_v29, %v4897_v39 }
 0x3d8   : > { %9956 = vmatpush3.bf16.msra.mxu1 %v10438_v46 }
 0x3d9   : > { %9424 = vmatpush3.bf16.msra.mxu0 %v10440_v58  ;;  %9957 = vmatprep.subr.bf16.mxu1 %v10441_v4  ;;  %v4903_v59 = vmul.f32 %v12723_v60, %v4901_v50 }
 0x3da   : > { %9425 = vmatprep.subr.bf16.mxu0 %v10442_v61 }
 0x3db   : > { %v8834_v29 = vpack.c.bf16 %v4903_v59, %v4903_v59  ;;  %v10456_v59 = vld [vmem:[%s12944_s3 + $0xb0] sm:$0xff]  }
 0x3dc   : > { %9958 = vmatpush3.bf16.msra.mxu1 %v10441_v4 }
 0x3dd   : > { %9426 = vmatpush3.bf16.msra.mxu0 %v10443_v55  ;;  %9963 = vmatprep.subr.bf16.mxu1 %v10450_v15  ;;  %4913 = vst.msk [vmem:[%s12739_s11 + $0xc] sm:$0xf] %vm4580_vm14, %v8834_v29  ;;  %v10457_v29 = vld [vmem:[%s12944_s3 + $0xb8] sm:$0xff]  }
 0x3de   : > { %9427 = vmatprep.subr.bf16.mxu0 %v10444_v12 }
 0x3df   : > { %9960 = vmatmul.mubr.bf16.vlgmr.msra.gmra.mrb[88].mxu1 %v7567_v52 }
 0x3e0   : > { %v9861_v37 = vpop.f32.mrb[68].mxu1  ;;  %9964 = vmatpush3.bf16.msra.mxu1 %v10450_v15 }
 0x3e1   : > { %9428 = vmatpush3.bf16.msra.mxu0 %v10445_v34  ;;  %v6195_v7 = vpop.f32.mrb[69].mxu1  ;;  %9965 = vmatprep.subr.bf16.mxu1 %v10451_v43 }
 0x3e2   : > { %v6196_v42 = vadd.f32 %v6195_v7, %v6147_v32  ;;  %9429 = vmatprep.subr.bf16.mxu0 %v10446_v26  ;;  %v9862_v35 = vpop.f32.mrb[70].mxu1 }
 0x3e3   : > { %v6198_v25 = vpop.f32.mrb[71].mxu1 }
 0x3e4   : > { %v6199_v57 = vadd.f32 %v6198_v25, %v6150_v1  ;;  %9966 = vmatpush3.bf16.msra.mxu1 %v10451_v43  ;;  %v9211_v0 = vpop.f32.mrb[92].mxu0  ;;  %v6210_v27 = vmax.f32 %v6196_v42, 0.0 }
 0x3e5   : > { %9430 = vmatpush3.bf16.msra.mxu0 %v10447_v62  ;;  %9967 = vmatprep.subr.bf16.mxu1 %v10452_v11  ;;  %v9212_v56 = vpop.f32.mrb[93].mxu0 }
 0x3e6   : > { %9431 = vmatprep.subr.bf16.mxu0 %v10448_v20  ;;  %v9213_v24 = vadd.f32 %v9212_v56, %v9211_v0  ;;  %v9214_v31 = vpop.f32.mrb[94].mxu0  ;;  %v6211_v10 = vmax.f32 %v6199_v57, 0.0 }
 0x3e7   : > { %v9215_v48 = vpop.f32.mrb[95].mxu0 }
 0x3e8   : > { %9968 = vmatpush3.bf16.msra.mxu1 %v10452_v11  ;;  %v6155_v2 = vadd.f32 %v9213_v24, %v12747_v19  ;;  %v9216_v3 = vadd.f32 %v9215_v48, %v9214_v31 }
 0x3e9   : > { %9432 = vmatpush3.bf16.msra.mxu0 %v10449_v30  ;;  %9969 = vmatprep.subr.bf16.mxu1 %v10453_v9 }
 0x3ea   : > { %v6204_v18 = vadd.f32 %v9861_v37, %v6155_v2  ;;  %v6158_v41 = vadd.f32 %v9216_v3, %v12747_v19 }
 0x3eb   : > { %v10003_v5 = vpop.permute.xlu1 %10002 }
 0x3ec   : > { %8131 = vmatmul.mubr.bf16.vlgmr.msra.gmra.mrb[136].mxu0 %v7893_v17  ;;  %v10005_v8 = vunpack.i.h.bf16 %v10003_v5  ;;  %v10004_v33 = vunpack.i.l.bf16 %v10003_v5  ;;  %9970 = vmatpush3.bf16.msra.mxu1 %v10453_v9  ;;  %v6212_v6 = vmax.f32 %v6204_v18, 0.0  ;;  %v6207_v14 = vadd.f32 %v9862_v35, %v6158_v41  ;;  %v9243_v44 = vpop.f32.mrb[96].mxu0 }
 0x3ed   : > { %9971 = vmatprep.subr.bf16.mxu1 %v10454_v36  ;;  %v9244_v46 = vpop.f32.mrb[97].mxu0 }
 0x3ee   : > { %v5562_v40 = vmax.f32 %v12542_v54, %v10005_v8  ;;  %v5231_v63 = vmax.f32 %v12483_v45, %v10004_v33  ;;  %v12786_v22 = vmax.f32 %v6210_v27, %v6212_v6  ;;  %v6213_v47 = vmax.f32 %v6207_v14, 0.0  ;;  %v9246_v58 = vpop.f32.mrb[98].mxu0 }
 0x3ef   : > { %v9245_v53 = vadd.f32 %v9244_v46, %v9243_v44  ;;  %v5559_v4 = vpop.permute.xlu1 %5558  ;;  %v9247_v50 = vpop.f32.mrb[99].mxu0 }
 0x3f0   : > { %v8837_v61 = vpack.c.bf16 %v5562_v40, %v5562_v40  ;;  %v8835_v39 = vpack.c.bf16 %v5231_v63, %v5231_v63  ;;  %v5563_v55 = vmax.f32 %v12549_v51, %v5559_v4  ;;  %9972 = vmatpush3.bf16.msra.mxu1 %v10454_v36  ;;  %v12789_v54 = vmax.f32 %v6211_v10, %v6213_v47 }
 0x3f1   : > { %v9248_v45 = vadd.f32 %v9247_v50, %v9246_v58  ;;  %v10006_v15 = vpack.i.bf16 %v12786_v22, %v12559_v28  ;;  %9973 = vmatprep.subr.bf16.mxu1 %v10455_v49  ;;  %v6478_v7 = vadd.f32 %v9245_v53, %v12747_v19 }
 0x3f2   : > { %5574 = vst.msk [vmem:[%s12739_s11 + $0x18] sm:$0xf] %vm4580_vm14, %v8837_v61  ;;  %5243 = vst.msk [vmem:[%s12739_s11 + $0x10] sm:$0xf] %vm4580_vm14, %v8835_v39  ;;  %v5565_v12 = vmul.f32 %v12723_v60, %v5563_v55  ;;  %6220 = vrot.lane.b32.xlu1 %v12789_v54, %s10467_s13 }
 0x3f3   : > { %10007 = vrot.lane.b32.xlu0 %v10006_v15, %s10467_s13  ;;  %v6481_v20 = vadd.f32 %v9248_v45, %v12747_v19 }
 0x3f4   : > { %v8838_v51 = vpack.c.bf16 %v5565_v12, %v5565_v12  ;;  %9974 = vmatpush3.bf16.msra.mxu1 %v10455_v49 }
 0x3f5   : > { %9975 = vmatprep.subr.bf16.mxu1 %v10456_v59 }
 0x3f6   : > { %5575 = vst.msk [vmem:[%s12739_s11 + $0x1c] sm:$0xf] %vm4580_vm14, %v8838_v51 }
 0x3f8   : > { %9976 = vmatpush3.bf16.msra.mxu1 %v10456_v59 }
 0x3f9   : > { %9977 = vmatprep.subr.bf16.mxu1 %v10457_v29 }
 0x3fc   : > { %9978 = vmatpush3.bf16.msra.mxu1 %v10457_v29  ;;  %v7896_v29 = vld [vmem:[#allocation3 + $0x228] sm:$0xff] }
 0x3fe   : > { %v9249_v34 = vpop.f32.mrb[100].mxu0 }
 0x3ff   : > { %v9250_v43 = vpop.f32.mrb[101].mxu0 }
 0x400   : > { %v9251_v52 = vadd.f32 %v9250_v43, %v9249_v34  ;;  %v9252_v26 = vpop.f32.mrb[102].mxu0  ;;  %v9881_v32 = vpop.f32.mrb[72].mxu1 }
 0x401   : > { %v9253_v37 = vpop.f32.mrb[103].mxu0  ;;  %v6526_v42 = vpop.f32.mrb[73].mxu1 }
 0x402   : > { %v9254_v62 = vadd.f32 %v9253_v37, %v9252_v26  ;;  %v6486_v11 = vadd.f32 %v9251_v52, %v12747_v19  ;;  %v6527_v35 = vadd.f32 %v6526_v42, %v6478_v7  ;;  %v9882_v1 = vpop.f32.mrb[74].mxu1  ;;  %v7898_v37 = vld [vmem:[#allocation3 + $0x238] sm:$0xff] }
 0x403   : > { %v6529_v0 = vpop.f32.mrb[75].mxu1 }
 0x404   : > { %v6535_v25 = vadd.f32 %v9881_v32, %v6486_v11  ;;  %v6489_v57 = vadd.f32 %v9254_v62, %v12747_v19  ;;  %v6541_v30 = vmax.f32 %v6527_v35, 0.0  ;;  %v6530_v9 = vadd.f32 %v6529_v0, %v6481_v20 }
 0x406   : > { %v6543_v56 = vmax.f32 %v6535_v25, 0.0  ;;  %v6538_v24 = vadd.f32 %v9882_v1, %v6489_v57  ;;  %v6542_v31 = vmax.f32 %v6530_v9, 0.0 }
 0x408   : > { %v12813_v48 = vmax.f32 %v6541_v30, %v6543_v56  ;;  %v6544_v2 = vmax.f32 %v6538_v24, 0.0 }
 0x40a   : > { %v12815_v3 = vmax.f32 %v6542_v31, %v6544_v2 }
 0x40c   : > { %6551 = vrot.lane.b32.xlu0 %v12815_v3, %s10467_s13  ;;  %v9281_v36 = vpop.f32.mrb[104].mxu0 }
 0x40d   : > { %v9282_v18 = vpop.f32.mrb[105].mxu0 }
 0x40e   : > { %v9283_v41 = vadd.f32 %v9282_v18, %v9281_v36  ;;  %v9284_v17 = vpop.f32.mrb[106].mxu0 }
 0x40f   : > { %v9285_v5 = vpop.f32.mrb[107].mxu0 }
 0x410   : > { %v9286_v8 = vadd.f32 %v9285_v5, %v9284_v17  ;;  %v6809_v47 = vadd.f32 %v9283_v41, %v12747_v19 }
 0x412   : > { %v6812_v50 = vadd.f32 %v9286_v8, %v12747_v19 }
 0x414   : > { %v9287_v33 = vpop.f32.mrb[108].mxu0 }
 0x415   : > { %v9288_v27 = vpop.f32.mrb[109].mxu0 }
 0x416   : > { %v9289_v6 = vadd.f32 %v9288_v27, %v9287_v33  ;;  %v9290_v14 = vpop.f32.mrb[110].mxu0 }
 0x417   : > { %v9291_v44 = vpop.f32.mrb[111].mxu0 }
 0x418   : > { %v9292_v49 = vadd.f32 %v9291_v44, %v9290_v14  ;;  %v6817_v46 = vadd.f32 %v9289_v6, %v12747_v19 }
 0x41a   : > { %v3908_v40 = vpop.permute.xlu0 %3907  ;;  %v6820_v4 = vadd.f32 %v9292_v49, %v12747_v19 }
 0x41b   : > { %3956 = vst.msk [vmem:[#allocation3 + $0x230] sm:$0xff] %vm3644_vm12, %v3908_v40 }
 0x41f   : > { %v4194_v63 = vpop.permute.xlu0 %4193 }
 0x420   : > { %4243 = vst.msk [vmem:[#allocation3 + $0x220] sm:$0xff] %vm3644_vm12, %v4194_v63 }
 0x421   : > { %v9901_v10 = vpop.f32.mrb[76].mxu1 }
 0x422   : > { %v6866_v53 = vadd.f32 %v9901_v10, %v6817_v46  ;;  %v6857_v58 = vpop.f32.mrb[77].mxu1  ;;  %v7897_v45 = vld [vmem:[#allocation3 + $0x230] sm:$0xff] }
 0x423   : > { %v6858_v61 = vadd.f32 %v6857_v58, %v6809_v47  ;;  %v9902_v39 = vpop.f32.mrb[78].mxu1  ;;  %v4565_v55 = vpop.permute.xlu0 %4564  ;;  %8138 = vmatprep.mubr.bf16.mxu0 %v7897_v45 }
 0x424   : > { %v6874_v15 = vmax.f32 %v6866_v53, 0.0  ;;  %v6869_v59 = vadd.f32 %v9902_v39, %v6820_v4  ;;  %v6860_v12 = vpop.f32.mrb[79].mxu1  ;;  %v4569_v51 = vmax.f32 %v12169_v16, %v4565_v55  ;;  %8139 = vmatmul.mubr.bf16.gmra.mrb[140].mxu0 %v7896_v29 }
 0x425   : > { %v6872_v34 = vmax.f32 %v6858_v61, 0.0  ;;  %v6861_v43 = vadd.f32 %v6860_v12, %v6812_v50 }
 0x426   : > { %v6875_v52 = vmax.f32 %v6869_v59, 0.0  ;;  %v4571_v26 = vmul.f32 %v12723_v60, %v4569_v51 }
 0x427   : > { %v12827_v32 = vmax.f32 %v6872_v34, %v6874_v15  ;;  %v6873_v7 = vmax.f32 %v6861_v43, 0.0  ;;  %v9998_v62 = vpop.permute.xlu0 %9997  ;;  %v7895_v11 = vld [vmem:[#allocation3 + $0x220] sm:$0xff] }
 0x428   : > { %v8832_v42 = vpack.c.bf16 %v4571_v26, %v4571_v26  ;;  %v10000_v35 = vunpack.i.h.bf16 %v9998_v62  ;;  %v9999_v16 = vunpack.i.l.bf16 %v9998_v62  ;;  %9979 = vmatprep.mubr.bf16.mxu1 %v7895_v11 }
 0x429   : > { %v10011_v1 = vpack.i.bf16 %v12827_v32, %v12813_v48  ;;  %v12831_v20 = vmax.f32 %v6873_v7, %v6875_v52  ;;  %9980 = vmatmul.mubr.bf16.vlgmr.msra.gmra.mrb[92].mxu1 %v7898_v37 }
 0x42a   : > { %4582 = vst.msk [vmem:[%s12739_s11 + $0x4] sm:$0xf] %vm4580_vm14, %v8832_v42  ;;  %v4900_v25 = vmax.f32 %v12175_v23, %v10000_v35  ;;  %v4568_v57 = vmax.f32 %v12164_v13, %v9999_v16 }
 0x42b   : > { %10012 = vrot.lane.b32.xlu1 %v10011_v1, %s10467_s13  ;;  %v5228_v0 = vpop.permute.xlu0 %5227 }
 0x42c   : > { %v8833_v30 = vpack.c.bf16 %v4900_v25, %v4900_v25  ;;  %v8831_v9 = vpack.c.bf16 %v4568_v57, %v4568_v57  ;;  %v5232_v56 = vmax.f32 %v12488_v21, %v5228_v0  ;;  %v9319_v31 = vpop.f32.mrb[112].mxu0 }
 0x42d   : > { %v9320_v2 = vpop.f32.mrb[113].mxu0 }
 0x42e   : > { %4912 = vst.msk [vmem:[%s12739_s11 + $0x8] sm:$0xf] %vm4580_vm14, %v8833_v30  ;;  %4581 = vst.msk [vmem:[%s12739_s11] sm:$0xf] %vm4580_vm14, %v8831_v9  ;;  %v5234_v24 = vmul.f32 %v12723_v60, %v5232_v56  ;;  %v9321_v23 = vadd.f32 %v9320_v2, %v9319_v31  ;;  %v9322_v36 = vpop.f32.mrb[114].mxu0 }
 0x42f   : > { %6882 = vrot.lane.b32.xlu1 %v12831_v20, %s10467_s13  ;;  %v5890_v18 = vpop.permute.xlu0 %5889  ;;  %v9323_v41 = vpop.f32.mrb[115].mxu0 }
 0x430   : > { %v8836_v13 = vpack.c.bf16 %v5234_v24, %v5234_v24  ;;  %v5894_v17 = vmax.f32 %v12561_v38, %v5890_v18  ;;  %v9324_v21 = vadd.f32 %v9323_v41, %v9322_v36 }
 0x432   : > { %5244 = vst.msk [vmem:[%s12739_s11 + $0x14] sm:$0xf] %vm4580_vm14, %v8836_v13  ;;  %v5896_v5 = vmul.f32 %v12723_v60, %v5894_v17  ;;  %v7143_v61 = vadd.f32 %v9324_v21, %v12747_v19 }
 0x434   : > { %v8840_v8 = vpack.c.bf16 %v5896_v5, %v5896_v5 }
 0x436   : > { %5906 = vst.msk [vmem:[%s12739_s11 + $0x24] sm:$0xf] %vm4580_vm14, %v8840_v8 }
 0x464   : > { %v6221_v33 = vpop.permute.xlu1 %6220 }
 0x465   : > { %v10008_v27 = vpop.permute.xlu0 %10007  ;;  %v6225_v6 = vmax.f32 %v12789_v54, %v6221_v33  ;;  %v7140_v54 = vadd.f32 %v9321_v23, %v12747_v19 }
 0x466   : > { %v10010_v14 = vunpack.i.h.bf16 %v10008_v27  ;;  %v10009_v44 = vunpack.i.l.bf16 %v10008_v27 }
 0x467   : > { %v6227_v49 = vmul.f32 %v12723_v60, %v6225_v6 }
 0x468   : > { %v6224_v38 = vmax.f32 %v12786_v22, %v10010_v14  ;;  %v5893_v40 = vmax.f32 %v12559_v28, %v10009_v44 }
 0x469   : > { %v8842_v63 = vpack.c.bf16 %v6227_v49, %v6227_v49 }
 0x46a   : > { %v8841_v46 = vpack.c.bf16 %v6224_v38, %v6224_v38  ;;  %v8839_v10 = vpack.c.bf16 %v5893_v40, %v5893_v40 }
 0x46b   : > { %6237 = vst.msk [vmem:[%s12739_s11 + $0x2c] sm:$0xf] %vm4580_vm14, %v8842_v63 }
 0x46c   : > { %6236 = vst.msk [vmem:[%s12739_s11 + $0x28] sm:$0xf] %vm4580_vm14, %v8841_v46  ;;  %5905 = vst.msk [vmem:[%s12739_s11 + $0x20] sm:$0xf] %vm4580_vm14, %v8839_v10 }
 0x472   : > { %v9921_v47 = vpop.f32.mrb[80].mxu1 }
 0x473   : > { %v7188_v53 = vpop.f32.mrb[81].mxu1 }
 0x474   : > { %v7189_v58 = vadd.f32 %v7188_v53, %v7140_v54  ;;  %v9922_v4 = vpop.f32.mrb[82].mxu1 }
 0x475   : > { %v7191_v22 = vpop.f32.mrb[83].mxu1 }
 0x476   : > { %v7192_v39 = vadd.f32 %v7191_v22, %v7143_v61  ;;  %v9325_v28 = vpop.f32.mrb[116].mxu0  ;;  %v7203_v43 = vmax.f32 %v7189_v58, 0.0 }
 0x477   : > { %v9326_v50 = vpop.f32.mrb[117].mxu0 }
 0x478   : > { %v9327_v55 = vadd.f32 %v9326_v50, %v9325_v28  ;;  %v9328_v45 = vpop.f32.mrb[118].mxu0  ;;  %v7204_v62 = vmax.f32 %v7192_v39, 0.0 }
 0x479   : > { %v9329_v15 = vpop.f32.mrb[119].mxu0 }
 0x47a   : > { %v7148_v59 = vadd.f32 %v9327_v55, %v12747_v19  ;;  %v9330_v12 = vadd.f32 %v9329_v15, %v9328_v45 }
 0x47c   : > { %v7197_v51 = vadd.f32 %v9921_v47, %v7148_v59  ;;  %v7151_v29 = vadd.f32 %v9330_v12, %v12747_v19 }
 0x47e   : > { %v6552_v34 = vpop.permute.xlu0 %6551  ;;  %v7205_v52 = vmax.f32 %v7197_v51, 0.0  ;;  %v7200_v26 = vadd.f32 %v9922_v4, %v7151_v29  ;;  %v9357_v7 = vpop.f32.mrb[120].mxu0 }
 0x47f   : > { %v6556_v37 = vmax.f32 %v12815_v3, %v6552_v34  ;;  %v9358_v11 = vpop.f32.mrb[121].mxu0 }
 0x480   : > { %v7206_v42 = vmax.f32 %v7200_v26, 0.0  ;;  %v9359_v16 = vadd.f32 %v9358_v11, %v9357_v7  ;;  %v9360_v1 = vpop.f32.mrb[122].mxu0  ;;  %v12868_v25 = vmax.f32 %v7203_v43, %v7205_v52 }
 0x481   : > { %v6558_v35 = vmul.f32 %v12723_v60, %v6556_v37  ;;  %v9361_v57 = vpop.f32.mrb[123].mxu0 }
 0x482   : > { %v12870_v0 = vmax.f32 %v7204_v62, %v7206_v42  ;;  %v9362_v9 = vadd.f32 %v9361_v57, %v9360_v1  ;;  %v7471_v23 = vadd.f32 %v9359_v16, %v12747_v19 }
 0x483   : > { %v8844_v30 = vpack.c.bf16 %v6558_v35, %v6558_v35 }
 0x484   : > { %7213 = vrot.lane.b32.xlu0 %v12870_v0, %s10467_s13  ;;  %v7474_v5 = vadd.f32 %v9362_v9, %v12747_v19 }
 0x485   : > { %6568 = vst.msk [vmem:[%s12739_s11 + $0x34] sm:$0xf] %vm4580_vm14, %v8844_v30 }
 0x48e   : > { %v9363_v3 = vpop.f32.mrb[124].mxu0 }
 0x48f   : > { %v9364_v56 = vpop.f32.mrb[125].mxu0 }
 0x490   : > { %v9365_v24 = vadd.f32 %v9364_v56, %v9363_v3  ;;  %v9366_v31 = vpop.f32.mrb[126].mxu0 }
 0x491   : > { %v9367_v2 = vpop.f32.mrb[127].mxu0 }
 0x492   : > { %v9941_v13 = vpop.f32.mrb[84].mxu1  ;;  %v9368_v36 = vadd.f32 %v9367_v2, %v9366_v31  ;;  %v7479_v18 = vadd.f32 %v9365_v24, %v12747_v19 }
 0x493   : > { %v7519_v41 = vpop.f32.mrb[85].mxu1 }
 0x494   : > { %v7520_v17 = vadd.f32 %v7519_v41, %v7471_v23  ;;  %v9942_v21 = vpop.f32.mrb[86].mxu1  ;;  %v7528_v8 = vadd.f32 %v9941_v13, %v7479_v18  ;;  %v7482_v33 = vadd.f32 %v9368_v36, %v12747_v19 }
 0x495   : > { %v7522_v27 = vpop.f32.mrb[87].mxu1 }
 0x496   : > { %v7534_v6 = vmax.f32 %v7520_v17, 0.0  ;;  %v7523_v14 = vadd.f32 %v7522_v27, %v7474_v5  ;;  %v7536_v44 = vmax.f32 %v7528_v8, 0.0  ;;  %v7531_v49 = vadd.f32 %v9942_v21, %v7482_v33 }
 0x498   : > { %v7535_v38 = vmax.f32 %v7523_v14, 0.0  ;;  %v12880_v40 = vmax.f32 %v7534_v6, %v7536_v44  ;;  %v7537_v63 = vmax.f32 %v7531_v49, 0.0 }
 0x49a   : > { %v12882_v46 = vmax.f32 %v7535_v38, %v7537_v63  ;;  %v10016_v13 = vpack.i.bf16 %v12880_v40, %v12868_v25 }
 0x49c   : > { %7544 = vrot.lane.b32.xlu1 %v12882_v46, %s10467_s13 }
 0x49d   : > { %v10013_v10 = vpop.permute.xlu1 %10012 }
 0x49e   : > { %v10015_v47 = vunpack.i.h.bf16 %v10013_v10  ;;  %v10014_v54 = vunpack.i.l.bf16 %v10013_v10 }
 0x49f   : > { %v9395_v53 = vpop.f32.mrb[128].mxu0 }
 0x4a0   : > { %v6886_v58 = vmax.f32 %v12827_v32, %v10015_v47  ;;  %v6555_v4 = vmax.f32 %v12813_v48, %v10014_v54  ;;  %v9396_v61 = vpop.f32.mrb[129].mxu0 }
 0x4a1   : > { %v9397_v22 = vadd.f32 %v9396_v61, %v9395_v53  ;;  %v9398_v39 = vpop.f32.mrb[130].mxu0  ;;  %v6883_v28 = vpop.permute.xlu1 %6882 }
 0x4a2   : > { %v8845_v50 = vpack.c.bf16 %v6886_v58, %v6886_v58  ;;  %v8843_v55 = vpack.c.bf16 %v6555_v4, %v6555_v4  ;;  %v6887_v45 = vmax.f32 %v12831_v20, %v6883_v28  ;;  %v9399_v15 = vpop.f32.mrb[131].mxu0 }
 0x4a3   : > { %v9400_v59 = vadd.f32 %v9399_v15, %v9398_v39  ;;  %v7802_v37 = vadd.f32 %v9397_v22, %v12747_v19 }
 0x4a4   : > { %6898 = vst.msk [vmem:[%s12739_s11 + $0x38] sm:$0xf] %vm4580_vm14, %v8845_v50  ;;  %6567 = vst.msk [vmem:[%s12739_s11 + $0x30] sm:$0xf] %vm4580_vm14, %v8843_v55  ;;  %v6889_v12 = vmul.f32 %v12723_v60, %v6887_v45 }
 0x4a5   : > { %v7805_v16 = vadd.f32 %v9400_v59, %v12747_v19 }
 0x4a6   : > { %v8846_v32 = vpack.c.bf16 %v6889_v12, %v6889_v12 }
 0x4a7   : > { %v9401_v51 = vpop.f32.mrb[132].mxu0 }
 0x4a8   : > { %6899 = vst.msk [vmem:[%s12739_s11 + $0x3c] sm:$0xf] %vm4580_vm14, %v8846_v32  ;;  %v9402_v48 = vpop.f32.mrb[133].mxu0 }
 0x4a9   : > { %v9403_v29 = vadd.f32 %v9402_v48, %v9401_v51  ;;  %v9404_v34 = vpop.f32.mrb[134].mxu0 }
 0x4aa   : > { %v9405_v43 = vpop.f32.mrb[135].mxu0 }
 0x4ab   : > { %v9406_v52 = vadd.f32 %v9405_v43, %v9404_v34  ;;  %v7810_v26 = vadd.f32 %v9403_v29, %v12747_v19 }
 0x4ad   : > { %v7813_v11 = vadd.f32 %v9406_v52, %v12747_v19 }
 0x4b2   : > { %v9961_v20 = vpop.f32.mrb[88].mxu1 }
 0x4b3   : > { %v7859_v7 = vadd.f32 %v9961_v20, %v7810_v26  ;;  %v7850_v62 = vpop.f32.mrb[89].mxu1 }
 0x4b4   : > { %v7851_v42 = vadd.f32 %v7850_v62, %v7802_v37  ;;  %v9962_v35 = vpop.f32.mrb[90].mxu1 }
 0x4b5   : > { %v7867_v1 = vmax.f32 %v7859_v7, 0.0  ;;  %v7862_v57 = vadd.f32 %v9962_v35, %v7813_v11  ;;  %v7853_v30 = vpop.f32.mrb[91].mxu1 }
 0x4b6   : > { %v7865_v9 = vmax.f32 %v7851_v42, 0.0  ;;  %v7854_v3 = vadd.f32 %v7853_v30, %v7805_v16 }
 0x4b7   : > { %v7868_v56 = vmax.f32 %v7862_v57, 0.0 }
 0x4b8   : > { %v12900_v24 = vmax.f32 %v7865_v9, %v7867_v1  ;;  %v7866_v31 = vmax.f32 %v7854_v3, 0.0 }
 0x4ba   : > { %v7870_v2 = vmax.f32 %v7866_v31, %v7868_v56 }
 0x4bc   : > { %7875 = vrot.lane.b32.xlu0 %v7870_v2, %s10467_s13 }
 0x4bf   : > { %v9433_v23 = vpop.f32.mrb[136].mxu0 }
 0x4c0   : > { %v9434_v36 = vpop.f32.mrb[137].mxu0  ;;  %10017 = vrot.lane.b32.xlu0 %v10016_v13, %s10467_s13 }
 0x4c1   : > { %v9435_v18 = vadd.f32 %v9434_v36, %v9433_v23  ;;  %v9436_v41 = vpop.f32.mrb[138].mxu0 }
 0x4c2   : > { %v9437_v17 = vpop.f32.mrb[139].mxu0 }
 0x4c3   : > { %v9438_v21 = vadd.f32 %v9437_v17, %v9436_v41  ;;  %v8133_v54 = vadd.f32 %v9435_v18, %v12747_v19 }
 0x4c5   : > { %v8136_v22 = vadd.f32 %v9438_v21, %v12747_v19 }
 0x4f6   : > { %v7214_v5 = vpop.permute.xlu0 %7213 }
 0x4f7   : > { %v7218_v8 = vmax.f32 %v12870_v0, %v7214_v5  ;;  %v9439_v33 = vpop.f32.mrb[140].mxu0 }
 0x4f8   : > { %v9440_v6 = vpop.f32.mrb[141].mxu0 }
 0x4f9   : > { %v7220_v27 = vmul.f32 %v12723_v60, %v7218_v8  ;;  %v9441_v14 = vadd.f32 %v9440_v6, %v9439_v33  ;;  %v9442_v44 = vpop.f32.mrb[142].mxu0 }
 0x4fa   : > { %v9443_v38 = vpop.f32.mrb[143].mxu0 }
 0x4fb   : > { %v8848_v49 = vpack.c.bf16 %v7220_v27, %v7220_v27  ;;  %v9444_v63 = vadd.f32 %v9443_v38, %v9442_v44  ;;  %v8141_v10 = vadd.f32 %v9441_v14, %v12747_v19 }
 0x4fc   : > { %v9981_v47 = vpop.f32.mrb[92].mxu1 }
 0x4fd   : > { %7230 = vst.msk [vmem:[%s12739_s11 + $0x44] sm:$0xf] %vm4580_vm14, %v8848_v49  ;;  %v8181_v53 = vpop.f32.mrb[93].mxu1  ;;  %v8190_v58 = vadd.f32 %v9981_v47, %v8141_v10  ;;  %v8144_v0 = vadd.f32 %v9444_v63, %v12747_v19 }
 0x4fe   : > { %v8182_v4 = vadd.f32 %v8181_v53, %v8133_v54  ;;  %v9982_v61 = vpop.f32.mrb[94].mxu1 }
 0x4ff   : > { %v8184_v39 = vpop.f32.mrb[95].mxu1  ;;  %v8198_v28 = vmax.f32 %v8190_v58, 0.0  ;;  %v8193_v55 = vadd.f32 %v9982_v61, %v8144_v0 }
 0x500   : > { %v8196_v50 = vmax.f32 %v8182_v4, 0.0  ;;  %v8185_v45 = vadd.f32 %v8184_v39, %v8136_v22 }
 0x501   : > { %v8199_v59 = vmax.f32 %v8193_v55, 0.0 }
 0x502   : > { %v8200_v15 = vmax.f32 %v8196_v50, %v8198_v28  ;;  %v8197_v12 = vmax.f32 %v8185_v45, 0.0 }
 0x504   : > { %v8201_v32 = vmax.f32 %v8197_v12, %v8199_v59  ;;  %v10021_v51 = vpack.i.bf16 %v8200_v15, %v12900_v24 }
 0x506   : > { %8206 = vrot.lane.b32.xlu1 %v8201_v32, %s10467_s13 }
 0x50a   : > { %10022 = vrot.lane.b32.xlu1 %v10021_v51, %s10467_s13 }
 0x50e   : > { %v7545_v48 = vpop.permute.xlu1 %7544 }
 0x50f   : > { %v7549_v19 = vmax.f32 %v12882_v46, %v7545_v48 }
 0x511   : > { %v7551_v29 = vmul.f32 %v12723_v60, %v7549_v19 }
 0x513   : > { %v8850_v34 = vpack.c.bf16 %v7551_v29, %v7551_v29 }
 0x515   : > { %7561 = vst.msk [vmem:[%s12739_s11 + $0x4c] sm:$0xf] %vm4580_vm14, %v8850_v34 }
 0x52e   : > { %v7876_v43 = vpop.permute.xlu0 %7875 }
 0x52f   : > { %v7880_v52 = vmax.f32 %v7870_v2, %v7876_v43 }
 0x531   : > { %v7882_v26 = vmul.f32 %v12723_v60, %v7880_v52 }
 0x532   : > { %v10018_v20 = vpop.permute.xlu0 %10017 }
 0x533   : > { %v8852_v37 = vpack.c.bf16 %v7882_v26, %v7882_v26  ;;  %v10020_v7 = vunpack.i.h.bf16 %v10018_v20  ;;  %v10019_v62 = vunpack.i.l.bf16 %v10018_v20 }
 0x535   : > { %7892 = vst.msk [vmem:[%s12739_s11 + $0x54] sm:$0xf] %vm4580_vm14, %v8852_v37  ;;  %v7548_v46 = vmax.f32 %v12880_v40, %v10020_v7  ;;  %v7217_v11 = vmax.f32 %v12868_v25, %v10019_v62 }
 0x537   : > { %v8849_v42 = vpack.c.bf16 %v7548_v46, %v7548_v46  ;;  %v8847_v35 = vpack.c.bf16 %v7217_v11, %v7217_v11 }
 0x539   : > { %7560 = vst.msk [vmem:[%s12739_s11 + $0x48] sm:$0xf] %vm4580_vm14, %v8849_v42  ;;  %7229 = vst.msk [vmem:[%s12739_s11 + $0x40] sm:$0xf] %vm4580_vm14, %v8847_v35 }
 0x578   : > { %v8207_v16 = vpop.permute.xlu1 %8206 }
 0x579   : > { %v8211_v1 = vmax.f32 %v8201_v32, %v8207_v16 }
 0x57b   : > { %v8213_v57 = vmul.f32 %v12723_v60, %v8211_v1 }
 0x57c   : > { %v10023_v30 = vpop.permute.xlu1 %10022 }
 0x57d   : > { %v8854_v9 = vpack.c.bf16 %v8213_v57, %v8213_v57  ;;  %v10025_v3 = vunpack.i.h.bf16 %v10023_v30  ;;  %v10024_v56 = vunpack.i.l.bf16 %v10023_v30 }
 0x57f   : > { %8223 = vst.msk [vmem:[%s12739_s11 + $0x5c] sm:$0xf] %vm4580_vm14, %v8854_v9  ;;  %v8210_v40 = vmax.f32 %v8200_v15, %v10025_v3  ;;  %v7879_v25 = vmax.f32 %v12900_v24, %v10024_v56 }
 0x581   : > { %v8853_v31 = vpack.c.bf16 %v8210_v40, %v8210_v40  ;;  %v8851_v2 = vpack.c.bf16 %v7879_v25, %v7879_v25 }
 0x583   : > { %8222 = vst.msk [vmem:[%s12739_s11 + $0x58] sm:$0xf] %vm4580_vm14, %v8853_v31  ;;  %7891 = vst.msk [vmem:[%s12739_s11 + $0x50] sm:$0xf] %vm4580_vm14, %v8851_v2 }
 0x584 PF: > { %s15_s18 = sadd.s32 1, %s10464_s18  }
 0x585   : > { %p12_p4 = scmp.ge.s32.totalorder %s15_s18, 4  }
 0x587   :  { %14 = sbr.rel (!%p12_p4) target bundleno = 1 (0x1), region = 70 }

</bundles_post_ra>
